<compile_context>
chip_gen: v7x
topology: tpu7x:2x2x1
jax: 0.10.0
libtpu: 0.0.40
codegen_flags: <defaults>
</compile_context>

<pallas_src>
import functools

import jax
import jax.numpy as jnp
import numpy as np
from jax.experimental import pallas as pl
from jax.experimental.pallas import tpu as pltpu

_BN_EPS = 1e-5
_HI = jax.lax.Precision.HIGHEST


# ---------------------------------------------------------------------------
# Kernel bodies
# ---------------------------------------------------------------------------
def _linear_bn_relu_kernel(a_ref, w_ref, gamma_ref, beta_ref, o_ref, *, eps):
    """(M,K)@(K,tn) -> BatchNorm1d (batch stats) -> ReLU, fused in one step.

    The Linear bias is intentionally omitted: a per-feature constant added
    before a batch-stat BatchNorm is exactly cancelled by the mean subtraction.
    """
    acc = jnp.dot(a_ref[...], w_ref[...], preferred_element_type=jnp.float32)
    inv_m = 1.0 / a_ref.shape[0]                       # real batch rows only
    mean = jnp.sum(acc, axis=0, keepdims=True) * inv_m
    xc = acc - mean
    var = jnp.sum(xc * xc, axis=0, keepdims=True) * inv_m   # biased (PyTorch)
    y = xc * jax.lax.rsqrt(var + eps) * gamma_ref[...] + beta_ref[...]
    o_ref[...] = jnp.maximum(y, 0.0).astype(o_ref.dtype)


def _conv_phase_bn_relu_kernel(p_ref, w_ref, fold_ref, gamma_ref, beta_ref,
                               o_ref, *, eps):
    """ConvTranspose phase matmul with BatchNorm2d + ReLU fused epilogue.

    p_ref    : (M, 9*Cin)       im2col patches, M = B*H*W
    w_ref    : (9*Cin, 4*Cout)  phase weight, columns ordered (py, px, co)
    fold_ref : (4*Cout, 4*Cout) 0/1 matrix with fold[r, q] = (r % Cout == q % Cout).
               colsum @ fold sums the 4 phase groups per channel and returns the
               result already broadcast back to all 4 groups, giving per-channel
               BN2d statistics without any lane reshuffle / reshape.
    gamma/beta: (1, 4*Cout) per-channel BN params tiled across the 4 phases.
    The ConvTranspose bias is omitted (cancelled by the batch-stat BN2d).
    """
    acc = jnp.dot(p_ref[...], w_ref[...], preferred_element_type=jnp.float32)
    inv_n = 1.0 / (4.0 * p_ref.shape[0])          # elements per channel = 4*M
    colsum = jnp.sum(acc, axis=0, keepdims=True)                      # (1,4C)
    mean = jnp.dot(colsum, fold_ref[...],
                   preferred_element_type=jnp.float32) * inv_n
    xc = acc - mean
    sqsum = jnp.sum(xc * xc, axis=0, keepdims=True)
    var = jnp.dot(sqsum, fold_ref[...],
                  preferred_element_type=jnp.float32) * inv_n
    y = xc * jax.lax.rsqrt(var + eps) * gamma_ref[...] + beta_ref[...]
    o_ref[...] = jnp.maximum(y, 0.0).astype(o_ref.dtype)


def _matmul_bias_sigmoid_kernel(a_ref, w_ref, bias_ref, o_ref):
    """(M,K)@(K,N) + bias -> sigmoid.  N is lane-dense (padded to 128)."""
    acc = jnp.dot(a_ref[...], w_ref[...], preferred_element_type=jnp.float32)
    acc = acc + bias_ref[...]
    o_ref[...] = jax.nn.sigmoid(acc).astype(o_ref.dtype)


# ---------------------------------------------------------------------------
# Pallas wrappers (no runtime padding; whole-array or N-tiled blocks)
# ---------------------------------------------------------------------------
def linear_bn_relu(x, w, gamma, beta, *, tn, eps=_BN_EPS):
    M, K = x.shape
    K2, N = w.shape
    assert K == K2 and N % tn == 0
    kernel = functools.partial(_linear_bn_relu_kernel, eps=eps)
    # N-tiled grid keeps the axis 'parallel' so a 2-TC chip (v7x) splits the
    # dominant weight stream across cores.
    return pl.pallas_call(
        kernel,
        out_shape=jax.ShapeDtypeStruct((M, N), jnp.bfloat16),
        grid=(N // tn,),
        in_specs=[
            pl.BlockSpec((M, K), lambda j: (0, 0)),
            pl.BlockSpec((K, tn), lambda j: (0, j)),
            pl.BlockSpec((1, tn), lambda j: (0, j)),
            pl.BlockSpec((1, tn), lambda j: (0, j)),
        ],
        out_specs=pl.BlockSpec((M, tn), lambda j: (0, j)),
        compiler_params=pltpu.CompilerParams(
            dimension_semantics=("parallel",)),
    )(x, w, gamma, beta)


def conv_phase_bn_relu(patches, w, fold, gamma, beta, *, eps=_BN_EPS):
    M, K = patches.shape
    K2, N = w.shape
    assert K == K2
    kernel = functools.partial(_conv_phase_bn_relu_kernel, eps=eps)
    return pl.pallas_call(
        kernel,
        out_shape=jax.ShapeDtypeStruct((M, N), jnp.bfloat16),
        grid=(1,),
        in_specs=[
            pl.BlockSpec((M, K), lambda i: (0, 0)),
            pl.BlockSpec((K, N), lambda i: (0, 0)),
            pl.BlockSpec((N, N), lambda i: (0, 0)),
            pl.BlockSpec((1, N), lambda i: (0, 0)),
            pl.BlockSpec((1, N), lambda i: (0, 0)),
        ],
        out_specs=pl.BlockSpec((M, N), lambda i: (0, 0)),
        compiler_params=pltpu.CompilerParams(
            dimension_semantics=("arbitrary",)),
    )(patches, w, fold, gamma, beta)


def conv_phase_sigmoid(patches, w, bias):
    M, K = patches.shape
    K2, N = w.shape
    assert K == K2
    return pl.pallas_call(
        _matmul_bias_sigmoid_kernel,
        out_shape=jax.ShapeDtypeStruct((M, N), jnp.float32),
        grid=(1,),
        in_specs=[
            pl.BlockSpec((M, K), lambda i: (0, 0)),
            pl.BlockSpec((K, N), lambda i: (0, 0)),
            pl.BlockSpec((1, N), lambda i: (0, 0)),
        ],
        out_specs=pl.BlockSpec((M, N), lambda i: (0, 0)),
        compiler_params=pltpu.CompilerParams(
            dimension_semantics=("arbitrary",)),
    )(patches, w, bias)


# ---------------------------------------------------------------------------
# ConvTranspose2d(k=4, s=2, p=1) phase decomposition helpers
# ---------------------------------------------------------------------------
# oh = 2*ih - 1 + kh  ==>  output phase py = oh % 2 at block i = oh // 2 reads
# input rows {i-1, i, i+1} (a 3x3 window of the 1-padded input).  Tap map
# (phase, window offset d in {0,1,2}) -> kernel index:
#   py=0: d=0 -> kh=3, d=1 -> kh=1 ; py=1: d=1 -> kh=2, d=2 -> kh=0.
_TAPS = {(0, 0): 3, (0, 1): 1, (1, 1): 2, (1, 2): 0}


def _phase_weight_from_pt(w_pt):
    """PyTorch ConvTranspose2d weight (Cin,Cout,4,4) -> (9*Cin, 4*Cout)."""
    w = np.asarray(w_pt, dtype=np.float32)
    cin, cout = w.shape[0], w.shape[1]
    full = np.zeros((3, 3, cin, 2, 2, cout), np.float32)
    for (py, dh), kh in _TAPS.items():
        for (px, dw), kw in _TAPS.items():
            full[dh, dw, :, py, px, :] = w[:, :, kh, kw]
    return jnp.asarray(full.reshape(9 * cin, 4 * cout))


def _phase_bias(bias, cout):
    """Per-(py,px,co) bias row vector, column order (py, px, co)."""
    b = jnp.asarray(bias, jnp.float32).reshape(1, cout)
    return jnp.tile(b, (1, 4))                          # (1, 4*Cout)


def _im2col_3x3(x_nhwc):
    """Dense 3x3 patches of the 1-padded input -> (B*H*W, 9*C)."""
    # TODO(synk): an in-kernel im2col needs a (B,H,W,C)->(B*H*W,C) value
    # reshape that Mosaic may reject; kept as XLA glue (<1.4 MB total traffic).
    B, H, W, C = x_nhwc.shape
    xp = jnp.pad(x_nhwc, ((0, 0), (1, 1), (1, 1), (0, 0)))
    cols = [xp[:, dh:dh + H, dw:dw + W, :]
            for dh in range(3) for dw in range(3)]
    patches = jnp.stack(cols, axis=3)                   # (B,H,W,9,C)
    return patches.reshape(B * H * W, 9 * C)


def _interleave_phases(y, B, H, W, cout):
    """(B*H*W, 4*Cout) phase columns (py,px,co) -> (B, 2H, 2W, Cout)."""
    y = y.reshape(B, H, W, 2, 2, cout)
    y = y.transpose(0, 1, 3, 2, 4, 5)                   # (B,H,2,W,2,Cout)
    return y.reshape(B, 2 * H, 2 * W, cout)


# ---------------------------------------------------------------------------
# Generator forward (Pallas path)
# ---------------------------------------------------------------------------
def generator_forward(z, params):
    B = z.shape[0]
    zb = z.astype(jnp.bfloat16)

    # Linear(50,1024) + BN1d + ReLU (bias cancelled by batch-stat BN)
    h = linear_bn_relu(zb, params["w1"], params["bn1_g"], params["bn1_b"],
                       tn=256)
    # Linear(1024,6272) + BN1d + ReLU; w2 columns pre-permuted to (H,W,C) so
    # the reshape below lands directly in NHWC (no XLA transpose).
    h = linear_bn_relu(h, params["w2"], params["bn2_g"], params["bn2_b"],
                       tn=896)
    x = h.reshape(B, 7, 7, 128)                         # NHWC

    # ConvTranspose2d(128,64,4,2,1) + BN2d + ReLU, all fused in one matmul
    p1 = _im2col_3x3(x)                                 # (B*49, 1152)
    y1 = conv_phase_bn_relu(p1, params["ct1_w"], params["fold64"],
                            params["bn3_gt"], params["bn3_bt"])
    x1 = _interleave_phases(y1, B, 7, 7, 64)            # (B,14,14,64)

    # ConvTranspose2d(64,1,4,2,1) + Sigmoid, lane-dense output (N 4 -> 128)
    p2 = _im2col_3x3(x1)                                # (B*196, 576)
    y2 = conv_phase_sigmoid(p2, params["ct2_w_pad"], params["ct2_b_pad"])
    img = _interleave_phases(y2[:, :4], B, 14, 14, 1)   # (B,28,28,1)
    return img.transpose(0, 3, 1, 2)                    # (B,1,28,28)


# ---------------------------------------------------------------------------
# Pure-XLA f32 reference of the PyTorch module (train-mode BatchNorm).
# Keeps the Linear / ConvTranspose biases the Pallas path provably drops.
# ---------------------------------------------------------------------------
def _bn_ref(x, gamma, beta, axes, eps=_BN_EPS):
    mean = jnp.mean(x, axis=axes, keepdims=True)
    var = jnp.mean((x - mean) ** 2, axis=axes, keepdims=True)
    return (x - mean) * jax.lax.rsqrt(var + eps) * gamma + beta


def _conv_transpose_ref(x_nhwc, w_pt, bias):
    """ConvTranspose2d(k=4, s=2, p=1) via input-dilated convolution."""
    w_hwio = jnp.flip(w_pt, axis=(2, 3)).transpose(2, 3, 0, 1)   # (kh,kw,ci,co)
    y = jax.lax.conv_general_dilated(
        x_nhwc, w_hwio, window_strides=(1, 1), padding=((2, 2), (2, 2)),
        lhs_dilation=(2, 2), dimension_numbers=("NHWC", "HWIO", "NHWC"),
        precision=_HI)
    return y + bias.reshape(1, 1, 1, -1)


def generator_forward_ref(z, params):
    B = z.shape[0]
    f32 = jnp.float32
    zb = z.astype(jnp.bfloat16).astype(f32)         # match kernel input rounding
    h = jnp.dot(zb, params["w1"].astype(f32), precision=_HI) + params["b1"]
    h = jax.nn.relu(_bn_ref(h, params["bn1_g"], params["bn1_b"], axes=0))
    h = jnp.dot(h, params["w2"].astype(f32), precision=_HI) + params["b2"]
    h = jax.nn.relu(_bn_ref(h, params["bn2_g"], params["bn2_b"], axes=0))
    x = h.reshape(B, 7, 7, 128)                     # w2 columns are (H,W,C)
    x = _conv_transpose_ref(x, params["ct1_w_pt"].astype(f32), params["ct1_bias"])
    x = jax.nn.relu(_bn_ref(x, params["bn3_g"].reshape(1, 1, 1, -1),
                            params["bn3_b"].reshape(1, 1, 1, -1), axes=(0, 1, 2)))
    x = _conv_transpose_ref(x, params["ct2_w_pt"].astype(f32), params["ct2_bias"])
    return jax.nn.sigmoid(x).transpose(0, 3, 1, 2)


# ---------------------------------------------------------------------------
# Parameters
# ---------------------------------------------------------------------------
def _bf16_round(x):
    return x.astype(jnp.bfloat16).astype(jnp.float32)


def init_params(key, latent_dim=50):
    ks = jax.random.split(key, 14)
    iels = 128 * 7 * 7
    scale = 0.05

    # --- parameters in their native "PyTorch" layout -------------------------
    w1 = _bf16_round(scale * jax.random.normal(ks[0], (latent_dim, 1024), jnp.float32))
    b1 = 0.02 * jax.random.normal(ks[1], (1, 1024), jnp.float32)
    bn1_g = 1.0 + 0.1 * jax.random.normal(ks[2], (1, 1024), jnp.float32)
    bn1_b = 0.05 * jax.random.normal(ks[3], (1, 1024), jnp.float32)

    w2_pt = _bf16_round(scale * jax.random.normal(ks[4], (1024, iels), jnp.float32))
    b2_pt = 0.02 * jax.random.normal(ks[5], (1, iels), jnp.float32)
    bn2_g_pt = 1.0 + 0.1 * jax.random.normal(ks[6], (1, iels), jnp.float32)
    bn2_b_pt = 0.05 * jax.random.normal(ks[7], (1, iels), jnp.float32)

    ct1_w_pt = _bf16_round(scale * jax.random.normal(ks[8], (128, 64, 4, 4), jnp.float32))
    ct1_bias = 0.02 * jax.random.normal(ks[9], (64,), jnp.float32)
    bn3_g = 1.0 + 0.1 * jax.random.normal(ks[10], (1, 64), jnp.float32)
    bn3_b = 0.05 * jax.random.normal(ks[11], (1, 64), jnp.float32)

    ct2_w_pt = _bf16_round(scale * jax.random.normal(ks[12], (64, 1, 4, 4), jnp.float32))
    ct2_bias = 0.02 * jax.random.normal(ks[13], (1,), jnp.float32)

    # --- one-time layout plumbing for the TPU kernels -------------------------
    # Permute Linear2's output columns (and its BN params) from PyTorch's
    # (C,H,W) flattening to (H,W,C) so the activation reshapes straight to NHWC.
    perm = np.arange(iels).reshape(128, 7, 7).transpose(1, 2, 0).reshape(-1)
    w2 = w2_pt[:, perm]
    b2 = b2_pt[:, perm]
    bn2_g = bn2_g_pt[:, perm]
    bn2_b = bn2_b_pt[:, perm]

    # ConvTranspose phase weights: (Cin,Cout,4,4) -> (9*Cin, 4*Cout), MXU-ready.
    # TODO(synk): on v5e/v6e w2 (12.8 MB, the dominant HBM stream) could be
    # stored int8 with per-column scales folded into bn2_g; kept bf16 here
    # because v7x's MXU has no integer path.
    ct1_w = _phase_weight_from_pt(ct1_w_pt)                       # (1152, 256)
    ct2_w = _phase_weight_from_pt(ct2_w_pt)                       # (576, 4)
    # Lane-dense final layer: pad N from 4 -> 128 with zero columns.
    ct2_w_pad = jnp.zeros((ct2_w.shape[0], 128), jnp.float32).at[:, :4].set(ct2_w)
    ct2_b_pad = jnp.zeros((1, 128), jnp.float32).at[:, :4].set(
        _phase_bias(ct2_bias, 1))

    # BN2d params tiled across the 4 phases (column order (py,px,co)), plus the
    # phase-fold matrix used for per-channel statistics inside the ct1 kernel.
    bn3_gt = jnp.tile(bn3_g, (1, 4))                              # (1, 256)
    bn3_bt = jnp.tile(bn3_b, (1, 4))
    fold64 = jnp.asarray(np.tile(np.eye(64, dtype=np.float32), (4, 4)))

    return {
        # ---- consumed by the Pallas kernels ----
        "w1": w1.astype(jnp.bfloat16),
        "bn1_g": bn1_g, "bn1_b": bn1_b,
        "w2": w2.astype(jnp.bfloat16),
        "bn2_g": bn2_g, "bn2_b": bn2_b,
        "ct1_w": ct1_w.astype(jnp.bfloat16),
        "fold64": fold64,
        "bn3_gt": bn3_gt, "bn3_bt": bn3_bt,
        "ct2_w_pad": ct2_w_pad.astype(jnp.bfloat16),
        "ct2_b_pad": ct2_b_pad,
        # ---- reference-only (PyTorch layout; the biases are provable no-ops
        #      in front of the batch-stat BatchNorms, so the kernels skip them)
        "b1": b1, "b2": b2,
        "ct1_w_pt": ct1_w_pt, "ct1_bias": ct1_bias,
        "bn3_g": bn3_g, "bn3_b": bn3_b,
        "ct2_w_pt": ct2_w_pt, "ct2_bias": ct2_bias,
    }


if __name__ == "__main__":
    key = jax.random.PRNGKey(0)
    k_param, k_z = jax.random.split(key)
    B, latent_dim = 4, 50
    params = init_params(k_param, latent_dim=latent_dim)
    z = jax.random.normal(k_z, (B, latent_dim), jnp.float32)

    fwd = jax.jit(generator_forward)
    img = jax.block_until_ready(fwd(z, params))

    assert img.shape == (B, 1, 28, 28), img.shape
    assert bool(jnp.all(jnp.isfinite(img)))
    assert bool(jnp.all((img >= 0.0) & (img <= 1.0)))   # sigmoid output range

    # Numerical check of the whole Pallas path (incl. the ConvTranspose phase
    # packing) against a pure-XLA f32 reference of the PyTorch module.
    ref = jax.block_until_ready(jax.jit(generator_forward_ref)(z, params))
    max_err = float(jnp.max(jnp.abs(img - ref)))
    assert max_err < 0.08, f"max abs err vs f32 reference: {max_err}"
    print("KERNEL_OK")
</pallas_src>

<mosaic_0001>
module attributes {stable_mosaic.version = 11 : i64} {
  func.func @_linear_bn_relu_kernel(%arg0: i32, %arg1: memref<4x50xbf16, #tpu.memory_space<vmem>>, %arg2: memref<50x256xbf16, #tpu.memory_space<vmem>>, %arg3: memref<1x256xf32, #tpu.memory_space<vmem>>, %arg4: memref<1x256xf32, #tpu.memory_space<vmem>>, %arg5: memref<4x256xbf16, #tpu.memory_space<vmem>>) attributes {dimension_semantics = [#tpu.dimension_semantics<parallel>], iteration_bounds = array<i64: 4>, scalar_prefetch = 0 : i64, scratch_operands = 0 : i64, tpu.core_type = #tpu.core_type<tc>, window_params = [{pipeline_mode = #tpu.pipeline_mode<synchronous>, transform_indices = @transform_0, window_bounds = array<i64: 4, 50>}, {transform_indices = @transform_1, window_bounds = array<i64: 50, 256>}, {transform_indices = @transform_2, window_bounds = array<i64: 1, 256>}, {transform_indices = @transform_3, window_bounds = array<i64: 1, 256>}, {transform_indices = @transform_4, window_bounds = array<i64: 4, 256>}]} {
    %c0 = arith.constant 0 : index
    %c0_0 = arith.constant 0 : index
    %0 = vector.load %arg1[%c0, %c0_0] : memref<4x50xbf16, #tpu.memory_space<vmem>>, vector<4x50xbf16>
    %c0_1 = arith.constant 0 : index
    %c0_2 = arith.constant 0 : index
    %1 = vector.load %arg2[%c0_1, %c0_2] : memref<50x256xbf16, #tpu.memory_space<vmem>>, vector<50x256xbf16>
    %cst = arith.constant dense<0.000000e+00> : vector<4x256xf32>
    %2 = tpu.matmul %0, %1, %cst {dimension_numbers = #tpu.dot_dimension_numbers<[1], [0], [0], [1], [0, 0, 1, 1], [], []>} : vector<4x50xbf16>, vector<50x256xbf16>, vector<4x256xf32> -> vector<4x256xf32>
    %cst_3 = arith.constant dense<0.000000e+00> : vector<256xf32>
    %3 = vector.multi_reduction <add>, %2, %cst_3 [0] : vector<4x256xf32> to vector<256xf32>
    %4 = vector.shape_cast %3 : vector<256xf32> to vector<1x256xf32>
    %cst_4 = arith.constant 2.500000e-01 : f32
    %5 = vector.broadcast %cst_4 : f32 to vector<1x256xf32>
    %6 = arith.mulf %4, %5 : vector<1x256xf32>
    %7 = vector.broadcast %6 : vector<1x256xf32> to vector<4x256xf32>
    %8 = arith.subf %2, %7 : vector<4x256xf32>
    %9 = arith.mulf %8, %8 : vector<4x256xf32>
    %cst_5 = arith.constant dense<0.000000e+00> : vector<256xf32>
    %10 = vector.multi_reduction <add>, %9, %cst_5 [0] : vector<4x256xf32> to vector<256xf32>
    %11 = vector.shape_cast %10 : vector<256xf32> to vector<1x256xf32>
    %cst_6 = arith.constant 2.500000e-01 : f32
    %12 = vector.broadcast %cst_6 : f32 to vector<1x256xf32>
    %13 = arith.mulf %11, %12 : vector<1x256xf32>
    %cst_7 = arith.constant 9.99999974E-6 : f32
    %14 = vector.broadcast %cst_7 : f32 to vector<1x256xf32>
    %15 = arith.addf %13, %14 : vector<1x256xf32>
    %16 = math.rsqrt %15 : vector<1x256xf32>
    %17 = vector.broadcast %16 : vector<1x256xf32> to vector<4x256xf32>
    %18 = arith.mulf %8, %17 : vector<4x256xf32>
    %c0_8 = arith.constant 0 : index
    %c0_9 = arith.constant 0 : index
    %19 = vector.load %arg3[%c0_8, %c0_9] : memref<1x256xf32, #tpu.memory_space<vmem>>, vector<1x256xf32>
    %20 = vector.broadcast %19 : vector<1x256xf32> to vector<4x256xf32>
    %21 = arith.mulf %18, %20 : vector<4x256xf32>
    %c0_10 = arith.constant 0 : index
    %c0_11 = arith.constant 0 : index
    %22 = vector.load %arg4[%c0_10, %c0_11] : memref<1x256xf32, #tpu.memory_space<vmem>>, vector<1x256xf32>
    %23 = vector.broadcast %22 : vector<1x256xf32> to vector<4x256xf32>
    %24 = arith.addf %21, %23 : vector<4x256xf32>
    %cst_12 = arith.constant 0.000000e+00 : f32
    %25 = vector.broadcast %cst_12 : f32 to vector<4x256xf32>
    %26 = arith.maximumf %24, %25 : vector<4x256xf32>
    %27 = arith.truncf %26 : vector<4x256xf32> to vector<4x256xbf16>
    %c0_13 = arith.constant 0 : index
    %c0_14 = arith.constant 0 : index
    %28 = vector.load %arg5[%c0_13, %c0_14] : memref<4x256xbf16, #tpu.memory_space<vmem>>, vector<4x256xbf16>
    tpu.vector_store %arg5[%c0_13, %c0_14], %27 {strides = array<i32>} : memref<4x256xbf16, #tpu.memory_space<vmem>>, vector<4x256xbf16>,
    return
  }
  func.func @transform_0(%arg0: i32) -> (i32, i32) {
    %c0_i32 = arith.constant 0 : i32
    %c0_i32_0 = arith.constant 0 : i32
    %c0_i32_1 = arith.constant 0 : i32
    return %c0_i32, %c0_i32_0 : i32, i32
  }
  func.func @transform_1(%arg0: i32) -> (i32, i32) {
    %c0_i32 = arith.constant 0 : i32
    %c0_i32_0 = arith.constant 0 : i32
    return %c0_i32, %arg0 : i32, i32
  }
  func.func @transform_2(%arg0: i32) -> (i32, i32) {
    %c0_i32 = arith.constant 0 : i32
    %c0_i32_0 = arith.constant 0 : i32
    return %c0_i32, %arg0 : i32, i32
  }
  func.func @transform_3(%arg0: i32) -> (i32, i32) {
    %c0_i32 = arith.constant 0 : i32
    %c0_i32_0 = arith.constant 0 : i32
    return %c0_i32, %arg0 : i32, i32
  }
  func.func @transform_4(%arg0: i32) -> (i32, i32) {
    %c0_i32 = arith.constant 0 : i32
    %c0_i32_0 = arith.constant 0 : i32
    return %c0_i32, %arg0 : i32, i32
  }
}

module attributes {stable_mosaic.version = 11 : i64} {
  func.func @_linear_bn_relu_kernel(%arg0: i32, %arg1: memref<4x1024xbf16, #tpu.memory_space<vmem>>, %arg2: memref<1024x896xbf16, #tpu.memory_space<vmem>>, %arg3: memref<1x896xf32, #tpu.memory_space<vmem>>, %arg4: memref<1x896xf32, #tpu.memory_space<vmem>>, %arg5: memref<4x896xbf16, #tpu.memory_space<vmem>>) attributes {dimension_semantics = [#tpu.dimension_semantics<parallel>], iteration_bounds = array<i64: 7>, scalar_prefetch = 0 : i64, scratch_operands = 0 : i64, tpu.core_type = #tpu.core_type<tc>, window_params = [{pipeline_mode = #tpu.pipeline_mode<synchronous>, transform_indices = @transform_0, window_bounds = array<i64: 4, 1024>}, {transform_indices = @transform_1, window_bounds = array<i64: 1024, 896>}, {transform_indices = @transform_2, window_bounds = array<i64: 1, 896>}, {transform_indices = @transform_3, window_bounds = array<i64: 1, 896>}, {transform_indices = @transform_4, window_bounds = array<i64: 4, 896>}]} {
    %c0 = arith.constant 0 : index
    %c0_0 = arith.constant 0 : index
    %0 = vector.load %arg1[%c0, %c0_0] : memref<4x1024xbf16, #tpu.memory_space<vmem>>, vector<4x1024xbf16>
    %c0_1 = arith.constant 0 : index
    %c0_2 = arith.constant 0 : index
    %1 = vector.load %arg2[%c0_1, %c0_2] : memref<1024x896xbf16, #tpu.memory_space<vmem>>, vector<1024x896xbf16>
    %cst = arith.constant dense<0.000000e+00> : vector<4x896xf32>
    %2 = tpu.matmul %0, %1, %cst {dimension_numbers = #tpu.dot_dimension_numbers<[1], [0], [0], [1], [0, 0, 1, 1], [], []>} : vector<4x1024xbf16>, vector<1024x896xbf16>, vector<4x896xf32> -> vector<4x896xf32>
    %cst_3 = arith.constant dense<0.000000e+00> : vector<896xf32>
    %3 = vector.multi_reduction <add>, %2, %cst_3 [0] : vector<4x896xf32> to vector<896xf32>
    %4 = vector.shape_cast %3 : vector<896xf32> to vector<1x896xf32>
    %cst_4 = arith.constant 2.500000e-01 : f32
    %5 = vector.broadcast %cst_4 : f32 to vector<1x896xf32>
    %6 = arith.mulf %4, %5 : vector<1x896xf32>
    %7 = vector.broadcast %6 : vector<1x896xf32> to vector<4x896xf32>
    %8 = arith.subf %2, %7 : vector<4x896xf32>
    %9 = arith.mulf %8, %8 : vector<4x896xf32>
    %cst_5 = arith.constant dense<0.000000e+00> : vector<896xf32>
    %10 = vector.multi_reduction <add>, %9, %cst_5 [0] : vector<4x896xf32> to vector<896xf32>
    %11 = vector.shape_cast %10 : vector<896xf32> to vector<1x896xf32>
    %cst_6 = arith.constant 2.500000e-01 : f32
    %12 = vector.broadcast %cst_6 : f32 to vector<1x896xf32>
    %13 = arith.mulf %11, %12 : vector<1x896xf32>
    %cst_7 = arith.constant 9.99999974E-6 : f32
    %14 = vector.broadcast %cst_7 : f32 to vector<1x896xf32>
    %15 = arith.addf %13, %14 : vector<1x896xf32>
    %16 = math.rsqrt %15 : vector<1x896xf32>
    %17 = vector.broadcast %16 : vector<1x896xf32> to vector<4x896xf32>
    %18 = arith.mulf %8, %17 : vector<4x896xf32>
    %c0_8 = arith.constant 0 : index
    %c0_9 = arith.constant 0 : index
    %19 = vector.load %arg3[%c0_8, %c0_9] : memref<1x896xf32, #tpu.memory_space<vmem>>, vector<1x896xf32>
    %20 = vector.broadcast %19 : vector<1x896xf32> to vector<4x896xf32>
    %21 = arith.mulf %18, %20 : vector<4x896xf32>
    %c0_10 = arith.constant 0 : index
    %c0_11 = arith.constant 0 : index
    %22 = vector.load %arg4[%c0_10, %c0_11] : memref<1x896xf32, #tpu.memory_space<vmem>>, vector<1x896xf32>
    %23 = vector.broadcast %22 : vector<1x896xf32> to vector<4x896xf32>
    %24 = arith.addf %21, %23 : vector<4x896xf32>
    %cst_12 = arith.constant 0.000000e+00 : f32
    %25 = vector.broadcast %cst_12 : f32 to vector<4x896xf32>
    %26 = arith.maximumf %24, %25 : vector<4x896xf32>
    %27 = arith.truncf %26 : vector<4x896xf32> to vector<4x896xbf16>
    %c0_13 = arith.constant 0 : index
    %c0_14 = arith.constant 0 : index
    %28 = vector.load %arg5[%c0_13, %c0_14] : memref<4x896xbf16, #tpu.memory_space<vmem>>, vector<4x896xbf16>
    tpu.vector_store %arg5[%c0_13, %c0_14], %27 {strides = array<i32>} : memref<4x896xbf16, #tpu.memory_space<vmem>>, vector<4x896xbf16>,
    return
  }
  func.func @transform_0(%arg0: i32) -> (i32, i32) {
    %c0_i32 = arith.constant 0 : i32
    %c0_i32_0 = arith.constant 0 : i32
    %c0_i32_1 = arith.constant 0 : i32
    return %c0_i32, %c0_i32_0 : i32, i32
  }
  func.func @transform_1(%arg0: i32) -> (i32, i32) {
    %c0_i32 = arith.constant 0 : i32
    %c0_i32_0 = arith.constant 0 : i32
    return %c0_i32, %arg0 : i32, i32
  }
  func.func @transform_2(%arg0: i32) -> (i32, i32) {
    %c0_i32 = arith.constant 0 : i32
    %c0_i32_0 = arith.constant 0 : i32
    return %c0_i32, %arg0 : i32, i32
  }
  func.func @transform_3(%arg0: i32) -> (i32, i32) {
    %c0_i32 = arith.constant 0 : i32
    %c0_i32_0 = arith.constant 0 : i32
    return %c0_i32, %arg0 : i32, i32
  }
  func.func @transform_4(%arg0: i32) -> (i32, i32) {
    %c0_i32 = arith.constant 0 : i32
    %c0_i32_0 = arith.constant 0 : i32
    return %c0_i32, %arg0 : i32, i32
  }
}

module attributes {stable_mosaic.version = 11 : i64} {
  func.func @_conv_phase_bn_relu_kernel(%arg0: i32, %arg1: memref<196x1152xbf16, #tpu.memory_space<vmem>>, %arg2: memref<1152x256xbf16, #tpu.memory_space<vmem>>, %arg3: memref<256x256xf32, #tpu.memory_space<vmem>>, %arg4: memref<1x256xf32, #tpu.memory_space<vmem>>, %arg5: memref<1x256xf32, #tpu.memory_space<vmem>>, %arg6: memref<196x256xbf16, #tpu.memory_space<vmem>>) attributes {dimension_semantics = [#tpu.dimension_semantics<arbitrary>], iteration_bounds = array<i64: 1>, scalar_prefetch = 0 : i64, scratch_operands = 0 : i64, tpu.core_type = #tpu.core_type<tc>, window_params = [{pipeline_mode = #tpu.pipeline_mode<synchronous>, transform_indices = @transform_0, window_bounds = array<i64: 196, 1152>}, {pipeline_mode = #tpu.pipeline_mode<synchronous>, transform_indices = @transform_1, window_bounds = array<i64: 1152, 256>}, {pipeline_mode = #tpu.pipeline_mode<synchronous>, transform_indices = @transform_2, window_bounds = array<i64: 256, 256>}, {pipeline_mode = #tpu.pipeline_mode<synchronous>, transform_indices = @transform_3, window_bounds = array<i64: 1, 256>}, {pipeline_mode = #tpu.pipeline_mode<synchronous>, transform_indices = @transform_4, window_bounds = array<i64: 1, 256>}, {pipeline_mode = #tpu.pipeline_mode<synchronous>, transform_indices = @transform_5, window_bounds = array<i64: 196, 256>}]} {
    %c0 = arith.constant 0 : index
    %c0_0 = arith.constant 0 : index
    %0 = vector.load %arg1[%c0, %c0_0] : memref<196x1152xbf16, #tpu.memory_space<vmem>>, vector<196x1152xbf16>
    %c0_1 = arith.constant 0 : index
    %c0_2 = arith.constant 0 : index
    %1 = vector.load %arg2[%c0_1, %c0_2] : memref<1152x256xbf16, #tpu.memory_space<vmem>>, vector<1152x256xbf16>
    %cst = arith.constant dense<0.000000e+00> : vector<196x256xf32>
    %2 = tpu.matmul %0, %1, %cst {dimension_numbers = #tpu.dot_dimension_numbers<[1], [0], [0], [1], [0, 0, 1, 1], [], []>} : vector<196x1152xbf16>, vector<1152x256xbf16>, vector<196x256xf32> -> vector<196x256xf32>
    %cst_3 = arith.constant dense<0.000000e+00> : vector<256xf32>
    %3 = vector.multi_reduction <add>, %2, %cst_3 [0] : vector<196x256xf32> to vector<256xf32>
    %4 = vector.shape_cast %3 : vector<256xf32> to vector<1x256xf32>
    %c0_4 = arith.constant 0 : index
    %c0_5 = arith.constant 0 : index
    %5 = vector.load %arg3[%c0_4, %c0_5] : memref<256x256xf32, #tpu.memory_space<vmem>>, vector<256x256xf32>
    %cst_6 = arith.constant dense<0.000000e+00> : vector<1x256xf32>
    %6 = tpu.matmul %4, %5, %cst_6 {dimension_numbers = #tpu.dot_dimension_numbers<[1], [0], [0], [1], [0, 0, 1, 1], [], []>} : vector<1x256xf32>, vector<256x256xf32>, vector<1x256xf32> -> vector<1x256xf32>
    %cst_7 = arith.constant 0.00127551018 : f32
    %7 = vector.broadcast %cst_7 : f32 to vector<1x256xf32>
    %8 = arith.mulf %6, %7 : vector<1x256xf32>
    %9 = vector.broadcast %8 : vector<1x256xf32> to vector<196x256xf32>
    %10 = arith.subf %2, %9 : vector<196x256xf32>
    %11 = arith.mulf %10, %10 : vector<196x256xf32>
    %cst_8 = arith.constant dense<0.000000e+00> : vector<256xf32>
    %12 = vector.multi_reduction <add>, %11, %cst_8 [0] : vector<196x256xf32> to vector<256xf32>
    %13 = vector.shape_cast %12 : vector<256xf32> to vector<1x256xf32>
    %c0_9 = arith.constant 0 : index
    %c0_10 = arith.constant 0 : index
    %14 = vector.load %arg3[%c0_9, %c0_10] : memref<256x256xf32, #tpu.memory_space<vmem>>, vector<256x256xf32>
    %cst_11 = arith.constant dense<0.000000e+00> : vector<1x256xf32>
    %15 = tpu.matmul %13, %14, %cst_11 {dimension_numbers = #tpu.dot_dimension_numbers<[1], [0], [0], [1], [0, 0, 1, 1], [], []>} : vector<1x256xf32>, vector<256x256xf32>, vector<1x256xf32> -> vector<1x256xf32>
    %cst_12 = arith.constant 0.00127551018 : f32
    %16 = vector.broadcast %cst_12 : f32 to vector<1x256xf32>
    %17 = arith.mulf %15, %16 : vector<1x256xf32>
    %cst_13 = arith.constant 9.99999974E-6 : f32
    %18 = vector.broadcast %cst_13 : f32 to vector<1x256xf32>
    %19 = arith.addf %17, %18 : vector<1x256xf32>
    %20 = math.rsqrt %19 : vector<1x256xf32>
    %21 = vector.broadcast %20 : vector<1x256xf32> to vector<196x256xf32>
    %22 = arith.mulf %10, %21 : vector<196x256xf32>
    %c0_14 = arith.constant 0 : index
    %c0_15 = arith.constant 0 : index
    %23 = vector.load %arg4[%c0_14, %c0_15] : memref<1x256xf32, #tpu.memory_space<vmem>>, vector<1x256xf32>
    %24 = vector.broadcast %23 : vector<1x256xf32> to vector<196x256xf32>
    %25 = arith.mulf %22, %24 : vector<196x256xf32>
    %c0_16 = arith.constant 0 : index
    %c0_17 = arith.constant 0 : index
    %26 = vector.load %arg5[%c0_16, %c0_17] : memref<1x256xf32, #tpu.memory_space<vmem>>, vector<1x256xf32>
    %27 = vector.broadcast %26 : vector<1x256xf32> to vector<196x256xf32>
    %28 = arith.addf %25, %27 : vector<196x256xf32>
    %cst_18 = arith.constant 0.000000e+00 : f32
    %29 = vector.broadcast %cst_18 : f32 to vector<196x256xf32>
    %30 = arith.maximumf %28, %29 : vector<196x256xf32>
    %31 = arith.truncf %30 : vector<196x256xf32> to vector<196x256xbf16>
    %c0_19 = arith.constant 0 : index
    %c0_20 = arith.constant 0 : index
    %32 = vector.load %arg6[%c0_19, %c0_20] : memref<196x256xbf16, #tpu.memory_space<vmem>>, vector<196x256xbf16>
    tpu.vector_store %arg6[%c0_19, %c0_20], %31 {strides = array<i32>} : memref<196x256xbf16, #tpu.memory_space<vmem>>, vector<196x256xbf16>,
    return
  }
  func.func @transform_0(%arg0: i32) -> (i32, i32) {
    %c0_i32 = arith.constant 0 : i32
    %c0_i32_0 = arith.constant 0 : i32
    %c0_i32_1 = arith.constant 0 : i32
    return %c0_i32, %c0_i32_0 : i32, i32
  }
  func.func @transform_1(%arg0: i32) -> (i32, i32) {
    %c0_i32 = arith.constant 0 : i32
    %c0_i32_0 = arith.constant 0 : i32
    %c0_i32_1 = arith.constant 0 : i32
    return %c0_i32, %c0_i32_0 : i32, i32
  }
  func.func @transform_2(%arg0: i32) -> (i32, i32) {
    %c0_i32 = arith.constant 0 : i32
    %c0_i32_0 = arith.constant 0 : i32
    %c0_i32_1 = arith.constant 0 : i32
    return %c0_i32, %c0_i32_0 : i32, i32
  }
  func.func @transform_3(%arg0: i32) -> (i32, i32) {
    %c0_i32 = arith.constant 0 : i32
    %c0_i32_0 = arith.constant 0 : i32
    %c0_i32_1 = arith.constant 0 : i32
    return %c0_i32, %c0_i32_0 : i32, i32
  }
  func.func @transform_4(%arg0: i32) -> (i32, i32) {
    %c0_i32 = arith.constant 0 : i32
    %c0_i32_0 = arith.constant 0 : i32
    %c0_i32_1 = arith.constant 0 : i32
    return %c0_i32, %c0_i32_0 : i32, i32
  }
  func.func @transform_5(%arg0: i32) -> (i32, i32) {
    %c0_i32 = arith.constant 0 : i32
    %c0_i32_0 = arith.constant 0 : i32
    %c0_i32_1 = arith.constant 0 : i32
    return %c0_i32, %c0_i32_0 : i32, i32
  }
}

module attributes {stable_mosaic.version = 11 : i64} {
  func.func @_matmul_bias_sigmoid_kernel(%arg0: i32, %arg1: memref<784x576xbf16, #tpu.memory_space<vmem>>, %arg2: memref<576x128xbf16, #tpu.memory_space<vmem>>, %arg3: memref<1x128xf32, #tpu.memory_space<vmem>>, %arg4: memref<784x128xf32, #tpu.memory_space<vmem>>) attributes {dimension_semantics = [#tpu.dimension_semantics<arbitrary>], iteration_bounds = array<i64: 1>, scalar_prefetch = 0 : i64, scratch_operands = 0 : i64, tpu.core_type = #tpu.core_type<tc>, window_params = [{pipeline_mode = #tpu.pipeline_mode<synchronous>, transform_indices = @transform_0, window_bounds = array<i64: 784, 576>}, {pipeline_mode = #tpu.pipeline_mode<synchronous>, transform_indices = @transform_1, window_bounds = array<i64: 576, 128>}, {pipeline_mode = #tpu.pipeline_mode<synchronous>, transform_indices = @transform_2, window_bounds = array<i64: 1, 128>}, {pipeline_mode = #tpu.pipeline_mode<synchronous>, transform_indices = @transform_3, window_bounds = array<i64: 784, 128>}]} {
    %c0 = arith.constant 0 : index
    %c0_0 = arith.constant 0 : index
    %0 = vector.load %arg1[%c0, %c0_0] : memref<784x576xbf16, #tpu.memory_space<vmem>>, vector<784x576xbf16>
    %c0_1 = arith.constant 0 : index
    %c0_2 = arith.constant 0 : index
    %1 = vector.load %arg2[%c0_1, %c0_2] : memref<576x128xbf16, #tpu.memory_space<vmem>>, vector<576x128xbf16>
    %cst = arith.constant dense<0.000000e+00> : vector<784x128xf32>
    %2 = tpu.matmul %0, %1, %cst {dimension_numbers = #tpu.dot_dimension_numbers<[1], [0], [0], [1], [0, 0, 1, 1], [], []>} : vector<784x576xbf16>, vector<576x128xbf16>, vector<784x128xf32> -> vector<784x128xf32>
    %c0_3 = arith.constant 0 : index
    %c0_4 = arith.constant 0 : index
    %3 = vector.load %arg3[%c0_3, %c0_4] : memref<1x128xf32, #tpu.memory_space<vmem>>, vector<1x128xf32>
    %4 = vector.broadcast %3 : vector<1x128xf32> to vector<784x128xf32>
    %5 = arith.addf %2, %4 : vector<784x128xf32>
    %6 = arith.negf %5 : vector<784x128xf32>
    %7 = math.exp %6 : vector<784x128xf32>
    %cst_5 = arith.constant 1.000000e+00 : f32
    %8 = vector.broadcast %cst_5 : f32 to vector<784x128xf32>
    %9 = arith.addf %8, %7 : vector<784x128xf32>
    %10 = arith.divf %8, %9 : vector<784x128xf32>
    %c0_6 = arith.constant 0 : index
    %c0_7 = arith.constant 0 : index
    %11 = vector.load %arg4[%c0_6, %c0_7] : memref<784x128xf32, #tpu.memory_space<vmem>>, vector<784x128xf32>
    tpu.vector_store %arg4[%c0_6, %c0_7], %10 {strides = array<i32>} : memref<784x128xf32, #tpu.memory_space<vmem>>, vector<784x128xf32>,
    return
  }
  func.func @transform_0(%arg0: i32) -> (i32, i32) {
    %c0_i32 = arith.constant 0 : i32
    %c0_i32_0 = arith.constant 0 : i32
    %c0_i32_1 = arith.constant 0 : i32
    return %c0_i32, %c0_i32_0 : i32, i32
  }
  func.func @transform_1(%arg0: i32) -> (i32, i32) {
    %c0_i32 = arith.constant 0 : i32
    %c0_i32_0 = arith.constant 0 : i32
    %c0_i32_1 = arith.constant 0 : i32
    return %c0_i32, %c0_i32_0 : i32, i32
  }
  func.func @transform_2(%arg0: i32) -> (i32, i32) {
    %c0_i32 = arith.constant 0 : i32
    %c0_i32_0 = arith.constant 0 : i32
    %c0_i32_1 = arith.constant 0 : i32
    return %c0_i32, %c0_i32_0 : i32, i32
  }
  func.func @transform_3(%arg0: i32) -> (i32, i32) {
    %c0_i32 = arith.constant 0 : i32
    %c0_i32_0 = arith.constant 0 : i32
    %c0_i32_1 = arith.constant 0 : i32
    return %c0_i32, %c0_i32_0 : i32, i32
  }
}

</mosaic_0001>

<bundles_post_ra>
// kernel: generator_forward.4
= control target key start
LH: loop header
LB: loop body
LE: loop exit
PB: predicated region body
PF: predicated region fallthrough
CT: control target
= control target key end

     0   :  { %9 = vsyncpa [#allocation3], 0  ;;  %s1064_s0 = inlined_call_operand.vmem [shape: bf16[4,50], index: 0, kind: input, shape index: {}]   ;;  %s1065_s1 = inlined_call_operand.hbm [shape: bf16[50,1024], index: 1, kind: input, shape index: {}]   ;;  %s1066_s2 = inlined_call_operand.hbm [shape: f32[1,1024], index: 2, kind: input, shape index: {}]   ;;  %s1067_s3 = inlined_call_operand.hbm [shape: f32[1,1024], index: 3, kind: input, shape index: {}]   ;;  %s1068_s4 = inlined_call_operand.vmem [shape: bf16[4,1024], index: 4, kind: output, shape index: {}]  }
   0x1   :  { %11 = vsyncpa [#allocation3 + $0x1], 0 }
   0x2   :  { %12 = vsyncpa [#allocation5], 0 }
   0x3   :  { %14 = vsyncpa [#allocation5 + $0x1], 0  ;;  %s854_s15 = smov 0   ;;  %s856_s16 = smov 0  }
   0x4   :  { %s858_s17 = smov 0   ;;  %s860_s18 = smov 0  }
   0x5 LB: > { %s873_s19 = sadd.s32 4294967295, %s820_s18   ;;  %s876_s20 = sadd.s32 1, %s820_s18   ;;  %s820_s18 = sphi %s860_s18, %s1081_s18   ;;  %s816_s17 = sphi %s858_s17, %s1080_s17   ;;  %s812_s16 = sphi %s856_s16, %s1079_s16   ;;  %s808_s15 = sphi %s854_s15, %s1078_s15  }
   0x6   : > { %s45_s21 = ssub.s32 %s820_s18, %s876_s20  ;;  %s48_s22 = sadd.s32 1, %s816_s17 }
   0x7   : > { %p46_p0 = scmp.eq.s32.totalorder %s45_s21, 0  ;;  %p55_p1 = scmp.ne.s32.totalorder %s816_s17, %s812_s16 }
   0x8   : > { %p56_p2 = scmp.eq.s32.totalorder %s820_s18, 0  ;;  %p61_p3 = scmp.ne.s32.totalorder %s812_s16, %s808_s15 }
   0x9   : > { %s886_s23 = scalar_select %p46_p0, %s816_s17, %s48_s22  }
   0xa   : > { %p57_p4 = por %p56_p2, %p55_p1  ;;  %p62_p5 = scmp.eq.s32.totalorder %s873_s19, 0 }
   0xb   : > { %p640_p6 = scmp.lt.s32.totalorder %s820_s18, 4  ;;  %s895_s25 = sand.u32 1, %s816_s17  }
   0xc   : > { %p890_p7 = por %p62_p5, %p61_p3  ;;  %s622_s26 = smul.u32 56, %s895_s25 }
   0xd   : > { %p898_p8 = pnand %p640_p6, %p57_p4  ;;  %s187_s28 = sand.u32 1, %s820_s18  }
   0xe   : > { %s1071_s24 = scalar_select %p890_p7, 1, 0 }
   0xf   : > { %s1072_s27 = scalar_select %p898_p8, 1, 0 }
  0x10   : > { %s170_s29 = scalar_lea.vmem [#allocation2], %s622_s26  ;;  %s594_s5 = sshll.u32 %s895_s25, 1 }
  0x11   : > { %s177_s30 = sshll.u32 %s170_s29, 4  ;;  %s620_s6 = sshll.u32 %s820_s18, 5  ;;  %s903_s30 = int_to_ptr.vmem [resolvable:$true] %s177_s30 }
  0x12   : > { %s912_s9 = scalar_lea.hbm %s1066_s2, %s620_s6  ;;  %s191_s10 = scalar_lea.vmem [#allocation4], %s594_s5 }
  0x13   : > { %s199_s11 = sshll.u32 %s191_s10, 4  ;;  %s918_s12 = scalar_lea.sflag [#allocation5], %s187_s28  ;;  %s916_s11 = int_to_ptr.vmem [resolvable:$true] %s199_s11 }
  0x14   : > { %s692_s13 = scalar_lea.hbm %s912_s9, 32  ;;  %p924_p10 = pneg %p898_p8 }
  0x15   : > { %p693_p9 = scmp.ne.s32.totalorder %s912_s9, %s692_s13  ;;  %s697_s22 = scalar_lea.hbm %s1066_s2, 128 }
  0x16   : > { %p698_p13 = scmp.lt.u32.totalorder %s912_s9, %s1066_s2  ;;  %p699_p0 = scmp.lt.u32.totalorder %s697_s22, %s692_s13 }
  0x17   : > { %p695_p11 = pnand %p924_p10, %p693_p9  ;;  %p701_p2 = scmp.lt.u32.totalorder %s692_s13, %s912_s9 }
  0x18   : > { %p700_p1 = por %p699_p0, %p698_p13 }
  0x19   : > { %p696_p12 = pneg %p695_p11 }
  0x1a   : > { %p702_p3 = por %p701_p2, %p700_p1 }
  0x1c   : > { %p703_p4 = pnand %p702_p3, %p696_p12 }
  0x1e   : > { %706 = shalt.err (!%p703_p4)
}
  0x1f   : > { %s707_s28 = scalar_lea.vmem %s916_s11, 32  ;;  %s822_s7 = smov [#allocation4]  }
  0x20   : > { %p708_p5 = scmp.ne.s32.totalorder %s916_s11, %s707_s28  ;;  %s712_s8 = sshll.u32 %s822_s7, 4  ;;  %s713_s8 = int_to_ptr.vmem [resolvable:$false] %s712_s8 }
  0x21   : > { %s714_s10 = scalar_lea.vmem %s713_s8, 64  ;;  %p715_p11 = scmp.lt.s32.totalorder %s916_s11, %s713_s8 }
  0x22   : > { %p710_p6 = pnand %p708_p5, %p924_p10  ;;  %p716_p7 = scmp.lt.s32.totalorder %s714_s10, %s707_s28 }
  0x24   : > { %p711_p9 = pneg %p710_p6  ;;  %p717_p13 = por %p716_p7, %p715_p11 }
  0x26   : > { %p718_p0 = pnand %p717_p13, %p711_p9 }
  0x28   : > { %721 = shalt.err (!%p718_p0)
}
  0x29   : > { %636 = dma.hbm_to_vmem [thread:$0]  (!%p898_p8), %s912_s9, 32, %s916_s11, %s918_s12  }
  0x2a   : > { %s953_s21 = scalar_lea.hbm %s1067_s3, %s620_s6  ;;  %p600_p7 = scmp.ge.s32.totalorder %s820_s18, 1 }
  0x2b   : > { %p223_p12 = scmp.lt.s32.totalorder %s820_s18, 5  ;;  %s619_s22 = sshll.u32 %s820_s18, 7 }
  0x2c   : > { %s961_s28 = scalar_lea.hbm %s1065_s1, %s619_s22  ;;  %s969_s11 = scalar_lea.vmem [#allocation6], %s594_s5 }
  0x2d   : > { %p963_p1 = pnand %p600_p7, %p223_p12  ;;  %s218_s6 = sshll.u32 %s969_s11, 4  ;;  %s219_s6 = int_to_ptr.vmem [resolvable:$true] %s218_s6 }
  0x2e   : > { %s167_s7 = scalar_lea.sflag [#allocation3], %s895_s25  ;;  %s722_s18 = scalar_lea.hbm %s961_s28, 896 }
  0x2f   : > { %s1074_s9 = scalar_select %p963_p1, 1, 0 }
  0x30   : > { %p723_p2 = scmp.ne.s32.totalorder %s961_s28, %s722_s18  ;;  %s727_s13 = scalar_lea.hbm %s1065_s1, 3584 }
  0x31   : > { %p728_p5 = scmp.lt.u32.totalorder %s961_s28, %s1065_s1  ;;  %p729_p6 = scmp.lt.u32.totalorder %s727_s13, %s722_s18 }
  0x32   : > { %p725_p3 = pnand %p723_p2, %p924_p10  ;;  %p731_p11 = scmp.lt.u32.totalorder %s722_s18, %s961_s28 }
  0x33   : > { %p730_p9 = por %p729_p6, %p728_p5 }
  0x34   : > { %p726_p4 = pneg %p725_p3 }
  0x35   : > { %p732_p13 = por %p731_p11, %p730_p9 }
  0x37   : > { %p733_p0 = pnand %p732_p13, %p726_p4 }
  0x39   : > { %736 = shalt.err (!%p733_p0)
}
  0x3a   : > { %s737_s5 = scalar_lea.vmem %s903_s30, 896  ;;  %s823_s26 = smov [#allocation2]  }
  0x3b   : > { %p738_p7 = scmp.ne.s32.totalorder %s903_s30, %s737_s5  ;;  %s742_s29 = sshll.u32 %s823_s26, 4  ;;  %s743_s29 = int_to_ptr.vmem [resolvable:$false] %s742_s29 }
  0x3c   : > { %s744_s8 = scalar_lea.vmem %s743_s29, 1792  ;;  %p745_p3 = scmp.lt.s32.totalorder %s903_s30, %s743_s29 }
  0x3d   : > { %p740_p12 = pnand %p738_p7, %p924_p10  ;;  %p746_p1 = scmp.lt.s32.totalorder %s744_s8, %s737_s5 }
  0x3f   : > { %p741_p2 = pneg %p740_p12  ;;  %p747_p5 = por %p746_p1, %p745_p3 }
  0x41   : > { %p748_p6 = pnand %p747_p5, %p741_p2 }
  0x43   : > { %751 = shalt.err (!%p748_p6)
}
  0x44   : > { %s824_s18 = smov 512   ;;  %s825_s10 = smov 128  }
  0x45   : > { %s826_s13 = smov 8   ;;  %s752_s15 = scalar_lea.hbm %s953_s21, 32 }
  0x46   : > { %633 = dma.hbm_to_vmem [thread:$0]  (!%p898_p8), %s961_s28, 896, %s903_s30, %s167_s7, %s824_s18, %s825_s10, %s826_s13  }
  0x47   : > { %p753_p1 = scmp.ne.s32.totalorder %s953_s21, %s752_s15  ;;  %s757_s26 = scalar_lea.hbm %s1067_s3, 128 }
  0x48   : > { %p758_p11 = scmp.lt.u32.totalorder %s953_s21, %s1067_s3  ;;  %p759_p13 = scmp.lt.u32.totalorder %s757_s26, %s752_s15 }
  0x49   : > { %p755_p4 = pnand %p753_p1, %p924_p10  ;;  %p761_p7 = scmp.lt.u32.totalorder %s752_s15, %s953_s21 }
  0x4a   : > { %p760_p0 = por %p759_p13, %p758_p11 }
  0x4b   : > { %p756_p9 = pneg %p755_p4 }
  0x4c   : > { %p762_p12 = por %p761_p7, %p760_p0 }
  0x4e   : > { %p763_p2 = pnand %p762_p12, %p756_p9 }
  0x50   : > { %766 = shalt.err (!%p763_p2)
}
  0x51   : > { %s767_s25 = scalar_lea.vmem %s219_s6, 32  ;;  %s827_s30 = smov [#allocation6]  }
  0x52   : > { %p768_p3 = scmp.ne.s32.totalorder %s219_s6, %s767_s25  ;;  %s772_s28 = sshll.u32 %s827_s30, 4  ;;  %s773_s28 = int_to_ptr.vmem [resolvable:$false] %s772_s28 }
  0x53   : > { %s774_s11 = scalar_lea.vmem %s773_s28, 64  ;;  %p775_p1 = scmp.lt.s32.totalorder %s219_s6, %s773_s28 }
  0x54   : > { %p770_p5 = pnand %p768_p3, %p924_p10  ;;  %p776_p4 = scmp.lt.s32.totalorder %s774_s11, %s767_s25 }
  0x56   : > { %p771_p6 = pneg %p770_p5  ;;  %p777_p8 = por %p776_p4, %p775_p1 }
  0x58   : > { %p778_p11 = pnand %p777_p8, %p771_p6 }
  0x5a   : > { %781 = shalt.err (!%p778_p11)
}
  0x5b   : > { %p1075_p13 = scmp.ne.s32.totalorder %s1072_s27, 0  ;;  %p1076_p9 = scmp.ne.s32.totalorder %s1074_s9, 0 }
  0x5c   : > { %s1019_s14 = sand.u32 (!%p1076_p9), 1, %s812_s16   ;;  %p1077_p10 = scmp.ne.s32.totalorder (!%p1076_p9), %s1071_s24, 0 }
  0x5d   : > { %639 = dma.hbm_to_vmem [thread:$0]  (!%p1075_p13), %s953_s21, 32, %s219_s6, %s918_s12  }
  0x5e   : > { %227 = sbr.rel (%p1076_p9) target bundleno = 393 (0x189), region = 36  ;;  %s230_s18 = scalar_lea.sflag (!%p1076_p9), [#allocation3], %s1019_s14 }
  0x5f   : > { %s623_s7 = smul.u32 (!%p1076_p9), 56, %s1019_s14 }
  0x61   : > { %s233_s10 = scalar_lea.vmem (!%p1076_p9), [#allocation2], %s623_s7 }
  0x65   : > { %799 = dma.done.wait (%p1077_p10), %s230_s18, 896  }
  0x66   : > { %801 = vsyncadd (%p1077_p10), %s230_s18, 4294966400  ;;  %s238_s27 = sand.u32 1, %s873_s19   ;;  %s601_s12 = sshll.u32 %s1019_s14, 1 }
  0x67   : > { %s239_s21 = scalar_lea.sflag [#allocation5], %s238_s27  ;;  %s1031_s9 = scalar_lea.vmem [#allocation4], %s601_s12 }
  0x68   : > { %803 = dma.done.wait (%p1077_p10), %s239_s21, 64  }
  0x69   : > { %805 = vsyncadd (%p1077_p10), %s239_s21, 4294967232  ;;  %v828_v0 = vmov 0   ;;  %v677_v1 = vld [vmem:[%s233_s10 + $0x4] ss:$8 sps:$4 sm:$0xff]   ;;  %v679_v2 = vld [vmem:[%s233_s10] ss:$8 sps:$4 sm:$0xff]   ;;  %v436_v51 = vlaneseq }
  0x6a   : > { %382 = vmatprep.mubr.bf16.mxu0 %v828_v0  ;;  %350 = vmatprep.subr.bf16.mxu0 %v677_v1  ;;  %v680_v3 = vld [vmem:[%s233_s10 + $0x14] ss:$8 sps:$4 sm:$0xff]   ;;  %v682_v4 = vld [vmem:[%s233_s10 + $0x10] ss:$8 sps:$4 sm:$0xff]   ;;  %v683_v5 = vld [vmem:[%s233_s10 + $0x24] ss:$8 sps:$4 sm:$0xff]  }
  0x6b   : > { %351 = vmatpush1.bf16.msra.mxu0 %v679_v2  ;;  %v303_v6 = vld [vmem:[%s233_s10 + $0x30] sm:$0x11]  ;;  %v685_v7 = vld [vmem:[%s233_s10 + $0x20] ss:$8 sps:$4 sm:$0xff]   ;;  %vm343_vm0 = vcmask 1040384   ;;  %vm339_vm1 = vcmask 408576  }
  0x6c   : > { %352 = vmatprep.subr.bf16.mxu0 %v680_v3  ;;  %v612_v8 = vcombine.high %v303_v6, %v303_v6  ;;  %v611_v9 = vcombine.low %v303_v6, %v303_v6  ;;  %v296_v11 = vld [vmem:[%s1064_s0] sm:$0x3]  ;;  %vm391_vm2 = vcmask 1043456   ;;  %v437_v55 = vshrl.u32 %v436_v51, 7  ;;  %s603_s13 = sshll.u32 %s873_s19, 1  ;;  %s251_s15 = scalar_lea.vmem [#allocation6], %s601_s12 }
  0x6d   : > { %v434_v57 = vld [vmem:[%s1031_s9] sm:$0x3]  ;;  %v448_v59 = vld [vmem:[%s251_s15] sm:$0x3]  ;;  %p290_p8 = scmp.lt.s32.totalorder %s603_s13, 7 }
  0x6e   : > { %v345_v10 = vsel %vm343_vm0, %v611_v9, 0  ;;  %v438_v56 = vsub.s32 0, %v437_v55  ;;  %v442_v58 = vsub.s32 1, %v437_v55 }
  0x6f   : > { %353 = vmatpush1.bf16.msra.mxu0 %v682_v4  ;;  %s1083_s13 = smov (!%p290_p8, %s603_s13), 7 }
  0x70   : > { %354 = vmatprep.subr.bf16.mxu0 %v683_v5  ;;  %v439_v60 = vrot.slane %v434_v57, %v438_v56  ;;  %v443_v62 = vrot.slane %v434_v57, %v442_v58  ;;  %v453_v1 = vrot.slane %v448_v59, %v438_v56  ;;  %v457_v3 = vrot.slane %v448_v59, %v442_v58  ;;  %s604_s22 = sshll.u32 %s1083_s13, 1 }
  0x71   : > { %s293_s26 = scalar_lea.vmem %s1068_s4, %s604_s22 }
  0x73   : > { %355 = vmatpush1.bf16.msra.mxu0 %v685_v7 }
  0x74   : > { %613 = vmatprep.subr.msk.bf16.mxu0 %vm343_vm0, %v612_v8 }
  0x77   : > { %357 = vmatpush1.bf16.msra.mxu0 %v345_v10 }
  0x7a   : > { %614 = vmatmul.mubr.msk.bf16.vlgmr.msra.gmra.mrb[0].mxu0 %vm339_vm1, %v296_v11 }
 0x14d   : > { %v384_v12 = vpop.f32.mrb[0].mxu0 }
 0x14e   : > { %v392_v13 = vsel %vm391_vm2, %v384_v12, 0.0  ;;  %v386_v14 = vpop.f32.mrb[1].mxu0 }
 0x14f   : > { %v393_v15 = vrot.slane %v392_v13, 4  ;;  %v399_v16 = vsel %vm391_vm2, %v386_v14, 0.0  ;;  %v388_v17 = vpop.f32.mrb[2].mxu0 }
 0x150   : > { %v400_v18 = vrot.slane %v399_v16, 4  ;;  %v389_v19 = vpop.f32.mrb[3].mxu0 }
 0x151   : > { %v394_v20 = vadd.f32 %v393_v15, %v392_v13 }
 0x152   : > { %v401_v21 = vadd.f32 %v400_v18, %v399_v16 }
 0x153   : > { %v395_v22 = vrot.slane %v394_v20, 2 }
 0x154   : > { %v402_v23 = vrot.slane %v401_v21, 2 }
 0x155   : > { %v396_v24 = vadd.f32 %v395_v22, %v394_v20 }
 0x156   : > { %v403_v25 = vadd.f32 %v402_v23, %v401_v21 }
 0x157   : > { %v397_v26 = vrot.slane %v396_v24, 1 }
 0x158   : > { %v404_v27 = vrot.slane %v403_v25, 1 }
 0x159   : > { %v398_v28 = vadd.f32 %v397_v26, %v396_v24 }
 0x15a   : > { %v405_v29 = vadd.f32 %v404_v27, %v403_v25 }
 0x15b   : > { %v406_v30 = vmul.f32 0.25, %v398_v28 }
 0x15c   : > { %v407_v31 = vmul.f32 0.25, %v405_v29 }
 0x15d   : > { %v408_v32 = vsub.f32 %v384_v12, %v406_v30 }
 0x15e   : > { %v409_v33 = vsub.f32 %v386_v14, %v407_v31 }
 0x15f   : > { %v410_v34 = vmul.f32 %v408_v32, %v408_v32 }
 0x160   : > { %v411_v35 = vmul.f32 %v409_v33, %v409_v33 }
 0x161   : > { %v412_v36 = vsel %vm391_vm2, %v410_v34, 0.0 }
 0x162   : > { %v413_v37 = vrot.slane %v412_v36, 4  ;;  %v419_v38 = vsel %vm391_vm2, %v411_v35, 0.0 }
 0x163   : > { %v420_v39 = vrot.slane %v419_v38, 4 }
 0x164   : > { %v414_v40 = vadd.f32 %v413_v37, %v412_v36 }
 0x165   : > { %v421_v41 = vadd.f32 %v420_v39, %v419_v38 }
 0x166   : > { %v415_v42 = vrot.slane %v414_v40, 2 }
 0x167   : > { %v422_v43 = vrot.slane %v421_v41, 2 }
 0x168   : > { %v416_v44 = vadd.f32 %v415_v42, %v414_v40 }
 0x169   : > { %v423_v45 = vadd.f32 %v422_v43, %v421_v41 }
 0x16a   : > { %v417_v46 = vrot.slane %v416_v44, 1 }
 0x16b   : > { %v424_v47 = vrot.slane %v423_v45, 1 }
 0x16c   : > { %v418_v48 = vadd.f32 %v417_v46, %v416_v44 }
 0x16d   : > { %v425_v49 = vadd.f32 %v424_v47, %v423_v45 }
 0x16e   : > { %v426_v50 = vmul.f32 0.25, %v418_v48 }
 0x16f   : > { %v427_v52 = vmul.f32 0.25, %v425_v49 }
 0x170   : > { %v428_v53 = vadd.f32 1e-05, %v426_v50 }
 0x171   : > { %v429_v54 = vadd.f32 1e-05, %v427_v52 }
 0x172   : > { %688 = vrsqrt.f32 %v428_v53 }
 0x173   : > { %690 = vrsqrt.f32 %v429_v54 }
 0x17c   : > { %v689_v61 = vpop.eup %688 }
 0x17d   : > { %v691_v63 = vpop.eup %690  ;;  %v432_v0 = vmul.f32 %v689_v61, %v408_v32 }
 0x17e   : > { %v433_v2 = vmul.f32 %v691_v63, %v409_v33 }
 0x17f   : > { %v446_v4 = vmul.f32 %v439_v60, %v432_v0 }
 0x180   : > { %v447_v5 = vmul.f32 %v443_v62, %v433_v2 }
 0x181   : > { %v460_v6 = vadd.f32 %v453_v1, %v446_v4 }
 0x182   : > { %v461_v7 = vadd.f32 %v457_v3, %v447_v5 }
 0x183   : > { %v462_v8 = vmax.f32 %v460_v6, 0.0 }
 0x184   : > { %v463_v9 = vmax.f32 %v461_v7, 0.0 }
 0x186   : > { %v615_v10 = vpack.c.bf16 %v463_v9, %v462_v8 }
 0x188   : > { %616 = vst.sshfl [vmem:[%s293_s26] sm:$0x33 pattern:$0x76325410] %v615_v10 }
 0x189 PF: > { %p17_p0 = scmp.ge.s32.totalorder %s876_s20, 6   ;;  %s1078_s15 = smov %s812_s16 }
 0x18a   : > { %s1079_s16 = smov %s816_s17  ;;  %s1080_s17 = smov %s886_s23 }
 0x18b   : > { %s1081_s18 = smov %s876_s20  ;;  %19 = sbr.rel (!%p17_p0) target bundleno = 5 (0x5), region = 100 }
 0x192   :  { %500 = vsyncpa [#allocation3], 1 }
 0x193   :  { %502 = vsyncpa [#allocation3 + $0x1], 1 }
 0x194   :  { %503 = vsyncpa [#allocation5], 1 }
 0x195   :  { %505 = vsyncpa [#allocation5 + $0x1], 1 }

// kernel: generator_forward.5
= control target key start
LH: loop header
LB: loop body
LE: loop exit
PB: predicated region body
PF: predicated region fallthrough
CT: control target
= control target key end

     0   :  { %9 = vsyncpa [#allocation3], 0  ;;  %s6467_s0 = inlined_call_operand.vmem [shape: bf16[4,1024], index: 0, kind: input, shape index: {}]   ;;  %s6468_s1 = inlined_call_operand.hbm [shape: bf16[1024,6272], index: 1, kind: input, shape index: {}]   ;;  %s6469_s2 = inlined_call_operand.hbm [shape: f32[1,6272], index: 2, kind: input, shape index: {}]   ;;  %s6470_s3 = inlined_call_operand.hbm [shape: f32[1,6272], index: 3, kind: input, shape index: {}]   ;;  %s6471_s4 = inlined_call_operand.vmem [shape: bf16[4,6272], index: 4, kind: output, shape index: {}]  }
   0x1   :  { %11 = vsyncpa [#allocation3 + $0x1], 0 }
   0x2   :  { %12 = vsyncpa [#allocation5], 0 }
   0x3   :  { %14 = vsyncpa [#allocation5 + $0x1], 0  ;;  %s5677_s15 = smov 0   ;;  %s5679_s16 = smov 0  }
   0x4   :  { %s5681_s17 = smov 0   ;;  %s5683_s18 = smov 0  }
   0x5 LB: > { %s5696_s19 = sadd.s32 4294967295, %s5643_s18   ;;  %s5699_s20 = sadd.s32 1, %s5643_s18   ;;  %s5643_s18 = sphi %s5683_s18, %s6484_s18   ;;  %s5639_s17 = sphi %s5681_s17, %s6483_s17   ;;  %s5635_s16 = sphi %s5679_s16, %s6482_s16   ;;  %s5631_s15 = sphi %s5677_s15, %s6481_s15  }
   0x6   : > { %s45_s21 = ssub.s32 %s5643_s18, %s5699_s20  ;;  %s48_s22 = sadd.s32 1, %s5639_s17 }
   0x7   : > { %p46_p0 = scmp.eq.s32.totalorder %s45_s21, 0  ;;  %p55_p1 = scmp.ne.s32.totalorder %s5639_s17, %s5635_s16 }
   0x8   : > { %p56_p2 = scmp.eq.s32.totalorder %s5643_s18, 0  ;;  %p61_p3 = scmp.ne.s32.totalorder %s5635_s16, %s5631_s15 }
   0x9   : > { %s5709_s23 = scalar_select %p46_p0, %s5639_s17, %s48_s22  }
   0xa   : > { %p57_p4 = por %p56_p2, %p55_p1  ;;  %p62_p5 = scmp.eq.s32.totalorder %s5696_s19, 0 }
   0xb   : > { %p4822_p6 = scmp.lt.s32.totalorder %s5643_s18, 7  ;;  %s5718_s25 = sand.u32 1, %s5639_s17  }
   0xc   : > { %p5713_p7 = por %p62_p5, %p61_p3  ;;  %s4801_s26 = smul.u32 3584, %s5718_s25 }
   0xd   : > { %p5721_p8 = pnand %p4822_p6, %p57_p4  ;;  %s187_s28 = sand.u32 1, %s5643_s18  }
   0xe   : > { %s6474_s24 = scalar_select %p5713_p7, 1, 0 }
   0xf   : > { %s6475_s27 = scalar_select %p5721_p8, 1, 0 }
  0x10   : > { %s170_s29 = scalar_lea.vmem [#allocation2], %s4801_s26  ;;  %s4802_s5 = smul.u32 7, %s5718_s25 }
  0x11   : > { %s177_s30 = sshll.u32 %s170_s29, 4  ;;  %s4677_s6 = smul.u32 112, %s5643_s18  ;;  %s5726_s30 = int_to_ptr.vmem [resolvable:$true] %s177_s30 }
  0x12   : > { %p4221_p9 = scmp.ge.s32.totalorder %s5643_s18, 1  ;;  %p223_p10 = scmp.lt.s32.totalorder %s5643_s18, 8 }
  0x13   : > { %s5737_s9 = scalar_lea.hbm %s6469_s2, %s4677_s6  ;;  %s191_s10 = scalar_lea.vmem [#allocation4], %s4802_s5 }
  0x14   : > { %s199_s11 = sshll.u32 %s191_s10, 4  ;;  %p5743_p11 = pnand %p4221_p9, %p223_p10  ;;  %s5741_s11 = int_to_ptr.vmem [resolvable:$true] %s199_s11 }
  0x15   : > { %s5747_s13 = scalar_lea.sflag [#allocation5], %s187_s28  ;;  %s5515_s14 = scalar_lea.hbm %s5737_s9, 112 }
  0x16   : > { %s6476_s12 = scalar_select %p5743_p11, 1, 0 }
  0x17   : > { %p5516_p12 = scmp.ne.s32.totalorder %s5737_s9, %s5515_s14  ;;  %p5753_p13 = pneg %p5721_p8 }
  0x18   : > { %s5520_s26 = scalar_lea.hbm %s6469_s2, 784  ;;  %p5521_p2 = scmp.lt.u32.totalorder %s5737_s9, %s6469_s2 }
  0x19   : > { %p5518_p0 = pnand %p5753_p13, %p5516_p12  ;;  %p5522_p3 = scmp.lt.u32.totalorder %s5520_s26, %s5515_s14 }
  0x1a   : > { %p5524_p5 = scmp.lt.u32.totalorder %s5515_s14, %s5737_s9 }
  0x1b   : > { %p5519_p1 = pneg %p5518_p0  ;;  %p5523_p4 = por %p5522_p3, %p5521_p2 }
  0x1d   : > { %p5525_p6 = por %p5524_p5, %p5523_p4 }
  0x1f   : > { %p5526_p9 = pnand %p5525_p6, %p5519_p1 }
  0x21   : > { %5529 = shalt.err (!%p5526_p9)
}
  0x22   : > { %s5530_s28 = scalar_lea.vmem %s5741_s11, 112  ;;  %s5645_s8 = smov [#allocation4]  }
  0x23   : > { %p5531_p10 = scmp.ne.s32.totalorder %s5741_s11, %s5530_s28  ;;  %s5535_s10 = sshll.u32 %s5645_s8, 4  ;;  %s5536_s10 = int_to_ptr.vmem [resolvable:$false] %s5535_s10 }
  0x24   : > { %s5537_s21 = scalar_lea.vmem %s5536_s10, 224  ;;  %p5538_p7 = scmp.lt.s32.totalorder %s5741_s11, %s5536_s10 }
  0x25   : > { %p5533_p12 = pnand %p5531_p10, %p5753_p13  ;;  %p5539_p11 = scmp.lt.s32.totalorder %s5537_s21, %s5530_s28 }
  0x27   : > { %p5534_p0 = pneg %p5533_p12  ;;  %p5540_p2 = por %p5539_p11, %p5538_p7 }
  0x29   : > { %p5541_p3 = pnand %p5540_p2, %p5534_p0 }
  0x2b   : > { %5544 = shalt.err (!%p5541_p3)
}
  0x2c   : > { %4818 = dma.hbm_to_vmem [thread:$0]  (!%p5721_p8), %s5737_s9, 112, %s5741_s11, %s5747_s13  }
  0x2d   : > { %s4676_s14 = smul.u32 448, %s5643_s18  ;;  %s167_s7 = scalar_lea.sflag [#allocation3], %s5718_s25 }
  0x2e   : > { %s5550_s9 = scalar_lea.hbm %s6468_s1, 401408 }
  0x2f   : > { %s5781_s29 = scalar_lea.hbm %s6468_s1, %s4676_s14 }
  0x30   : > { %s5545_s28 = scalar_lea.hbm %s5781_s29, 57344  ;;  %p5551_p4 = scmp.lt.u32.totalorder %s5781_s29, %s6468_s1 }
  0x31   : > { %p5546_p7 = scmp.ne.s32.totalorder %s5781_s29, %s5545_s28  ;;  %p5552_p5 = scmp.lt.u32.totalorder %s5550_s9, %s5545_s28 }
  0x32   : > { %p5554_p9 = scmp.lt.u32.totalorder %s5545_s28, %s5781_s29 }
  0x33   : > { %p5548_p11 = pnand %p5546_p7, %p5753_p13  ;;  %p5553_p6 = por %p5552_p5, %p5551_p4 }
  0x35   : > { %p5549_p1 = pneg %p5548_p11  ;;  %p5555_p10 = por %p5554_p9, %p5553_p6 }
  0x37   : > { %p5556_p12 = pnand %p5555_p10, %p5549_p1 }
  0x39   : > { %5559 = shalt.err (!%p5556_p12)
}
  0x3a   : > { %s5560_s14 = scalar_lea.vmem %s5726_s30, 57344  ;;  %s5646_s22 = smov [#allocation2]  }
  0x3b   : > { %p5561_p0 = scmp.ne.s32.totalorder %s5726_s30, %s5560_s14  ;;  %s5565_s26 = sshll.u32 %s5646_s22, 4  ;;  %s5566_s26 = int_to_ptr.vmem [resolvable:$false] %s5565_s26 }
  0x3c   : > { %s5567_s8 = scalar_lea.vmem %s5566_s26, 114688  ;;  %p5568_p7 = scmp.lt.s32.totalorder %s5726_s30, %s5566_s26 }
  0x3d   : > { %p5563_p2 = pnand %p5561_p0, %p5753_p13  ;;  %p5569_p11 = scmp.lt.s32.totalorder %s5567_s8, %s5560_s14 }
  0x3f   : > { %p5564_p3 = pneg %p5563_p2  ;;  %p5570_p4 = por %p5569_p11, %p5568_p7 }
  0x41   : > { %p5571_p5 = pnand %p5570_p4, %p5564_p3 }
  0x43   : > { %5574 = shalt.err (!%p5571_p5)
}
  0x44   : > { %s5647_s28 = smov 3136   ;;  %s5648_s10 = smov 448  }
  0x45   : > { %s5649_s9 = smov 28   ;;  %s5812_s14 = scalar_lea.hbm %s6470_s3, %s4677_s6 }
  0x46   : > { %4815 = dma.hbm_to_vmem [thread:$0]  (!%p5721_p8), %s5781_s29, 57344, %s5726_s30, %s167_s7, %s5647_s28, %s5648_s10, %s5649_s9  }
  0x47   : > { %s210_s22 = scalar_lea.vmem [#allocation6], %s4802_s5  ;;  %s5575_s8 = scalar_lea.hbm %s5812_s14, 112 }
  0x48   : > { %s218_s26 = sshll.u32 %s210_s22, 4  ;;  %p5576_p1 = scmp.ne.s32.totalorder %s5812_s14, %s5575_s8  ;;  %s219_s26 = int_to_ptr.vmem [resolvable:$true] %s218_s26 }
  0x49   : > { %s5580_s29 = scalar_lea.hbm %s6470_s3, 784  ;;  %p5581_p10 = scmp.lt.u32.totalorder %s5812_s14, %s6470_s3 }
  0x4a   : > { %p5578_p6 = pnand %p5576_p1, %p5753_p13  ;;  %p5582_p12 = scmp.lt.u32.totalorder %s5580_s29, %s5575_s8 }
  0x4b   : > { %p5584_p2 = scmp.lt.u32.totalorder %s5575_s8, %s5812_s14 }
  0x4c   : > { %p5579_p9 = pneg %p5578_p6  ;;  %p5583_p0 = por %p5582_p12, %p5581_p10 }
  0x4e   : > { %p5585_p3 = por %p5584_p2, %p5583_p0 }
  0x50   : > { %p5586_p7 = pnand %p5585_p3, %p5579_p9 }
  0x52   : > { %5589 = shalt.err (!%p5586_p7)
}
  0x53   : > { %s5590_s25 = scalar_lea.vmem %s219_s26, 112  ;;  %s5650_s5 = smov [#allocation6]  }
  0x54   : > { %p5591_p11 = scmp.ne.s32.totalorder %s219_s26, %s5590_s25  ;;  %s5595_s28 = sshll.u32 %s5650_s5, 4  ;;  %s5596_s28 = int_to_ptr.vmem [resolvable:$false] %s5595_s28 }
  0x55   : > { %s5597_s10 = scalar_lea.vmem %s5596_s28, 224  ;;  %p5598_p1 = scmp.lt.s32.totalorder %s219_s26, %s5596_s28 }
  0x56   : > { %p5593_p4 = pnand %p5591_p11, %p5753_p13  ;;  %p5599_p6 = scmp.lt.s32.totalorder %s5597_s10, %s5590_s25 }
  0x58   : > { %p5594_p5 = pneg %p5593_p4  ;;  %p5600_p8 = por %p5599_p6, %p5598_p1 }
  0x5a   : > { %p5601_p10 = pnand %p5600_p8, %p5594_p5 }
  0x5c   : > { %5604 = shalt.err (!%p5601_p10)
}
  0x5d   : > { %p6478_p12 = scmp.ne.s32.totalorder %s6475_s27, 0  ;;  %p6479_p9 = scmp.ne.s32.totalorder %s6476_s12, 0 }
  0x5e   : > { %s5837_s15 = sand.u32 (!%p6479_p9), 1, %s5635_s16   ;;  %p6480_p8 = scmp.ne.s32.totalorder (!%p6479_p9), %s6474_s24, 0 }
  0x5f   : > { %4821 = dma.hbm_to_vmem [thread:$0]  (!%p6478_p12), %s5812_s14, 112, %s219_s26, %s5747_s13  }
  0x60   : > { %227 = sbr.rel (%p6479_p9) target bundleno = 837 (0x345), region = 36  ;;  %s230_s11 = scalar_lea.sflag (!%p6479_p9), [#allocation3], %s5837_s15 }
  0x61   : > { %s4804_s9 = smul.u32 (!%p6479_p9), 3584, %s5837_s15 }
  0x63   : > { %s5841_s21 = scalar_lea.vmem (!%p6479_p9), [#allocation2], %s4804_s9 }
  0x67   : > { %5622 = dma.done.wait (%p6480_p8), %s230_s11, 57344  }
  0x68   : > { %5624 = vsyncadd (%p6480_p8), %s230_s11, 4294909952  ;;  %s238_s27 = sand.u32 1, %s5696_s19   ;;  %s4805_s12 = smul.u32 7, %s5837_s15 }
  0x69   : > { %s239_s13 = scalar_lea.sflag [#allocation5], %s238_s27 }
  0x6a   : > { %s5851_s14 = scalar_lea.vmem [#allocation4], %s4805_s12 }
  0x6b   : > { %5626 = dma.done.wait (%p6480_p8), %s239_s13, 224  }
  0x6c   : > { %5628 = vsyncadd (%p6480_p8), %s239_s13, 4294967072  ;;  %v4859_v0 = vld [vmem:[%s5841_s21 + $0x4] ss:$28 sps:$4 sm:$0xff]   ;;  %v4865_v4 = vld [vmem:[%s5841_s21 + $0x3c] ss:$28 sps:$4 sm:$0xff]   ;;  %v816_v38 = vlaneseq  ;;  %vm3810_vm0 = vcmask 1043456  }
  0x6d   : > { %v4861_v1 = vld [vmem:[%s5841_s21 + $0x384] ss:$28 sps:$4 sm:$0xff]   ;;  %3158 = vmatprep.subr.bf16.mxu1 %v4859_v0  ;;  %v4867_v5 = vld [vmem:[%s5841_s21 + $0x3bc] ss:$28 sps:$4 sm:$0xff]   ;;  %v4871_v8 = vld [vmem:[%s5841_s21 + $0x74] ss:$28 sps:$4 sm:$0xff]  }
  0x6e   : > { %v4863_v2 = vld [vmem:[%s5841_s21] ss:$28 sps:$4 sm:$0xff]   ;;  %3199 = vmatprep.subr.bf16.mxu0 %v4861_v1  ;;  %v4869_v6 = vld [vmem:[%s5841_s21 + $0x38] ss:$28 sps:$4 sm:$0xff]   ;;  %v4875_v10 = vld [vmem:[%s5841_s21 + $0x70] ss:$28 sps:$4 sm:$0xff]  }
  0x6f   : > { %v4864_v3 = vld [vmem:[%s5841_s21 + $0x380] ss:$28 sps:$4 sm:$0xff]   ;;  %3159 = vmatpush1.bf16.msra.mxu1 %v4863_v2  ;;  %v4870_v7 = vld [vmem:[%s5841_s21 + $0x3b8] ss:$28 sps:$4 sm:$0xff]   ;;  %v4876_v11 = vld [vmem:[%s5841_s21 + $0x3f0] ss:$28 sps:$4 sm:$0xff]  }
  0x70   : > { %3200 = vmatpush1.bf16.msra.mxu0 %v4864_v3  ;;  %3160 = vmatprep.subr.bf16.mxu1 %v4865_v4  ;;  %v4873_v9 = vld [vmem:[%s5841_s21 + $0x3f4] ss:$28 sps:$4 sm:$0xff]   ;;  %v4877_v12 = vld [vmem:[%s5841_s21 + $0xac] ss:$28 sps:$4 sm:$0xff]   ;;  %v4883_v16 = vld [vmem:[%s5841_s21 + $0xe4] ss:$28 sps:$4 sm:$0xff]  }
  0x71   : > { %3201 = vmatprep.subr.bf16.mxu0 %v4867_v5  ;;  %v4879_v13 = vld [vmem:[%s5841_s21 + $0x42c] ss:$28 sps:$4 sm:$0xff]   ;;  %v4885_v17 = vld [vmem:[%s5841_s21 + $0x464] ss:$28 sps:$4 sm:$0xff]   ;;  %v4889_v20 = vld [vmem:[%s5841_s21 + $0x11c] ss:$28 sps:$4 sm:$0xff]  }
  0x72   : > { %v4881_v14 = vld [vmem:[%s5841_s21 + $0xa8] ss:$28 sps:$4 sm:$0xff]   ;;  %v4887_v18 = vld [vmem:[%s5841_s21 + $0xe0] ss:$28 sps:$4 sm:$0xff]   ;;  %v4893_v22 = vld [vmem:[%s5841_s21 + $0x118] ss:$28 sps:$4 sm:$0xff]  }
  0x73   : > { %3161 = vmatpush1.bf16.msra.mxu1 %v4869_v6  ;;  %v4882_v15 = vld [vmem:[%s5841_s21 + $0x428] ss:$28 sps:$4 sm:$0xff]   ;;  %v4888_v19 = vld [vmem:[%s5841_s21 + $0x460] ss:$28 sps:$4 sm:$0xff]   ;;  %v4894_v23 = vld [vmem:[%s5841_s21 + $0x498] ss:$28 sps:$4 sm:$0xff]  }
  0x74   : > { %3202 = vmatpush1.bf16.msra.mxu0 %v4870_v7  ;;  %3162 = vmatprep.subr.bf16.mxu1 %v4871_v8  ;;  %v4891_v21 = vld [vmem:[%s5841_s21 + $0x49c] ss:$28 sps:$4 sm:$0xff]   ;;  %v4895_v24 = vld [vmem:[%s5841_s21 + $0x154] ss:$28 sps:$4 sm:$0xff]   ;;  %v4901_v28 = vld [vmem:[%s5841_s21 + $0x18c] ss:$28 sps:$4 sm:$0xff]  }
  0x75   : > { %3203 = vmatprep.subr.bf16.mxu0 %v4873_v9  ;;  %v4897_v25 = vld [vmem:[%s5841_s21 + $0x4d4] ss:$28 sps:$4 sm:$0xff]   ;;  %v4903_v29 = vld [vmem:[%s5841_s21 + $0x50c] ss:$28 sps:$4 sm:$0xff]   ;;  %v4907_v32 = vld [vmem:[%s5841_s21 + $0x1c4] ss:$28 sps:$4 sm:$0xff]  }
  0x76   : > { %v4899_v26 = vld [vmem:[%s5841_s21 + $0x150] ss:$28 sps:$4 sm:$0xff]   ;;  %v4905_v30 = vld [vmem:[%s5841_s21 + $0x188] ss:$28 sps:$4 sm:$0xff]   ;;  %v4911_v34 = vld [vmem:[%s5841_s21 + $0x1c0] ss:$28 sps:$4 sm:$0xff]  }
  0x77   : > { %3163 = vmatpush1.bf16.msra.mxu1 %v4875_v10  ;;  %v4900_v27 = vld [vmem:[%s5841_s21 + $0x4d0] ss:$28 sps:$4 sm:$0xff]   ;;  %v4906_v31 = vld [vmem:[%s5841_s21 + $0x508] ss:$28 sps:$4 sm:$0xff]   ;;  %v4912_v35 = vld [vmem:[%s5841_s21 + $0x540] ss:$28 sps:$4 sm:$0xff]  }
  0x78   : > { %3204 = vmatpush1.bf16.msra.mxu0 %v4876_v11  ;;  %3164 = vmatprep.subr.bf16.mxu1 %v4877_v12  ;;  %v4909_v33 = vld [vmem:[%s5841_s21 + $0x544] ss:$28 sps:$4 sm:$0xff]   ;;  %v5651_v36 = vmov 1983009808   ;;  %v4913_v39 = vld [vmem:[%s5841_s21 + $0x1fc] ss:$28 sps:$4 sm:$0xff]  }
  0x79   : > { %3205 = vmatprep.subr.bf16.mxu0 %v4879_v13  ;;  %v814_v37 = vunpack.c.l.s4 %v5651_v36  ;;  %v4915_v40 = vld [vmem:[%s5841_s21 + $0x57c] ss:$28 sps:$4 sm:$0xff]   ;;  %v5896_v43 = vshrl.u32 %v816_v38, 7  ;;  %v4919_v45 = vld [vmem:[%s5841_s21 + $0x234] ss:$28 sps:$4 sm:$0xff]   ;;  %v296_v52 = vld [vmem:[%s6467_s0] sm:$0xff] }
  0x7a   : > { %v4917_v41 = vld [vmem:[%s5841_s21 + $0x1f8] ss:$28 sps:$4 sm:$0xff]   ;;  %v4923_v47 = vld [vmem:[%s5841_s21 + $0x230] ss:$28 sps:$4 sm:$0xff]   ;;  %v4929_v53 = vld [vmem:[%s5841_s21 + $0x268] ss:$28 sps:$4 sm:$0xff]   ;;  %v812_v55 = vcombine.high %v296_v52, %v296_v52 }
  0x7b   : > { %3165 = vmatpush1.bf16.msra.mxu1 %v4881_v14  ;;  %v815_v42 = vunpack.c.0.s8 %v814_v37  ;;  %v4918_v44 = vld [vmem:[%s5841_s21 + $0x578] ss:$28 sps:$4 sm:$0xff]   ;;  %v4924_v48 = vld [vmem:[%s5841_s21 + $0x5b0] ss:$28 sps:$4 sm:$0xff]   ;;  %v4930_v56 = vld [vmem:[%s5841_s21 + $0x5e8] ss:$28 sps:$4 sm:$0xff]  }
  0x7c   : > { %3206 = vmatpush1.bf16.msra.mxu0 %v4882_v15  ;;  %3166 = vmatprep.subr.bf16.mxu1 %v4883_v16  ;;  %v4921_v46 = vld [vmem:[%s5841_s21 + $0x5b4] ss:$28 sps:$4 sm:$0xff]   ;;  %v4925_v50 = vld [vmem:[%s5841_s21 + $0x26c] ss:$28 sps:$4 sm:$0xff]   ;;  %v4931_v57 = vld [vmem:[%s5841_s21 + $0x2a4] ss:$28 sps:$4 sm:$0xff]  }
  0x7d   : > { %3207 = vmatprep.subr.bf16.mxu0 %v4885_v17  ;;  %v5904_v49 = vsub.s32 %v815_v42, %v5896_v43  ;;  %v4927_v51 = vld [vmem:[%s5841_s21 + $0x5ec] ss:$28 sps:$4 sm:$0xff]   ;;  %v4933_v58 = vld [vmem:[%s5841_s21 + $0x624] ss:$28 sps:$4 sm:$0xff]   ;;  %v4937_v0 = vld [vmem:[%s5841_s21 + $0x2dc] ss:$28 sps:$4 sm:$0xff]  }
  0x7e   : > { %v4935_v61 = vld [vmem:[%s5841_s21 + $0x2a0] ss:$28 sps:$4 sm:$0xff]   ;;  %v4941_v2 = vld [vmem:[%s5841_s21 + $0x2d8] ss:$28 sps:$4 sm:$0xff]   ;;  %v4947_v6 = vld [vmem:[%s5841_s21 + $0x310] ss:$28 sps:$4 sm:$0xff]  }
  0x7f   : > { %3167 = vmatpush1.bf16.msra.mxu1 %v4887_v18  ;;  %v5913_v54 = vrot.slane %v296_v52, %v5904_v49  ;;  %v5923_v60 = vrot.slane %v812_v55, %v5904_v49  ;;  %v4936_v63 = vld [vmem:[%s5841_s21 + $0x620] ss:$28 sps:$4 sm:$0xff]   ;;  %v4942_v3 = vld [vmem:[%s5841_s21 + $0x658] ss:$28 sps:$4 sm:$0xff]   ;;  %v4948_v7 = vld [vmem:[%s5841_s21 + $0x690] ss:$28 sps:$4 sm:$0xff]  }
  0x80   : > { %3208 = vmatpush1.bf16.msra.mxu0 %v4888_v19  ;;  %3168 = vmatprep.subr.bf16.mxu1 %v4889_v20  ;;  %v4939_v1 = vld [vmem:[%s5841_s21 + $0x65c] ss:$28 sps:$4 sm:$0xff]   ;;  %v4943_v4 = vld [vmem:[%s5841_s21 + $0x314] ss:$28 sps:$4 sm:$0xff]   ;;  %v4949_v8 = vld [vmem:[%s5841_s21 + $0x34c] ss:$28 sps:$4 sm:$0xff]  }
  0x81   : > { %3209 = vmatprep.subr.bf16.mxu0 %v4891_v21  ;;  %v5920_v59 = vcombine.high %v5913_v54, %v5913_v54  ;;  %v5929_v62 = vcombine.high %v5923_v60, %v5923_v60  ;;  %v4945_v5 = vld [vmem:[%s5841_s21 + $0x694] ss:$28 sps:$4 sm:$0xff]   ;;  %v4951_v9 = vld [vmem:[%s5841_s21 + $0x6cc] ss:$28 sps:$4 sm:$0xff]   ;;  %v4958_v12 = vld [vmem:[%s5841_s21 + $0x704] ss:$28 sps:$4 sm:$0xff]  }
  0x82   : > { %v4953_v10 = vld [vmem:[%s5841_s21 + $0x348] ss:$28 sps:$4 sm:$0xff]   ;;  %v4956_v14 = vld [vmem:[%s5841_s21 + $0x700] ss:$28 sps:$4 sm:$0xff]   ;;  %v4962_v18 = vld [vmem:[%s5841_s21 + $0x738] ss:$28 sps:$4 sm:$0xff]  }
  0x83   : > { %3169 = vmatpush1.bf16.msra.mxu1 %v4893_v22  ;;  %3190 = vmatprep.mubr.bf16.mxu1 %v5920_v59  ;;  %v4954_v11 = vld [vmem:[%s5841_s21 + $0x6c8] ss:$28 sps:$4 sm:$0xff]   ;;  %v4964_v16 = vld [vmem:[%s5841_s21 + $0x73c] ss:$28 sps:$4 sm:$0xff]   ;;  %v4970_v20 = vld [vmem:[%s5841_s21 + $0x774] ss:$28 sps:$4 sm:$0xff]  }
  0x84   : > { %3210 = vmatpush1.bf16.msra.mxu0 %v4894_v23  ;;  %3170 = vmatprep.subr.bf16.mxu1 %v4895_v24  ;;  %v4961_v13 = vld [vmem:[%s5841_s21 + $0xc] ss:$28 sps:$4 sm:$0xff]   ;;  %v4967_v17 = vld [vmem:[%s5841_s21 + $0x44] ss:$28 sps:$4 sm:$0xff]   ;;  %v4973_v21 = vld [vmem:[%s5841_s21 + $0x7c] ss:$28 sps:$4 sm:$0xff]  }
  0x85   : > { %3211 = vmatprep.subr.bf16.mxu0 %v4897_v25  ;;  %3231 = vmatprep.mubr.bf16.mxu0 %v5929_v62  ;;  %v4959_v15 = vld [vmem:[%s5841_s21 + $0x8] ss:$28 sps:$4 sm:$0xff]   ;;  %v4965_v19 = vld [vmem:[%s5841_s21 + $0x40] ss:$28 sps:$4 sm:$0xff]   ;;  %v4968_v22 = vld [vmem:[%s5841_s21 + $0x770] ss:$28 sps:$4 sm:$0xff]  }
  0x86   : > { %v4971_v23 = vld [vmem:[%s5841_s21 + $0x78] ss:$28 sps:$4 sm:$0xff]   ;;  %v4976_v24 = vld [vmem:[%s5841_s21 + $0x7ac] ss:$28 sps:$4 sm:$0xff]   ;;  %v5015_v55 = vld [vmem:[%s5841_s21 + $0x204] ss:$28 sps:$4 sm:$0xff]  }
  0x87   : > { %3171 = vmatpush1.bf16.msra.mxu1 %v4899_v26  ;;  %v4979_v25 = vld [vmem:[%s5841_s21 + $0xb4] ss:$28 sps:$4 sm:$0xff]   ;;  %v4974_v26 = vld [vmem:[%s5841_s21 + $0x7a8] ss:$28 sps:$4 sm:$0xff]   ;;  %v4997_v37 = vld [vmem:[%s5841_s21 + $0x15c] ss:$28 sps:$4 sm:$0xff]  }
  0x88   : > { %3212 = vmatpush1.bf16.msra.mxu0 %v4900_v27  ;;  %3172 = vmatprep.subr.bf16.mxu1 %v4901_v28  ;;  %v4977_v27 = vld [vmem:[%s5841_s21 + $0xb0] ss:$28 sps:$4 sm:$0xff]   ;;  %v4982_v28 = vld [vmem:[%s5841_s21 + $0x7e4] ss:$28 sps:$4 sm:$0xff]   ;;  %s251_s30 = scalar_lea.vmem [#allocation6], %s4805_s12  ;;  %s289_s18 = smul.u32 7, %s5696_s19 }
  0x89   : > { %3213 = vmatprep.subr.bf16.mxu0 %v4903_v29  ;;  %v4985_v29 = vld [vmem:[%s5841_s21 + $0xec] ss:$28 sps:$4 sm:$0xff]   ;;  %v4994_v36 = vld [vmem:[%s5841_s21 + $0x854] ss:$28 sps:$4 sm:$0xff]  }
  0x8a   : > { %v5977_v38 = vld [vmem:[%s6467_s0 + $0x8] sm:$0xff]  ;;  %p290_p13 = scmp.lt.s32.totalorder %s289_s18, 48 }
  0x8b   : > { %3173 = vmatpush1.bf16.msra.mxu1 %v4905_v30  ;;  %v4980_v30 = vld [vmem:[%s5841_s21 + $0x7e0] ss:$28 sps:$4 sm:$0xff]   ;;  %v5007_v52 = vld [vmem:[%s5841_s21 + $0x1c8] ss:$28 sps:$4 sm:$0xff]  }
  0x8c   : > { %3214 = vmatpush1.bf16.msra.mxu0 %v4906_v31  ;;  %3174 = vmatprep.subr.bf16.mxu1 %v4907_v32  ;;  %v4983_v31 = vld [vmem:[%s5841_s21 + $0xe8] ss:$28 sps:$4 sm:$0xff]   ;;  %v4988_v32 = vld [vmem:[%s5841_s21 + $0x81c] ss:$28 sps:$4 sm:$0xff]   ;;  %s6486_s18 = smov (!%p290_p13, %s289_s18), 48 }
  0x8d   : > { %3215 = vmatprep.subr.bf16.mxu0 %v4909_v33  ;;  %v4991_v33 = vld [vmem:[%s5841_s21 + $0x124] ss:$28 sps:$4 sm:$0xff]   ;;  %s4222_s19 = sshll.u32 %s6486_s18, 1 }
  0x8e   : > { %s6433_s6 = scalar_lea.vmem %s6471_s4, %s4222_s19 }
  0x8f   : > { %3175 = vmatpush1.bf16.msra.mxu1 %v4911_v34  ;;  %v4986_v34 = vld [vmem:[%s5841_s21 + $0x818] ss:$28 sps:$4 sm:$0xff]  }
  0x90   : > { %3216 = vmatpush1.bf16.msra.mxu0 %v4912_v35  ;;  %3176 = vmatprep.subr.bf16.mxu1 %v4913_v39  ;;  %v4989_v35 = vld [vmem:[%s5841_s21 + $0x120] ss:$28 sps:$4 sm:$0xff]   ;;  %v5981_v39 = vrot.slane %v5977_v38, %v5904_v49 }
  0x91   : > { %3217 = vmatprep.subr.bf16.mxu0 %v4915_v40  ;;  %v4992_v40 = vld [vmem:[%s5841_s21 + $0x850] ss:$28 sps:$4 sm:$0xff]  }
  0x92   : > { %v5987_v42 = vcombine.high %v5981_v39, %v5981_v39 }
  0x93   : > { %3177 = vmatpush1.bf16.msra.mxu1 %v4917_v41  ;;  %v4995_v41 = vld [vmem:[%s5841_s21 + $0x158] ss:$28 sps:$4 sm:$0xff]  }
  0x94   : > { %3218 = vmatpush1.bf16.msra.mxu0 %v4918_v44  ;;  %3178 = vmatprep.subr.bf16.mxu1 %v4919_v45  ;;  %v5000_v44 = vld [vmem:[%s5841_s21 + $0x88c] ss:$28 sps:$4 sm:$0xff]   ;;  %v5003_v45 = vld [vmem:[%s5841_s21 + $0x194] ss:$28 sps:$4 sm:$0xff]  }
  0x95   : > { %3219 = vmatprep.subr.bf16.mxu0 %v4921_v46  ;;  %v4998_v46 = vld [vmem:[%s5841_s21 + $0x888] ss:$28 sps:$4 sm:$0xff]  }
  0x97   : > { %3179 = vmatpush1.bf16.msra.mxu1 %v4923_v47  ;;  %v5001_v47 = vld [vmem:[%s5841_s21 + $0x190] ss:$28 sps:$4 sm:$0xff]  }
  0x98   : > { %3220 = vmatpush1.bf16.msra.mxu0 %v4924_v48  ;;  %3180 = vmatprep.subr.bf16.mxu1 %v4925_v50  ;;  %v5006_v48 = vld [vmem:[%s5841_s21 + $0x8c4] ss:$28 sps:$4 sm:$0xff]   ;;  %v5009_v50 = vld [vmem:[%s5841_s21 + $0x1cc] ss:$28 sps:$4 sm:$0xff]  }
  0x99   : > { %3221 = vmatprep.subr.bf16.mxu0 %v4927_v51  ;;  %v5004_v51 = vld [vmem:[%s5841_s21 + $0x8c0] ss:$28 sps:$4 sm:$0xff]  }
  0x9b   : > { %3181 = vmatpush1.bf16.msra.mxu1 %v4929_v53  ;;  %v5012_v53 = vld [vmem:[%s5841_s21 + $0x8fc] ss:$28 sps:$4 sm:$0xff]  }
  0x9c   : > { %3222 = vmatpush1.bf16.msra.mxu0 %v4930_v56  ;;  %3182 = vmatprep.subr.bf16.mxu1 %v4931_v57  ;;  %v5010_v56 = vld [vmem:[%s5841_s21 + $0x8f8] ss:$28 sps:$4 sm:$0xff]   ;;  %v5013_v57 = vld [vmem:[%s5841_s21 + $0x200] ss:$28 sps:$4 sm:$0xff]  }
  0x9d   : > { %3223 = vmatprep.subr.bf16.mxu0 %v4933_v58  ;;  %v5018_v58 = vld [vmem:[%s5841_s21 + $0x934] ss:$28 sps:$4 sm:$0xff]  }
  0x9f   : > { %3183 = vmatpush1.bf16.msra.mxu1 %v4935_v61  ;;  %v5021_v61 = vld [vmem:[%s5841_s21 + $0x23c] ss:$28 sps:$4 sm:$0xff]  }
  0xa0   : > { %3224 = vmatpush1.bf16.msra.mxu0 %v4936_v63  ;;  %3184 = vmatprep.subr.bf16.mxu1 %v4937_v0  ;;  %v5016_v63 = vld [vmem:[%s5841_s21 + $0x930] ss:$28 sps:$4 sm:$0xff]   ;;  %v5019_v0 = vld [vmem:[%s5841_s21 + $0x238] ss:$28 sps:$4 sm:$0xff]  }
  0xa1   : > { %3225 = vmatprep.subr.bf16.mxu0 %v4939_v1  ;;  %v5024_v1 = vld [vmem:[%s5841_s21 + $0x96c] ss:$28 sps:$4 sm:$0xff]  }
  0xa3   : > { %3185 = vmatpush1.bf16.msra.mxu1 %v4941_v2  ;;  %v5027_v2 = vld [vmem:[%s5841_s21 + $0x274] ss:$28 sps:$4 sm:$0xff]  }
  0xa4   : > { %3226 = vmatpush1.bf16.msra.mxu0 %v4942_v3  ;;  %3186 = vmatprep.subr.bf16.mxu1 %v4943_v4  ;;  %v5022_v3 = vld [vmem:[%s5841_s21 + $0x968] ss:$28 sps:$4 sm:$0xff]   ;;  %v5025_v4 = vld [vmem:[%s5841_s21 + $0x270] ss:$28 sps:$4 sm:$0xff]  }
  0xa5   : > { %3227 = vmatprep.subr.bf16.mxu0 %v4945_v5  ;;  %v5030_v5 = vld [vmem:[%s5841_s21 + $0x9a4] ss:$28 sps:$4 sm:$0xff]  }
  0xa7   : > { %3187 = vmatpush1.bf16.msra.mxu1 %v4947_v6  ;;  %v5033_v6 = vld [vmem:[%s5841_s21 + $0x2ac] ss:$28 sps:$4 sm:$0xff]  }
  0xa8   : > { %3228 = vmatpush1.bf16.msra.mxu0 %v4948_v7  ;;  %3188 = vmatprep.subr.bf16.mxu1 %v4949_v8  ;;  %v5028_v7 = vld [vmem:[%s5841_s21 + $0x9a0] ss:$28 sps:$4 sm:$0xff]   ;;  %v5031_v8 = vld [vmem:[%s5841_s21 + $0x2a8] ss:$28 sps:$4 sm:$0xff]  }
  0xa9   : > { %3229 = vmatprep.subr.bf16.mxu0 %v4951_v9  ;;  %v5036_v9 = vld [vmem:[%s5841_s21 + $0x9dc] ss:$28 sps:$4 sm:$0xff]  }
  0xab   : > { %3189 = vmatpush1.bf16.msra.mxu1 %v4953_v10  ;;  %v5039_v10 = vld [vmem:[%s5841_s21 + $0x2e4] ss:$28 sps:$4 sm:$0xff]  }
  0xac   : > { %3230 = vmatpush1.bf16.msra.mxu0 %v4954_v11  ;;  %3322 = vmatprep.subr.bf16.mxu1 %v4961_v13  ;;  %v5034_v11 = vld [vmem:[%s5841_s21 + $0x9d8] ss:$28 sps:$4 sm:$0xff]  }
  0xad   : > { %3240 = vmatprep.subr.bf16.mxu0 %v4958_v12  ;;  %v5037_v12 = vld [vmem:[%s5841_s21 + $0x2e0] ss:$28 sps:$4 sm:$0xff]   ;;  %v5042_v13 = vld [vmem:[%s5841_s21 + $0xa14] ss:$28 sps:$4 sm:$0xff]  }
  0xae   : > { %3191 = vmatmul.mubr.bf16.vlgmr.msra.gmra.mrb[0].mxu1 %v5913_v54 }
  0xaf   : > { %3232 = vmatmul.mubr.bf16.vlgmr.msra.gmra.mrb[0].mxu0 %v5923_v60  ;;  %3323 = vmatpush1.bf16.msra.mxu1 %v4959_v15  ;;  %v5040_v15 = vld [vmem:[%s5841_s21 + $0xa10] ss:$28 sps:$4 sm:$0xff]  }
  0xb0   : > { %3241 = vmatpush1.bf16.msra.mxu0 %v4956_v14  ;;  %3324 = vmatprep.subr.bf16.mxu1 %v4967_v17  ;;  %v5045_v14 = vld [vmem:[%s5841_s21 + $0x31c] ss:$28 sps:$4 sm:$0xff]   ;;  %v5048_v17 = vld [vmem:[%s5841_s21 + $0xa4c] ss:$28 sps:$4 sm:$0xff]  }
  0xb1   : > { %3242 = vmatprep.subr.bf16.mxu0 %v4964_v16  ;;  %3354 = vmatprep.mubr.bf16.mxu1 %v5920_v59  ;;  %v5043_v16 = vld [vmem:[%s5841_s21 + $0x318] ss:$28 sps:$4 sm:$0xff]  }
  0xb2   : > { %3272 = vmatprep.mubr.bf16.mxu0 %v5987_v42 }
  0xb3   : > { %3325 = vmatpush1.bf16.msra.mxu1 %v4965_v19  ;;  %v829_v19 = vcombine.high %v5977_v38, %v5977_v38  ;;  %v5070_v38 = vld [vmem:[%s5841_s21 + $0xb28] ss:$28 sps:$4 sm:$0xff]  }
  0xb4   : > { %3243 = vmatpush1.bf16.msra.mxu0 %v4962_v18  ;;  %3326 = vmatprep.subr.bf16.mxu1 %v4973_v21  ;;  %v5051_v18 = vld [vmem:[%s5841_s21 + $0x354] ss:$28 sps:$4 sm:$0xff]  }
  0xb5   : > { %3244 = vmatprep.subr.bf16.mxu0 %v4970_v20  ;;  %v5046_v20 = vld [vmem:[%s5841_s21 + $0xa48] ss:$28 sps:$4 sm:$0xff]   ;;  %v5049_v21 = vld [vmem:[%s5841_s21 + $0x350] ss:$28 sps:$4 sm:$0xff]  }
  0xb7   : > { %3327 = vmatpush1.bf16.msra.mxu1 %v4971_v23  ;;  %v5057_v23 = vld [vmem:[%s5841_s21 + $0x38c] ss:$28 sps:$4 sm:$0xff]  }
  0xb8   : > { %3245 = vmatpush1.bf16.msra.mxu0 %v4968_v22  ;;  %3328 = vmatprep.subr.bf16.mxu1 %v4979_v25  ;;  %v5054_v22 = vld [vmem:[%s5841_s21 + $0xa84] ss:$28 sps:$4 sm:$0xff]  }
  0xb9   : > { %3246 = vmatprep.subr.bf16.mxu0 %v4976_v24  ;;  %v6031_v24 = vrot.slane %v829_v19, %v5904_v49  ;;  %v5052_v25 = vld [vmem:[%s5841_s21 + $0xa80] ss:$28 sps:$4 sm:$0xff]   ;;  %v5127_v19 = vld [vmem:[%s5841_s21 + $0x628] ss:$28 sps:$4 sm:$0xff]  }
  0xbb   : > { %3329 = vmatpush1.bf16.msra.mxu1 %v4977_v27  ;;  %v5060_v27 = vld [vmem:[%s5841_s21 + $0xabc] ss:$28 sps:$4 sm:$0xff]  }
  0xbc   : > { %3247 = vmatpush1.bf16.msra.mxu0 %v4974_v26  ;;  %3330 = vmatprep.subr.bf16.mxu1 %v4985_v29  ;;  %v5055_v26 = vld [vmem:[%s5841_s21 + $0x388] ss:$28 sps:$4 sm:$0xff]   ;;  %v6039_v29 = vcombine.high %v6031_v24, %v6031_v24 }
  0xbd   : > { %3248 = vmatprep.subr.bf16.mxu0 %v4982_v28  ;;  %v5063_v28 = vld [vmem:[%s5841_s21 + $0x3c4] ss:$28 sps:$4 sm:$0xff]  }
  0xbf   : > { %3331 = vmatpush1.bf16.msra.mxu1 %v4983_v31  ;;  %v5061_v31 = vld [vmem:[%s5841_s21 + $0x3c0] ss:$28 sps:$4 sm:$0xff]  }
  0xc0   : > { %3249 = vmatpush1.bf16.msra.mxu0 %v4980_v30  ;;  %3332 = vmatprep.subr.bf16.mxu1 %v4991_v33  ;;  %v5058_v30 = vld [vmem:[%s5841_s21 + $0xab8] ss:$28 sps:$4 sm:$0xff]  }
  0xc1   : > { %3250 = vmatprep.subr.bf16.mxu0 %v4988_v32  ;;  %v5066_v32 = vld [vmem:[%s5841_s21 + $0xaf4] ss:$28 sps:$4 sm:$0xff]   ;;  %v5069_v33 = vld [vmem:[%s5841_s21 + $0x3fc] ss:$28 sps:$4 sm:$0xff]  }
  0xc3   : > { %3333 = vmatpush1.bf16.msra.mxu1 %v4989_v35  ;;  %v5067_v35 = vld [vmem:[%s5841_s21 + $0x3f8] ss:$28 sps:$4 sm:$0xff]  }
  0xc4   : > { %3251 = vmatpush1.bf16.msra.mxu0 %v4986_v34  ;;  %3334 = vmatprep.subr.bf16.mxu1 %v4997_v37  ;;  %v5064_v34 = vld [vmem:[%s5841_s21 + $0xaf0] ss:$28 sps:$4 sm:$0xff]  }
  0xc5   : > { %3252 = vmatprep.subr.bf16.mxu0 %v4994_v36  ;;  %v5072_v36 = vld [vmem:[%s5841_s21 + $0xb2c] ss:$28 sps:$4 sm:$0xff]   ;;  %v5075_v37 = vld [vmem:[%s5841_s21 + $0x434] ss:$28 sps:$4 sm:$0xff]  }
  0xc7   : > { %3335 = vmatpush1.bf16.msra.mxu1 %v4995_v41  ;;  %v5078_v41 = vld [vmem:[%s5841_s21 + $0xb64] ss:$28 sps:$4 sm:$0xff]  }
  0xc8   : > { %3253 = vmatpush1.bf16.msra.mxu0 %v4992_v40  ;;  %3336 = vmatprep.subr.bf16.mxu1 %v5003_v45  ;;  %v5073_v40 = vld [vmem:[%s5841_s21 + $0x430] ss:$28 sps:$4 sm:$0xff]   ;;  %v5076_v45 = vld [vmem:[%s5841_s21 + $0xb60] ss:$28 sps:$4 sm:$0xff]  }
  0xc9   : > { %3254 = vmatprep.subr.bf16.mxu0 %v5000_v44  ;;  %v5081_v44 = vld [vmem:[%s5841_s21 + $0x46c] ss:$28 sps:$4 sm:$0xff]  }
  0xcb   : > { %3337 = vmatpush1.bf16.msra.mxu1 %v5001_v47  ;;  %v5084_v47 = vld [vmem:[%s5841_s21 + $0xb9c] ss:$28 sps:$4 sm:$0xff]  }
  0xcc   : > { %3255 = vmatpush1.bf16.msra.mxu0 %v4998_v46  ;;  %3338 = vmatprep.subr.bf16.mxu1 %v5009_v50  ;;  %v5079_v46 = vld [vmem:[%s5841_s21 + $0x468] ss:$28 sps:$4 sm:$0xff]   ;;  %v5082_v50 = vld [vmem:[%s5841_s21 + $0xb98] ss:$28 sps:$4 sm:$0xff]  }
  0xcd   : > { %3256 = vmatprep.subr.bf16.mxu0 %v5006_v48  ;;  %v5087_v48 = vld [vmem:[%s5841_s21 + $0x4a4] ss:$28 sps:$4 sm:$0xff]  }
  0xcf   : > { %3339 = vmatpush1.bf16.msra.mxu1 %v5007_v52  ;;  %v5090_v52 = vld [vmem:[%s5841_s21 + $0xbd4] ss:$28 sps:$4 sm:$0xff]  }
  0xd0   : > { %3257 = vmatpush1.bf16.msra.mxu0 %v5004_v51  ;;  %3340 = vmatprep.subr.bf16.mxu1 %v5015_v55  ;;  %v5085_v51 = vld [vmem:[%s5841_s21 + $0x4a0] ss:$28 sps:$4 sm:$0xff]   ;;  %v5088_v55 = vld [vmem:[%s5841_s21 + $0xbd0] ss:$28 sps:$4 sm:$0xff]  }
  0xd1   : > { %3258 = vmatprep.subr.bf16.mxu0 %v5012_v53  ;;  %v5093_v53 = vld [vmem:[%s5841_s21 + $0x4dc] ss:$28 sps:$4 sm:$0xff]  }
  0xd3   : > { %3341 = vmatpush1.bf16.msra.mxu1 %v5013_v57  ;;  %v5096_v57 = vld [vmem:[%s5841_s21 + $0xc0c] ss:$28 sps:$4 sm:$0xff]  }
  0xd4   : > { %3259 = vmatpush1.bf16.msra.mxu0 %v5010_v56  ;;  %3342 = vmatprep.subr.bf16.mxu1 %v5021_v61  ;;  %v5091_v56 = vld [vmem:[%s5841_s21 + $0x4d8] ss:$28 sps:$4 sm:$0xff]   ;;  %v5094_v61 = vld [vmem:[%s5841_s21 + $0xc08] ss:$28 sps:$4 sm:$0xff]  }
  0xd5   : > { %3260 = vmatprep.subr.bf16.mxu0 %v5018_v58  ;;  %v5099_v58 = vld [vmem:[%s5841_s21 + $0x514] ss:$28 sps:$4 sm:$0xff]  }
  0xd7   : > { %3343 = vmatpush1.bf16.msra.mxu1 %v5019_v0  ;;  %v5102_v0 = vld [vmem:[%s5841_s21 + $0xc44] ss:$28 sps:$4 sm:$0xff]  }
  0xd8   : > { %3261 = vmatpush1.bf16.msra.mxu0 %v5016_v63  ;;  %3344 = vmatprep.subr.bf16.mxu1 %v5027_v2  ;;  %v5097_v63 = vld [vmem:[%s5841_s21 + $0x510] ss:$28 sps:$4 sm:$0xff]   ;;  %v5100_v2 = vld [vmem:[%s5841_s21 + $0xc40] ss:$28 sps:$4 sm:$0xff]  }
  0xd9   : > { %3262 = vmatprep.subr.bf16.mxu0 %v5024_v1  ;;  %v5105_v1 = vld [vmem:[%s5841_s21 + $0x54c] ss:$28 sps:$4 sm:$0xff]  }
  0xdb   : > { %3345 = vmatpush1.bf16.msra.mxu1 %v5025_v4  ;;  %v5108_v4 = vld [vmem:[%s5841_s21 + $0xc7c] ss:$28 sps:$4 sm:$0xff]  }
  0xdc   : > { %3263 = vmatpush1.bf16.msra.mxu0 %v5022_v3  ;;  %3346 = vmatprep.subr.bf16.mxu1 %v5033_v6  ;;  %v5103_v3 = vld [vmem:[%s5841_s21 + $0x548] ss:$28 sps:$4 sm:$0xff]   ;;  %v5106_v6 = vld [vmem:[%s5841_s21 + $0xc78] ss:$28 sps:$4 sm:$0xff]  }
  0xdd   : > { %3264 = vmatprep.subr.bf16.mxu0 %v5030_v5  ;;  %v5111_v5 = vld [vmem:[%s5841_s21 + $0x584] ss:$28 sps:$4 sm:$0xff]  }
  0xdf   : > { %3347 = vmatpush1.bf16.msra.mxu1 %v5031_v8  ;;  %v5114_v8 = vld [vmem:[%s5841_s21 + $0xcb4] ss:$28 sps:$4 sm:$0xff]  }
  0xe0   : > { %3265 = vmatpush1.bf16.msra.mxu0 %v5028_v7  ;;  %3348 = vmatprep.subr.bf16.mxu1 %v5039_v10  ;;  %v5109_v7 = vld [vmem:[%s5841_s21 + $0x580] ss:$28 sps:$4 sm:$0xff]   ;;  %v5112_v10 = vld [vmem:[%s5841_s21 + $0xcb0] ss:$28 sps:$4 sm:$0xff]  }
  0xe1   : > { %3266 = vmatprep.subr.bf16.mxu0 %v5036_v9  ;;  %v5117_v9 = vld [vmem:[%s5841_s21 + $0x5bc] ss:$28 sps:$4 sm:$0xff]  }
  0xe3   : > { %3349 = vmatpush1.bf16.msra.mxu1 %v5037_v12  ;;  %v5120_v12 = vld [vmem:[%s5841_s21 + $0xcec] ss:$28 sps:$4 sm:$0xff]  }
  0xe4   : > { %3267 = vmatpush1.bf16.msra.mxu0 %v5034_v11  ;;  %3350 = vmatprep.subr.bf16.mxu1 %v5045_v14  ;;  %v5115_v11 = vld [vmem:[%s5841_s21 + $0x5b8] ss:$28 sps:$4 sm:$0xff]   ;;  %v5118_v14 = vld [vmem:[%s5841_s21 + $0xce8] ss:$28 sps:$4 sm:$0xff]  }
  0xe5   : > { %3268 = vmatprep.subr.bf16.mxu0 %v5042_v13  ;;  %v5123_v13 = vld [vmem:[%s5841_s21 + $0x5f4] ss:$28 sps:$4 sm:$0xff]  }
  0xe7   : > { %3351 = vmatpush1.bf16.msra.mxu1 %v5043_v16  ;;  %v5126_v16 = vld [vmem:[%s5841_s21 + $0xd24] ss:$28 sps:$4 sm:$0xff]  }
  0xe8   : > { %3269 = vmatpush1.bf16.msra.mxu0 %v5040_v15  ;;  %3352 = vmatprep.subr.bf16.mxu1 %v5051_v18  ;;  %v5121_v15 = vld [vmem:[%s5841_s21 + $0x5f0] ss:$28 sps:$4 sm:$0xff]   ;;  %v5124_v18 = vld [vmem:[%s5841_s21 + $0xd20] ss:$28 sps:$4 sm:$0xff]  }
  0xe9   : > { %3270 = vmatprep.subr.bf16.mxu0 %v5048_v17  ;;  %v5129_v17 = vld [vmem:[%s5841_s21 + $0x62c] ss:$28 sps:$4 sm:$0xff]  }
  0xeb   : > { %3353 = vmatpush1.bf16.msra.mxu1 %v5049_v21  ;;  %v5135_v21 = vld [vmem:[%s5841_s21 + $0x664] ss:$28 sps:$4 sm:$0xff]  }
  0xec   : > { %3271 = vmatpush1.bf16.msra.mxu0 %v5046_v20  ;;  %3363 = vmatprep.subr.bf16.mxu1 %v5057_v23  ;;  %v5132_v20 = vld [vmem:[%s5841_s21 + $0xd5c] ss:$28 sps:$4 sm:$0xff]  }
  0xed   : > { %3281 = vmatprep.subr.bf16.mxu0 %v5054_v22  ;;  %v5130_v22 = vld [vmem:[%s5841_s21 + $0xd58] ss:$28 sps:$4 sm:$0xff]   ;;  %v5133_v23 = vld [vmem:[%s5841_s21 + $0x660] ss:$28 sps:$4 sm:$0xff]  }
  0xee   : > { %3355 = vmatmul.mubr.bf16.vlgmr.msra.gmra.mrb[4].mxu1 %v5913_v54 }
  0xef   : > { %3273 = vmatmul.mubr.bf16.vlgmr.msra.gmra.mrb[0].mxu0 %v5981_v39  ;;  %3364 = vmatpush1.bf16.msra.mxu1 %v5055_v26  ;;  %v5141_v26 = vld [vmem:[%s5841_s21 + $0x69c] ss:$28 sps:$4 sm:$0xff]  }
  0xf0   : > { %3282 = vmatpush1.bf16.msra.mxu0 %v5052_v25  ;;  %3365 = vmatprep.subr.bf16.mxu1 %v5063_v28  ;;  %v5138_v25 = vld [vmem:[%s5841_s21 + $0xd94] ss:$28 sps:$4 sm:$0xff]  }
  0xf1   : > { %3283 = vmatprep.subr.bf16.mxu0 %v5060_v27  ;;  %3313 = vmatprep.mubr.bf16.mxu0 %v6039_v29  ;;  %v5136_v27 = vld [vmem:[%s5841_s21 + $0xd90] ss:$28 sps:$4 sm:$0xff]   ;;  %v5139_v28 = vld [vmem:[%s5841_s21 + $0x698] ss:$28 sps:$4 sm:$0xff]  }
  0xf2   : > { %3395 = vmatprep.mubr.bf16.mxu1 %v5929_v62 }
  0xf3   : > { %3366 = vmatpush1.bf16.msra.mxu1 %v5061_v31  ;;  %v5147_v31 = vld [vmem:[%s5841_s21 + $0x6d4] ss:$28 sps:$4 sm:$0xff]  }
  0xf4   : > { %3284 = vmatpush1.bf16.msra.mxu0 %v5058_v30  ;;  %3367 = vmatprep.subr.bf16.mxu1 %v5069_v33  ;;  %v5144_v30 = vld [vmem:[%s5841_s21 + $0xdcc] ss:$28 sps:$4 sm:$0xff]  }
  0xf5   : > { %3285 = vmatprep.subr.bf16.mxu0 %v5066_v32  ;;  %v5142_v32 = vld [vmem:[%s5841_s21 + $0xdc8] ss:$28 sps:$4 sm:$0xff]   ;;  %v5145_v33 = vld [vmem:[%s5841_s21 + $0x6d0] ss:$28 sps:$4 sm:$0xff]  }
  0xf7   : > { %3368 = vmatpush1.bf16.msra.mxu1 %v5067_v35  ;;  %v5154_v35 = vld [vmem:[%s5841_s21 + $0x14] ss:$28 sps:$4 sm:$0xff]  }
  0xf8   : > { %3286 = vmatpush1.bf16.msra.mxu0 %v5064_v34  ;;  %3369 = vmatprep.subr.bf16.mxu1 %v5075_v37  ;;  %v5151_v34 = vld [vmem:[%s5841_s21 + $0x70c] ss:$28 sps:$4 sm:$0xff]  }
  0xf9   : > { %3287 = vmatprep.subr.bf16.mxu0 %v5072_v36  ;;  %v5149_v36 = vld [vmem:[%s5841_s21 + $0x708] ss:$28 sps:$4 sm:$0xff]   ;;  %v5152_v37 = vld [vmem:[%s5841_s21 + $0x10] ss:$28 sps:$4 sm:$0xff]  }
  0xfb   : > { %3370 = vmatpush1.bf16.msra.mxu1 %v5073_v40  ;;  %v5160_v40 = vld [vmem:[%s5841_s21 + $0x4c] ss:$28 sps:$4 sm:$0xff]  }
  0xfc   : > { %3288 = vmatpush1.bf16.msra.mxu0 %v5070_v38  ;;  %3371 = vmatprep.subr.bf16.mxu1 %v5081_v44  ;;  %v5157_v38 = vld [vmem:[%s5841_s21 + $0x744] ss:$28 sps:$4 sm:$0xff]  }
  0xfd   : > { %3289 = vmatprep.subr.bf16.mxu0 %v5078_v41  ;;  %v5155_v41 = vld [vmem:[%s5841_s21 + $0x740] ss:$28 sps:$4 sm:$0xff]   ;;  %v5158_v44 = vld [vmem:[%s5841_s21 + $0x48] ss:$28 sps:$4 sm:$0xff]  }
  0xff   : > { %3372 = vmatpush1.bf16.msra.mxu1 %v5079_v46  ;;  %v5166_v46 = vld [vmem:[%s5841_s21 + $0x84] ss:$28 sps:$4 sm:$0xff]  }
 0x100   : > { %3290 = vmatpush1.bf16.msra.mxu0 %v5076_v45  ;;  %3373 = vmatprep.subr.bf16.mxu1 %v5087_v48  ;;  %v5163_v45 = vld [vmem:[%s5841_s21 + $0x77c] ss:$28 sps:$4 sm:$0xff]  }
 0x101   : > { %3291 = vmatprep.subr.bf16.mxu0 %v5084_v47  ;;  %v5161_v47 = vld [vmem:[%s5841_s21 + $0x778] ss:$28 sps:$4 sm:$0xff]   ;;  %v5164_v48 = vld [vmem:[%s5841_s21 + $0x80] ss:$28 sps:$4 sm:$0xff]  }
 0x103   : > { %3374 = vmatpush1.bf16.msra.mxu1 %v5085_v51  ;;  %v5172_v51 = vld [vmem:[%s5841_s21 + $0xbc] ss:$28 sps:$4 sm:$0xff]  }
 0x104   : > { %3292 = vmatpush1.bf16.msra.mxu0 %v5082_v50  ;;  %3375 = vmatprep.subr.bf16.mxu1 %v5093_v53  ;;  %v5169_v50 = vld [vmem:[%s5841_s21 + $0x7b4] ss:$28 sps:$4 sm:$0xff]  }
 0x105   : > { %3293 = vmatprep.subr.bf16.mxu0 %v5090_v52  ;;  %v5167_v52 = vld [vmem:[%s5841_s21 + $0x7b0] ss:$28 sps:$4 sm:$0xff]   ;;  %v5170_v53 = vld [vmem:[%s5841_s21 + $0xb8] ss:$28 sps:$4 sm:$0xff]  }
 0x107   : > { %3376 = vmatpush1.bf16.msra.mxu1 %v5091_v56  ;;  %v5178_v56 = vld [vmem:[%s5841_s21 + $0xf4] ss:$28 sps:$4 sm:$0xff]  }
 0x108   : > { %3294 = vmatpush1.bf16.msra.mxu0 %v5088_v55  ;;  %3377 = vmatprep.subr.bf16.mxu1 %v5099_v58  ;;  %v5175_v55 = vld [vmem:[%s5841_s21 + $0x7ec] ss:$28 sps:$4 sm:$0xff]  }
 0x109   : > { %3295 = vmatprep.subr.bf16.mxu0 %v5096_v57  ;;  %v5173_v57 = vld [vmem:[%s5841_s21 + $0x7e8] ss:$28 sps:$4 sm:$0xff]   ;;  %v5176_v58 = vld [vmem:[%s5841_s21 + $0xf0] ss:$28 sps:$4 sm:$0xff]  }
 0x10b   : > { %3378 = vmatpush1.bf16.msra.mxu1 %v5097_v63  ;;  %v5184_v63 = vld [vmem:[%s5841_s21 + $0x12c] ss:$28 sps:$4 sm:$0xff]  }
 0x10c   : > { %3296 = vmatpush1.bf16.msra.mxu0 %v5094_v61  ;;  %3379 = vmatprep.subr.bf16.mxu1 %v5105_v1  ;;  %v5181_v61 = vld [vmem:[%s5841_s21 + $0x824] ss:$28 sps:$4 sm:$0xff]  }
 0x10d   : > { %3297 = vmatprep.subr.bf16.mxu0 %v5102_v0  ;;  %v5179_v0 = vld [vmem:[%s5841_s21 + $0x820] ss:$28 sps:$4 sm:$0xff]   ;;  %v5182_v1 = vld [vmem:[%s5841_s21 + $0x128] ss:$28 sps:$4 sm:$0xff]  }
 0x10f   : > { %3380 = vmatpush1.bf16.msra.mxu1 %v5103_v3  ;;  %v5190_v3 = vld [vmem:[%s5841_s21 + $0x164] ss:$28 sps:$4 sm:$0xff]  }
 0x110   : > { %3298 = vmatpush1.bf16.msra.mxu0 %v5100_v2  ;;  %3381 = vmatprep.subr.bf16.mxu1 %v5111_v5  ;;  %v5187_v2 = vld [vmem:[%s5841_s21 + $0x85c] ss:$28 sps:$4 sm:$0xff]  }
 0x111   : > { %3299 = vmatprep.subr.bf16.mxu0 %v5108_v4  ;;  %v5185_v4 = vld [vmem:[%s5841_s21 + $0x858] ss:$28 sps:$4 sm:$0xff]   ;;  %v5188_v5 = vld [vmem:[%s5841_s21 + $0x160] ss:$28 sps:$4 sm:$0xff]  }
 0x113   : > { %3382 = vmatpush1.bf16.msra.mxu1 %v5109_v7  ;;  %v5196_v7 = vld [vmem:[%s5841_s21 + $0x19c] ss:$28 sps:$4 sm:$0xff]  }
 0x114   : > { %3300 = vmatpush1.bf16.msra.mxu0 %v5106_v6  ;;  %3383 = vmatprep.subr.bf16.mxu1 %v5117_v9  ;;  %v5193_v6 = vld [vmem:[%s5841_s21 + $0x894] ss:$28 sps:$4 sm:$0xff]  }
 0x115   : > { %3301 = vmatprep.subr.bf16.mxu0 %v5114_v8  ;;  %v5191_v8 = vld [vmem:[%s5841_s21 + $0x890] ss:$28 sps:$4 sm:$0xff]   ;;  %v5194_v9 = vld [vmem:[%s5841_s21 + $0x198] ss:$28 sps:$4 sm:$0xff]  }
 0x117   : > { %3384 = vmatpush1.bf16.msra.mxu1 %v5115_v11  ;;  %v5202_v11 = vld [vmem:[%s5841_s21 + $0x1d4] ss:$28 sps:$4 sm:$0xff]  }
 0x118   : > { %3302 = vmatpush1.bf16.msra.mxu0 %v5112_v10  ;;  %3385 = vmatprep.subr.bf16.mxu1 %v5123_v13  ;;  %v5199_v10 = vld [vmem:[%s5841_s21 + $0x8cc] ss:$28 sps:$4 sm:$0xff]  }
 0x119   : > { %3303 = vmatprep.subr.bf16.mxu0 %v5120_v12  ;;  %v5197_v12 = vld [vmem:[%s5841_s21 + $0x8c8] ss:$28 sps:$4 sm:$0xff]   ;;  %v5200_v13 = vld [vmem:[%s5841_s21 + $0x1d0] ss:$28 sps:$4 sm:$0xff]  }
 0x11b   : > { %3386 = vmatpush1.bf16.msra.mxu1 %v5121_v15  ;;  %v5208_v15 = vld [vmem:[%s5841_s21 + $0x20c] ss:$28 sps:$4 sm:$0xff]  }
 0x11c   : > { %3304 = vmatpush1.bf16.msra.mxu0 %v5118_v14  ;;  %3387 = vmatprep.subr.bf16.mxu1 %v5129_v17  ;;  %v5205_v14 = vld [vmem:[%s5841_s21 + $0x904] ss:$28 sps:$4 sm:$0xff]  }
 0x11d   : > { %3305 = vmatprep.subr.bf16.mxu0 %v5126_v16  ;;  %v5203_v16 = vld [vmem:[%s5841_s21 + $0x900] ss:$28 sps:$4 sm:$0xff]   ;;  %v5206_v17 = vld [vmem:[%s5841_s21 + $0x208] ss:$28 sps:$4 sm:$0xff]  }
 0x11f   : > { %3388 = vmatpush1.bf16.msra.mxu1 %v5127_v19  ;;  %v5214_v19 = vld [vmem:[%s5841_s21 + $0x244] ss:$28 sps:$4 sm:$0xff]  }
 0x120   : > { %3306 = vmatpush1.bf16.msra.mxu0 %v5124_v18  ;;  %3389 = vmatprep.subr.bf16.mxu1 %v5135_v21  ;;  %v5211_v18 = vld [vmem:[%s5841_s21 + $0x93c] ss:$28 sps:$4 sm:$0xff]  }
 0x121   : > { %3307 = vmatprep.subr.bf16.mxu0 %v5132_v20  ;;  %v5209_v20 = vld [vmem:[%s5841_s21 + $0x938] ss:$28 sps:$4 sm:$0xff]   ;;  %v5212_v21 = vld [vmem:[%s5841_s21 + $0x240] ss:$28 sps:$4 sm:$0xff]  }
 0x123   : > { %3390 = vmatpush1.bf16.msra.mxu1 %v5133_v23  ;;  %v5220_v23 = vld [vmem:[%s5841_s21 + $0x27c] ss:$28 sps:$4 sm:$0xff]  }
 0x124   : > { %3308 = vmatpush1.bf16.msra.mxu0 %v5130_v22  ;;  %3391 = vmatprep.subr.bf16.mxu1 %v5141_v26  ;;  %v5217_v22 = vld [vmem:[%s5841_s21 + $0x974] ss:$28 sps:$4 sm:$0xff]  }
 0x125   : > { %3309 = vmatprep.subr.bf16.mxu0 %v5138_v25  ;;  %v5215_v25 = vld [vmem:[%s5841_s21 + $0x970] ss:$28 sps:$4 sm:$0xff]   ;;  %v5218_v26 = vld [vmem:[%s5841_s21 + $0x278] ss:$28 sps:$4 sm:$0xff]  }
 0x127   : > { %3392 = vmatpush1.bf16.msra.mxu1 %v5139_v28  ;;  %v5226_v28 = vld [vmem:[%s5841_s21 + $0x2b4] ss:$28 sps:$4 sm:$0xff]  }
 0x128   : > { %3310 = vmatpush1.bf16.msra.mxu0 %v5136_v27  ;;  %3393 = vmatprep.subr.bf16.mxu1 %v5147_v31  ;;  %v5223_v27 = vld [vmem:[%s5841_s21 + $0x9ac] ss:$28 sps:$4 sm:$0xff]  }
 0x129   : > { %3311 = vmatprep.subr.bf16.mxu0 %v5144_v30  ;;  %v5221_v30 = vld [vmem:[%s5841_s21 + $0x9a8] ss:$28 sps:$4 sm:$0xff]   ;;  %v5224_v31 = vld [vmem:[%s5841_s21 + $0x2b0] ss:$28 sps:$4 sm:$0xff]  }
 0x12b   : > { %3394 = vmatpush1.bf16.msra.mxu1 %v5145_v33  ;;  %v5232_v33 = vld [vmem:[%s5841_s21 + $0x2ec] ss:$28 sps:$4 sm:$0xff]  }
 0x12c   : > { %3312 = vmatpush1.bf16.msra.mxu0 %v5142_v32  ;;  %3404 = vmatprep.subr.bf16.mxu1 %v5151_v34  ;;  %v5229_v32 = vld [vmem:[%s5841_s21 + $0x9e4] ss:$28 sps:$4 sm:$0xff]  }
 0x12d   : > { %3486 = vmatprep.subr.bf16.mxu0 %v5154_v35  ;;  %v5227_v34 = vld [vmem:[%s5841_s21 + $0x9e0] ss:$28 sps:$4 sm:$0xff]   ;;  %v5230_v35 = vld [vmem:[%s5841_s21 + $0x2e8] ss:$28 sps:$4 sm:$0xff]  }
 0x12e   : > { %3396 = vmatmul.mubr.bf16.vlgmr.msra.gmra.mrb[4].mxu1 %v5923_v60 }
 0x12f   : > { %3314 = vmatmul.mubr.bf16.vlgmr.msra.gmra.mrb[0].mxu0 %v6031_v24  ;;  %3405 = vmatpush1.bf16.msra.mxu1 %v5149_v36  ;;  %v5235_v36 = vld [vmem:[%s5841_s21 + $0xa1c] ss:$28 sps:$4 sm:$0xff]  }
 0x130   : > { %3487 = vmatpush1.bf16.msra.mxu0 %v5152_v37  ;;  %3406 = vmatprep.subr.bf16.mxu1 %v5157_v38  ;;  %v5238_v37 = vld [vmem:[%s5841_s21 + $0x324] ss:$28 sps:$4 sm:$0xff]   ;;  %v5233_v38 = vld [vmem:[%s5841_s21 + $0xa18] ss:$28 sps:$4 sm:$0xff]  }
 0x131   : > { %3488 = vmatprep.subr.bf16.mxu0 %v5160_v40  ;;  %3436 = vmatprep.mubr.bf16.mxu1 %v5987_v42  ;;  %v5236_v40 = vld [vmem:[%s5841_s21 + $0x320] ss:$28 sps:$4 sm:$0xff]  }
 0x132   : > { %3518 = vmatprep.mubr.bf16.mxu0 %v5920_v59 }
 0x133   : > { %3407 = vmatpush1.bf16.msra.mxu1 %v5155_v41  ;;  %v5241_v41 = vld [vmem:[%s5841_s21 + $0xa54] ss:$28 sps:$4 sm:$0xff]  }
 0x134   : > { %3489 = vmatpush1.bf16.msra.mxu0 %v5158_v44  ;;  %3408 = vmatprep.subr.bf16.mxu1 %v5163_v45  ;;  %v5244_v44 = vld [vmem:[%s5841_s21 + $0x35c] ss:$28 sps:$4 sm:$0xff]   ;;  %v5239_v45 = vld [vmem:[%s5841_s21 + $0xa50] ss:$28 sps:$4 sm:$0xff]  }
 0x135   : > { %3490 = vmatprep.subr.bf16.mxu0 %v5166_v46  ;;  %v5242_v46 = vld [vmem:[%s5841_s21 + $0x358] ss:$28 sps:$4 sm:$0xff]  }
 0x137   : > { %3409 = vmatpush1.bf16.msra.mxu1 %v5161_v47  ;;  %v5247_v47 = vld [vmem:[%s5841_s21 + $0xa8c] ss:$28 sps:$4 sm:$0xff]  }
 0x138   : > { %3491 = vmatpush1.bf16.msra.mxu0 %v5164_v48  ;;  %3410 = vmatprep.subr.bf16.mxu1 %v5169_v50  ;;  %v5250_v48 = vld [vmem:[%s5841_s21 + $0x394] ss:$28 sps:$4 sm:$0xff]   ;;  %v5245_v50 = vld [vmem:[%s5841_s21 + $0xa88] ss:$28 sps:$4 sm:$0xff]  }
 0x139   : > { %3492 = vmatprep.subr.bf16.mxu0 %v5172_v51  ;;  %v5248_v51 = vld [vmem:[%s5841_s21 + $0x390] ss:$28 sps:$4 sm:$0xff]  }
 0x13b   : > { %3411 = vmatpush1.bf16.msra.mxu1 %v5167_v52  ;;  %v5253_v52 = vld [vmem:[%s5841_s21 + $0xac4] ss:$28 sps:$4 sm:$0xff]  }
 0x13c   : > { %3493 = vmatpush1.bf16.msra.mxu0 %v5170_v53  ;;  %3412 = vmatprep.subr.bf16.mxu1 %v5175_v55  ;;  %v5256_v53 = vld [vmem:[%s5841_s21 + $0x3cc] ss:$28 sps:$4 sm:$0xff]   ;;  %v5251_v55 = vld [vmem:[%s5841_s21 + $0xac0] ss:$28 sps:$4 sm:$0xff]  }
 0x13d   : > { %3494 = vmatprep.subr.bf16.mxu0 %v5178_v56  ;;  %v5254_v56 = vld [vmem:[%s5841_s21 + $0x3c8] ss:$28 sps:$4 sm:$0xff]  }
 0x13f   : > { %3413 = vmatpush1.bf16.msra.mxu1 %v5173_v57  ;;  %v5259_v57 = vld [vmem:[%s5841_s21 + $0xafc] ss:$28 sps:$4 sm:$0xff]  }
 0x140   : > { %3495 = vmatpush1.bf16.msra.mxu0 %v5176_v58  ;;  %3414 = vmatprep.subr.bf16.mxu1 %v5181_v61  ;;  %v5262_v58 = vld [vmem:[%s5841_s21 + $0x404] ss:$28 sps:$4 sm:$0xff]   ;;  %v5257_v61 = vld [vmem:[%s5841_s21 + $0xaf8] ss:$28 sps:$4 sm:$0xff]  }
 0x141   : > { %3496 = vmatprep.subr.bf16.mxu0 %v5184_v63  ;;  %v5260_v63 = vld [vmem:[%s5841_s21 + $0x400] ss:$28 sps:$4 sm:$0xff]  }
 0x143   : > { %3415 = vmatpush1.bf16.msra.mxu1 %v5179_v0  ;;  %v5265_v0 = vld [vmem:[%s5841_s21 + $0xb34] ss:$28 sps:$4 sm:$0xff]  }
 0x144   : > { %3497 = vmatpush1.bf16.msra.mxu0 %v5182_v1  ;;  %3416 = vmatprep.subr.bf16.mxu1 %v5187_v2  ;;  %v5268_v1 = vld [vmem:[%s5841_s21 + $0x43c] ss:$28 sps:$4 sm:$0xff]   ;;  %v5263_v2 = vld [vmem:[%s5841_s21 + $0xb30] ss:$28 sps:$4 sm:$0xff]  }
 0x145   : > { %3498 = vmatprep.subr.bf16.mxu0 %v5190_v3  ;;  %v5266_v3 = vld [vmem:[%s5841_s21 + $0x438] ss:$28 sps:$4 sm:$0xff]  }
 0x147   : > { %3417 = vmatpush1.bf16.msra.mxu1 %v5185_v4  ;;  %v5271_v4 = vld [vmem:[%s5841_s21 + $0xb6c] ss:$28 sps:$4 sm:$0xff]  }
 0x148   : > { %3499 = vmatpush1.bf16.msra.mxu0 %v5188_v5  ;;  %3418 = vmatprep.subr.bf16.mxu1 %v5193_v6  ;;  %v5274_v5 = vld [vmem:[%s5841_s21 + $0x474] ss:$28 sps:$4 sm:$0xff]   ;;  %v5269_v6 = vld [vmem:[%s5841_s21 + $0xb68] ss:$28 sps:$4 sm:$0xff]  }
 0x149   : > { %3500 = vmatprep.subr.bf16.mxu0 %v5196_v7  ;;  %v5272_v7 = vld [vmem:[%s5841_s21 + $0x470] ss:$28 sps:$4 sm:$0xff]  }
 0x14b   : > { %3419 = vmatpush1.bf16.msra.mxu1 %v5191_v8  ;;  %v5277_v8 = vld [vmem:[%s5841_s21 + $0xba4] ss:$28 sps:$4 sm:$0xff]  }
 0x14c   : > { %3501 = vmatpush1.bf16.msra.mxu0 %v5194_v9  ;;  %3420 = vmatprep.subr.bf16.mxu1 %v5199_v10  ;;  %v5280_v9 = vld [vmem:[%s5841_s21 + $0x4ac] ss:$28 sps:$4 sm:$0xff]   ;;  %v5275_v10 = vld [vmem:[%s5841_s21 + $0xba0] ss:$28 sps:$4 sm:$0xff]  }
 0x14d   : > { %3502 = vmatprep.subr.bf16.mxu0 %v5202_v11  ;;  %v5278_v11 = vld [vmem:[%s5841_s21 + $0x4a8] ss:$28 sps:$4 sm:$0xff]  }
 0x14f   : > { %3421 = vmatpush1.bf16.msra.mxu1 %v5197_v12  ;;  %v5283_v12 = vld [vmem:[%s5841_s21 + $0xbdc] ss:$28 sps:$4 sm:$0xff]  }
 0x150   : > { %3503 = vmatpush1.bf16.msra.mxu0 %v5200_v13  ;;  %3422 = vmatprep.subr.bf16.mxu1 %v5205_v14  ;;  %v5286_v13 = vld [vmem:[%s5841_s21 + $0x4e4] ss:$28 sps:$4 sm:$0xff]  }
 0x151   : > { %3504 = vmatprep.subr.bf16.mxu0 %v5208_v15  ;;  %v5281_v15 = vld [vmem:[%s5841_s21 + $0xbd8] ss:$28 sps:$4 sm:$0xff]  }
 0x153   : > { %3423 = vmatpush1.bf16.msra.mxu1 %v5203_v16  ;;  %v5284_v16 = vld [vmem:[%s5841_s21 + $0x4e0] ss:$28 sps:$4 sm:$0xff]  }
 0x154   : > { %3505 = vmatpush1.bf16.msra.mxu0 %v5206_v17  ;;  %3424 = vmatprep.subr.bf16.mxu1 %v5211_v18 }
 0x155   : > { %3506 = vmatprep.subr.bf16.mxu0 %v5214_v19  ;;  %v5289_v19 = vld [vmem:[%s5841_s21 + $0xc14] ss:$28 sps:$4 sm:$0xff]  }
 0x157   : > { %3425 = vmatpush1.bf16.msra.mxu1 %v5209_v20 }
 0x158   : > { %3507 = vmatpush1.bf16.msra.mxu0 %v5212_v21  ;;  %3426 = vmatprep.subr.bf16.mxu1 %v5217_v22  ;;  %v5292_v21 = vld [vmem:[%s5841_s21 + $0x51c] ss:$28 sps:$4 sm:$0xff]   ;;  %v5287_v22 = vld [vmem:[%s5841_s21 + $0xc10] ss:$28 sps:$4 sm:$0xff]  }
 0x159   : > { %3508 = vmatprep.subr.bf16.mxu0 %v5220_v23  ;;  %v5290_v23 = vld [vmem:[%s5841_s21 + $0x518] ss:$28 sps:$4 sm:$0xff]  }
 0x15b   : > { %3427 = vmatpush1.bf16.msra.mxu1 %v5215_v25  ;;  %v5295_v25 = vld [vmem:[%s5841_s21 + $0xc4c] ss:$28 sps:$4 sm:$0xff]  }
 0x15c   : > { %3509 = vmatpush1.bf16.msra.mxu0 %v5218_v26  ;;  %3428 = vmatprep.subr.bf16.mxu1 %v5223_v27  ;;  %v5298_v26 = vld [vmem:[%s5841_s21 + $0x554] ss:$28 sps:$4 sm:$0xff]   ;;  %v5293_v27 = vld [vmem:[%s5841_s21 + $0xc48] ss:$28 sps:$4 sm:$0xff]  }
 0x15d   : > { %3510 = vmatprep.subr.bf16.mxu0 %v5226_v28  ;;  %v5296_v28 = vld [vmem:[%s5841_s21 + $0x550] ss:$28 sps:$4 sm:$0xff]  }
 0x15f   : > { %3429 = vmatpush1.bf16.msra.mxu1 %v5221_v30  ;;  %v5301_v30 = vld [vmem:[%s5841_s21 + $0xc84] ss:$28 sps:$4 sm:$0xff]  }
 0x160   : > { %3511 = vmatpush1.bf16.msra.mxu0 %v5224_v31  ;;  %3430 = vmatprep.subr.bf16.mxu1 %v5229_v32  ;;  %v5304_v31 = vld [vmem:[%s5841_s21 + $0x58c] ss:$28 sps:$4 sm:$0xff]   ;;  %v5299_v32 = vld [vmem:[%s5841_s21 + $0xc80] ss:$28 sps:$4 sm:$0xff]  }
 0x161   : > { %3512 = vmatprep.subr.bf16.mxu0 %v5232_v33  ;;  %v5302_v33 = vld [vmem:[%s5841_s21 + $0x588] ss:$28 sps:$4 sm:$0xff]  }
 0x163   : > { %3431 = vmatpush1.bf16.msra.mxu1 %v5227_v34  ;;  %v5307_v34 = vld [vmem:[%s5841_s21 + $0xcbc] ss:$28 sps:$4 sm:$0xff]  }
 0x164   : > { %3513 = vmatpush1.bf16.msra.mxu0 %v5230_v35  ;;  %3432 = vmatprep.subr.bf16.mxu1 %v5235_v36  ;;  %v5310_v35 = vld [vmem:[%s5841_s21 + $0x5c4] ss:$28 sps:$4 sm:$0xff]   ;;  %v5305_v36 = vld [vmem:[%s5841_s21 + $0xcb8] ss:$28 sps:$4 sm:$0xff]  }
 0x165   : > { %3514 = vmatprep.subr.bf16.mxu0 %v5238_v37  ;;  %v5308_v37 = vld [vmem:[%s5841_s21 + $0x5c0] ss:$28 sps:$4 sm:$0xff]  }
 0x167   : > { %3433 = vmatpush1.bf16.msra.mxu1 %v5233_v38  ;;  %v5313_v38 = vld [vmem:[%s5841_s21 + $0xcf4] ss:$28 sps:$4 sm:$0xff]  }
 0x168   : > { %3515 = vmatpush1.bf16.msra.mxu0 %v5236_v40  ;;  %3434 = vmatprep.subr.bf16.mxu1 %v5241_v41  ;;  %v5316_v40 = vld [vmem:[%s5841_s21 + $0x5fc] ss:$28 sps:$4 sm:$0xff]   ;;  %v5311_v41 = vld [vmem:[%s5841_s21 + $0xcf0] ss:$28 sps:$4 sm:$0xff]  }
 0x169   : > { %3516 = vmatprep.subr.bf16.mxu0 %v5244_v44  ;;  %v5314_v44 = vld [vmem:[%s5841_s21 + $0x5f8] ss:$28 sps:$4 sm:$0xff]  }
 0x16b   : > { %3435 = vmatpush1.bf16.msra.mxu1 %v5239_v45  ;;  %v5319_v45 = vld [vmem:[%s5841_s21 + $0xd2c] ss:$28 sps:$4 sm:$0xff]  }
 0x16c   : > { %3517 = vmatpush1.bf16.msra.mxu0 %v5242_v46  ;;  %3445 = vmatprep.subr.bf16.mxu1 %v5247_v47  ;;  %v5322_v46 = vld [vmem:[%s5841_s21 + $0x634] ss:$28 sps:$4 sm:$0xff]   ;;  %v5317_v47 = vld [vmem:[%s5841_s21 + $0xd28] ss:$28 sps:$4 sm:$0xff]  }
 0x16d   : > { %3527 = vmatprep.subr.bf16.mxu0 %v5250_v48  ;;  %v5320_v48 = vld [vmem:[%s5841_s21 + $0x630] ss:$28 sps:$4 sm:$0xff]  }
 0x16e   : > { %3437 = vmatmul.mubr.bf16.vlgmr.msra.gmra.mrb[4].mxu1 %v5981_v39 }
 0x16f   : > { %3519 = vmatmul.mubr.bf16.vlgmr.msra.gmra.mrb[4].mxu0 %v5913_v54  ;;  %3446 = vmatpush1.bf16.msra.mxu1 %v5245_v50  ;;  %v5325_v50 = vld [vmem:[%s5841_s21 + $0xd64] ss:$28 sps:$4 sm:$0xff]  }
 0x170   : > { %3528 = vmatpush1.bf16.msra.mxu0 %v5248_v51  ;;  %3447 = vmatprep.subr.bf16.mxu1 %v5253_v52  ;;  %v5328_v51 = vld [vmem:[%s5841_s21 + $0x66c] ss:$28 sps:$4 sm:$0xff]   ;;  %v5323_v52 = vld [vmem:[%s5841_s21 + $0xd60] ss:$28 sps:$4 sm:$0xff]  }
 0x171   : > { %3529 = vmatprep.subr.bf16.mxu0 %v5256_v53  ;;  %3477 = vmatprep.mubr.bf16.mxu1 %v6039_v29  ;;  %v5326_v53 = vld [vmem:[%s5841_s21 + $0x668] ss:$28 sps:$4 sm:$0xff]  }
 0x172   : > { %3559 = vmatprep.mubr.bf16.mxu0 %v5929_v62 }
 0x173   : > { %3448 = vmatpush1.bf16.msra.mxu1 %v5251_v55  ;;  %v5331_v55 = vld [vmem:[%s5841_s21 + $0xd9c] ss:$28 sps:$4 sm:$0xff]  }
 0x174   : > { %3530 = vmatpush1.bf16.msra.mxu0 %v5254_v56  ;;  %3449 = vmatprep.subr.bf16.mxu1 %v5259_v57  ;;  %v5334_v56 = vld [vmem:[%s5841_s21 + $0x6a4] ss:$28 sps:$4 sm:$0xff]   ;;  %v5329_v57 = vld [vmem:[%s5841_s21 + $0xd98] ss:$28 sps:$4 sm:$0xff]  }
 0x175   : > { %3531 = vmatprep.subr.bf16.mxu0 %v5262_v58  ;;  %v5332_v58 = vld [vmem:[%s5841_s21 + $0x6a0] ss:$28 sps:$4 sm:$0xff]  }
 0x177   : > { %3450 = vmatpush1.bf16.msra.mxu1 %v5257_v61  ;;  %v5337_v61 = vld [vmem:[%s5841_s21 + $0xdd4] ss:$28 sps:$4 sm:$0xff]  }
 0x178   : > { %3532 = vmatpush1.bf16.msra.mxu0 %v5260_v63  ;;  %3451 = vmatprep.subr.bf16.mxu1 %v5265_v0  ;;  %v5340_v63 = vld [vmem:[%s5841_s21 + $0x6dc] ss:$28 sps:$4 sm:$0xff]   ;;  %v5335_v0 = vld [vmem:[%s5841_s21 + $0xdd0] ss:$28 sps:$4 sm:$0xff]  }
 0x179   : > { %3533 = vmatprep.subr.bf16.mxu0 %v5268_v1  ;;  %v5338_v1 = vld [vmem:[%s5841_s21 + $0x6d8] ss:$28 sps:$4 sm:$0xff]  }
 0x17b   : > { %3452 = vmatpush1.bf16.msra.mxu1 %v5263_v2  ;;  %v5343_v2 = vld [vmem:[%s5841_s21 + $0x714] ss:$28 sps:$4 sm:$0xff]  }
 0x17c   : > { %3534 = vmatpush1.bf16.msra.mxu0 %v5266_v3  ;;  %3453 = vmatprep.subr.bf16.mxu1 %v5271_v4  ;;  %v5344_v3 = vld [vmem:[%s5841_s21 + $0x1d8] ss:$28 sps:$4 sm:$0xff]   ;;  %v5341_v4 = vld [vmem:[%s5841_s21 + $0x710] ss:$28 sps:$4 sm:$0xff]  }
 0x17d   : > { %3535 = vmatprep.subr.bf16.mxu0 %v5274_v5  ;;  %v5345_v5 = vld [vmem:[%s5841_s21 + $0x18] ss:$28 sps:$4 sm:$0xff]  }
 0x17f   : > { %3454 = vmatpush1.bf16.msra.mxu1 %v5269_v6  ;;  %v5348_v6 = vld [vmem:[%s5841_s21 + $0x74c] ss:$28 sps:$4 sm:$0xff]  }
 0x180   : > { %3536 = vmatpush1.bf16.msra.mxu0 %v5272_v7  ;;  %3455 = vmatprep.subr.bf16.mxu1 %v5277_v8  ;;  %v5349_v7 = vld [vmem:[%s5841_s21 + $0x210] ss:$28 sps:$4 sm:$0xff]   ;;  %v5346_v8 = vld [vmem:[%s5841_s21 + $0x748] ss:$28 sps:$4 sm:$0xff]  }
 0x181   : > { %3537 = vmatprep.subr.bf16.mxu0 %v5280_v9  ;;  %v6201_v14 = vpop.f32.mrb[0].mxu1  ;;  %v5350_v9 = vld [vmem:[%s5841_s21 + $0x50] ss:$28 sps:$4 sm:$0xff]  }
 0x182   : > { %v6205_v17 = vpop.f32.mrb[1].mxu1 }
 0x183   : > { %v3196_v18 = vpop.f32.mrb[2].mxu1  ;;  %3456 = vmatpush1.bf16.msra.mxu1 %v5275_v10  ;;  %v5353_v10 = vld [vmem:[%s5841_s21 + $0x784] ss:$28 sps:$4 sm:$0xff]  }
 0x184   : > { %3538 = vmatpush1.bf16.msra.mxu0 %v5278_v11  ;;  %v3197_v20 = vpop.f32.mrb[3].mxu1  ;;  %3457 = vmatprep.subr.bf16.mxu1 %v5283_v12  ;;  %v5354_v11 = vld [vmem:[%s5841_s21 + $0x248] ss:$28 sps:$4 sm:$0xff]   ;;  %v5351_v12 = vld [vmem:[%s5841_s21 + $0x780] ss:$28 sps:$4 sm:$0xff]  }
 0x185   : > { %3539 = vmatprep.subr.bf16.mxu0 %v5286_v13  ;;  %v5355_v13 = vld [vmem:[%s5841_s21 + $0x88] ss:$28 sps:$4 sm:$0xff]   ;;  %v5356_v18 = vld [vmem:[%s5841_s21 + $0x7b8] ss:$28 sps:$4 sm:$0xff]  }
 0x186   : > { %v5364_v20 = vld [vmem:[%s5841_s21 + $0x2b8] ss:$28 sps:$4 sm:$0xff]  }
 0x187   : > { %3458 = vmatpush1.bf16.msra.mxu1 %v5281_v15  ;;  %v5358_v15 = vld [vmem:[%s5841_s21 + $0x7bc] ss:$28 sps:$4 sm:$0xff]  }
 0x188   : > { %3540 = vmatpush1.bf16.msra.mxu0 %v5284_v16  ;;  %3459 = vmatprep.subr.bf16.mxu1 %v5289_v19  ;;  %v5359_v16 = vld [vmem:[%s5841_s21 + $0x280] ss:$28 sps:$4 sm:$0xff]   ;;  %v5363_v19 = vld [vmem:[%s5841_s21 + $0x7f4] ss:$28 sps:$4 sm:$0xff]  }
 0x189   : > { %3541 = vmatprep.subr.bf16.mxu0 %v5292_v21  ;;  %v5361_v21 = vld [vmem:[%s5841_s21 + $0x7f0] ss:$28 sps:$4 sm:$0xff]  }
 0x18b   : > { %3460 = vmatpush1.bf16.msra.mxu1 %v5287_v22  ;;  %v5365_v22 = vld [vmem:[%s5841_s21 + $0xf8] ss:$28 sps:$4 sm:$0xff]  }
 0x18c   : > { %3542 = vmatpush1.bf16.msra.mxu0 %v5290_v23  ;;  %3461 = vmatprep.subr.bf16.mxu1 %v5295_v25  ;;  %v5368_v23 = vld [vmem:[%s5841_s21 + $0x82c] ss:$28 sps:$4 sm:$0xff]  }
 0x18d   : > { %3543 = vmatprep.subr.bf16.mxu0 %v5298_v26  ;;  %v5369_v25 = vld [vmem:[%s5841_s21 + $0x2f0] ss:$28 sps:$4 sm:$0xff]   ;;  %v5366_v26 = vld [vmem:[%s5841_s21 + $0x828] ss:$28 sps:$4 sm:$0xff]  }
 0x18f   : > { %3462 = vmatpush1.bf16.msra.mxu1 %v5293_v27  ;;  %v5370_v27 = vld [vmem:[%s5841_s21 + $0x130] ss:$28 sps:$4 sm:$0xff]  }
 0x190   : > { %3544 = vmatpush1.bf16.msra.mxu0 %v5296_v28  ;;  %3463 = vmatprep.subr.bf16.mxu1 %v5301_v30  ;;  %v5373_v28 = vld [vmem:[%s5841_s21 + $0x864] ss:$28 sps:$4 sm:$0xff]  }
 0x191   : > { %3545 = vmatprep.subr.bf16.mxu0 %v5304_v31  ;;  %v5374_v30 = vld [vmem:[%s5841_s21 + $0x328] ss:$28 sps:$4 sm:$0xff]   ;;  %v5371_v31 = vld [vmem:[%s5841_s21 + $0x860] ss:$28 sps:$4 sm:$0xff]  }
 0x193   : > { %3464 = vmatpush1.bf16.msra.mxu1 %v5299_v32  ;;  %v5375_v32 = vld [vmem:[%s5841_s21 + $0x168] ss:$28 sps:$4 sm:$0xff]  }
 0x194   : > { %3546 = vmatpush1.bf16.msra.mxu0 %v5302_v33  ;;  %3465 = vmatprep.subr.bf16.mxu1 %v5307_v34  ;;  %v5378_v33 = vld [vmem:[%s5841_s21 + $0x89c] ss:$28 sps:$4 sm:$0xff]  }
 0x195   : > { %3547 = vmatprep.subr.bf16.mxu0 %v5310_v35  ;;  %v5379_v34 = vld [vmem:[%s5841_s21 + $0x360] ss:$28 sps:$4 sm:$0xff]   ;;  %v5376_v35 = vld [vmem:[%s5841_s21 + $0x898] ss:$28 sps:$4 sm:$0xff]  }
 0x197   : > { %3466 = vmatpush1.bf16.msra.mxu1 %v5305_v36  ;;  %v5380_v36 = vld [vmem:[%s5841_s21 + $0x1a0] ss:$28 sps:$4 sm:$0xff]  }
 0x198   : > { %3548 = vmatpush1.bf16.msra.mxu0 %v5308_v37  ;;  %3467 = vmatprep.subr.bf16.mxu1 %v5313_v38  ;;  %v5383_v37 = vld [vmem:[%s5841_s21 + $0x8d4] ss:$28 sps:$4 sm:$0xff]  }
 0x199   : > { %3549 = vmatprep.subr.bf16.mxu0 %v5316_v40  ;;  %v5384_v38 = vld [vmem:[%s5841_s21 + $0x558] ss:$28 sps:$4 sm:$0xff]   ;;  %v5381_v40 = vld [vmem:[%s5841_s21 + $0x8d0] ss:$28 sps:$4 sm:$0xff]  }
 0x19b   : > { %3468 = vmatpush1.bf16.msra.mxu1 %v5311_v41  ;;  %v5385_v41 = vld [vmem:[%s5841_s21 + $0x398] ss:$28 sps:$4 sm:$0xff]  }
 0x19c   : > { %3550 = vmatpush1.bf16.msra.mxu0 %v5314_v44  ;;  %3469 = vmatprep.subr.bf16.mxu1 %v5319_v45  ;;  %v5388_v44 = vld [vmem:[%s5841_s21 + $0x90c] ss:$28 sps:$4 sm:$0xff]  }
 0x19d   : > { %3551 = vmatprep.subr.bf16.mxu0 %v5322_v46  ;;  %v5389_v45 = vld [vmem:[%s5841_s21 + $0x590] ss:$28 sps:$4 sm:$0xff]   ;;  %v5386_v46 = vld [vmem:[%s5841_s21 + $0x908] ss:$28 sps:$4 sm:$0xff]  }
 0x19f   : > { %3470 = vmatpush1.bf16.msra.mxu1 %v5317_v47  ;;  %v5390_v47 = vld [vmem:[%s5841_s21 + $0x3d0] ss:$28 sps:$4 sm:$0xff]  }
 0x1a0   : > { %3552 = vmatpush1.bf16.msra.mxu0 %v5320_v48  ;;  %3471 = vmatprep.subr.bf16.mxu1 %v5325_v50  ;;  %v5393_v48 = vld [vmem:[%s5841_s21 + $0x944] ss:$28 sps:$4 sm:$0xff]  }
 0x1a1   : > { %3553 = vmatprep.subr.bf16.mxu0 %v5328_v51  ;;  %v5394_v50 = vld [vmem:[%s5841_s21 + $0x5c8] ss:$28 sps:$4 sm:$0xff]   ;;  %v5391_v51 = vld [vmem:[%s5841_s21 + $0x940] ss:$28 sps:$4 sm:$0xff]  }
 0x1a3   : > { %3472 = vmatpush1.bf16.msra.mxu1 %v5323_v52  ;;  %v5398_v52 = vld [vmem:[%s5841_s21 + $0x97c] ss:$28 sps:$4 sm:$0xff]  }
 0x1a4   : > { %3554 = vmatpush1.bf16.msra.mxu0 %v5326_v53  ;;  %3473 = vmatprep.subr.bf16.mxu1 %v5331_v55  ;;  %v5399_v53 = vld [vmem:[%s5841_s21 + $0x600] ss:$28 sps:$4 sm:$0xff]   ;;  %v5396_v55 = vld [vmem:[%s5841_s21 + $0x978] ss:$28 sps:$4 sm:$0xff]  }
 0x1a5   : > { %3555 = vmatprep.subr.bf16.mxu0 %v5334_v56  ;;  %v5400_v56 = vld [vmem:[%s5841_s21 + $0x440] ss:$28 sps:$4 sm:$0xff]  }
 0x1a7   : > { %3474 = vmatpush1.bf16.msra.mxu1 %v5329_v57  ;;  %v5404_v57 = vld [vmem:[%s5841_s21 + $0x638] ss:$28 sps:$4 sm:$0xff]  }
 0x1a8   : > { %3556 = vmatpush1.bf16.msra.mxu0 %v5332_v58  ;;  %3475 = vmatprep.subr.bf16.mxu1 %v5337_v61  ;;  %v5401_v58 = vld [vmem:[%s5841_s21 + $0x9b0] ss:$28 sps:$4 sm:$0xff]   ;;  %v5405_v61 = vld [vmem:[%s5841_s21 + $0x478] ss:$28 sps:$4 sm:$0xff]  }
 0x1a9   : > { %3557 = vmatprep.subr.bf16.mxu0 %v5340_v63  ;;  %v5408_v63 = vld [vmem:[%s5841_s21 + $0x9ec] ss:$28 sps:$4 sm:$0xff]  }
 0x1ab   : > { %3476 = vmatpush1.bf16.msra.mxu1 %v5335_v0  ;;  %v5409_v0 = vld [vmem:[%s5841_s21 + $0x670] ss:$28 sps:$4 sm:$0xff]  }
 0x1ac   : > { %3558 = vmatpush1.bf16.msra.mxu0 %v5338_v1  ;;  %4679 = vmatprep.subr.bf16.mxu1 %v5344_v3  ;;  %v5406_v1 = vld [vmem:[%s5841_s21 + $0x9e8] ss:$28 sps:$4 sm:$0xff]  }
 0x1ad   : > { %3568 = vmatprep.subr.bf16.mxu0 %v5343_v2  ;;  %v5410_v2 = vld [vmem:[%s5841_s21 + $0x4b0] ss:$28 sps:$4 sm:$0xff]   ;;  %v5413_v3 = vld [vmem:[%s5841_s21 + $0xa24] ss:$28 sps:$4 sm:$0xff]  }
 0x1ae   : > { %3478 = vmatmul.mubr.bf16.vlgmr.msra.gmra.mrb[4].mxu1 %v6031_v24 }
 0x1af   : > { %3560 = vmatmul.mubr.bf16.vlgmr.msra.gmra.mrb[4].mxu0 %v5923_v60  ;;  %4680 = vmatpush3.bf16.msra.mxu1 %v5345_v5  ;;  %v5411_v5 = vld [vmem:[%s5841_s21 + $0xa20] ss:$28 sps:$4 sm:$0xff]  }
 0x1b0   : > { %3569 = vmatpush1.bf16.msra.mxu0 %v5341_v4  ;;  %4681 = vmatprep.subr.bf16.mxu1 %v5349_v7  ;;  %v5414_v4 = vld [vmem:[%s5841_s21 + $0x6a8] ss:$28 sps:$4 sm:$0xff]   ;;  %v5418_v7 = vld [vmem:[%s5841_s21 + $0xa5c] ss:$28 sps:$4 sm:$0xff]  }
 0x1b1   : > { %3570 = vmatprep.subr.bf16.mxu0 %v5348_v6  ;;  %3682 = vmatprep.mubr.bf16.mxu1 %v5920_v59  ;;  %v5360_v59 = vld [vmem:[%s5841_s21 + $0xc0] ss:$28 sps:$4 sm:$0xff]   ;;  %v5415_v6 = vld [vmem:[%s5841_s21 + $0x4e8] ss:$28 sps:$4 sm:$0xff]  }
 0x1b2   : > { %3600 = vmatprep.mubr.bf16.mxu0 %v5987_v42 }
 0x1b3   : > { %4682 = vmatpush3.bf16.msra.mxu1 %v5350_v9  ;;  %v5416_v9 = vld [vmem:[%s5841_s21 + $0xa58] ss:$28 sps:$4 sm:$0xff]  }
 0x1b4   : > { %3571 = vmatpush1.bf16.msra.mxu0 %v5346_v8  ;;  %4683 = vmatprep.subr.bf16.mxu1 %v5354_v11  ;;  %v5419_v8 = vld [vmem:[%s5841_s21 + $0x6e0] ss:$28 sps:$4 sm:$0xff]   ;;  %v5423_v11 = vld [vmem:[%s5841_s21 + $0xa94] ss:$28 sps:$4 sm:$0xff]  }
 0x1b5   : > { %3572 = vmatprep.subr.bf16.mxu0 %v5353_v10  ;;  %v5420_v10 = vld [vmem:[%s5841_s21 + $0x520] ss:$28 sps:$4 sm:$0xff]  }
 0x1b7   : > { %4684 = vmatpush3.bf16.msra.mxu1 %v5355_v13  ;;  %v5421_v13 = vld [vmem:[%s5841_s21 + $0xa90] ss:$28 sps:$4 sm:$0xff]  }
 0x1b8   : > { %3573 = vmatpush1.bf16.msra.mxu0 %v5351_v12  ;;  %4685 = vmatprep.subr.bf16.mxu1 %v5359_v16  ;;  %v5424_v12 = vld [vmem:[%s5841_s21 + $0x8d8] ss:$28 sps:$4 sm:$0xff]   ;;  %v5428_v16 = vld [vmem:[%s5841_s21 + $0xacc] ss:$28 sps:$4 sm:$0xff]  }
 0x1b9   : > { %3574 = vmatprep.subr.bf16.mxu0 %v5358_v15  ;;  %v5425_v15 = vld [vmem:[%s5841_s21 + $0x718] ss:$28 sps:$4 sm:$0xff]  }
 0x1bb   : > { %4686 = vmatpush3.bf16.msra.mxu1 %v5360_v59  ;;  %v5426_v59 = vld [vmem:[%s5841_s21 + $0xac8] ss:$28 sps:$4 sm:$0xff]  }
 0x1bc   : > { %3575 = vmatpush1.bf16.msra.mxu0 %v5356_v18  ;;  %4687 = vmatprep.subr.bf16.mxu1 %v5364_v20  ;;  %v5429_v18 = vld [vmem:[%s5841_s21 + $0x910] ss:$28 sps:$4 sm:$0xff]   ;;  %v5433_v20 = vld [vmem:[%s5841_s21 + $0xb04] ss:$28 sps:$4 sm:$0xff]  }
 0x1bd   : > { %3576 = vmatprep.subr.bf16.mxu0 %v5363_v19  ;;  %v5430_v19 = vld [vmem:[%s5841_s21 + $0x750] ss:$28 sps:$4 sm:$0xff]  }
 0x1bf   : > { %4688 = vmatpush3.bf16.msra.mxu1 %v5365_v22  ;;  %v5435_v22 = vld [vmem:[%s5841_s21 + $0x788] ss:$28 sps:$4 sm:$0xff]  }
 0x1c0   : > { %3577 = vmatpush1.bf16.msra.mxu0 %v5361_v21  ;;  %4689 = vmatprep.subr.bf16.mxu1 %v5369_v25  ;;  %v5434_v21 = vld [vmem:[%s5841_s21 + $0x948] ss:$28 sps:$4 sm:$0xff]   ;;  %v5439_v25 = vld [vmem:[%s5841_s21 + $0x980] ss:$28 sps:$4 sm:$0xff]  }
 0x1c1   : > { %3578 = vmatprep.subr.bf16.mxu0 %v5368_v23  ;;  %v5438_v23 = vld [vmem:[%s5841_s21 + $0xb3c] ss:$28 sps:$4 sm:$0xff]  }
 0x1c3   : > { %4690 = vmatpush3.bf16.msra.mxu1 %v5370_v27  ;;  %v5443_v27 = vld [vmem:[%s5841_s21 + $0xb74] ss:$28 sps:$4 sm:$0xff]  }
 0x1c4   : > { %3579 = vmatpush1.bf16.msra.mxu0 %v5366_v26  ;;  %4691 = vmatprep.subr.bf16.mxu1 %v5374_v30  ;;  %v5436_v26 = vld [vmem:[%s5841_s21 + $0xb38] ss:$28 sps:$4 sm:$0xff]   ;;  %v5441_v30 = vld [vmem:[%s5841_s21 + $0xb70] ss:$28 sps:$4 sm:$0xff]  }
 0x1c5   : > { %3580 = vmatprep.subr.bf16.mxu0 %v5373_v28  ;;  %v5444_v28 = vld [vmem:[%s5841_s21 + $0x9b8] ss:$28 sps:$4 sm:$0xff]  }
 0x1c7   : > { %4692 = vmatpush3.bf16.msra.mxu1 %v5375_v32  ;;  %v5448_v32 = vld [vmem:[%s5841_s21 + $0xbac] ss:$28 sps:$4 sm:$0xff]  }
 0x1c8   : > { %3581 = vmatpush1.bf16.msra.mxu0 %v5371_v31  ;;  %4693 = vmatprep.subr.bf16.mxu1 %v5379_v34  ;;  %v5445_v31 = vld [vmem:[%s5841_s21 + $0x7f8] ss:$28 sps:$4 sm:$0xff]   ;;  %v5446_v34 = vld [vmem:[%s5841_s21 + $0xba8] ss:$28 sps:$4 sm:$0xff]  }
 0x1c9   : > { %3582 = vmatprep.subr.bf16.mxu0 %v5378_v33  ;;  %v5449_v33 = vld [vmem:[%s5841_s21 + $0x9f0] ss:$28 sps:$4 sm:$0xff]  }
 0x1cb   : > { %4694 = vmatpush3.bf16.msra.mxu1 %v5380_v36  ;;  %v5453_v36 = vld [vmem:[%s5841_s21 + $0xbe4] ss:$28 sps:$4 sm:$0xff]  }
 0x1cc   : > { %3583 = vmatpush1.bf16.msra.mxu0 %v5376_v35  ;;  %4701 = vmatprep.subr.bf16.mxu1 %v5384_v38  ;;  %v5450_v35 = vld [vmem:[%s5841_s21 + $0x830] ss:$28 sps:$4 sm:$0xff]  }
 0x1cd   : > { %3584 = vmatprep.subr.bf16.mxu0 %v5383_v37  ;;  %v5454_v37 = vld [vmem:[%s5841_s21 + $0xa28] ss:$28 sps:$4 sm:$0xff]  }
 0x1ce   : > { %3683 = vmatmul.mubr.bf16.vlgmr.msra.gmra.mrb[8].mxu1 %v5913_v54  ;;  %v5395_v54 = vld [vmem:[%s5841_s21 + $0x408] ss:$28 sps:$4 sm:$0xff]  }
 0x1cf   : > { %4702 = vmatpush3.bf16.msra.mxu1 %v5385_v41  ;;  %3722 = vmatprep.mubr.bf16.mxu1 %v5929_v62  ;;  %v5403_v62 = vld [vmem:[%s5841_s21 + $0x9b4] ss:$28 sps:$4 sm:$0xff]  }
 0x1d0   : > { %3585 = vmatpush1.bf16.msra.mxu0 %v5381_v40  ;;  %4703 = vmatprep.subr.bf16.mxu1 %v5389_v45 }
 0x1d1   : > { %3586 = vmatprep.subr.bf16.mxu0 %v5388_v44 }
 0x1d3   : > { %4704 = vmatpush3.bf16.msra.mxu1 %v5390_v47  ;;  %v5455_v47 = vld [vmem:[%s5841_s21 + $0x868] ss:$28 sps:$4 sm:$0xff]  }
 0x1d4   : > { %3587 = vmatpush1.bf16.msra.mxu0 %v5386_v46  ;;  %4705 = vmatprep.subr.bf16.mxu1 %v5394_v50  ;;  %v5451_v46 = vld [vmem:[%s5841_s21 + $0xbe0] ss:$28 sps:$4 sm:$0xff]  }
 0x1d5   : > { %3588 = vmatprep.subr.bf16.mxu0 %v5393_v48 }
 0x1d7   : > { %4706 = vmatpush3.bf16.msra.mxu1 %v5395_v54  ;;  %v5459_v54 = vld [vmem:[%s5841_s21 + $0xa60] ss:$28 sps:$4 sm:$0xff]  }
 0x1d8   : > { %3589 = vmatpush1.bf16.msra.mxu0 %v5391_v51  ;;  %4707 = vmatprep.subr.bf16.mxu1 %v5399_v53  ;;  %v5458_v51 = vld [vmem:[%s5841_s21 + $0xc1c] ss:$28 sps:$4 sm:$0xff]  }
 0x1d9   : > { %3590 = vmatprep.subr.bf16.mxu0 %v5398_v52 }
 0x1db   : > { %4708 = vmatpush3.bf16.msra.mxu1 %v5400_v56  ;;  %v5460_v56 = vld [vmem:[%s5841_s21 + $0x8a0] ss:$28 sps:$4 sm:$0xff]  }
 0x1dc   : > { %3591 = vmatpush1.bf16.msra.mxu0 %v5396_v55  ;;  %4709 = vmatprep.subr.bf16.mxu1 %v5404_v57  ;;  %v5456_v55 = vld [vmem:[%s5841_s21 + $0xc18] ss:$28 sps:$4 sm:$0xff]  }
 0x1dd   : > { %3592 = vmatprep.subr.bf16.mxu0 %v5403_v62  ;;  %v5463_v57 = vld [vmem:[%s5841_s21 + $0xc54] ss:$28 sps:$4 sm:$0xff]  }
 0x1df   : > { %4710 = vmatpush3.bf16.msra.mxu1 %v5405_v61 }
 0x1e0   : > { %3593 = vmatpush1.bf16.msra.mxu0 %v5401_v58  ;;  %4711 = vmatprep.subr.bf16.mxu1 %v5409_v0  ;;  %v5464_v58 = vld [vmem:[%s5841_s21 + $0xc58] ss:$28 sps:$4 sm:$0xff]  }
 0x1e1   : > { %3594 = vmatprep.subr.bf16.mxu0 %v5408_v63 }
 0x1e3   : > { %4712 = vmatpush3.bf16.msra.mxu1 %v5410_v2  ;;  %v5465_v2 = vld [vmem:[%s5841_s21 + $0xa98] ss:$28 sps:$4 sm:$0xff]  }
 0x1e4   : > { %3595 = vmatpush1.bf16.msra.mxu0 %v5406_v1  ;;  %4713 = vmatprep.subr.bf16.mxu1 %v5414_v4  ;;  %v5461_v1 = vld [vmem:[%s5841_s21 + $0xc50] ss:$28 sps:$4 sm:$0xff]  }
 0x1e5   : > { %3596 = vmatprep.subr.bf16.mxu0 %v5413_v3  ;;  %v5468_v4 = vld [vmem:[%s5841_s21 + $0xc8c] ss:$28 sps:$4 sm:$0xff]  }
 0x1e7   : > { %4714 = vmatpush3.bf16.msra.mxu1 %v5415_v6 }
 0x1e8   : > { %3597 = vmatpush1.bf16.msra.mxu0 %v5411_v5  ;;  %4715 = vmatprep.subr.bf16.mxu1 %v5419_v8  ;;  %v5469_v5 = vld [vmem:[%s5841_s21 + $0xc90] ss:$28 sps:$4 sm:$0xff]  }
 0x1e9   : > { %3598 = vmatprep.subr.bf16.mxu0 %v5418_v7 }
 0x1eb   : > { %4716 = vmatpush3.bf16.msra.mxu1 %v5420_v10  ;;  %v5470_v10 = vld [vmem:[%s5841_s21 + $0xad0] ss:$28 sps:$4 sm:$0xff]  }
 0x1ec   : > { %3599 = vmatpush1.bf16.msra.mxu0 %v5416_v9  ;;  %4723 = vmatprep.subr.bf16.mxu1 %v5424_v12  ;;  %v5466_v9 = vld [vmem:[%s5841_s21 + $0xc88] ss:$28 sps:$4 sm:$0xff]  }
 0x1ed   : > { %3609 = vmatprep.subr.bf16.mxu0 %v5423_v11  ;;  %v5473_v12 = vld [vmem:[%s5841_s21 + $0xcc4] ss:$28 sps:$4 sm:$0xff]  }
 0x1ee   : > { %3723 = vmatmul.mubr.bf16.vlgmr.msra.gmra.mrb[12].mxu1 %v5923_v60  ;;  %v5431_v60 = vld [vmem:[%s5841_s21 + $0xb00] ss:$28 sps:$4 sm:$0xff]  }
 0x1ef   : > { %3601 = vmatmul.mubr.bf16.vlgmr.msra.gmra.mrb[4].mxu0 %v5981_v39  ;;  %4724 = vmatpush3.bf16.msra.mxu1 %v5425_v15 }
 0x1f0   : > { %3610 = vmatpush1.bf16.msra.mxu0 %v5421_v13  ;;  %4725 = vmatprep.subr.bf16.mxu1 %v5429_v18  ;;  %v5474_v13 = vld [vmem:[%s5841_s21 + $0xcc8] ss:$28 sps:$4 sm:$0xff]   ;;  %v5471_v18 = vld [vmem:[%s5841_s21 + $0xcc0] ss:$28 sps:$4 sm:$0xff]  }
 0x1f1   : > { %3611 = vmatprep.subr.bf16.mxu0 %v5428_v16  ;;  %3762 = vmatprep.mubr.bf16.mxu1 %v5987_v42  ;;  %v5440_v42 = vld [vmem:[%s5841_s21 + $0x7c0] ss:$28 sps:$4 sm:$0xff]  }
 0x1f2   : > { %3641 = vmatprep.mubr.bf16.mxu0 %v6039_v29 }
 0x1f3   : > { %4726 = vmatpush3.bf16.msra.mxu1 %v5430_v19 }
 0x1f4   : > { %3612 = vmatpush1.bf16.msra.mxu0 %v5426_v59  ;;  %4727 = vmatprep.subr.bf16.mxu1 %v5434_v21  ;;  %v5475_v59 = vld [vmem:[%s5841_s21 + $0xb08] ss:$28 sps:$4 sm:$0xff]   ;;  %v5479_v21 = vld [vmem:[%s5841_s21 + $0xd00] ss:$28 sps:$4 sm:$0xff]  }
 0x1f5   : > { %3613 = vmatprep.subr.bf16.mxu0 %v5433_v20  ;;  %v5478_v20 = vld [vmem:[%s5841_s21 + $0xcfc] ss:$28 sps:$4 sm:$0xff]  }
 0x1f7   : > { %4728 = vmatpush3.bf16.msra.mxu1 %v5435_v22 }
 0x1f8   : > { %3614 = vmatpush1.bf16.msra.mxu0 %v5431_v60  ;;  %4729 = vmatprep.subr.bf16.mxu1 %v5439_v25  ;;  %v5480_v25 = vld [vmem:[%s5841_s21 + $0xb40] ss:$28 sps:$4 sm:$0xff]  }
 0x1f9   : > { %3615 = vmatprep.subr.bf16.mxu0 %v5438_v23  ;;  %v5476_v23 = vld [vmem:[%s5841_s21 + $0xcf8] ss:$28 sps:$4 sm:$0xff]  }
 0x1fb   : > { %4730 = vmatpush3.bf16.msra.mxu1 %v5440_v42 }
 0x1fc   : > { %3616 = vmatpush1.bf16.msra.mxu0 %v5436_v26  ;;  %4731 = vmatprep.subr.bf16.mxu1 %v5444_v28  ;;  %v5484_v28 = vld [vmem:[%s5841_s21 + $0xd38] ss:$28 sps:$4 sm:$0xff]  }
 0x1fd   : > { %3617 = vmatprep.subr.bf16.mxu0 %v5443_v27  ;;  %v5483_v27 = vld [vmem:[%s5841_s21 + $0xd34] ss:$28 sps:$4 sm:$0xff]  }
 0x1ff   : > { %4732 = vmatpush3.bf16.msra.mxu1 %v5445_v31 }
 0x200   : > { %3618 = vmatpush1.bf16.msra.mxu0 %v5441_v30  ;;  %4733 = vmatprep.subr.bf16.mxu1 %v5449_v33  ;;  %v5481_v33 = vld [vmem:[%s5841_s21 + $0xd30] ss:$28 sps:$4 sm:$0xff]  }
 0x201   : > { %3619 = vmatprep.subr.bf16.mxu0 %v5448_v32 }
 0x202   : > { %v3315_v38 = vpop.f32.mrb[0].mxu0 }
 0x203   : > { %v4767_v40 = vadd.f32 %v3315_v38, %v6201_v14  ;;  %v3317_v41 = vpop.f32.mrb[1].mxu0  ;;  %4734 = vmatpush3.bf16.msra.mxu1 %v5450_v35 }
 0x204   : > { %v4768_v44 = vadd.f32 %v3317_v41, %v6205_v17  ;;  %v3319_v45 = vpop.f32.mrb[2].mxu0  ;;  %3620 = vmatpush1.bf16.msra.mxu0 %v5446_v34  ;;  %4735 = vmatprep.subr.bf16.mxu1 %v5454_v37  ;;  %v5485_v34 = vld [vmem:[%s5841_s21 + $0xb78] ss:$28 sps:$4 sm:$0xff]   ;;  %v5489_v37 = vld [vmem:[%s5841_s21 + $0xd70] ss:$28 sps:$4 sm:$0xff]  }
 0x205   : > { %v3811_v48 = vsel %vm3810_vm0, %v4767_v40, 0.0  ;;  %v3320_v50 = vpop.f32.mrb[3].mxu0  ;;  %3621 = vmatprep.subr.bf16.mxu0 %v5453_v36  ;;  %v5488_v36 = vld [vmem:[%s5841_s21 + $0xd6c] ss:$28 sps:$4 sm:$0xff]  }
 0x206   : > { %v3812_v14 = vrot.slane %v3811_v48, 4  ;;  %v3818_v52 = vsel %vm3810_vm0, %v4768_v44, 0.0  ;;  %v5490_v45 = vld [vmem:[%s5841_s21 + $0xbb0] ss:$28 sps:$4 sm:$0xff]  }
 0x207   : > { %v3819_v17 = vrot.slane %v3818_v52, 4  ;;  %4736 = vmatpush3.bf16.msra.mxu1 %v5455_v47  ;;  %v5493_v47 = vld [vmem:[%s5841_s21 + $0xda4] ss:$28 sps:$4 sm:$0xff]  }
 0x208   : > { %v3813_v53 = vadd.f32 %v3812_v14, %v3811_v48  ;;  %3622 = vmatpush1.bf16.msra.mxu0 %v5451_v46  ;;  %4737 = vmatprep.subr.bf16.mxu1 %v5459_v54  ;;  %v5494_v48 = vld [vmem:[%s5841_s21 + $0xda8] ss:$28 sps:$4 sm:$0xff]   ;;  %v5491_v14 = vld [vmem:[%s5841_s21 + $0xda0] ss:$28 sps:$4 sm:$0xff]  }
 0x209   : > { %v3820_v62 = vadd.f32 %v3819_v17, %v3818_v52  ;;  %3623 = vmatprep.subr.bf16.mxu0 %v5458_v51  ;;  %v5495_v52 = vld [vmem:[%s5841_s21 + $0xbe8] ss:$28 sps:$4 sm:$0xff]  }
 0x20a   : > { %v3814_v61 = vrot.slane %v3813_v53, 2 }
 0x20b   : > { %v3821_v63 = vrot.slane %v3820_v62, 2  ;;  %4738 = vmatpush3.bf16.msra.mxu1 %v5460_v56 }
 0x20c   : > { %v3815_v0 = vadd.f32 %v3814_v61, %v3813_v53  ;;  %3624 = vmatpush1.bf16.msra.mxu0 %v5456_v55  ;;  %4745 = vmatprep.subr.bf16.mxu1 %v5464_v58  ;;  %v5498_v53 = vld [vmem:[%s5841_s21 + $0xddc] ss:$28 sps:$4 sm:$0xff]  }
 0x20d   : > { %v3822_v3 = vadd.f32 %v3821_v63, %v3820_v62  ;;  %3625 = vmatprep.subr.bf16.mxu0 %v5463_v57  ;;  %v5499_v55 = vld [vmem:[%s5841_s21 + $0xde0] ss:$28 sps:$4 sm:$0xff]   ;;  %v5496_v58 = vld [vmem:[%s5841_s21 + $0xdd8] ss:$28 sps:$4 sm:$0xff]   ;;  %v3962_v63 = vsub.s32 0, %v5896_v43 }
 0x20e   : > { %v3816_v6 = vrot.slane %v3815_v0, 1  ;;  %3763 = vmatmul.mubr.bf16.vlgmr.msra.gmra.mrb[16].mxu1 %v5981_v39  ;;  %v5500_v61 = vld [vmem:[%s5841_s21 + $0xc20] ss:$28 sps:$4 sm:$0xff]  }
 0x20f   : > { %v3823_v7 = vrot.slane %v3822_v3, 1  ;;  %4746 = vmatpush3.bf16.msra.mxu1 %v5465_v2  ;;  %3802 = vmatprep.mubr.bf16.mxu1 %v6039_v29  ;;  %v6406_v2 = vld [vmem:[%s251_s30] sm:$0xff] }
 0x210   : > { %v3817_v8 = vadd.f32 %v3816_v6, %v3815_v0  ;;  %3626 = vmatpush1.bf16.msra.mxu0 %v5461_v1  ;;  %4747 = vmatprep.subr.bf16.mxu1 %v5469_v5  ;;  %v6399_v0 = vld [vmem:[%s5851_s14] sm:$0xff]  ;;  %v3966_v1 = vsub.s32 1, %v5896_v43 }
 0x211   : > { %v3824_v11 = vadd.f32 %v3823_v7, %v3822_v3  ;;  %3627 = vmatprep.subr.bf16.mxu0 %v5468_v4  ;;  %v3963_v3 = vrot.slane %v6399_v0, %v3962_v63 }
 0x212   : > { %v3860_v15 = vmul.f32 0.25, %v3817_v8  ;;  %v3967_v5 = vrot.slane %v6399_v0, %v3966_v1  ;;  %v4007_v8 = vrot.slane %v6406_v2, %v3962_v63 }
 0x213   : > { %v3861_v16 = vmul.f32 0.25, %v3824_v11  ;;  %4748 = vmatpush3.bf16.msra.mxu1 %v5470_v10  ;;  %v4011_v10 = vrot.slane %v6406_v2, %v3966_v1 }
 0x214   : > { %v6365_v39 = vsub.f32 %v4767_v40, %v3860_v15  ;;  %3628 = vmatpush1.bf16.msra.mxu0 %v5466_v9  ;;  %4749 = vmatprep.subr.bf16.mxu1 %v5474_v13 }
 0x215   : > { %v6369_v19 = vsub.f32 %v4768_v44, %v3861_v16  ;;  %3629 = vmatprep.subr.bf16.mxu0 %v5473_v12  ;;  %v5486_v44 = vld [vmem:[%s5841_s21 + $0xd68] ss:$28 sps:$4 sm:$0xff]  }
 0x216   : > { %v3874_v29 = vmul.f32 %v6365_v39, %v6365_v39 }
 0x217   : > { %v3875_v60 = vmul.f32 %v6369_v19, %v6369_v19  ;;  %4750 = vmatpush3.bf16.msra.mxu1 %v5475_v59 }
 0x218   : > { %v3881_v22 = vsel %vm3810_vm0, %v3874_v29, 0.0  ;;  %3630 = vmatpush1.bf16.msra.mxu0 %v5471_v18  ;;  %4751 = vmatprep.subr.bf16.mxu1 %v5479_v21 }
 0x219   : > { %v3882_v26 = vrot.slane %v3881_v22, 4  ;;  %v3888_v42 = vsel %vm3810_vm0, %v3875_v60, 0.0  ;;  %3631 = vmatprep.subr.bf16.mxu0 %v5478_v20 }
 0x21a   : > { %v3889_v30 = vrot.slane %v3888_v42, 4 }
 0x21b   : > { %v3883_v31 = vadd.f32 %v3882_v26, %v3881_v22  ;;  %4752 = vmatpush3.bf16.msra.mxu1 %v5480_v25 }
 0x21c   : > { %v3890_v32 = vadd.f32 %v3889_v30, %v3888_v42  ;;  %3632 = vmatpush1.bf16.msra.mxu0 %v5476_v23  ;;  %4753 = vmatprep.subr.bf16.mxu1 %v5484_v28 }
 0x21d   : > { %v3884_v35 = vrot.slane %v3883_v31, 2  ;;  %3633 = vmatprep.subr.bf16.mxu0 %v5483_v27 }
 0x21e   : > { %v3891_v38 = vrot.slane %v3890_v32, 2 }
 0x21f   : > { %v3885_v40 = vadd.f32 %v3884_v35, %v3883_v31  ;;  %4754 = vmatpush3.bf16.msra.mxu1 %v5485_v34 }
 0x220   : > { %v3892_v41 = vadd.f32 %v3891_v38, %v3890_v32  ;;  %3634 = vmatpush1.bf16.msra.mxu0 %v5481_v33  ;;  %4755 = vmatprep.subr.bf16.mxu1 %v5489_v37 }
 0x221   : > { %v3886_v46 = vrot.slane %v3885_v40, 1  ;;  %3635 = vmatprep.subr.bf16.mxu0 %v5488_v36 }
 0x222   : > { %v3893_v50 = vrot.slane %v3892_v41, 1 }
 0x223   : > { %v3887_v51 = vadd.f32 %v3886_v46, %v3885_v40  ;;  %4756 = vmatpush3.bf16.msra.mxu1 %v5490_v45 }
 0x224   : > { %v3894_v54 = vadd.f32 %v3893_v50, %v3892_v41  ;;  %3636 = vmatpush1.bf16.msra.mxu0 %v5486_v44  ;;  %4757 = vmatprep.subr.bf16.mxu1 %v5494_v48 }
 0x225   : > { %v3930_v17 = vmul.f32 0.25, %v3887_v51  ;;  %3637 = vmatprep.subr.bf16.mxu0 %v5493_v47 }
 0x226   : > { %v3931_v56 = vmul.f32 0.25, %v3894_v54 }
 0x227   : > { %v3937_v62 = vadd.f32 1e-05, %v3930_v17  ;;  %4758 = vmatpush3.bf16.msra.mxu1 %v5495_v52 }
 0x228   : > { %v3938_v57 = vadd.f32 1e-05, %v3931_v56  ;;  %3638 = vmatpush1.bf16.msra.mxu0 %v5491_v14  ;;  %4759 = vmatprep.subr.bf16.mxu1 %v5499_v55 }
 0x229   : > { %5501 = vrsqrt.f32 %v3937_v62  ;;  %3639 = vmatprep.subr.bf16.mxu0 %v5498_v53 }
 0x22a   : > { %5503 = vrsqrt.f32 %v3938_v57 }
 0x22b   : > { %4760 = vmatpush3.bf16.msra.mxu1 %v5500_v61 }
 0x22c   : > { %3640 = vmatpush1.bf16.msra.mxu0 %v5496_v58 }
 0x22e   : > { %3803 = vmatmul.mubr.bf16.vlgmr.msra.gmra.mrb[20].mxu1 %v6031_v24 }
 0x22f   : > { %3642 = vmatmul.mubr.bf16.vlgmr.msra.gmra.mrb[4].mxu0 %v6031_v24 }
 0x233   : > { %v5502_v4 = vpop.eup %5501 }
 0x234   : > { %v5504_v6 = vpop.eup %5503  ;;  %v3951_v7 = vmul.f32 %v5502_v4, %v6365_v39 }
 0x235   : > { %v3952_v9 = vmul.f32 %v5504_v6, %v6369_v19  ;;  %v3974_v6 = vsub.s32 3, %v5896_v43 }
 0x236   : > { %v3995_v11 = vmul.f32 %v3963_v3, %v3951_v7 }
 0x237   : > { %v3996_v24 = vmul.f32 %v3967_v5, %v3952_v9  ;;  %v3970_v5 = vsub.s32 2, %v5896_v43  ;;  %v3975_v9 = vrot.slane %v6399_v0, %v3974_v6 }
 0x238   : > { %v4039_v12 = vadd.f32 %v4007_v8, %v3995_v11 }
 0x239   : > { %v4040_v13 = vadd.f32 %v4011_v10, %v3996_v24  ;;  %v3971_v7 = vrot.slane %v6399_v0, %v3970_v5  ;;  %v4015_v24 = vrot.slane %v6406_v2, %v3970_v5 }
 0x23a   : > { %v4046_v15 = vmax.f32 %v4039_v12, 0.0 }
 0x23b   : > { %v4047_v16 = vmax.f32 %v4040_v13, 0.0  ;;  %v4019_v13 = vrot.slane %v6406_v2, %v3974_v6 }
 0x23d   : > { %v6414_v18 = vpack.c.bf16 %v4047_v16, %v4046_v15 }
 0x281   : > { %v3479_v59 = vpop.f32.mrb[4].mxu1 }
 0x282   : > { %v3825_v20 = vsel %vm3810_vm0, %v3479_v59, 0.0  ;;  %v3481_v21 = vpop.f32.mrb[5].mxu1 }
 0x283   : > { %v3826_v29 = vrot.slane %v3825_v20, 4  ;;  %v3832_v39 = vsel %vm3810_vm0, %v3481_v21, 0.0  ;;  %v3483_v60 = vpop.f32.mrb[6].mxu1 }
 0x284   : > { %v3833_v22 = vrot.slane %v3832_v39, 4  ;;  %v3484_v19 = vpop.f32.mrb[7].mxu1  ;;  %v4075_v60 = vrot.slane %v6414_v18, %v5904_v49 }
 0x285   : > { %v3827_v23 = vadd.f32 %v3826_v29, %v3825_v20 }
 0x286   : > { %v3834_v25 = vadd.f32 %v3833_v22, %v3832_v39 }
 0x287   : > { %v3828_v26 = vrot.slane %v3827_v23, 2 }
 0x288   : > { %v3835_v42 = vrot.slane %v3834_v25, 2 }
 0x289   : > { %v3829_v27 = vadd.f32 %v3828_v26, %v3827_v23 }
 0x28a   : > { %v3836_v28 = vadd.f32 %v3835_v42, %v3834_v25 }
 0x28b   : > { %v3830_v30 = vrot.slane %v3829_v27, 1 }
 0x28c   : > { %v3837_v31 = vrot.slane %v3836_v28, 1 }
 0x28d   : > { %v3831_v32 = vadd.f32 %v3830_v30, %v3829_v27 }
 0x28e   : > { %v3838_v33 = vadd.f32 %v3837_v31, %v3836_v28 }
 0x28f   : > { %v3862_v34 = vmul.f32 0.25, %v3831_v32 }
 0x290   : > { %v3863_v35 = vmul.f32 0.25, %v3838_v33 }
 0x291   : > { %v3869_v36 = vsub.f32 %v3479_v59, %v3862_v34 }
 0x292   : > { %v3870_v37 = vsub.f32 %v3481_v21, %v3863_v35 }
 0x293   : > { %v3876_v38 = vmul.f32 %v3869_v36, %v3869_v36 }
 0x294   : > { %v3877_v40 = vmul.f32 %v3870_v37, %v3870_v37 }
 0x295   : > { %v3895_v41 = vsel %vm3810_vm0, %v3876_v38, 0.0 }
 0x296   : > { %v3896_v44 = vrot.slane %v3895_v41, 4  ;;  %v3902_v45 = vsel %vm3810_vm0, %v3877_v40, 0.0 }
 0x297   : > { %v3903_v46 = vrot.slane %v3902_v45, 4 }
 0x298   : > { %v3897_v47 = vadd.f32 %v3896_v44, %v3895_v41 }
 0x299   : > { %v3904_v48 = vadd.f32 %v3903_v46, %v3902_v45 }
 0x29a   : > { %v3898_v50 = vrot.slane %v3897_v47, 2 }
 0x29b   : > { %v3905_v51 = vrot.slane %v3904_v48, 2 }
 0x29c   : > { %v3899_v54 = vadd.f32 %v3898_v50, %v3897_v47 }
 0x29d   : > { %v3906_v14 = vadd.f32 %v3905_v51, %v3904_v48 }
 0x29e   : > { %v3900_v52 = vrot.slane %v3899_v54, 1 }
 0x29f   : > { %v3907_v17 = vrot.slane %v3906_v14, 1 }
 0x2a0   : > { %v3901_v53 = vadd.f32 %v3900_v52, %v3899_v54 }
 0x2a1   : > { %v3908_v55 = vadd.f32 %v3907_v17, %v3906_v14  ;;  %v4695_v56 = vpop.f32.mrb[8].mxu1 }
 0x2a2   : > { %v3932_v62 = vmul.f32 0.25, %v3901_v53  ;;  %v4696_v57 = vpop.f32.mrb[9].mxu1 }
 0x2a3   : > { %v3933_v58 = vmul.f32 0.25, %v3908_v55  ;;  %v4697_v61 = vadd.f32 %v4696_v57, %v4695_v56  ;;  %v4698_v63 = vpop.f32.mrb[10].mxu1 }
 0x2a4   : > { %v3939_v1 = vadd.f32 1e-05, %v3932_v62  ;;  %v4699_v3 = vpop.f32.mrb[11].mxu1 }
 0x2a5   : > { %v3940_v4 = vadd.f32 1e-05, %v3933_v58 }
 0x2a6   : > { %5505 = vrsqrt.f32 %v3939_v1 }
 0x2a7   : > { %5507 = vrsqrt.f32 %v3940_v4 }
 0x2b0   : > { %v5506_v8 = vpop.eup %5505 }
 0x2b1   : > { %v5508_v10 = vpop.eup %5507  ;;  %v3953_v11 = vmul.f32 %v5506_v8, %v3869_v36 }
 0x2b2   : > { %v3954_v12 = vmul.f32 %v5508_v10, %v3870_v37 }
 0x2b3   : > { %v3997_v15 = vmul.f32 %v3971_v7, %v3953_v11 }
 0x2b4   : > { %v3998_v16 = vmul.f32 %v3975_v9, %v3954_v12 }
 0x2b5   : > { %v4041_v59 = vadd.f32 %v4015_v24, %v3997_v15 }
 0x2b6   : > { %v4042_v20 = vadd.f32 %v4019_v13, %v3998_v16 }
 0x2b7   : > { %v4048_v21 = vmax.f32 %v4041_v59, 0.0 }
 0x2b8   : > { %v4049_v29 = vmax.f32 %v4042_v20, 0.0 }
 0x2ba   : > { %v4672_v39 = vpack.c.bf16 %v4049_v29, %v4048_v21 }
 0x2bc   : > { %v4082_v22 = vrot.slane %v4672_v39, %v5904_v49 }
 0x2be   : > { %v4083_v19 = vcombine.low %v4075_v60, %v4082_v22 }
 0x2c0   : > { %4102 = vst [vmem:[%s6433_s6] sm:$0xff] %v4083_v19 }
 0x2c1   : > { %v4717_v23 = vpop.f32.mrb[12].mxu1 }
 0x2c2   : > { %v4718_v25 = vpop.f32.mrb[13].mxu1 }
 0x2c3   : > { %v4719_v26 = vadd.f32 %v4718_v25, %v4717_v23  ;;  %v4720_v42 = vpop.f32.mrb[14].mxu1 }
 0x2c4   : > { %v4721_v27 = vpop.f32.mrb[15].mxu1 }
 0x2c5   : > { %v3725_v28 = vadd.f32 %v4719_v26, %v4697_v61 }
 0x2e1   : > { %v4739_v30 = vpop.f32.mrb[16].mxu1 }
 0x2e2   : > { %v4740_v31 = vpop.f32.mrb[17].mxu1 }
 0x2e3   : > { %v4741_v32 = vadd.f32 %v4740_v31, %v4739_v30  ;;  %v4742_v18 = vpop.f32.mrb[18].mxu1 }
 0x2e4   : > { %v4743_v33 = vpop.f32.mrb[19].mxu1 }
 0x2e5   : > { %v3765_v34 = vadd.f32 %v4741_v32, %v3725_v28 }
 0x301   : > { %v4761_v36 = vpop.f32.mrb[20].mxu1 }
 0x302   : > { %v3643_v35 = vpop.f32.mrb[4].mxu0  ;;  %v4762_v40 = vpop.f32.mrb[21].mxu1 }
 0x303   : > { %v3839_v37 = vsel %vm3810_vm0, %v3643_v35, 0.0  ;;  %v3645_v38 = vpop.f32.mrb[5].mxu0  ;;  %v4763_v45 = vadd.f32 %v4762_v40, %v4761_v36  ;;  %v4764_v47 = vpop.f32.mrb[22].mxu1 }
 0x304   : > { %v3840_v41 = vrot.slane %v3839_v37, 4  ;;  %v3846_v44 = vsel %vm3810_vm0, %v3645_v38, 0.0  ;;  %v3647_v46 = vpop.f32.mrb[6].mxu0  ;;  %v4765_v51 = vpop.f32.mrb[23].mxu1 }
 0x305   : > { %v3847_v48 = vrot.slane %v3846_v44, 4  ;;  %v3648_v50 = vpop.f32.mrb[7].mxu0  ;;  %v3805_v14 = vadd.f32 %v4763_v45, %v3765_v34  ;;  %v3978_v45 = vsub.s32 4, %v5896_v43  ;;  %v3982_v46 = vsub.s32 5, %v5896_v43 }
 0x306   : > { %v3841_v54 = vadd.f32 %v3840_v41, %v3839_v37  ;;  %v3986_v51 = vsub.s32 6, %v5896_v43 }
 0x307   : > { %v3848_v52 = vadd.f32 %v3847_v48, %v3846_v44  ;;  %v3853_v53 = vsel %vm3810_vm0, %v3805_v14, 0.0  ;;  %v3979_v47 = vrot.slane %v6399_v0, %v3978_v45  ;;  %v3983_v50 = vrot.slane %v6399_v0, %v3982_v46 }
 0x308   : > { %v3842_v17 = vrot.slane %v3841_v54, 2  ;;  %v3854_v56 = vrot.slane %v3853_v53, 4 }
 0x309   : > { %v3849_v55 = vrot.slane %v3848_v52, 2 }
 0x30a   : > { %v3843_v62 = vadd.f32 %v3842_v17, %v3841_v54  ;;  %v3855_v58 = vadd.f32 %v3854_v56, %v3853_v53  ;;  %v4027_v53 = vrot.slane %v6406_v2, %v3982_v46 }
 0x30b   : > { %v3850_v57 = vadd.f32 %v3849_v55, %v3848_v52  ;;  %v4023_v52 = vrot.slane %v6406_v2, %v3978_v45 }
 0x30c   : > { %v3844_v61 = vrot.slane %v3843_v62, 1  ;;  %v3856_v1 = vrot.slane %v3855_v58, 2 }
 0x30d   : > { %v3851_v63 = vrot.slane %v3850_v57, 1 }
 0x30e   : > { %v3845_v3 = vadd.f32 %v3844_v61, %v3843_v62  ;;  %v3857_v5 = vadd.f32 %v3856_v1, %v3855_v58  ;;  %v3987_v62 = vrot.slane %v6399_v0, %v3986_v51  ;;  %v4031_v1 = vrot.slane %v6406_v2, %v3986_v51 }
 0x30f   : > { %v3852_v4 = vadd.f32 %v3851_v63, %v3850_v57 }
 0x310   : > { %v3864_v6 = vmul.f32 0.25, %v3845_v3  ;;  %v3858_v8 = vrot.slane %v3857_v5, 1 }
 0x311   : > { %v3865_v7 = vmul.f32 0.25, %v3852_v4 }
 0x312   : > { %v3871_v9 = vsub.f32 %v3643_v35, %v3864_v6  ;;  %v3859_v11 = vadd.f32 %v3858_v8, %v3857_v5 }
 0x313   : > { %v3872_v10 = vsub.f32 %v3645_v38, %v3865_v7 }
 0x314   : > { %v3878_v24 = vmul.f32 %v3871_v9, %v3871_v9  ;;  %v3866_v13 = vmul.f32 0.25, %v3859_v11 }
 0x315   : > { %v3879_v12 = vmul.f32 %v3872_v10, %v3872_v10 }
 0x316   : > { %v3909_v15 = vsel %vm3810_vm0, %v3878_v24, 0.0  ;;  %v3873_v20 = vsub.f32 %v3805_v14, %v3866_v13 }
 0x317   : > { %v3910_v16 = vrot.slane %v3909_v15, 4  ;;  %v3916_v59 = vsel %vm3810_vm0, %v3879_v12, 0.0 }
 0x318   : > { %v3917_v21 = vrot.slane %v3916_v59, 4  ;;  %v3880_v39 = vmul.f32 %v3873_v20, %v3873_v20 }
 0x319   : > { %v3911_v29 = vadd.f32 %v3910_v16, %v3909_v15 }
 0x31a   : > { %v3918_v60 = vadd.f32 %v3917_v21, %v3916_v59  ;;  %v3923_v19 = vsel %vm3810_vm0, %v3880_v39, 0.0 }
 0x31b   : > { %v3912_v22 = vrot.slane %v3911_v29, 2  ;;  %v3924_v25 = vrot.slane %v3923_v19, 4 }
 0x31c   : > { %v3919_v23 = vrot.slane %v3918_v60, 2 }
 0x31d   : > { %v3913_v26 = vadd.f32 %v3912_v22, %v3911_v29  ;;  %v3925_v27 = vadd.f32 %v3924_v25, %v3923_v19 }
 0x31e   : > { %v3920_v42 = vadd.f32 %v3919_v23, %v3918_v60 }
 0x31f   : > { %v3914_v28 = vrot.slane %v3913_v26, 1  ;;  %v3926_v31 = vrot.slane %v3925_v27, 2 }
 0x320   : > { %v3921_v30 = vrot.slane %v3920_v42, 1 }
 0x321   : > { %v3915_v32 = vadd.f32 %v3914_v28, %v3913_v26  ;;  %v3927_v33 = vadd.f32 %v3926_v31, %v3925_v27 }
 0x322   : > { %v3922_v18 = vadd.f32 %v3921_v30, %v3920_v42 }
 0x323   : > { %v3934_v34 = vmul.f32 0.25, %v3915_v32  ;;  %v3928_v36 = vrot.slane %v3927_v33, 1 }
 0x324   : > { %v3935_v35 = vmul.f32 0.25, %v3922_v18 }
 0x325   : > { %v3941_v37 = vadd.f32 1e-05, %v3934_v34  ;;  %v3929_v40 = vadd.f32 %v3928_v36, %v3927_v33 }
 0x326   : > { %v3942_v38 = vadd.f32 1e-05, %v3935_v35 }
 0x327   : > { %5509 = vrsqrt.f32 %v3941_v37  ;;  %v3936_v41 = vmul.f32 0.25, %v3929_v40 }
 0x328   : > { %5511 = vrsqrt.f32 %v3942_v38 }
 0x329   : > { %v3943_v44 = vadd.f32 1e-05, %v3936_v41 }
 0x32b   : > { %5513 = vrsqrt.f32 %v3943_v44 }
 0x331   : > { %v5510_v48 = vpop.eup %5509 }
 0x332   : > { %v5512_v54 = vpop.eup %5511  ;;  %v3955_v14 = vmul.f32 %v5510_v48, %v3871_v9 }
 0x333   : > { %v3956_v17 = vmul.f32 %v5512_v54, %v3872_v10 }
 0x334   : > { %v3999_v55 = vmul.f32 %v3979_v47, %v3955_v14 }
 0x335   : > { %v4000_v56 = vmul.f32 %v3983_v50, %v3956_v17  ;;  %v5514_v57 = vpop.eup %5513 }
 0x336   : > { %v4043_v58 = vadd.f32 %v4023_v52, %v3999_v55  ;;  %v3957_v63 = vmul.f32 %v5514_v57, %v3873_v20 }
 0x337   : > { %v4044_v61 = vadd.f32 %v4027_v53, %v4000_v56 }
 0x338   : > { %v4050_v3 = vmax.f32 %v4043_v58, 0.0  ;;  %v4001_v4 = vmul.f32 %v3987_v62, %v3957_v63 }
 0x339   : > { %v4051_v43 = vmax.f32 %v4044_v61, 0.0 }
 0x33a   : > { %v4045_v6 = vadd.f32 %v4031_v1, %v4001_v4 }
 0x33b   : > { %v4673_v5 = vpack.c.bf16 %v4051_v43, %v4050_v3 }
 0x33c   : > { %v4052_v7 = vmax.f32 %v4045_v6, 0.0 }
 0x33d   : > { %v4091_v9 = vrot.slane %v4673_v5, %v5904_v49 }
 0x33e   : > { %v4059_v8 = vpack.c.bf16 %v4052_v7, %v4052_v7 }
 0x340   : > { %v4098_v10 = vrot.slane %v4059_v8, %v5904_v49 }
 0x342   : > { %v4099_v11 = vcombine.low %v4091_v9, %v4098_v10 }
 0x344   : > { %4103 = vst [vmem:[%s6433_s6 + $0x8] sm:$0x3f] %v4099_v11 }
 0x345 PF: > { %p17_p0 = scmp.ge.s32.totalorder %s5699_s20, 9   ;;  %s6481_s15 = smov %s5635_s16 }
 0x346   : > { %s6482_s16 = smov %s5639_s17  ;;  %s6483_s17 = smov %s5709_s23 }
 0x347   : > { %s6484_s18 = smov %s5699_s20  ;;  %19 = sbr.rel (!%p17_p0) target bundleno = 5 (0x5), region = 100 }
 0x34e   :  { %4126 = vsyncpa [#allocation3], 1 }
 0x34f   :  { %4128 = vsyncpa [#allocation3 + $0x1], 1 }
 0x350   :  { %4129 = vsyncpa [#allocation5], 1 }
 0x351   :  { %4131 = vsyncpa [#allocation5 + $0x1], 1 }

// kernel: generator_forward.6
= control target key start
LH: loop header
LB: loop body
LE: loop exit
PB: predicated region body
PF: predicated region fallthrough
CT: control target
= control target key end

     0   :  { %vm2422_vm0 = vcmask 1043456   ;;  %s6411_s1 = inlined_call_operand.vmem [shape: bf16[1152,256], index: 1, kind: input, shape index: {}]   ;;  %s6412_s0 = inlined_call_operand.vmem [shape: bf16[196,1152], index: 0, kind: input, shape index: {}]   ;;  %s6413_s2 = inlined_call_operand.vmem [shape: f32[256,256], index: 2, kind: input, shape index: {}]   ;;  %s6414_s3 = inlined_call_operand.vmem [shape: f32[1,256], index: 3, kind: input, shape index: {}]   ;;  %s6415_s4 = inlined_call_operand.vmem [shape: f32[1,256], index: 4, kind: input, shape index: {}]   ;;  %s6416_s5 = inlined_call_operand.vmem [shape: bf16[196,256], index: 5, kind: output, shape index: {}]  }
   0x1   :  { %v3905_v0 = vld [vmem:[%s6411_s1 + $0x4] ss:$8 sps:$4 sm:$0xff]   ;;  %v3909_v2 = vld [vmem:[%s6411_s1] ss:$8 sps:$4 sm:$0xff]   ;;  %v3911_v4 = vld [vmem:[%s6411_s1 + $0x14] ss:$8 sps:$4 sm:$0xff]  }
   0x2   :  { %v3907_v1 = vld [vmem:[%s6411_s1 + $0x204] ss:$8 sps:$4 sm:$0xff]   ;;  %1594 = vmatprep.subr.bf16.mxu1 %v3905_v0  ;;  %v3910_v3 = vld [vmem:[%s6411_s1 + $0x200] ss:$8 sps:$4 sm:$0xff]   ;;  %v3913_v5 = vld [vmem:[%s6411_s1 + $0x214] ss:$8 sps:$4 sm:$0xff]  }
   0x3   :  { %1916 = vmatprep.subr.bf16.mxu0 %v3907_v1  ;;  %1595 = vmatpush1.bf16.msra.mxu1 %v3909_v2  ;;  %v3915_v6 = vld [vmem:[%s6411_s1 + $0x10] ss:$8 sps:$4 sm:$0xff]   ;;  %v3917_v8 = vld [vmem:[%s6411_s1 + $0x24] ss:$8 sps:$4 sm:$0xff]   ;;  %v3921_v10 = vld [vmem:[%s6411_s1 + $0x20] ss:$8 sps:$4 sm:$0xff]  }
   0x4   :  { %1917 = vmatpush1.bf16.msra.mxu0 %v3910_v3  ;;  %1596 = vmatprep.subr.bf16.mxu1 %v3911_v4  ;;  %v3916_v7 = vld [vmem:[%s6411_s1 + $0x210] ss:$8 sps:$4 sm:$0xff]   ;;  %v3919_v9 = vld [vmem:[%s6411_s1 + $0x224] ss:$8 sps:$4 sm:$0xff]   ;;  %v3922_v11 = vld [vmem:[%s6411_s1 + $0x220] ss:$8 sps:$4 sm:$0xff]  }
   0x5   :  { %1918 = vmatprep.subr.bf16.mxu0 %v3913_v5  ;;  %v3923_v12 = vld [vmem:[%s6411_s1 + $0x34] ss:$8 sps:$4 sm:$0xff]   ;;  %v3927_v14 = vld [vmem:[%s6411_s1 + $0x30] ss:$8 sps:$4 sm:$0xff]   ;;  %v3929_v16 = vld [vmem:[%s6411_s1 + $0x44] ss:$8 sps:$4 sm:$0xff]  }
   0x6   :  { %v3925_v13 = vld [vmem:[%s6411_s1 + $0x234] ss:$8 sps:$4 sm:$0xff]   ;;  %v3928_v15 = vld [vmem:[%s6411_s1 + $0x230] ss:$8 sps:$4 sm:$0xff]   ;;  %v3931_v17 = vld [vmem:[%s6411_s1 + $0x244] ss:$8 sps:$4 sm:$0xff]  }
   0x7   :  { %1597 = vmatpush1.bf16.msra.mxu1 %v3915_v6  ;;  %v3933_v18 = vld [vmem:[%s6411_s1 + $0x40] ss:$8 sps:$4 sm:$0xff]   ;;  %v3935_v20 = vld [vmem:[%s6411_s1 + $0x54] ss:$8 sps:$4 sm:$0xff]   ;;  %v3939_v22 = vld [vmem:[%s6411_s1 + $0x50] ss:$8 sps:$4 sm:$0xff]  }
   0x8   :  { %1919 = vmatpush1.bf16.msra.mxu0 %v3916_v7  ;;  %1598 = vmatprep.subr.bf16.mxu1 %v3917_v8  ;;  %v3934_v19 = vld [vmem:[%s6411_s1 + $0x240] ss:$8 sps:$4 sm:$0xff]   ;;  %v3937_v21 = vld [vmem:[%s6411_s1 + $0x254] ss:$8 sps:$4 sm:$0xff]   ;;  %v3940_v23 = vld [vmem:[%s6411_s1 + $0x250] ss:$8 sps:$4 sm:$0xff]  }
   0x9   :  { %1920 = vmatprep.subr.bf16.mxu0 %v3919_v9  ;;  %v3941_v24 = vld [vmem:[%s6411_s1 + $0x64] ss:$8 sps:$4 sm:$0xff]   ;;  %v3945_v26 = vld [vmem:[%s6411_s1 + $0x60] ss:$8 sps:$4 sm:$0xff]   ;;  %v3947_v28 = vld [vmem:[%s6411_s1 + $0x74] ss:$8 sps:$4 sm:$0xff]  }
   0xa   :  { %v3943_v25 = vld [vmem:[%s6411_s1 + $0x264] ss:$8 sps:$4 sm:$0xff]   ;;  %v3946_v27 = vld [vmem:[%s6411_s1 + $0x260] ss:$8 sps:$4 sm:$0xff]   ;;  %v3949_v29 = vld [vmem:[%s6411_s1 + $0x274] ss:$8 sps:$4 sm:$0xff]  }
   0xb   :  { %1599 = vmatpush1.bf16.msra.mxu1 %v3921_v10  ;;  %v3951_v30 = vld [vmem:[%s6411_s1 + $0x70] ss:$8 sps:$4 sm:$0xff]   ;;  %v3953_v32 = vld [vmem:[%s6411_s1 + $0x84] ss:$8 sps:$4 sm:$0xff]   ;;  %v3957_v34 = vld [vmem:[%s6411_s1 + $0x80] ss:$8 sps:$4 sm:$0xff]  }
   0xc   :  { %1921 = vmatpush1.bf16.msra.mxu0 %v3922_v11  ;;  %1600 = vmatprep.subr.bf16.mxu1 %v3923_v12  ;;  %v3952_v31 = vld [vmem:[%s6411_s1 + $0x270] ss:$8 sps:$4 sm:$0xff]   ;;  %v3955_v33 = vld [vmem:[%s6411_s1 + $0x284] ss:$8 sps:$4 sm:$0xff]   ;;  %v3958_v35 = vld [vmem:[%s6411_s1 + $0x280] ss:$8 sps:$4 sm:$0xff]  }
   0xd   :  { %1922 = vmatprep.subr.bf16.mxu0 %v3925_v13  ;;  %v3959_v36 = vld [vmem:[%s6411_s1 + $0x94] ss:$8 sps:$4 sm:$0xff]   ;;  %v3963_v38 = vld [vmem:[%s6411_s1 + $0x90] ss:$8 sps:$4 sm:$0xff]   ;;  %v3965_v40 = vld [vmem:[%s6411_s1 + $0xa4] ss:$8 sps:$4 sm:$0xff]  }
   0xe   :  { %v3961_v37 = vld [vmem:[%s6411_s1 + $0x294] ss:$8 sps:$4 sm:$0xff]   ;;  %v3964_v39 = vld [vmem:[%s6411_s1 + $0x290] ss:$8 sps:$4 sm:$0xff]   ;;  %v3967_v41 = vld [vmem:[%s6411_s1 + $0x2a4] ss:$8 sps:$4 sm:$0xff]  }
   0xf   :  { %1601 = vmatpush1.bf16.msra.mxu1 %v3927_v14  ;;  %v3969_v42 = vld [vmem:[%s6411_s1 + $0xa0] ss:$8 sps:$4 sm:$0xff]   ;;  %v3971_v44 = vld [vmem:[%s6411_s1 + $0xb4] ss:$8 sps:$4 sm:$0xff]   ;;  %v3975_v46 = vld [vmem:[%s6411_s1 + $0xb0] ss:$8 sps:$4 sm:$0xff]  }
  0x10   :  { %1923 = vmatpush1.bf16.msra.mxu0 %v3928_v15  ;;  %1602 = vmatprep.subr.bf16.mxu1 %v3929_v16  ;;  %v3970_v43 = vld [vmem:[%s6411_s1 + $0x2a0] ss:$8 sps:$4 sm:$0xff]   ;;  %v3973_v45 = vld [vmem:[%s6411_s1 + $0x2b4] ss:$8 sps:$4 sm:$0xff]   ;;  %v3976_v47 = vld [vmem:[%s6411_s1 + $0x2b0] ss:$8 sps:$4 sm:$0xff]  }
  0x11   :  { %1924 = vmatprep.subr.bf16.mxu0 %v3931_v17  ;;  %v3977_v48 = vld [vmem:[%s6411_s1 + $0xc4] ss:$8 sps:$4 sm:$0xff]   ;;  %v4006_v51 = vld [vmem:[%s6412_s0 + $0x14] ss:$36 sps:$4 sm:$0xff]   ;;  %v3981_v52 = vld [vmem:[%s6411_s1 + $0xc0] ss:$8 sps:$4 sm:$0xff]  }
  0x12   :  { %v4003_v49 = vld [vmem:[%s6412_s0 + $0x4] ss:$36 sps:$4 sm:$0xff]   ;;  %1948 = vmatprep.mubr.bf16.mxu0 %v4006_v51  ;;  %v3983_v54 = vld [vmem:[%s6411_s1 + $0xd4] ss:$8 sps:$4 sm:$0xff]   ;;  %v3987_v56 = vld [vmem:[%s6411_s1 + $0xd0] ss:$8 sps:$4 sm:$0xff]  }
  0x13   :  { %1603 = vmatpush1.bf16.msra.mxu1 %v3933_v18  ;;  %v3979_v50 = vld [vmem:[%s6411_s1 + $0x2c4] ss:$8 sps:$4 sm:$0xff]   ;;  %1626 = vmatprep.mubr.bf16.mxu1 %v4003_v49  ;;  %v3982_v53 = vld [vmem:[%s6411_s1 + $0x2c0] ss:$8 sps:$4 sm:$0xff]   ;;  %v3985_v55 = vld [vmem:[%s6411_s1 + $0x2d4] ss:$8 sps:$4 sm:$0xff]  }
  0x14   :  { %1925 = vmatpush1.bf16.msra.mxu0 %v3934_v19  ;;  %1604 = vmatprep.subr.bf16.mxu1 %v3935_v20  ;;  %v3988_v57 = vld [vmem:[%s6411_s1 + $0x2d0] ss:$8 sps:$4 sm:$0xff]   ;;  %v3989_v58 = vld [vmem:[%s6411_s1 + $0xe4] ss:$8 sps:$4 sm:$0xff]   ;;  %v3993_v60 = vld [vmem:[%s6411_s1 + $0xe0] ss:$8 sps:$4 sm:$0xff]  }
  0x15   :  { %1926 = vmatprep.subr.bf16.mxu0 %v3937_v21  ;;  %v3991_v59 = vld [vmem:[%s6411_s1 + $0x2e4] ss:$8 sps:$4 sm:$0xff]   ;;  %v3994_v61 = vld [vmem:[%s6411_s1 + $0x2e0] ss:$8 sps:$4 sm:$0xff]   ;;  %v3995_v62 = vld [vmem:[%s6411_s1 + $0xf4] ss:$8 sps:$4 sm:$0xff]  }
  0x16   :  { %v3997_v63 = vld [vmem:[%s6411_s1 + $0x2f4] ss:$8 sps:$4 sm:$0xff]   ;;  %v3999_v0 = vld [vmem:[%s6411_s1 + $0xf0] ss:$8 sps:$4 sm:$0xff]   ;;  %v4009_v2 = vld [vmem:[%s6411_s1 + $0x304] ss:$8 sps:$4 sm:$0xff]  }
  0x17   :  { %1605 = vmatpush1.bf16.msra.mxu1 %v3939_v22  ;;  %v4000_v1 = vld [vmem:[%s6411_s1 + $0x2f0] ss:$8 sps:$4 sm:$0xff]   ;;  %v4001_v3 = vld [vmem:[%s6412_s0] ss:$36 sps:$4 sm:$0xff]   ;;  %v4016_v8 = vld [vmem:[%s6411_s1 + $0x314] ss:$8 sps:$4 sm:$0xff]  }
  0x18   :  { %1927 = vmatpush1.bf16.msra.mxu0 %v3940_v23  ;;  %1606 = vmatprep.subr.bf16.mxu1 %v3941_v24  ;;  %v4004_v4 = vld [vmem:[%s6412_s0 + $0x10] ss:$36 sps:$4 sm:$0xff]   ;;  %v4007_v5 = vld [vmem:[%s6411_s1 + $0x300] ss:$8 sps:$4 sm:$0xff]   ;;  %v4059_v11 = vld [vmem:[%s6411_s1 + $0x104] ss:$8 sps:$4 sm:$0xff]  }
  0x19   :  { %1928 = vmatprep.subr.bf16.mxu0 %v3943_v25  ;;  %v4010_v6 = vld [vmem:[%s6412_s0 + $0x4c] ss:$36 sps:$4 sm:$0xff]   ;;  %v4012_v7 = vld [vmem:[%s6412_s0 + $0x5c] ss:$36 sps:$4 sm:$0xff]   ;;  %v4022_v17 = vld [vmem:[%s6412_s0 + $0x94] ss:$36 sps:$4 sm:$0xff]  }
  0x1a   :  { %v4014_v9 = vld [vmem:[%s6411_s1 + $0x310] ss:$8 sps:$4 sm:$0xff]   ;;  %v4057_v10 = vld [vmem:[%s6411_s1 + $0x100] ss:$8 sps:$4 sm:$0xff]   ;;  %v4021_v13 = vld [vmem:[%s6411_s1 + $0x324] ss:$8 sps:$4 sm:$0xff]  }
  0x1b   :  { %1607 = vmatpush1.bf16.msra.mxu1 %v3945_v26  ;;  %v4017_v12 = vld [vmem:[%s6412_s0 + $0x48] ss:$36 sps:$4 sm:$0xff]   ;;  %v4018_v14 = vld [vmem:[%s6412_s0 + $0x58] ss:$36 sps:$4 sm:$0xff]   ;;  %v4026_v23 = vld [vmem:[%s6412_s0 + $0x90] ss:$36 sps:$4 sm:$0xff]  }
  0x1c   :  { %1929 = vmatpush1.bf16.msra.mxu0 %v3946_v27  ;;  %1608 = vmatprep.subr.bf16.mxu1 %v3947_v28  ;;  %v4063_v15 = vld [vmem:[%s6411_s1 + $0x114] ss:$8 sps:$4 sm:$0xff]   ;;  %v4019_v16 = vld [vmem:[%s6411_s1 + $0x320] ss:$8 sps:$4 sm:$0xff]   ;;  %v4061_v20 = vld [vmem:[%s6411_s1 + $0x110] ss:$8 sps:$4 sm:$0xff]  }
  0x1d   :  { %1930 = vmatprep.subr.bf16.mxu0 %v3949_v29  ;;  %v4024_v18 = vld [vmem:[%s6412_s0 + $0xa4] ss:$36 sps:$4 sm:$0xff]   ;;  %v4030_v19 = vld [vmem:[%s6411_s1 + $0x334] ss:$8 sps:$4 sm:$0xff]   ;;  %v4028_v22 = vld [vmem:[%s6411_s1 + $0x330] ss:$8 sps:$4 sm:$0xff]  }
  0x1e   :  { %v4074_v21 = vld [vmem:[%s6411_s1 + $0x124] ss:$8 sps:$4 sm:$0xff]   ;;  %v4072_v26 = vld [vmem:[%s6411_s1 + $0x120] ss:$8 sps:$4 sm:$0xff]  }
  0x1f   :  { %1609 = vmatpush1.bf16.msra.mxu1 %v3951_v30  ;;  %v4039_v24 = vld [vmem:[%s6411_s1 + $0x344] ss:$8 sps:$4 sm:$0xff]   ;;  %v4031_v27 = vld [vmem:[%s6412_s0 + $0xdc] ss:$36 sps:$4 sm:$0xff]  }
  0x20   :  { %1931 = vmatpush1.bf16.msra.mxu0 %v3952_v31  ;;  %1610 = vmatprep.subr.bf16.mxu1 %v3953_v32  ;;  %v4027_v25 = vld [vmem:[%s6412_s0 + $0xa0] ss:$36 sps:$4 sm:$0xff]   ;;  %v4033_v28 = vld [vmem:[%s6412_s0 + $0xec] ss:$36 sps:$4 sm:$0xff]   ;;  %v4078_v30 = vld [vmem:[%s6411_s1 + $0x134] ss:$8 sps:$4 sm:$0xff]  }
  0x21   :  { %1932 = vmatprep.subr.bf16.mxu0 %v3955_v33  ;;  %v4037_v29 = vld [vmem:[%s6411_s1 + $0x340] ss:$8 sps:$4 sm:$0xff]   ;;  %v4048_v31 = vld [vmem:[%s6411_s1 + $0x354] ss:$8 sps:$4 sm:$0xff]   ;;  %v4076_v32 = vld [vmem:[%s6411_s1 + $0x130] ss:$8 sps:$4 sm:$0xff]  }
  0x22   :  { %v4089_v33 = vld [vmem:[%s6411_s1 + $0x144] ss:$8 sps:$4 sm:$0xff]   ;;  %v4102_v49 = vld [vmem:[%s6411_s1 + $0x160] ss:$8 sps:$4 sm:$0xff]  }
  0x23   :  { %1611 = vmatpush1.bf16.msra.mxu1 %v3957_v34  ;;  %v4046_v34 = vld [vmem:[%s6411_s1 + $0x350] ss:$8 sps:$4 sm:$0xff]  }
  0x24   :  { %1933 = vmatpush1.bf16.msra.mxu0 %v3958_v35  ;;  %1612 = vmatprep.subr.bf16.mxu1 %v3959_v36  ;;  %v4035_v35 = vld [vmem:[%s6412_s0 + $0xd8] ss:$36 sps:$4 sm:$0xff]   ;;  %v4055_v36 = vld [vmem:[%s6411_s1 + $0x364] ss:$8 sps:$4 sm:$0xff]  }
  0x25   :  { %1934 = vmatprep.subr.bf16.mxu0 %v3961_v37  ;;  %v4087_v37 = vld [vmem:[%s6411_s1 + $0x140] ss:$8 sps:$4 sm:$0xff]   ;;  %v4049_v51 = vld [vmem:[%s6412_s0 + $0x16c] ss:$36 sps:$4 sm:$0xff]  }
  0x27   :  { %1613 = vmatpush1.bf16.msra.mxu1 %v3963_v38  ;;  %v4036_v38 = vld [vmem:[%s6412_s0 + $0xe8] ss:$36 sps:$4 sm:$0xff]  }
  0x28   :  { %1935 = vmatpush1.bf16.msra.mxu0 %v3964_v39  ;;  %1614 = vmatprep.subr.bf16.mxu1 %v3965_v40  ;;  %v4040_v39 = vld [vmem:[%s6412_s0 + $0x124] ss:$36 sps:$4 sm:$0xff]   ;;  %v4042_v40 = vld [vmem:[%s6412_s0 + $0x134] ss:$36 sps:$4 sm:$0xff]  }
  0x29   :  { %1936 = vmatprep.subr.bf16.mxu0 %v3967_v41  ;;  %v4053_v41 = vld [vmem:[%s6411_s1 + $0x360] ss:$8 sps:$4 sm:$0xff]  }
  0x2b   :  { %1615 = vmatpush1.bf16.msra.mxu1 %v3969_v42  ;;  %v4096_v42 = vld [vmem:[%s6411_s1 + $0x154] ss:$8 sps:$4 sm:$0xff]  }
  0x2c   :  { %1937 = vmatpush1.bf16.msra.mxu0 %v3970_v43  ;;  %1616 = vmatprep.subr.bf16.mxu1 %v3971_v44  ;;  %v4066_v43 = vld [vmem:[%s6411_s1 + $0x374] ss:$8 sps:$4 sm:$0xff]   ;;  %v4094_v44 = vld [vmem:[%s6411_s1 + $0x150] ss:$8 sps:$4 sm:$0xff]  }
  0x2d   :  { %1938 = vmatprep.subr.bf16.mxu0 %v3973_v45  ;;  %v4104_v45 = vld [vmem:[%s6411_s1 + $0x164] ss:$8 sps:$4 sm:$0xff]  }
  0x2f   :  { %1617 = vmatpush1.bf16.msra.mxu1 %v3975_v46  ;;  %v4064_v46 = vld [vmem:[%s6411_s1 + $0x370] ss:$8 sps:$4 sm:$0xff]  }
  0x30   :  { %1939 = vmatpush1.bf16.msra.mxu0 %v3976_v47  ;;  %1618 = vmatprep.subr.bf16.mxu1 %v3977_v48  ;;  %v4044_v47 = vld [vmem:[%s6412_s0 + $0x120] ss:$36 sps:$4 sm:$0xff]  }
  0x31   :  { %1940 = vmatprep.subr.bf16.mxu0 %v3979_v50  ;;  %v4081_v48 = vld [vmem:[%s6411_s1 + $0x384] ss:$8 sps:$4 sm:$0xff]   ;;  %v4045_v50 = vld [vmem:[%s6412_s0 + $0x130] ss:$36 sps:$4 sm:$0xff]  }
  0x33   :  { %1619 = vmatpush1.bf16.msra.mxu1 %v3981_v52  ;;  %v4051_v52 = vld [vmem:[%s6412_s0 + $0x17c] ss:$36 sps:$4 sm:$0xff]  }
  0x34   :  { %1941 = vmatpush1.bf16.msra.mxu0 %v3982_v53  ;;  %1620 = vmatprep.subr.bf16.mxu1 %v3983_v54  ;;  %v4079_v53 = vld [vmem:[%s6411_s1 + $0x380] ss:$8 sps:$4 sm:$0xff]   ;;  %v4111_v54 = vld [vmem:[%s6411_s1 + $0x174] ss:$8 sps:$4 sm:$0xff]  }
  0x35   :  { %1942 = vmatprep.subr.bf16.mxu0 %v3985_v55  ;;  %v4093_v55 = vld [vmem:[%s6411_s1 + $0x394] ss:$8 sps:$4 sm:$0xff]  }
  0x37   :  { %1621 = vmatpush1.bf16.msra.mxu1 %v3987_v56  ;;  %v4109_v56 = vld [vmem:[%s6411_s1 + $0x170] ss:$8 sps:$4 sm:$0xff]  }
  0x38   :  { %1943 = vmatpush1.bf16.msra.mxu0 %v3988_v57  ;;  %1622 = vmatprep.subr.bf16.mxu1 %v3989_v58  ;;  %v4119_v57 = vld [vmem:[%s6411_s1 + $0x184] ss:$8 sps:$4 sm:$0xff]   ;;  %v4091_v58 = vld [vmem:[%s6411_s1 + $0x390] ss:$8 sps:$4 sm:$0xff]  }
  0x39   :  { %1944 = vmatprep.subr.bf16.mxu0 %v3991_v59  ;;  %v4056_v59 = vld [vmem:[%s6412_s0 + $0x168] ss:$36 sps:$4 sm:$0xff]  }
  0x3b   :  { %1623 = vmatpush1.bf16.msra.mxu1 %v3993_v60  ;;  %v4108_v60 = vld [vmem:[%s6411_s1 + $0x3a4] ss:$8 sps:$4 sm:$0xff]  }
  0x3c   :  { %1945 = vmatpush1.bf16.msra.mxu0 %v3994_v61  ;;  %1624 = vmatprep.subr.bf16.mxu1 %v3995_v62  ;;  %v4117_v61 = vld [vmem:[%s6411_s1 + $0x180] ss:$8 sps:$4 sm:$0xff]   ;;  %v4060_v62 = vld [vmem:[%s6412_s0 + $0x178] ss:$36 sps:$4 sm:$0xff]  }
  0x3d   :  { %1946 = vmatprep.subr.bf16.mxu0 %v3997_v63  ;;  %v4067_v63 = vld [vmem:[%s6412_s0 + $0x1b4] ss:$36 sps:$4 sm:$0xff]  }
  0x3f   :  { %1625 = vmatpush1.bf16.msra.mxu1 %v3999_v0  ;;  %v4069_v0 = vld [vmem:[%s6412_s0 + $0x1c4] ss:$36 sps:$4 sm:$0xff]  }
  0x40   :  { %1947 = vmatpush1.bf16.msra.mxu0 %v4000_v1  ;;  %1755 = vmatprep.subr.bf16.mxu1 %v4059_v11  ;;  %v4106_v1 = vld [vmem:[%s6411_s1 + $0x3a0] ss:$8 sps:$4 sm:$0xff]  }
  0x41   :  { %2077 = vmatprep.subr.bf16.mxu0 %v4009_v2  ;;  %v4126_v2 = vld [vmem:[%s6411_s1 + $0x194] ss:$8 sps:$4 sm:$0xff]  }
  0x42   :  { %1627 = vmatmul.mubr.bf16.vlgmr.msra.gmra.mrb[0].mxu1 %v4001_v3  ;;  %v4123_v3 = vld [vmem:[%s6411_s1 + $0x3b4] ss:$8 sps:$4 sm:$0xff]  }
  0x43   :  { %1949 = vmatmul.mubr.bf16.vlgmr.msra.gmra.mrb[0].mxu0 %v4004_v4  ;;  %1636 = vmatprep.mubr.bf16.mxu1 %v4010_v6  ;;  %v4124_v4 = vld [vmem:[%s6411_s1 + $0x190] ss:$8 sps:$4 sm:$0xff]   ;;  %v4082_v11 = vld [vmem:[%s6412_s0 + $0x1fc] ss:$36 sps:$4 sm:$0xff]  }
  0x44   :  { %2078 = vmatpush1.bf16.msra.mxu0 %v4007_v5  ;;  %1958 = vmatprep.mubr.bf16.mxu0 %v4012_v7  ;;  %v4137_v5 = vld [vmem:[%s6411_s1 + $0x1a4] ss:$8 sps:$4 sm:$0xff]   ;;  %v4071_v6 = vld [vmem:[%s6412_s0 + $0x1b0] ss:$36 sps:$4 sm:$0xff]  }
  0x45   :  { %2079 = vmatprep.subr.bf16.mxu0 %v4016_v8  ;;  %1756 = vmatpush1.bf16.msra.mxu1 %v4057_v10  ;;  %v4121_v7 = vld [vmem:[%s6411_s1 + $0x3b0] ss:$8 sps:$4 sm:$0xff]   ;;  %v4129_v8 = vld [vmem:[%s6411_s1 + $0x3c4] ss:$8 sps:$4 sm:$0xff]  }
  0x46   :  { %1757 = vmatprep.subr.bf16.mxu1 %v4063_v15  ;;  %v4075_v10 = vld [vmem:[%s6412_s0 + $0x1c0] ss:$36 sps:$4 sm:$0xff]   ;;  %v4141_v15 = vld [vmem:[%s6411_s1 + $0x1b4] ss:$8 sps:$4 sm:$0xff]  }
  0x48   :  { %2080 = vmatpush1.bf16.msra.mxu0 %v4014_v9  ;;  %v4135_v9 = vld [vmem:[%s6411_s1 + $0x1a0] ss:$8 sps:$4 sm:$0xff]  }
  0x49   :  { %2081 = vmatprep.subr.bf16.mxu0 %v4021_v13  ;;  %1758 = vmatpush1.bf16.msra.mxu1 %v4061_v20  ;;  %v4127_v13 = vld [vmem:[%s6411_s1 + $0x3c0] ss:$8 sps:$4 sm:$0xff]   ;;  %v4142_v20 = vld [vmem:[%s6411_s1 + $0x3d0] ss:$8 sps:$4 sm:$0xff]  }
  0x4a   :  { %1637 = vmatmul.mubr.bf16.gmra.mrb[4].mxu1 %v4017_v12  ;;  %1759 = vmatprep.subr.bf16.mxu1 %v4074_v21  ;;  %v4084_v12 = vld [vmem:[%s6412_s0 + $0x20c] ss:$36 sps:$4 sm:$0xff]   ;;  %v4150_v21 = vld [vmem:[%s6411_s1 + $0x1c0] ss:$8 sps:$4 sm:$0xff]  }
  0x4b   :  { %1959 = vmatmul.mubr.bf16.gmra.mrb[4].mxu0 %v4018_v14  ;;  %1646 = vmatprep.mubr.bf16.mxu1 %v4022_v17  ;;  %v4139_v14 = vld [vmem:[%s6411_s1 + $0x1b0] ss:$8 sps:$4 sm:$0xff]   ;;  %v4152_v17 = vld [vmem:[%s6411_s1 + $0x1c4] ss:$8 sps:$4 sm:$0xff]  }
  0x4c   :  { %2082 = vmatpush1.bf16.msra.mxu0 %v4019_v16  ;;  %1968 = vmatprep.mubr.bf16.mxu0 %v4024_v18  ;;  %v4144_v16 = vld [vmem:[%s6411_s1 + $0x3d4] ss:$8 sps:$4 sm:$0xff]  }
  0x4d   :  { %2083 = vmatprep.subr.bf16.mxu0 %v4030_v19  ;;  %1760 = vmatpush1.bf16.msra.mxu1 %v4072_v26  ;;  %v4086_v18 = vld [vmem:[%s6412_s0 + $0x1f8] ss:$36 sps:$4 sm:$0xff]   ;;  %v4090_v19 = vld [vmem:[%s6412_s0 + $0x208] ss:$36 sps:$4 sm:$0xff]  }
  0x4e   :  { %1761 = vmatprep.subr.bf16.mxu1 %v4078_v30  ;;  %v4157_v26 = vld [vmem:[%s6411_s1 + $0x1d0] ss:$8 sps:$4 sm:$0xff]   ;;  %v4101_v30 = vld [vmem:[%s6412_s0 + $0x240] ss:$36 sps:$4 sm:$0xff]  }
  0x50   :  { %2084 = vmatpush1.bf16.msra.mxu0 %v4028_v22  ;;  %v4156_v22 = vld [vmem:[%s6411_s1 + $0x3e4] ss:$8 sps:$4 sm:$0xff]  }
  0x51   :  { %2085 = vmatprep.subr.bf16.mxu0 %v4039_v24  ;;  %1762 = vmatpush1.bf16.msra.mxu1 %v4076_v32  ;;  %v4099_v24 = vld [vmem:[%s6412_s0 + $0x254] ss:$36 sps:$4 sm:$0xff]  }
  0x52   :  { %1647 = vmatmul.mubr.bf16.gmra.mrb[8].mxu1 %v4026_v23  ;;  %1763 = vmatprep.subr.bf16.mxu1 %v4089_v33  ;;  %v4097_v23 = vld [vmem:[%s6412_s0 + $0x244] ss:$36 sps:$4 sm:$0xff]   ;;  %v4167_v32 = vld [vmem:[%s6411_s1 + $0x3f0] ss:$8 sps:$4 sm:$0xff]  }
  0x53   :  { %1969 = vmatmul.mubr.bf16.gmra.mrb[8].mxu0 %v4027_v25  ;;  %1656 = vmatprep.mubr.bf16.mxu1 %v4031_v27  ;;  %v4154_v25 = vld [vmem:[%s6411_s1 + $0x3e0] ss:$8 sps:$4 sm:$0xff]   ;;  %v4159_v27 = vld [vmem:[%s6411_s1 + $0x1d4] ss:$8 sps:$4 sm:$0xff]   ;;  %v4181_v33 = vld [vmem:[%s6411_s1 + $0x404] ss:$8 sps:$4 sm:$0xff]  }
  0x54   :  { %1978 = vmatprep.mubr.bf16.mxu0 %v4033_v28  ;;  %2086 = vmatpush1.bf16.msra.mxu0 %v4037_v29  ;;  %v4169_v28 = vld [vmem:[%s6411_s1 + $0x3f4] ss:$8 sps:$4 sm:$0xff]   ;;  %v4165_v29 = vld [vmem:[%s6411_s1 + $0x1e4] ss:$8 sps:$4 sm:$0xff]  }
  0x55   :  { %2087 = vmatprep.subr.bf16.mxu0 %v4048_v31  ;;  %1764 = vmatpush1.bf16.msra.mxu1 %v4087_v37  ;;  %v4163_v31 = vld [vmem:[%s6411_s1 + $0x1e0] ss:$8 sps:$4 sm:$0xff]   ;;  %v4172_v37 = vld [vmem:[%s6411_s1 + $0x1f4] ss:$8 sps:$4 sm:$0xff]  }
  0x56   :  { %1765 = vmatprep.subr.bf16.mxu1 %v4096_v42  ;;  %v4132_v42 = vld [vmem:[%s6412_s0 + $0x2e4] ss:$36 sps:$4 sm:$0xff]  }
  0x58   :  { %2088 = vmatpush1.bf16.msra.mxu0 %v4046_v34  ;;  %v4105_v34 = vld [vmem:[%s6412_s0 + $0x250] ss:$36 sps:$4 sm:$0xff]  }
  0x59   :  { %2089 = vmatprep.subr.bf16.mxu0 %v4055_v36  ;;  %1766 = vmatpush1.bf16.msra.mxu1 %v4094_v44  ;;  %v4114_v36 = vld [vmem:[%s6412_s0 + $0x29c] ss:$36 sps:$4 sm:$0xff]  }
  0x5a   :  { %1657 = vmatmul.mubr.bf16.gmra.mrb[12].mxu1 %v4035_v35  ;;  %1767 = vmatprep.subr.bf16.mxu1 %v4104_v45  ;;  %v4112_v35 = vld [vmem:[%s6412_s0 + $0x28c] ss:$36 sps:$4 sm:$0xff]   ;;  %v4138_v44 = vld [vmem:[%s6412_s0 + $0x2e0] ss:$36 sps:$4 sm:$0xff]  }
  0x5b   :  { %1979 = vmatmul.mubr.bf16.gmra.mrb[12].mxu0 %v4036_v38  ;;  %1666 = vmatprep.mubr.bf16.mxu1 %v4040_v39  ;;  %v4170_v38 = vld [vmem:[%s6411_s1 + $0x1f0] ss:$8 sps:$4 sm:$0xff]   ;;  %v4116_v39 = vld [vmem:[%s6412_s0 + $0x288] ss:$36 sps:$4 sm:$0xff]   ;;  %v4145_v45 = vld [vmem:[%s6412_s0 + $0x31c] ss:$36 sps:$4 sm:$0xff]  }
  0x5c   :  { %1988 = vmatprep.mubr.bf16.mxu0 %v4042_v40  ;;  %2090 = vmatpush1.bf16.msra.mxu0 %v4053_v41  ;;  %v4120_v40 = vld [vmem:[%s6412_s0 + $0x298] ss:$36 sps:$4 sm:$0xff]  }
  0x5d   :  { %2091 = vmatprep.subr.bf16.mxu0 %v4066_v43  ;;  %1768 = vmatpush1.bf16.msra.mxu1 %v4102_v49  ;;  %v4130_v41 = vld [vmem:[%s6412_s0 + $0x2d4] ss:$36 sps:$4 sm:$0xff]  }
  0x5e   :  { %1769 = vmatprep.subr.bf16.mxu1 %v4111_v54  ;;  %v4134_v43 = vld [vmem:[%s6412_s0 + $0x2d0] ss:$36 sps:$4 sm:$0xff]   ;;  %v4149_v49 = vld [vmem:[%s6412_s0 + $0x318] ss:$36 sps:$4 sm:$0xff]  }
  0x60   :  { %2092 = vmatpush1.bf16.msra.mxu0 %v4064_v46  ;;  %v4147_v46 = vld [vmem:[%s6412_s0 + $0x32c] ss:$36 sps:$4 sm:$0xff]  }
  0x61   :  { %2093 = vmatprep.subr.bf16.mxu0 %v4081_v48  ;;  %1770 = vmatpush1.bf16.msra.mxu1 %v4109_v56  ;;  %v143_v48 = vld [vmem:[%s6412_s0 + $0x370] sm:$0x33]  ;;  %v4178_v56 = vld [vmem:[%s6412_s0 + $0x1c] ss:$36 sps:$4 sm:$0xff]  }
  0x62   :  { %1667 = vmatmul.mubr.bf16.gmra.mrb[16].mxu1 %v4044_v47  ;;  %1771 = vmatprep.subr.bf16.mxu1 %v4119_v57  ;;  %v141_v47 = vld [vmem:[%s6412_s0 + $0x360] sm:$0x33]  ;;  %v3371_v54 = vcombine.low %v143_v48, %v143_v48  ;;  %v4173_v57 = vld [vmem:[%s6412_s0 + $0x8] ss:$36 sps:$4 sm:$0xff]  }
  0x63   :  { %1989 = vmatmul.mubr.bf16.gmra.mrb[16].mxu0 %v4045_v50  ;;  %1676 = vmatprep.mubr.bf16.mxu1 %v4049_v51  ;;  %v4153_v50 = vld [vmem:[%s6412_s0 + $0x328] ss:$36 sps:$4 sm:$0xff]   ;;  %v3368_v51 = vcombine.high %v141_v47, %v141_v47 }
  0x64   :  { %1998 = vmatprep.mubr.bf16.mxu0 %v4051_v52  ;;  %2094 = vmatpush1.bf16.msra.mxu0 %v4079_v53  ;;  %v3372_v52 = vcombine.high %v143_v48, %v143_v48  ;;  %v3367_v53 = vcombine.low %v141_v47, %v141_v47  ;;  %v4256_v47 = vld [vmem:[%s6412_s0 + $0x2ec] ss:$36 sps:$4 sm:$0xff]   ;;  %v4258_v48 = vld [vmem:[%s6412_s0 + $0x2d8] ss:$36 sps:$4 sm:$0xff]  }
  0x65   :  { %2095 = vmatprep.subr.bf16.mxu0 %v4093_v55  ;;  %1772 = vmatpush1.bf16.msra.mxu1 %v4117_v61  ;;  %v4175_v55 = vld [vmem:[%s6412_s0 + $0xc] ss:$36 sps:$4 sm:$0xff]   ;;  %v4184_v61 = vld [vmem:[%s6412_s0 + $0x64] ss:$36 sps:$4 sm:$0xff]  }
  0x66   :  { %1773 = vmatprep.subr.bf16.mxu1 %v4126_v2  ;;  %v4187_v2 = vld [vmem:[%s6412_s0 + $0x60] ss:$36 sps:$4 sm:$0xff]  }
  0x68   :  { %2096 = vmatpush1.bf16.msra.mxu0 %v4091_v58  ;;  %v4176_v58 = vld [vmem:[%s6412_s0 + $0x18] ss:$36 sps:$4 sm:$0xff]  }
  0x69   :  { %2097 = vmatprep.subr.bf16.mxu0 %v4108_v60  ;;  %1774 = vmatpush1.bf16.msra.mxu1 %v4124_v4  ;;  %v4182_v60 = vld [vmem:[%s6412_s0 + $0x54] ss:$36 sps:$4 sm:$0xff]   ;;  %v4193_v4 = vld [vmem:[%s6412_s0 + $0xac] ss:$36 sps:$4 sm:$0xff]  }
  0x6a   :  { %1677 = vmatmul.mubr.bf16.gmra.mrb[20].mxu1 %v4056_v59  ;;  %1775 = vmatprep.subr.bf16.mxu1 %v4137_v5  ;;  %v4179_v59 = vld [vmem:[%s6411_s1 + $0x400] ss:$8 sps:$4 sm:$0xff]  }
  0x6b   :  { %1999 = vmatmul.mubr.bf16.gmra.mrb[20].mxu0 %v4060_v62  ;;  %1686 = vmatprep.mubr.bf16.mxu1 %v4067_v63  ;;  %v4190_v62 = vld [vmem:[%s6411_s1 + $0x414] ss:$8 sps:$4 sm:$0xff]   ;;  %v4188_v63 = vld [vmem:[%s6411_s1 + $0x410] ss:$8 sps:$4 sm:$0xff]   ;;  %v4203_v5 = vld [vmem:[%s6411_s1 + $0x420] ss:$8 sps:$4 sm:$0xff]  }
  0x6c   :  { %2008 = vmatprep.mubr.bf16.mxu0 %v4069_v0  ;;  %2098 = vmatpush1.bf16.msra.mxu0 %v4106_v1  ;;  %v4205_v0 = vld [vmem:[%s6411_s1 + $0x424] ss:$8 sps:$4 sm:$0xff]   ;;  %v4186_v1 = vld [vmem:[%s6412_s0 + $0x50] ss:$36 sps:$4 sm:$0xff]  }
  0x6d   :  { %2099 = vmatprep.subr.bf16.mxu0 %v4123_v3  ;;  %1776 = vmatpush1.bf16.msra.mxu1 %v4135_v9  ;;  %v4191_v3 = vld [vmem:[%s6412_s0 + $0x9c] ss:$36 sps:$4 sm:$0xff]  }
  0x6e   :  { %1777 = vmatprep.subr.bf16.mxu1 %v4141_v15  ;;  %v4195_v9 = vld [vmem:[%s6412_s0 + $0x98] ss:$36 sps:$4 sm:$0xff]  }
  0x6f   :  { %v4242_v15 = vld [vmem:[%s6411_s1 + $0x450] ss:$8 sps:$4 sm:$0xff]  }
  0x70   :  { %2100 = vmatpush1.bf16.msra.mxu0 %v4121_v7  ;;  %v4216_v7 = vld [vmem:[%s6411_s1 + $0x430] ss:$8 sps:$4 sm:$0xff]  }
  0x71   :  { %2101 = vmatprep.subr.bf16.mxu0 %v4129_v8  ;;  %1778 = vmatpush1.bf16.msra.mxu1 %v4139_v14  ;;  %v4229_v8 = vld [vmem:[%s6411_s1 + $0x444] ss:$8 sps:$4 sm:$0xff]   ;;  %v4244_v14 = vld [vmem:[%s6411_s1 + $0x454] ss:$8 sps:$4 sm:$0xff]  }
  0x72   :  { %1687 = vmatmul.mubr.bf16.gmra.mrb[24].mxu1 %v4071_v6  ;;  %1779 = vmatprep.subr.bf16.mxu1 %v4152_v17  ;;  %v4218_v6 = vld [vmem:[%s6411_s1 + $0x434] ss:$8 sps:$4 sm:$0xff]   ;;  %v4201_v17 = vld [vmem:[%s6412_s0 + $0xe0] ss:$36 sps:$4 sm:$0xff]  }
  0x73   :  { %2009 = vmatmul.mubr.bf16.gmra.mrb[24].mxu0 %v4075_v10  ;;  %1696 = vmatprep.mubr.bf16.mxu1 %v4082_v11  ;;  %v4196_v10 = vld [vmem:[%s6412_s0 + $0xa8] ss:$36 sps:$4 sm:$0xff]  }
  0x74   :  { %2018 = vmatprep.mubr.bf16.mxu0 %v4084_v12  ;;  %2102 = vmatpush1.bf16.msra.mxu0 %v4127_v13  ;;  %v4197_v11 = vld [vmem:[%s6412_s0 + $0xe4] ss:$36 sps:$4 sm:$0xff]   ;;  %v4199_v12 = vld [vmem:[%s6412_s0 + $0xf4] ss:$36 sps:$4 sm:$0xff]  }
  0x75   :  { %2103 = vmatprep.subr.bf16.mxu0 %v4144_v16  ;;  %1780 = vmatpush1.bf16.msra.mxu1 %v4150_v21  ;;  %v4227_v13 = vld [vmem:[%s6411_s1 + $0x440] ss:$8 sps:$4 sm:$0xff]   ;;  %v4253_v16 = vld [vmem:[%s6411_s1 + $0x464] ss:$8 sps:$4 sm:$0xff]  }
  0x76   :  { %1781 = vmatprep.subr.bf16.mxu1 %v4159_v27  ;;  %v4251_v21 = vld [vmem:[%s6411_s1 + $0x460] ss:$8 sps:$4 sm:$0xff]  }
  0x77   :  { %v4214_v27 = vld [vmem:[%s6412_s0 + $0x184] ss:$36 sps:$4 sm:$0xff]  }
  0x78   :  { %2104 = vmatpush1.bf16.msra.mxu0 %v4142_v20  ;;  %v4208_v20 = vld [vmem:[%s6412_s0 + $0x13c] ss:$36 sps:$4 sm:$0xff]  }
  0x79   :  { %2105 = vmatprep.subr.bf16.mxu0 %v4156_v22  ;;  %1782 = vmatpush1.bf16.msra.mxu1 %v4157_v26  ;;  %v4268_v22 = vld [vmem:[%s6411_s1 + $0x474] ss:$8 sps:$4 sm:$0xff]  }
  0x7a   :  { %1697 = vmatmul.mubr.bf16.gmra.mrb[28].mxu1 %v4086_v18  ;;  %1783 = vmatprep.subr.bf16.mxu1 %v4165_v29  ;;  %v4202_v18 = vld [vmem:[%s6412_s0 + $0xf0] ss:$36 sps:$4 sm:$0xff]   ;;  %v4220_v29 = vld [vmem:[%s6412_s0 + $0x180] ss:$36 sps:$4 sm:$0xff]  }
  0x7b   :  { %2019 = vmatmul.mubr.bf16.gmra.mrb[28].mxu0 %v4090_v19  ;;  %1706 = vmatprep.mubr.bf16.mxu1 %v4097_v23  ;;  %v4206_v19 = vld [vmem:[%s6412_s0 + $0x12c] ss:$36 sps:$4 sm:$0xff]   ;;  %v4212_v26 = vld [vmem:[%s6412_s0 + $0x174] ss:$36 sps:$4 sm:$0xff]  }
  0x7c   :  { %2028 = vmatprep.mubr.bf16.mxu0 %v4099_v24  ;;  %2106 = vmatpush1.bf16.msra.mxu0 %v4154_v25  ;;  %v4266_v23 = vld [vmem:[%s6411_s1 + $0x470] ss:$8 sps:$4 sm:$0xff]   ;;  %v4210_v24 = vld [vmem:[%s6412_s0 + $0x128] ss:$36 sps:$4 sm:$0xff]  }
  0x7d   :  { %2107 = vmatprep.subr.bf16.mxu0 %v4169_v28  ;;  %1784 = vmatpush1.bf16.msra.mxu1 %v4163_v31  ;;  %v4211_v25 = vld [vmem:[%s6412_s0 + $0x138] ss:$36 sps:$4 sm:$0xff]   ;;  %v4219_v28 = vld [vmem:[%s6412_s0 + $0x170] ss:$36 sps:$4 sm:$0xff]  }
  0x7e   :  { %1785 = vmatprep.subr.bf16.mxu1 %v4172_v37  ;;  %v4223_v31 = vld [vmem:[%s6412_s0 + $0x1cc] ss:$36 sps:$4 sm:$0xff]  }
  0x7f   :  { %v4235_v37 = vld [vmem:[%s6412_s0 + $0x210] ss:$36 sps:$4 sm:$0xff]  }
  0x80   :  { %2108 = vmatpush1.bf16.msra.mxu0 %v4167_v32  ;;  %v4225_v32 = vld [vmem:[%s6412_s0 + $0x1b8] ss:$36 sps:$4 sm:$0xff]  }
  0x81   :  { %2238 = vmatprep.subr.bf16.mxu0 %v4181_v33  ;;  %1786 = vmatpush1.bf16.msra.mxu1 %v4170_v38  ;;  %v4226_v33 = vld [vmem:[%s6412_s0 + $0x1c8] ss:$36 sps:$4 sm:$0xff]  }
  0x82   :  { %1707 = vmatmul.mubr.bf16.gmra.mrb[32].mxu1 %v4101_v30  ;;  %v4221_v30 = vld [vmem:[%s6412_s0 + $0x1bc] ss:$36 sps:$4 sm:$0xff]   ;;  %v4236_v38 = vld [vmem:[%s6412_s0 + $0x24c] ss:$36 sps:$4 sm:$0xff]  }
  0x83   :  { %2029 = vmatmul.mubr.bf16.gmra.mrb[32].mxu0 %v4105_v34  ;;  %1716 = vmatprep.mubr.bf16.mxu1 %v4112_v35  ;;  %v4230_v34 = vld [vmem:[%s6412_s0 + $0x204] ss:$36 sps:$4 sm:$0xff]   ;;  %v4232_v35 = vld [vmem:[%s6412_s0 + $0x214] ss:$36 sps:$4 sm:$0xff]  }
  0x84   :  { %2038 = vmatprep.mubr.bf16.mxu0 %v4114_v36  ;;  %v4234_v36 = vld [vmem:[%s6412_s0 + $0x200] ss:$36 sps:$4 sm:$0xff]  }
  0x8a   :  { %1717 = vmatmul.mubr.bf16.gmra.mrb[36].mxu1 %v4116_v39  ;;  %v4238_v39 = vld [vmem:[%s6412_s0 + $0x25c] ss:$36 sps:$4 sm:$0xff]  }
  0x8b   :  { %2039 = vmatmul.mubr.bf16.gmra.mrb[36].mxu0 %v4120_v40  ;;  %1726 = vmatprep.mubr.bf16.mxu1 %v4130_v41  ;;  %v4240_v40 = vld [vmem:[%s6412_s0 + $0x248] ss:$36 sps:$4 sm:$0xff]   ;;  %v4241_v41 = vld [vmem:[%s6412_s0 + $0x258] ss:$36 sps:$4 sm:$0xff]  }
  0x8c   :  { %2048 = vmatprep.mubr.bf16.mxu0 %v4132_v42  ;;  %v4245_v42 = vld [vmem:[%s6412_s0 + $0x294] ss:$36 sps:$4 sm:$0xff]  }
  0x92   :  { %1727 = vmatmul.mubr.bf16.gmra.mrb[40].mxu1 %v4134_v43  ;;  %v4247_v43 = vld [vmem:[%s6412_s0 + $0x2a4] ss:$36 sps:$4 sm:$0xff]  }
  0x93   :  { %2049 = vmatmul.mubr.bf16.gmra.mrb[40].mxu0 %v4138_v44  ;;  %1736 = vmatprep.mubr.bf16.mxu1 %v4145_v45  ;;  %v4249_v44 = vld [vmem:[%s6412_s0 + $0x290] ss:$36 sps:$4 sm:$0xff]   ;;  %v4250_v45 = vld [vmem:[%s6412_s0 + $0x2a0] ss:$36 sps:$4 sm:$0xff]  }
  0x94   :  { %2058 = vmatprep.mubr.bf16.mxu0 %v4147_v46  ;;  %v4254_v46 = vld [vmem:[%s6412_s0 + $0x2dc] ss:$36 sps:$4 sm:$0xff]  }
  0x9a   :  { %1737 = vmatmul.mubr.bf16.gmra.mrb[44].mxu1 %v4149_v49  ;;  %v4259_v49 = vld [vmem:[%s6412_s0 + $0x2e8] ss:$36 sps:$4 sm:$0xff]  }
  0x9b   :  { %2059 = vmatmul.mubr.bf16.gmra.mrb[44].mxu0 %v4153_v50  ;;  %1746 = vmatprep.mubr.bf16.mxu1 %v3368_v51  ;;  %v4260_v50 = vld [vmem:[%s6412_s0 + $0x324] ss:$36 sps:$4 sm:$0xff]   ;;  %v4262_v51 = vld [vmem:[%s6412_s0 + $0x334] ss:$36 sps:$4 sm:$0xff]  }
  0x9c   :  { %2068 = vmatprep.mubr.bf16.mxu0 %v3372_v52  ;;  %v142_v52 = vld [vmem:[%s6412_s0 + $0x368] sm:$0x33] }
  0xa2   :  { %1747 = vmatmul.mubr.bf16.gmra.mrb[48].mxu1 %v3367_v53  ;;  %v144_v53 = vld [vmem:[%s6412_s0 + $0x378] sm:$0x33] }
  0xa3   :  { %2069 = vmatmul.mubr.bf16.gmra.mrb[48].mxu0 %v3371_v54  ;;  %1787 = vmatprep.mubr.bf16.mxu1 %v4175_v55  ;;  %v4264_v54 = vld [vmem:[%s6412_s0 + $0x320] ss:$36 sps:$4 sm:$0xff]   ;;  %v4265_v55 = vld [vmem:[%s6412_s0 + $0x330] ss:$36 sps:$4 sm:$0xff]  }
  0xa4   :  { %2109 = vmatprep.mubr.bf16.mxu0 %v4178_v56  ;;  %v3370_v56 = vcombine.high %v142_v52, %v142_v52 }
  0xaa   :  { %1788 = vmatmul.mubr.bf16.vlgmr.msra.gmra.mrb[0].mxu1 %v4173_v57  ;;  %v3374_v57 = vcombine.high %v144_v53, %v144_v53 }
  0xab   :  { %2110 = vmatmul.mubr.bf16.vlgmr.msra.gmra.mrb[0].mxu0 %v4176_v58  ;;  %1797 = vmatprep.mubr.bf16.mxu1 %v4182_v60  ;;  %v3369_v58 = vcombine.low %v142_v52, %v142_v52  ;;  %v4290_v60 = vmov 0   ;;  %v2483_v52 = vld [vmem:[%s6413_s2 + $0xa8] sm:$0xff] }
  0xac   :  { %2239 = vmatpush1.bf16.msra.mxu0 %v4179_v59  ;;  %2119 = vmatprep.mubr.bf16.mxu0 %v4184_v61  ;;  %v3373_v59 = vcombine.low %v144_v53, %v144_v53  ;;  %v4273_v61 = vld [vmem:[%s6412_s0 + $0x20] ss:$36 sps:$4 sm:$0xff]   ;;  %v2485_v53 = vld [vmem:[%s6413_s2 + $0xb8] sm:$0xff] }
  0xad   :  { %2240 = vmatprep.subr.bf16.mxu0 %v4190_v62  ;;  %v4274_v62 = vld [vmem:[%s6412_s0 + $0x68] ss:$36 sps:$4 sm:$0xff]  }
  0xb0   :  { %2241 = vmatpush1.bf16.msra.mxu0 %v4188_v63  ;;  %v4275_v63 = vld [vmem:[%s6412_s0 + $0xb0] ss:$36 sps:$4 sm:$0xff]  }
  0xb1   :  { %2242 = vmatprep.subr.bf16.mxu0 %v4205_v0  ;;  %v4276_v0 = vld [vmem:[%s6412_s0 + $0xf8] ss:$36 sps:$4 sm:$0xff]  }
  0xb2   :  { %1798 = vmatmul.mubr.bf16.gmra.mrb[4].mxu1 %v4186_v1  ;;  %v4277_v1 = vld [vmem:[%s6412_s0 + $0x140] ss:$36 sps:$4 sm:$0xff]  }
  0xb3   :  { %2120 = vmatmul.mubr.bf16.gmra.mrb[4].mxu0 %v4187_v2  ;;  %1807 = vmatprep.mubr.bf16.mxu1 %v4191_v3  ;;  %v4278_v2 = vld [vmem:[%s6412_s0 + $0x188] ss:$36 sps:$4 sm:$0xff]   ;;  %v4279_v3 = vld [vmem:[%s6412_s0 + $0x1d0] ss:$36 sps:$4 sm:$0xff]  }
  0xb4   :  { %2129 = vmatprep.mubr.bf16.mxu0 %v4193_v4  ;;  %2243 = vmatpush1.bf16.msra.mxu0 %v4203_v5  ;;  %v4280_v4 = vld [vmem:[%s6412_s0 + $0x218] ss:$36 sps:$4 sm:$0xff]   ;;  %v4281_v5 = vld [vmem:[%s6412_s0 + $0x260] ss:$36 sps:$4 sm:$0xff]  }
  0xb5   :  { %2244 = vmatprep.subr.bf16.mxu0 %v4218_v6  ;;  %v4282_v6 = vld [vmem:[%s6412_s0 + $0x2a8] ss:$36 sps:$4 sm:$0xff]  }
  0xb8   :  { %2245 = vmatpush1.bf16.msra.mxu0 %v4216_v7  ;;  %v4283_v7 = vld [vmem:[%s6412_s0 + $0x2f0] ss:$36 sps:$4 sm:$0xff]  }
  0xb9   :  { %2246 = vmatprep.subr.bf16.mxu0 %v4229_v8  ;;  %v4284_v8 = vld [vmem:[%s6412_s0 + $0x338] ss:$36 sps:$4 sm:$0xff]  }
  0xba   :  { %1808 = vmatmul.mubr.bf16.gmra.mrb[8].mxu1 %v4195_v9  ;;  %v4285_v9 = vld [vmem:[%s6412_s0 + $0x380] ss:$0 sps:$4 sm:$0x33]  }
  0xbb   :  { %2130 = vmatmul.mubr.bf16.gmra.mrb[8].mxu0 %v4196_v10  ;;  %1817 = vmatprep.mubr.bf16.mxu1 %v4197_v11  ;;  %v2463_v10 = vld [vmem:[%s6413_s2 + $0x8] sm:$0xff]  ;;  %v2465_v11 = vld [vmem:[%s6413_s2 + $0x18] sm:$0xff] }
  0xbc   :  { %2139 = vmatprep.mubr.bf16.mxu0 %v4199_v12  ;;  %2247 = vmatpush1.bf16.msra.mxu0 %v4227_v13  ;;  %v2462_v12 = vld [vmem:[%s6413_s2] sm:$0xff]  ;;  %v5101_v13 = vpack.c.bf16 %v2465_v11, %v2463_v10 }
  0xbd   :  { %2248 = vmatprep.subr.bf16.mxu0 %v4244_v14  ;;  %v2464_v14 = vld [vmem:[%s6413_s2 + $0x10] sm:$0xff]  ;;  %v2490_v11 = vld [vmem:[%s6413_s2 + $0xe0] sm:$0xff] }
  0xbe   :  { %3571 = vmatprep.subr.bf16.mxu1 %v5101_v13 }
  0xc0   :  { %2249 = vmatpush1.bf16.msra.mxu0 %v4242_v15  ;;  %v5106_v15 = vpack.c.bf16 %v2464_v14, %v2462_v12  ;;  %v2492_v12 = vld [vmem:[%s6413_s2 + $0xf0] sm:$0xff] }
  0xc1   :  { %2250 = vmatprep.subr.bf16.mxu0 %v4253_v16  ;;  %v2467_v16 = vld [vmem:[%s6413_s2 + $0x28] sm:$0xff]  ;;  %v5272_v14 = vpack.c.bf16 %v2492_v12, %v2490_v11 }
  0xc2   :  { %1818 = vmatmul.mubr.bf16.gmra.mrb[12].mxu1 %v4201_v17  ;;  %v2469_v17 = vld [vmem:[%s6413_s2 + $0x38] sm:$0xff] }
  0xc3   :  { %2140 = vmatmul.mubr.bf16.gmra.mrb[12].mxu0 %v4202_v18  ;;  %1827 = vmatprep.mubr.bf16.mxu1 %v4206_v19  ;;  %v2466_v18 = vld [vmem:[%s6413_s2 + $0x20] sm:$0xff]  ;;  %v5119_v19 = vpack.c.bf16 %v2469_v17, %v2467_v16  ;;  %6482 = vst [vmem:[#allocation13_spill] sm:$0xff] %v5272_v14 }
  0xc4   :  { %2149 = vmatprep.mubr.bf16.mxu0 %v4208_v20  ;;  %2251 = vmatpush1.bf16.msra.mxu0 %v4251_v21  ;;  %v2468_v20 = vld [vmem:[%s6413_s2 + $0x30] sm:$0xff] }
  0xc5   :  { %2252 = vmatprep.subr.bf16.mxu0 %v4268_v22  ;;  %3573 = vmatpush1.bf16.msra.mxu1 %v5106_v15  ;;  %v5126_v22 = vpack.c.bf16 %v2468_v20, %v2466_v18 }
  0xc6   :  { %3575 = vmatprep.subr.bf16.mxu1 %v5119_v19 }
  0xc8   :  { %2253 = vmatpush1.bf16.msra.mxu0 %v4266_v23 }
  0xc9   :  { %3577 = vmatpush1.bf16.msra.mxu1 %v5126_v22 }
  0xca   :  { %1828 = vmatmul.mubr.bf16.gmra.mrb[16].mxu1 %v4210_v24 }
  0xcb   :  { %2150 = vmatmul.mubr.bf16.gmra.mrb[16].mxu0 %v4211_v25  ;;  %1837 = vmatprep.mubr.bf16.mxu1 %v4212_v26  ;;  %v2471_v26 = vld [vmem:[%s6413_s2 + $0x48] sm:$0xff] }
  0xcc   :  { %2159 = vmatprep.mubr.bf16.mxu0 %v4214_v27  ;;  %v2473_v27 = vld [vmem:[%s6413_s2 + $0x58] sm:$0xff] }
  0xd2   :  { %1838 = vmatmul.mubr.bf16.gmra.mrb[20].mxu1 %v4219_v28  ;;  %v5142_v28 = vpack.c.bf16 %v2473_v27, %v2471_v26  ;;  %v2495_v26 = vld [vmem:[%s6413_s2 + $0x108] sm:$0xff]  ;;  %v2497_v27 = vld [vmem:[%s6413_s2 + $0x118] sm:$0xff] }
  0xd3   :  { %2160 = vmatmul.mubr.bf16.gmra.mrb[20].mxu0 %v4220_v29  ;;  %1847 = vmatprep.mubr.bf16.mxu1 %v4221_v30  ;;  %v2470_v29 = vld [vmem:[%s6413_s2 + $0x40] sm:$0xff]  ;;  %v2472_v30 = vld [vmem:[%s6413_s2 + $0x50] sm:$0xff] }
  0xd4   :  { %2169 = vmatprep.mubr.bf16.mxu0 %v4223_v31  ;;  %6471 = vst [vmem:[#allocation2_spill] sm:$0xff] %v5142_v28  ;;  %v5150_v31 = vpack.c.bf16 %v2472_v30, %v2470_v29  ;;  %3579 = vmatprep.subr.bf16.mxu1 %v5142_v28  ;;  %v5290_v29 = vpack.c.bf16 %v2497_v27, %v2495_v26  ;;  %v2494_v30 = vld [vmem:[%s6413_s2 + $0x100] sm:$0xff] }
  0xd6   :  { %6472 = vst [vmem:[#allocation3_spill] sm:$0xff] %v5150_v31  ;;  %3581 = vmatpush1.bf16.msra.mxu1 %v5150_v31  ;;  %6483 = vst [vmem:[#allocation14_spill] sm:$0xff] %v5290_v29 }
  0xda   :  { %1848 = vmatmul.mubr.bf16.gmra.mrb[24].mxu1 %v4225_v32 }
  0xdb   :  { %2170 = vmatmul.mubr.bf16.gmra.mrb[24].mxu0 %v4226_v33  ;;  %1857 = vmatprep.mubr.bf16.mxu1 %v4230_v34 }
  0xdc   :  { %2179 = vmatprep.mubr.bf16.mxu0 %v4232_v35 }
  0xe2   :  { %1858 = vmatmul.mubr.bf16.gmra.mrb[28].mxu1 %v4234_v36  ;;  %v2475_v36 = vld [vmem:[%s6413_s2 + $0x68] sm:$0xff] }
  0xe3   :  { %2180 = vmatmul.mubr.bf16.gmra.mrb[28].mxu0 %v4235_v37  ;;  %1867 = vmatprep.mubr.bf16.mxu1 %v4236_v38  ;;  %v2477_v37 = vld [vmem:[%s6413_s2 + $0x78] sm:$0xff] }
  0xe4   :  { %2189 = vmatprep.mubr.bf16.mxu0 %v4238_v39  ;;  %v5168_v38 = vpack.c.bf16 %v2477_v37, %v2475_v36  ;;  %v2474_v39 = vld [vmem:[%s6413_s2 + $0x60] sm:$0xff]  ;;  %v2496_v36 = vld [vmem:[%s6413_s2 + $0x110] sm:$0xff] }
  0xe5   :  { %v5298_v37 = vpack.c.bf16 %v2496_v36, %v2494_v30  ;;  %v2507_v30 = vld [vmem:[%s6413_s2 + $0x168] sm:$0xff]  ;;  %v2509_v36 = vld [vmem:[%s6413_s2 + $0x178] sm:$0xff] }
  0xe6   :  { %6473 = vst [vmem:[#allocation4_spill] sm:$0xff] %v5168_v38  ;;  %3583 = vmatprep.subr.bf16.mxu1 %v5168_v38 }
  0xe7   :  { %6484 = vst [vmem:[#allocation15_spill] sm:$0xff] %v5298_v37 }
  0xea   :  { %1868 = vmatmul.mubr.bf16.gmra.mrb[32].mxu1 %v4240_v40  ;;  %v2476_v40 = vld [vmem:[%s6413_s2 + $0x70] sm:$0xff] }
  0xeb   :  { %2190 = vmatmul.mubr.bf16.gmra.mrb[32].mxu0 %v4241_v41  ;;  %1877 = vmatprep.mubr.bf16.mxu1 %v4245_v42  ;;  %v5176_v41 = vpack.c.bf16 %v2476_v40, %v2474_v39  ;;  %v2479_v42 = vld [vmem:[%s6413_s2 + $0x88] sm:$0xff]  ;;  %v2501_v40 = vld [vmem:[%s6413_s2 + $0x138] sm:$0xff] }
  0xec   :  { %2199 = vmatprep.mubr.bf16.mxu0 %v4247_v43  ;;  %v2481_v43 = vld [vmem:[%s6413_s2 + $0x98] sm:$0xff]  ;;  %v2499_v39 = vld [vmem:[%s6413_s2 + $0x128] sm:$0xff] }
  0xed   :  { %6474 = vst [vmem:[#allocation5_spill] sm:$0xff] %v5176_v41  ;;  %3585 = vmatpush1.bf16.msra.mxu1 %v5176_v41 }
  0xf2   :  { %1878 = vmatmul.mubr.bf16.gmra.mrb[36].mxu1 %v4249_v44  ;;  %v2478_v44 = vld [vmem:[%s6413_s2 + $0x80] sm:$0xff] }
  0xf3   :  { %2200 = vmatmul.mubr.bf16.gmra.mrb[36].mxu0 %v4250_v45  ;;  %1887 = vmatprep.mubr.bf16.mxu1 %v4254_v46  ;;  %v5189_v45 = vpack.c.bf16 %v2481_v43, %v2479_v42  ;;  %v2480_v46 = vld [vmem:[%s6413_s2 + $0x90] sm:$0xff]  ;;  %v5308_v42 = vpack.c.bf16 %v2501_v40, %v2499_v39  ;;  %v2506_v39 = vld [vmem:[%s6413_s2 + $0x160] sm:$0xff]  ;;  %v5363_v40 = vpack.c.bf16 %v2509_v36, %v2507_v30  ;;  %v2511_v30 = vld [vmem:[%s6413_s2 + $0x188] sm:$0xff] }
  0xf4   :  { %2209 = vmatprep.mubr.bf16.mxu0 %v4256_v47  ;;  %v2513_v36 = vld [vmem:[%s6413_s2 + $0x198] sm:$0xff] }
  0xf5   :  { %6475 = vst [vmem:[#allocation6_spill] sm:$0xff] %v5189_v45  ;;  %3587 = vmatprep.subr.bf16.mxu1 %v5189_v45  ;;  %6485 = vst [vmem:[#allocation16_spill] sm:$0xff] %v5308_v42 }
  0xf6   :  { %6489 = vst [vmem:[#allocation20_spill] sm:$0xff] %v5363_v40 }
  0xfa   :  { %1888 = vmatmul.mubr.bf16.gmra.mrb[40].mxu1 %v4258_v48  ;;  %v5196_v48 = vpack.c.bf16 %v2480_v46, %v2478_v44 }
  0xfb   :  { %2210 = vmatmul.mubr.bf16.gmra.mrb[40].mxu0 %v4259_v49  ;;  %1897 = vmatprep.mubr.bf16.mxu1 %v4260_v50 }
  0xfc   :  { %2219 = vmatprep.mubr.bf16.mxu0 %v4262_v51  ;;  %6476 = vst [vmem:[#allocation7_spill] sm:$0xff] %v5196_v48  ;;  %3589 = vmatpush1.bf16.msra.mxu1 %v5196_v48 }
 0x102   :  { %1898 = vmatmul.mubr.bf16.gmra.mrb[44].mxu1 %v4264_v54  ;;  %v2482_v54 = vld [vmem:[%s6413_s2 + $0xa0] sm:$0xff] }
 0x103   :  { %2220 = vmatmul.mubr.bf16.gmra.mrb[44].mxu0 %v4265_v55  ;;  %1907 = vmatprep.mubr.bf16.mxu1 %v3370_v56  ;;  %v5215_v55 = vpack.c.bf16 %v2485_v53, %v2483_v52  ;;  %v2484_v56 = vld [vmem:[%s6413_s2 + $0xb0] sm:$0xff]  ;;  %v2498_v53 = vld [vmem:[%s6413_s2 + $0x120] sm:$0xff] }
 0x104   :  { %2229 = vmatprep.mubr.bf16.mxu0 %v3374_v57 }
 0x105   :  { %6477 = vst [vmem:[#allocation8_spill] sm:$0xff] %v5215_v55  ;;  %3591 = vmatprep.subr.bf16.mxu1 %v5215_v55 }
 0x10a   :  { %1908 = vmatmul.mubr.bf16.gmra.mrb[48].mxu1 %v3369_v58  ;;  %v5222_v58 = vpack.c.bf16 %v2484_v56, %v2482_v54  ;;  %v2500_v54 = vld [vmem:[%s6413_s2 + $0x130] sm:$0xff] }
 0x10b   :  { %2230 = vmatmul.mubr.bf16.gmra.mrb[48].mxu0 %v3373_v59  ;;  %v5325_v56 = vpack.c.bf16 %v2500_v54, %v2498_v53  ;;  %v2508_v53 = vld [vmem:[%s6413_s2 + $0x170] sm:$0xff] }
 0x10c   :  { %2270 = vmatprep.mubr.bf16.mxu0 %v4290_v60  ;;  %6478 = vst [vmem:[#allocation9_spill] sm:$0xff] %v5222_v58  ;;  %3593 = vmatpush1.bf16.msra.mxu1 %v5222_v58 }
 0x10d   :  { %6486 = vst [vmem:[#allocation17_spill] sm:$0xff] %v5325_v56 }
 0x113   :  { %2271 = vmatmul.mubr.bf16.vlgmr.msra.gmra.mrb[0].mxu0 %v4273_v61 }
 0x114   :  { %2280 = vmatprep.mubr.bf16.mxu0 %v4290_v60 }
 0x11b   :  { %2281 = vmatmul.mubr.bf16.gmra.mrb[4].mxu0 %v4274_v62  ;;  %v2487_v62 = vld [vmem:[%s6413_s2 + $0xc8] sm:$0xff] }
 0x11c   :  { %2290 = vmatprep.mubr.bf16.mxu0 %v4290_v60 }
 0x123   :  { %2291 = vmatmul.mubr.bf16.gmra.mrb[8].mxu0 %v4275_v63  ;;  %v2489_v63 = vld [vmem:[%s6413_s2 + $0xd8] sm:$0xff] }
 0x124   :  { %2300 = vmatprep.mubr.bf16.mxu0 %v4290_v60 }
 0x12b   :  { %2301 = vmatmul.mubr.bf16.gmra.mrb[12].mxu0 %v4276_v0  ;;  %v2486_v0 = vld [vmem:[%s6413_s2 + $0xc0] sm:$0xff] }
 0x12c   :  { %2310 = vmatprep.mubr.bf16.mxu0 %v4290_v60 }
 0x133   :  { %2311 = vmatmul.mubr.bf16.gmra.mrb[16].mxu0 %v4277_v1  ;;  %v5241_v1 = vpack.c.bf16 %v2489_v63, %v2487_v62  ;;  %v2503_v62 = vld [vmem:[%s6413_s2 + $0x148] sm:$0xff]  ;;  %v2505_v63 = vld [vmem:[%s6413_s2 + $0x158] sm:$0xff] }
 0x134   :  { %2320 = vmatprep.mubr.bf16.mxu0 %v4290_v60 }
 0x135   :  { %6479 = vst [vmem:[#allocation10_spill] sm:$0xff] %v5241_v1  ;;  %3595 = vmatprep.subr.bf16.mxu1 %v5241_v1  ;;  %v2522_v1 = vld [vmem:[%s6413_s2 + $0x1e0] sm:$0xff] }
 0x13b   :  { %2321 = vmatmul.mubr.bf16.gmra.mrb[20].mxu0 %v4278_v2  ;;  %v2488_v2 = vld [vmem:[%s6413_s2 + $0xd0] sm:$0xff] }
 0x13c   :  { %2330 = vmatprep.mubr.bf16.mxu0 %v4290_v60 }
 0x143   :  { %2331 = vmatmul.mubr.bf16.gmra.mrb[24].mxu0 %v4279_v3 }
 0x144   :  { %2340 = vmatprep.mubr.bf16.mxu0 %v4290_v60 }
 0x14b   :  { %2341 = vmatmul.mubr.bf16.gmra.mrb[28].mxu0 %v4280_v4  ;;  %v5248_v4 = vpack.c.bf16 %v2488_v2, %v2486_v0  ;;  %v2502_v0 = vld [vmem:[%s6413_s2 + $0x140] sm:$0xff]  ;;  %v5337_v2 = vpack.c.bf16 %v2505_v63, %v2503_v62  ;;  %v5370_v62 = vpack.c.bf16 %v2508_v53, %v2506_v39  ;;  %v5386_v39 = vpack.c.bf16 %v2513_v36, %v2511_v30 }
 0x14c   :  { %2350 = vmatprep.mubr.bf16.mxu0 %v4290_v60  ;;  %v2510_v53 = vld [vmem:[%s6413_s2 + $0x180] sm:$0xff] }
 0x14d   :  { %6480 = vst [vmem:[#allocation11_spill] sm:$0xff] %v5248_v4  ;;  %3597 = vmatpush1.bf16.msra.mxu1 %v5248_v4  ;;  %6487 = vst [vmem:[#allocation18_spill] sm:$0xff] %v5337_v2 }
 0x14e   :  { %6490 = vst [vmem:[#allocation21_spill] sm:$0xff] %v5370_v62  ;;  %6491 = vst [vmem:[#allocation22_spill] sm:$0xff] %v5386_v39 }
 0x153   :  { %2351 = vmatmul.mubr.bf16.gmra.mrb[32].mxu0 %v4281_v5 }
 0x154   :  { %2360 = vmatprep.mubr.bf16.mxu0 %v4290_v60 }
 0x15b   :  { %2361 = vmatmul.mubr.bf16.gmra.mrb[36].mxu0 %v4282_v6 }
 0x15c   :  { %2370 = vmatprep.mubr.bf16.mxu0 %v4290_v60 }
 0x163   :  { %2371 = vmatmul.mubr.bf16.gmra.mrb[40].mxu0 %v4283_v7 }
 0x164   :  { %2380 = vmatprep.mubr.bf16.mxu0 %v4290_v60 }
 0x16b   :  { %2381 = vmatmul.mubr.bf16.gmra.mrb[44].mxu0 %v4284_v8  ;;  %v2491_v8 = vld [vmem:[%s6413_s2 + $0xe8] sm:$0xff] }
 0x16c   :  { %2390 = vmatprep.mubr.bf16.mxu0 %v4290_v60 }
 0x173   :  { %2391 = vmatmul.mubr.bf16.gmra.mrb[48].mxu0 %v4285_v9  ;;  %v2493_v9 = vld [vmem:[%s6413_s2 + $0xf8] sm:$0xff] }
 0x174   :  { %v5264_v10 = vpack.c.bf16 %v2493_v9, %v2491_v8  ;;  %v2504_v8 = vld [vmem:[%s6413_s2 + $0x150] sm:$0xff] }
 0x175   :  { %v5344_v11 = vpack.c.bf16 %v2504_v8, %v2502_v0 }
 0x176   :  { %6481 = vst [vmem:[#allocation12_spill] sm:$0xff] %v5264_v10  ;;  %3599 = vmatprep.subr.bf16.mxu1 %v5264_v10 }
 0x177   :  { %3601 = vmatpush1.bf16.msra.mxu1 %v5272_v14  ;;  %6488 = vst [vmem:[#allocation19_spill] sm:$0xff] %v5344_v11 }
 0x178   :  { %3603 = vmatprep.subr.bf16.mxu1 %v5290_v29 }
 0x17b   :  { %3605 = vmatpush1.bf16.msra.mxu1 %v5298_v37 }
 0x17c   :  { %3607 = vmatprep.subr.bf16.mxu1 %v5308_v42 }
 0x17d   :  { %v5124_v21 = vpop.f32.mrb[0].mxu1 }
 0x17e   :  { %v5128_v23 = vpop.f32.mrb[1].mxu1 }
 0x17f   :  { %v5131_v24 = vpop.f32.mrb[2].mxu1  ;;  %3609 = vmatpush1.bf16.msra.mxu1 %v5325_v56  ;;  %v2515_v56 = vld [vmem:[%s6413_s2 + $0x1a8] sm:$0xff] }
 0x180   :  { %v5134_v25 = vpop.f32.mrb[3].mxu1  ;;  %3611 = vmatprep.subr.bf16.mxu1 %v5337_v2 }
 0x183   :  { %3613 = vmatpush1.bf16.msra.mxu1 %v5344_v11 }
 0x184   :  { %3615 = vmatprep.subr.bf16.mxu1 %v5363_v40 }
 0x185   :  { %v5153_v32 = vpop.f32.mrb[4].mxu1 }
 0x186   :  { %v5156_v33 = vpop.f32.mrb[5].mxu1 }
 0x187   :  { %v5158_v34 = vpop.f32.mrb[6].mxu1  ;;  %3617 = vmatpush1.bf16.msra.mxu1 %v5370_v62  ;;  %v2512_v62 = vld [vmem:[%s6413_s2 + $0x190] sm:$0xff] }
 0x188   :  { %v5160_v35 = vpop.f32.mrb[7].mxu1  ;;  %v5394_v40 = vpack.c.bf16 %v2512_v62, %v2510_v53  ;;  %3619 = vmatprep.subr.bf16.mxu1 %v5386_v39  ;;  %v2517_v62 = vld [vmem:[%s6413_s2 + $0x1b8] sm:$0xff]  ;;  %v2514_v39 = vld [vmem:[%s6413_s2 + $0x1a0] sm:$0xff] }
 0x189   :  { %v5412_v53 = vpack.c.bf16 %v2517_v62, %v2515_v56  ;;  %v2519_v56 = vld [vmem:[%s6413_s2 + $0x1c8] sm:$0xff]  ;;  %v2521_v62 = vld [vmem:[%s6413_s2 + $0x1d8] sm:$0xff] }
 0x18a   :  { %6492 = vst [vmem:[#allocation23_spill] sm:$0xff] %v5394_v40 }
 0x18b   :  { %3621 = vmatpush1.bf16.msra.mxu1 %v5394_v40  ;;  %6493 = vst [vmem:[#allocation24_spill] sm:$0xff] %v5412_v53  ;;  %v2516_v40 = vld [vmem:[%s6413_s2 + $0x1b0] sm:$0xff] }
 0x18c   :  { %v5420_v42 = vpack.c.bf16 %v2516_v40, %v2514_v39  ;;  %3623 = vmatprep.subr.bf16.mxu1 %v5412_v53  ;;  %v5436_v40 = vpack.c.bf16 %v2521_v62, %v2519_v56  ;;  %v2518_v39 = vld [vmem:[%s6413_s2 + $0x1c0] sm:$0xff]  ;;  %v2523_v56 = vld [vmem:[%s6413_s2 + $0x1e8] sm:$0xff]  ;;  %v2525_v62 = vld [vmem:[%s6413_s2 + $0x1f8] sm:$0xff] }
 0x18d   :  { %v5194_v47 = vpop.f32.mrb[8].mxu1  ;;  %v5456_v4 = vpack.c.bf16 %v2525_v62, %v2523_v56 }
 0x18e   :  { %v5198_v49 = vpop.f32.mrb[9].mxu1  ;;  %6494 = vst [vmem:[#allocation25_spill] sm:$0xff] %v5420_v42  ;;  %6495 = vst [vmem:[#allocation26_spill] sm:$0xff] %v5436_v40 }
 0x18f   :  { %v5201_v50 = vpop.f32.mrb[10].mxu1  ;;  %3625 = vmatpush1.bf16.msra.mxu1 %v5420_v42  ;;  %v2520_v42 = vld [vmem:[%s6413_s2 + $0x1d0] sm:$0xff]  ;;  %6497 = vst [vmem:[#allocation28_spill] sm:$0xff] %v5456_v4 }
 0x190   :  { %v5203_v51 = vpop.f32.mrb[11].mxu1  ;;  %v5446_v10 = vpack.c.bf16 %v2520_v42, %v2518_v39  ;;  %3627 = vmatprep.subr.bf16.mxu1 %v5436_v40  ;;  %v2524_v42 = vld [vmem:[%s6413_s2 + $0x1f0] sm:$0xff] }
 0x191   :  { %v5464_v39 = vpack.c.bf16 %v2524_v42, %v2522_v1 }
 0x192   :  { %6496 = vst [vmem:[#allocation27_spill] sm:$0xff] %v5446_v10 }
 0x193   :  { %3629 = vmatpush1.bf16.msra.mxu1 %v5446_v10  ;;  %6498 = vst [vmem:[#allocation29_spill] sm:$0xff] %v5464_v39 }
 0x194   :  { %3631 = vmatprep.subr.bf16.mxu1 %v5456_v4 }
 0x195   :  { %v5220_v57 = vpop.f32.mrb[12].mxu1 }
 0x196   :  { %v5224_v59 = vpop.f32.mrb[13].mxu1 }
 0x197   :  { %v5227_v60 = vpop.f32.mrb[14].mxu1  ;;  %3633 = vmatpush1.bf16.msra.mxu1 %v5464_v39 }
 0x198   :  { %v5230_v61 = vpop.f32.mrb[15].mxu1  ;;  %3635 = vmatprep.subr.bf16.mxu1 %v5101_v13 }
 0x19d   :  { %v5246_v3 = vpop.f32.mrb[16].mxu1 }
 0x19e   :  { %v5250_v5 = vpop.f32.mrb[17].mxu1 }
 0x19f   :  { %v5253_v6 = vpop.f32.mrb[18].mxu1 }
 0x1a0   :  { %v5256_v7 = vpop.f32.mrb[19].mxu1 }
 0x1a5   :  { %v5274_v16 = vpop.f32.mrb[20].mxu1 }
 0x1a6   :  { %v5277_v17 = vpop.f32.mrb[21].mxu1 }
 0x1a7   :  { %v5280_v18 = vpop.f32.mrb[22].mxu1 }
 0x1a8   :  { %v5282_v20 = vpop.f32.mrb[23].mxu1 }
 0x1ad   :  { %v5310_v43 = vpop.f32.mrb[24].mxu1 }
 0x1ae   :  { %v5312_v44 = vpop.f32.mrb[25].mxu1 }
 0x1af   :  { %v5315_v46 = vpop.f32.mrb[26].mxu1 }
 0x1b0   :  { %v5317_v52 = vpop.f32.mrb[27].mxu1 }
 0x1b5   :  { %v5342_v9 = vpop.f32.mrb[28].mxu1 }
 0x1b6   :  { %v5346_v12 = vpop.f32.mrb[29].mxu1 }
 0x1b7   :  { %v5349_v26 = vpop.f32.mrb[30].mxu1 }
 0x1b8   :  { %v5352_v27 = vpop.f32.mrb[31].mxu1 }
 0x1bd   :  { %v5368_v54 = vpop.f32.mrb[32].mxu1 }
 0x1be   :  { %v5372_v63 = vpop.f32.mrb[33].mxu1 }
 0x1bf   :  { %v5375_v0 = vpop.f32.mrb[34].mxu1 }
 0x1c0   :  { %v5378_v8 = vpop.f32.mrb[35].mxu1 }
 0x1c5   :  { %v5396_v11 = vpop.f32.mrb[36].mxu1 }
 0x1c6   :  { %v5399_v2 = vpop.f32.mrb[37].mxu1 }
 0x1c7   :  { %v5402_v30 = vpop.f32.mrb[38].mxu1 }
 0x1c8   :  { %v5404_v36 = vpop.f32.mrb[39].mxu1 }
 0x1cd   :  { %v5422_v37 = vpop.f32.mrb[40].mxu1 }
 0x1ce   :  { %v5425_v29 = vpop.f32.mrb[41].mxu1 }
 0x1cf   :  { %v5434_v14 = vpop.f32.mrb[42].mxu1 }
 0x1d0   :  { %v5444_v53 = vpop.f32.mrb[43].mxu1 }
 0x1d5   :  { %v5466_v10 = vpop.f32.mrb[44].mxu1 }
 0x1d6   :  { %v5469_v40 = vpop.f32.mrb[45].mxu1 }
 0x1d7   :  { %v5472_v56 = vpop.f32.mrb[46].mxu1 }
 0x1d8   :  { %v5475_v62 = vpop.f32.mrb[47].mxu1 }
 0x1dd   :  { %v5477_v58 = vpop.f32.mrb[48].mxu1 }
 0x1de   :  { %v5479_v55 = vpop.f32.mrb[49].mxu1 }
 0x1df   :  { %v1913_v1 = vpop.f32.mrb[50].mxu1 }
 0x1e0   :  { %v1914_v42 = vpop.f32.mrb[51].mxu1 }
 0x1e6   :  { %v2272_v48 = vpop.f32.mrb[0].mxu0 }
 0x1e7   :  { %v5482_v45 = vadd.f32 %v2272_v48, %v5124_v21  ;;  %v2274_v4 = vpop.f32.mrb[1].mxu0 }
 0x1e8   :  { %v5485_v41 = vadd.f32 %v2274_v4, %v5128_v23  ;;  %v2276_v39 = vpop.f32.mrb[2].mxu0 }
 0x1e9   :  { %6499 = vst [vmem:[#allocation30_spill] sm:$0xff] %v5482_v45  ;;  %v5488_v38 = vadd.f32 %v2276_v39, %v5131_v24  ;;  %v2278_v13 = vpop.f32.mrb[3].mxu0 }
 0x1ea   :  { %v5491_v31 = vadd.f32 %v2278_v13, %v5134_v25 }
 0x1eb   :  { %6500 = vst [vmem:[#allocation31_spill] sm:$0xff] %v5488_v38 }
 0x1ee   :  { %v2282_v28 = vpop.f32.mrb[4].mxu0 }
 0x1ef   :  { %v5494_v1 = vadd.f32 %v2282_v28, %v5153_v32  ;;  %v2284_v42 = vpop.f32.mrb[5].mxu0 }
 0x1f0   :  { %v5497_v21 = vadd.f32 %v2284_v42, %v5156_v33  ;;  %v2286_v48 = vpop.f32.mrb[6].mxu0 }
 0x1f1   :  { %v5500_v23 = vadd.f32 %v2286_v48, %v5158_v34  ;;  %v2288_v4 = vpop.f32.mrb[7].mxu0 }
 0x1f2   :  { %v5503_v24 = vadd.f32 %v2288_v4, %v5160_v35 }
 0x1f6   :  { %v2292_v39 = vpop.f32.mrb[8].mxu0 }
 0x1f7   :  { %v5506_v25 = vadd.f32 %v2292_v39, %v5194_v47  ;;  %v2294_v13 = vpop.f32.mrb[9].mxu0 }
 0x1f8   :  { %v5509_v28 = vadd.f32 %v2294_v13, %v5198_v49  ;;  %v2296_v32 = vpop.f32.mrb[10].mxu0 }
 0x1f9   :  { %v5512_v33 = vadd.f32 %v2296_v32, %v5201_v50  ;;  %v2298_v42 = vpop.f32.mrb[11].mxu0 }
 0x1fa   :  { %v5515_v34 = vadd.f32 %v2298_v42, %v5203_v51  ;;  %v2399_v51 = vadd.f32 %v5488_v38, %v5482_v45 }
 0x1fe   :  { %v2302_v48 = vpop.f32.mrb[12].mxu0 }
 0x1ff   :  { %v5518_v35 = vadd.f32 %v2302_v48, %v5220_v57  ;;  %v2304_v4 = vpop.f32.mrb[13].mxu0  ;;  %v2431_v57 = vadd.f32 %v5491_v31, %v5485_v41  ;;  %v2400_v48 = vadd.f32 %v5494_v1, %v2399_v51 }
 0x200   :  { %v5521_v47 = vadd.f32 %v2304_v4, %v5224_v59  ;;  %v2306_v39 = vpop.f32.mrb[14].mxu0 }
 0x201   :  { %v5524_v49 = vadd.f32 %v2306_v39, %v5227_v60  ;;  %v2308_v13 = vpop.f32.mrb[15].mxu0  ;;  %v2401_v45 = vadd.f32 %v5500_v23, %v2400_v48 }
 0x202   :  { %v5527_v50 = vadd.f32 %v2308_v13, %v5230_v61  ;;  %v2432_v61 = vadd.f32 %v5497_v21, %v2431_v57 }
 0x206   :  { %v2312_v32 = vpop.f32.mrb[16].mxu0 }
 0x207   :  { %v5534_v42 = vadd.f32 %v2312_v32, %v5246_v3  ;;  %v2314_v59 = vpop.f32.mrb[17].mxu0  ;;  %v2433_v3 = vadd.f32 %v5503_v24, %v2432_v61  ;;  %v2402_v32 = vadd.f32 %v5506_v25, %v2401_v45 }
 0x208   :  { %v5538_v60 = vadd.f32 %v2314_v59, %v5250_v5  ;;  %v2316_v4 = vpop.f32.mrb[18].mxu0 }
 0x209   :  { %v5542_v39 = vadd.f32 %v2316_v4, %v5253_v6  ;;  %v2318_v13 = vpop.f32.mrb[19].mxu0  ;;  %v2434_v5 = vadd.f32 %v5509_v28, %v2433_v3  ;;  %v2403_v48 = vadd.f32 %v5512_v33, %v2402_v32 }
 0x20a   :  { %v5545_v38 = vadd.f32 %v2318_v13, %v5256_v7 }
 0x20b   :  { %v2435_v45 = vadd.f32 %v5515_v34, %v2434_v5  ;;  %v2404_v3 = vadd.f32 %v5518_v35, %v2403_v48 }
 0x20e   :  { %v2322_v51 = vpop.f32.mrb[20].mxu0 }
 0x20f   :  { %v5552_v59 = vadd.f32 %v2322_v51, %v5274_v16  ;;  %v2324_v57 = vpop.f32.mrb[21].mxu0  ;;  %v2436_v16 = vadd.f32 %v5521_v47, %v2435_v45 }
 0x210   :  { %v5555_v6 = vadd.f32 %v2324_v57, %v5277_v17  ;;  %v2326_v4 = vpop.f32.mrb[22].mxu0 }
 0x211   :  { %v5558_v7 = vadd.f32 %v2326_v4, %v5280_v18  ;;  %v2328_v13 = vpop.f32.mrb[23].mxu0  ;;  %v2405_v18 = vadd.f32 %v5524_v49, %v2404_v3 }
 0x212   :  { %v5562_v61 = vadd.f32 %v2328_v13, %v5282_v20  ;;  %v2437_v20 = vadd.f32 %v5527_v50, %v2436_v16 }
 0x213   :  { %v2406_v48 = vadd.f32 %v5534_v42, %v2405_v18 }
 0x216   :  { %v2332_v51 = vpop.f32.mrb[24].mxu0 }
 0x217   :  { %v5568_v17 = vadd.f32 %v2332_v51, %v5310_v43  ;;  %v2334_v57 = vpop.f32.mrb[25].mxu0  ;;  %v2438_v43 = vadd.f32 %v5538_v60, %v2437_v20  ;;  %v2407_v51 = vadd.f32 %v5542_v39, %v2406_v48 }
 0x218   :  { %v5572_v4 = vadd.f32 %v2334_v57, %v5312_v44  ;;  %v2336_v32 = vpop.f32.mrb[26].mxu0 }
 0x219   :  { %v5576_v13 = vadd.f32 %v2336_v32, %v5315_v46  ;;  %v2338_v5 = vpop.f32.mrb[27].mxu0  ;;  %v2439_v44 = vadd.f32 %v5545_v38, %v2438_v43  ;;  %v2408_v46 = vadd.f32 %v5552_v59, %v2407_v51 }
 0x21a   :  { %v5580_v45 = vadd.f32 %v2338_v5, %v5317_v52 }
 0x21b   :  { %v2440_v52 = vadd.f32 %v5555_v6, %v2439_v44  ;;  %v2409_v43 = vadd.f32 %v5558_v7, %v2408_v46 }
 0x21e   :  { %v2342_v3 = vpop.f32.mrb[28].mxu0 }
 0x21f   :  { %v5586_v57 = vadd.f32 %v2342_v3, %v5342_v9  ;;  %v2344_v16 = vpop.f32.mrb[29].mxu0  ;;  %v2441_v9 = vadd.f32 %v5562_v61, %v2440_v52  ;;  %v2410_v3 = vadd.f32 %v5568_v17, %v2409_v43 }
 0x220   :  { %v5590_v32 = vadd.f32 %v2344_v16, %v5346_v12  ;;  %v2346_v18 = vpop.f32.mrb[30].mxu0 }
 0x221   :  { %v5594_v5 = vadd.f32 %v2346_v18, %v5349_v26  ;;  %v2348_v20 = vpop.f32.mrb[31].mxu0  ;;  %v2442_v12 = vadd.f32 %v5572_v4, %v2441_v9  ;;  %v2411_v46 = vadd.f32 %v5576_v13, %v2410_v3 }
 0x222   :  { %v5597_v48 = vadd.f32 %v2348_v20, %v5352_v27 }
 0x223   :  { %v2443_v43 = vadd.f32 %v5580_v45, %v2442_v12  ;;  %v2412_v9 = vadd.f32 %v5586_v57, %v2411_v46 }
 0x226   :  { %v2352_v51 = vpop.f32.mrb[32].mxu0 }
 0x227   :  { %v5604_v16 = vadd.f32 %v2352_v51, %v5368_v54  ;;  %v2354_v44 = vpop.f32.mrb[33].mxu0  ;;  %v2444_v54 = vadd.f32 %v5590_v32, %v2443_v43 }
 0x228   :  { %v5607_v26 = vadd.f32 %v2354_v44, %v5372_v63  ;;  %v2356_v18 = vpop.f32.mrb[34].mxu0 }
 0x229   :  { %v5610_v27 = vadd.f32 %v2356_v18, %v5375_v0  ;;  %v2358_v20 = vpop.f32.mrb[35].mxu0  ;;  %v2413_v0 = vadd.f32 %v5594_v5, %v2412_v9 }
 0x22a   :  { %v5614_v52 = vadd.f32 %v2358_v20, %v5378_v8  ;;  %v2445_v8 = vadd.f32 %v5597_v48, %v2444_v54 }
 0x22b   :  { %v2414_v46 = vadd.f32 %v5604_v16, %v2413_v0 }
 0x22e   :  { %v2362_v51 = vpop.f32.mrb[36].mxu0 }
 0x22f   :  { %v5620_v63 = vadd.f32 %v2362_v51, %v5396_v11  ;;  %v2364_v44 = vpop.f32.mrb[37].mxu0  ;;  %v2446_v11 = vadd.f32 %v5607_v26, %v2445_v8  ;;  %v2415_v51 = vadd.f32 %v5610_v27, %v2414_v46 }
 0x230   :  { %v5624_v18 = vadd.f32 %v2364_v44, %v5399_v2  ;;  %v2366_v3 = vpop.f32.mrb[38].mxu0 }
 0x231   :  { %6501 = vst [vmem:[#allocation32_spill] sm:$0xff] %v5620_v63  ;;  %v5628_v20 = vadd.f32 %v2366_v3, %v5402_v30  ;;  %v2368_v12 = vpop.f32.mrb[39].mxu0  ;;  %v2447_v2 = vadd.f32 %v5614_v52, %v2446_v11  ;;  %v2416_v30 = vadd.f32 %v5620_v63, %v2415_v51 }
 0x232   :  { %v5632_v43 = vadd.f32 %v2368_v12, %v5404_v36 }
 0x233   :  { %6502 = vst [vmem:[#allocation33_spill] sm:$0xff] %v5628_v20  ;;  %v2448_v36 = vadd.f32 %v5624_v18, %v2447_v2  ;;  %v2417_v11 = vadd.f32 %v5628_v20, %v2416_v30 }
 0x236   :  { %v2372_v9 = vpop.f32.mrb[40].mxu0 }
 0x237   :  { %v5638_v44 = vadd.f32 %v2372_v9, %v5422_v37  ;;  %v2374_v54 = vpop.f32.mrb[41].mxu0  ;;  %v2449_v37 = vadd.f32 %v5632_v43, %v2448_v36 }
 0x238   :  { %v5642_v3 = vadd.f32 %v2374_v54, %v5425_v29  ;;  %v2376_v0 = vpop.f32.mrb[42].mxu0 }
 0x239   :  { %6503 = vst [vmem:[#allocation34_spill] sm:$0xff] %v5638_v44  ;;  %v5646_v12 = vadd.f32 %v2376_v0, %v5434_v14  ;;  %v2378_v8 = vpop.f32.mrb[43].mxu0  ;;  %v2418_v9 = vadd.f32 %v5638_v44, %v2417_v11 }
 0x23a   :  { %v5649_v46 = vadd.f32 %v2378_v8, %v5444_v53  ;;  %v2450_v29 = vadd.f32 %v5642_v3, %v2449_v37 }
 0x23b   :  { %6504 = vst [vmem:[#allocation35_spill] sm:$0xff] %v5646_v12  ;;  %v2419_v30 = vadd.f32 %v5646_v12, %v2418_v9 }
 0x23c   :  { %v2451_v11 = vadd.f32 %v5649_v46, %v2450_v29 }
 0x23e   :  { %v2382_v51 = vpop.f32.mrb[44].mxu0 }
 0x23f   :  { %v5656_v54 = vadd.f32 %v2382_v51, %v5466_v10  ;;  %v2384_v2 = vpop.f32.mrb[45].mxu0 }
 0x240   :  { %v5659_v14 = vadd.f32 %v2384_v2, %v5469_v40  ;;  %v2386_v0 = vpop.f32.mrb[46].mxu0 }
 0x241   :  { %6505 = vst [vmem:[#allocation36_spill] sm:$0xff] %v5656_v54  ;;  %v5662_v53 = vadd.f32 %v2386_v0, %v5472_v56  ;;  %v2388_v8 = vpop.f32.mrb[47].mxu0  ;;  %v2420_v37 = vadd.f32 %v5656_v54, %v2419_v30 }
 0x242   :  { %v5666_v36 = vadd.f32 %v2388_v8, %v5475_v62  ;;  %v2452_v10 = vadd.f32 %v5659_v14, %v2451_v11 }
 0x243   :  { %6506 = vst [vmem:[#allocation37_spill] sm:$0xff] %v5662_v53  ;;  %v2421_v56 = vadd.f32 %v5662_v53, %v2420_v37 }
 0x244   :  { %v2453_v62 = vadd.f32 %v5666_v36, %v2452_v10 }
 0x246   :  { %v2392_v51 = vpop.f32.mrb[48].mxu0 }
 0x247   :  { %v5672_v40 = vadd.f32 %v2392_v51, %v5477_v58  ;;  %v2394_v2 = vpop.f32.mrb[49].mxu0 }
 0x248   :  { %v5676_v0 = vadd.f32 %v2394_v2, %v5479_v55  ;;  %v2396_v9 = vpop.f32.mrb[50].mxu0 }
 0x249   :  { %v2423_v29 = vsel %vm2422_vm0, %v5672_v40, 0.0  ;;  %v2397_v8 = vpop.f32.mrb[51].mxu0 }
 0x24a   :  { %v2424_v30 = vadd.f32 %v2423_v29, %v2421_v56  ;;  %v2454_v11 = vsel %vm2422_vm0, %v5676_v0, 0.0  ;;  %v6507_v56 = vld [vmem:[#allocation2_spill] sm:$0xff]  ;;  %v6518_v29 = vld [vmem:[#allocation13_spill] sm:$0xff] }
 0x24b   :  { %v2455_v54 = vadd.f32 %v2454_v11, %v2453_v62  ;;  %v6508_v62 = vld [vmem:[#allocation3_spill] sm:$0xff]  ;;  %v6519_v8 = vld [vmem:[#allocation14_spill] sm:$0xff]  ;;  %v6521_v11 = vld [vmem:[#allocation16_spill] sm:$0xff] }
 0x24c   :  { %v2425_v58 = vrot.slane %v2424_v30, 4 }
 0x24d   :  { %v2456_v51 = vrot.slane %v2455_v54, 4 }
 0x24e   :  { %v2426_v12 = vadd.f32 %v2425_v58, %v2424_v30  ;;  %v6520_v30 = vld [vmem:[#allocation15_spill] sm:$0xff]  ;;  %v6522_v58 = vld [vmem:[#allocation17_spill] sm:$0xff] }
 0x24f   :  { %v2457_v44 = vadd.f32 %v2456_v51, %v2455_v54  ;;  %v6509_v54 = vld [vmem:[#allocation4_spill] sm:$0xff]  ;;  %v6523_v51 = vld [vmem:[#allocation18_spill] sm:$0xff] }
 0x250   :  { %v2427_v37 = vrot.slane %v2426_v12, 2 }
 0x251   :  { %v2458_v53 = vrot.slane %v2457_v44, 2 }
 0x252   :  { %v2428_v55 = vadd.f32 %v2427_v37, %v2426_v12  ;;  %v6510_v12 = vld [vmem:[#allocation5_spill] sm:$0xff]  ;;  %v6524_v37 = vld [vmem:[#allocation19_spill] sm:$0xff] }
 0x253   :  { %v2459_v2 = vadd.f32 %v2458_v53, %v2457_v44  ;;  %v6511_v44 = vld [vmem:[#allocation6_spill] sm:$0xff]  ;;  %v6513_v53 = vld [vmem:[#allocation8_spill] sm:$0xff] }
 0x254   :  { %v2429_v9 = vrot.slane %v2428_v55, 1 }
 0x255   :  { %v2460_v20 = vrot.slane %v2459_v2, 1 }
 0x256   :  { %v2430_v63 = vadd.f32 %v2429_v9, %v2428_v55  ;;  %v6525_v55 = vld [vmem:[#allocation20_spill] sm:$0xff]  ;;  %v6527_v9 = vld [vmem:[#allocation22_spill] sm:$0xff] }
 0x257   :  { %v2461_v10 = vadd.f32 %v2460_v20, %v2459_v2  ;;  %v6512_v20 = vld [vmem:[#allocation7_spill] sm:$0xff]  ;;  %v6526_v2 = vld [vmem:[#allocation21_spill] sm:$0xff] }
 0x259   :  { %2590 = vmatprep.mubr.f32.mxu1 %v2461_v10  ;;  %v6528_v10 = vld [vmem:[#allocation23_spill] sm:$0xff] }
 0x25a   :  { %2591 = vmatmul.mubr.f32.vlgmr.msra.gmra.mrb[52].mxu1 %v2430_v63  ;;  %v6514_v63 = vld [vmem:[#allocation9_spill] sm:$0xff] }
 0x25b   :  { %3637 = vmatpush1.bf16.msra.mxu1 %v5106_v15  ;;  %v6515_v15 = vld [vmem:[#allocation10_spill] sm:$0xff] }
 0x25c   :  { %3639 = vmatprep.subr.bf16.mxu1 %v5119_v19  ;;  %v6516_v19 = vld [vmem:[#allocation11_spill] sm:$0xff] }
 0x25f   :  { %3641 = vmatpush1.bf16.msra.mxu1 %v5126_v22  ;;  %v6517_v22 = vld [vmem:[#allocation12_spill] sm:$0xff] }
 0x260   :  { %3643 = vmatprep.subr.bf16.mxu1 %v6507_v56  ;;  %v6529_v56 = vld [vmem:[#allocation24_spill] sm:$0xff] }
 0x263   :  { %3645 = vmatpush1.bf16.msra.mxu1 %v6508_v62  ;;  %v6530_v62 = vld [vmem:[#allocation25_spill] sm:$0xff] }
 0x264   :  { %3647 = vmatprep.subr.bf16.mxu1 %v6509_v54  ;;  %v6531_v54 = vld [vmem:[#allocation26_spill] sm:$0xff] }
 0x267   :  { %3649 = vmatpush1.bf16.msra.mxu1 %v6510_v12  ;;  %v6532_v12 = vld [vmem:[#allocation27_spill] sm:$0xff] }
 0x268   :  { %3651 = vmatprep.subr.bf16.mxu1 %v6511_v44  ;;  %v6533_v44 = vld [vmem:[#allocation28_spill] sm:$0xff] }
 0x26b   :  { %3653 = vmatpush1.bf16.msra.mxu1 %v6512_v20  ;;  %v6534_v20 = vld [vmem:[#allocation29_spill] sm:$0xff] }
 0x26c   :  { %3655 = vmatprep.subr.bf16.mxu1 %v6513_v53  ;;  %v2599_v53 = vlaneseq }
 0x26f   :  { %3657 = vmatpush1.bf16.msra.mxu1 %v6514_v63  ;;  %v5714_v63 = vshrl.u32 %v2599_v53, 7 }
 0x270   :  { %3659 = vmatprep.subr.bf16.mxu1 %v6515_v15 }
 0x273   :  { %3661 = vmatpush1.bf16.msra.mxu1 %v6516_v19 }
 0x274   :  { %3663 = vmatprep.subr.bf16.mxu1 %v6517_v22  ;;  %v5717_v22 = vsub.s32 0, %v5714_v63 }
 0x277   :  { %3665 = vmatpush1.bf16.msra.mxu1 %v6518_v29 }
 0x278   :  { %3667 = vmatprep.subr.bf16.mxu1 %v6519_v8 }
 0x27b   :  { %3669 = vmatpush1.bf16.msra.mxu1 %v6520_v30 }
 0x27c   :  { %3671 = vmatprep.subr.bf16.mxu1 %v6521_v11 }
 0x27f   :  { %3673 = vmatpush1.bf16.msra.mxu1 %v6522_v58 }
 0x280   :  { %3675 = vmatprep.subr.bf16.mxu1 %v6523_v51 }
 0x283   :  { %3677 = vmatpush1.bf16.msra.mxu1 %v6524_v37 }
 0x284   :  { %3679 = vmatprep.subr.bf16.mxu1 %v6525_v55 }
 0x287   :  { %3681 = vmatpush1.bf16.msra.mxu1 %v6526_v2 }
 0x288   :  { %3683 = vmatprep.subr.bf16.mxu1 %v6527_v9 }
 0x28b   :  { %3685 = vmatpush1.bf16.msra.mxu1 %v6528_v10 }
 0x28c   :  { %3687 = vmatprep.subr.bf16.mxu1 %v6529_v56 }
 0x28f   :  { %3689 = vmatpush1.bf16.msra.mxu1 %v6530_v62 }
 0x290   :  { %3691 = vmatprep.subr.bf16.mxu1 %v6531_v54 }
 0x293   :  { %3693 = vmatpush1.bf16.msra.mxu1 %v6532_v12  ;;  %v6535_v12 = vld [vmem:[#allocation30_spill] sm:$0xff] }
 0x294   :  { %3695 = vmatprep.subr.bf16.mxu1 %v6533_v44 }
 0x297   :  { %3697 = vmatpush1.bf16.msra.mxu1 %v6534_v20 }
 0x32d   :  { %v2592_v15 = vpop.f32.mrb[52].mxu1 }
 0x32e   :  { %v2594_v19 = vpop.f32.mrb[53].mxu1  ;;  %v2597_v55 = vmul.f32 0.0012755102, %v2592_v15  ;;  %v6536_v15 = vld [vmem:[#allocation31_spill] sm:$0xff] }
 0x32f   :  { %v2598_v29 = vmul.f32 0.0012755102, %v2594_v19 }
 0x330   :  { %v5749_v9 = vrot.slane %v2597_v55, %v5717_v22 }
 0x331   :  { %v5720_v8 = vrot.slane %v2598_v29, %v5717_v22 }
 0x332   :  { %v5765_v44 = vsub.f32 %v6535_v12, %v5749_v9 }
 0x333   :  { %v5724_v30 = vsub.f32 %v5485_v41, %v5720_v8  ;;  %v5728_v11 = vsub.f32 %v5491_v31, %v5720_v8  ;;  %v5732_v58 = vsub.f32 %v5497_v21, %v5720_v8  ;;  %v5740_v2 = vsub.f32 %v5503_v24, %v5720_v8 }
 0x334   :  { %v5744_v41 = vsub.f32 %v5509_v28, %v5720_v8  ;;  %v5753_v10 = vsub.f32 %v5515_v34, %v5720_v8  ;;  %v5759_v62 = vsub.f32 %v5521_v47, %v5720_v8  ;;  %v5769_v34 = vsub.f32 %v5527_v50, %v5720_v8 }
 0x335   :  { %v2658_v51 = vmul.f32 %v5724_v30, %v5724_v30  ;;  %v2660_v37 = vmul.f32 %v5728_v11, %v5728_v11  ;;  %v2662_v31 = vmul.f32 %v5732_v58, %v5732_v58  ;;  %v2664_v56 = vmul.f32 %v5740_v2, %v5740_v2 }
 0x336   :  { %v2666_v28 = vmul.f32 %v5744_v41, %v5744_v41  ;;  %v2668_v20 = vmul.f32 %v5753_v10, %v5753_v10  ;;  %v5775_v47 = vsub.f32 %v6536_v15, %v5749_v9  ;;  %v5779_v19 = vsub.f32 %v5538_v60, %v5720_v8 }
 0x337   :  { %v2738_v21 = vadd.f32 %v2660_v37, %v2658_v51  ;;  %v2670_v29 = vmul.f32 %v5759_v62, %v5759_v62  ;;  %v5785_v50 = vsub.f32 %v5545_v38, %v5720_v8  ;;  %v5789_v37 = vsub.f32 %v5494_v1, %v5749_v9 }
 0x338   :  { %v2672_v55 = vmul.f32 %v5769_v34, %v5769_v34  ;;  %v2657_v60 = vmul.f32 %v5765_v44, %v5765_v44  ;;  %v2674_v38 = vmul.f32 %v5779_v19, %v5779_v19  ;;  %v5805_v1 = vsub.f32 %v5500_v23, %v5749_v9 }
 0x339   :  { %v2739_v24 = vadd.f32 %v2738_v21, %v2662_v31  ;;  %v2659_v21 = vmul.f32 %v5775_v47, %v5775_v47  ;;  %v5821_v23 = vsub.f32 %v5572_v4, %v5720_v8 }
 0x33b   :  { %v2740_v54 = vadd.f32 %v2739_v24, %v2664_v56  ;;  %v5799_v56 = vsub.f32 %v5555_v6, %v5720_v8  ;;  %v5815_v6 = vsub.f32 %v5506_v25, %v5749_v9  ;;  %v2663_v25 = vmul.f32 %v5805_v1, %v5805_v1 }
 0x33d   :  { %v2741_v53 = vadd.f32 %v2740_v54, %v2666_v28  ;;  %v5809_v28 = vsub.f32 %v5562_v61, %v5720_v8  ;;  %v2676_v54 = vmul.f32 %v5785_v50, %v5785_v50  ;;  %v2678_v61 = vmul.f32 %v5799_v56, %v5799_v56 }
 0x33f   :  { %v2742_v51 = vadd.f32 %v2741_v53, %v2668_v20  ;;  %v2661_v20 = vmul.f32 %v5789_v37, %v5789_v37  ;;  %v2707_v53 = vadd.f32 %v2659_v21, %v2657_v60  ;;  %v2680_v4 = vmul.f32 %v5809_v28, %v5809_v28 }
 0x340   :  { %v5839_v60 = vsub.f32 %v5518_v35, %v5749_v9 }
 0x341   :  { %v2743_v31 = vadd.f32 %v2742_v51, %v2670_v29  ;;  %v5827_v29 = vsub.f32 %v5512_v33, %v5749_v9  ;;  %v2708_v51 = vadd.f32 %v2707_v53, %v2661_v20  ;;  %v2665_v33 = vmul.f32 %v5815_v6, %v5815_v6 }
 0x342   :  { %v5857_v20 = vsub.f32 %v5597_v48, %v5720_v8 }
 0x343   :  { %v2744_v24 = vadd.f32 %v2743_v31, %v2672_v55  ;;  %v5833_v55 = vsub.f32 %v5580_v45, %v5720_v8  ;;  %v2709_v21 = vadd.f32 %v2708_v51, %v2663_v25  ;;  %v2682_v45 = vmul.f32 %v5821_v23, %v5821_v23 }
 0x344   :  { %v2667_v35 = vmul.f32 %v5827_v29, %v5827_v29  ;;  %6538 = vst [vmem:[#allocation3_spill] sm:$0xff] %v5857_v20  ;;  %v5869_v25 = vsub.f32 %v5607_v26, %v5720_v8  ;;  %v2688_v26 = vmul.f32 %v5857_v20, %v5857_v20 }
 0x345   :  { %v2745_v12 = vadd.f32 %v2744_v24, %v2674_v38  ;;  %v5845_v38 = vsub.f32 %v5590_v32, %v5720_v8  ;;  %v2684_v32 = vmul.f32 %v5833_v55, %v5833_v55 }
 0x346   :  { %6539 = vst [vmem:[#allocation4_spill] sm:$0xff] %v5869_v25 }
 0x347   :  { %v2746_v15 = vadd.f32 %v2745_v12, %v2676_v54  ;;  %6537 = vst [vmem:[#allocation2_spill] sm:$0xff] %v5845_v38  ;;  %v5851_v54 = vsub.f32 %v5524_v49, %v5749_v9  ;;  %v2710_v12 = vadd.f32 %v2709_v21, %v2665_v33  ;;  %v2669_v49 = vmul.f32 %v5839_v60, %v5839_v60 }
 0x348   :  { %v2686_v48 = vmul.f32 %v5845_v38, %v5845_v38  ;;  %v5881_v33 = vsub.f32 %v5614_v52, %v5720_v8  ;;  %v2690_v52 = vmul.f32 %v5869_v25, %v5869_v25 }
 0x349   :  { %v2747_v31 = vadd.f32 %v2746_v15, %v2678_v61  ;;  %v5863_v61 = vsub.f32 %v5534_v42, %v5749_v9  ;;  %v2711_v15 = vadd.f32 %v2710_v12, %v2667_v35  ;;  %v2671_v42 = vmul.f32 %v5851_v54, %v5851_v54 }
 0x34a   :  { %6540 = vst [vmem:[#allocation5_spill] sm:$0xff] %v5881_v33  ;;  %v5893_v35 = vsub.f32 %v5624_v18, %v5720_v8  ;;  %v2692_v18 = vmul.f32 %v5881_v33, %v5881_v33 }
 0x34b   :  { %v2748_v24 = vadd.f32 %v2747_v31, %v2680_v4  ;;  %v5875_v4 = vsub.f32 %v5542_v39, %v5749_v9  ;;  %v2712_v31 = vadd.f32 %v2711_v15, %v2669_v49  ;;  %v2673_v39 = vmul.f32 %v5863_v61, %v5863_v61 }
 0x34c   :  { %6541 = vst [vmem:[#allocation6_spill] sm:$0xff] %v5893_v35  ;;  %v5905_v49 = vsub.f32 %v5632_v43, %v5720_v8  ;;  %v2694_v43 = vmul.f32 %v5893_v35, %v5893_v35 }
 0x34d   :  { %v2749_v53 = vadd.f32 %v2748_v24, %v2682_v45  ;;  %v5887_v45 = vsub.f32 %v5552_v59, %v5749_v9  ;;  %v2713_v24 = vadd.f32 %v2712_v31, %v2671_v42  ;;  %v2675_v59 = vmul.f32 %v5875_v4, %v5875_v4 }
 0x34e   :  { %6542 = vst [vmem:[#allocation7_spill] sm:$0xff] %v5905_v49  ;;  %v5917_v42 = vsub.f32 %v5642_v3, %v5720_v8  ;;  %v2696_v3 = vmul.f32 %v5905_v49, %v5905_v49 }
 0x34f   :  { %v2750_v51 = vadd.f32 %v2749_v53, %v2684_v32  ;;  %v5899_v32 = vsub.f32 %v5558_v7, %v5749_v9  ;;  %v2714_v53 = vadd.f32 %v2713_v24, %v2673_v39  ;;  %v2677_v7 = vmul.f32 %v5887_v45, %v5887_v45 }
 0x350   :  { %6543 = vst [vmem:[#allocation8_spill] sm:$0xff] %v5917_v42  ;;  %v5929_v39 = vsub.f32 %v5649_v46, %v5720_v8  ;;  %v2698_v46 = vmul.f32 %v5917_v42, %v5917_v42 }
 0x351   :  { %v2751_v21 = vadd.f32 %v2750_v51, %v2686_v48  ;;  %v5911_v48 = vsub.f32 %v5568_v17, %v5749_v9  ;;  %v2715_v51 = vadd.f32 %v2714_v53, %v2675_v59  ;;  %v2679_v17 = vmul.f32 %v5899_v32, %v5899_v32 }
 0x352   :  { %6544 = vst [vmem:[#allocation9_spill] sm:$0xff] %v5929_v39  ;;  %v5941_v59 = vsub.f32 %v5659_v14, %v5720_v8  ;;  %v5957_v14 = vsub.f32 %v5676_v0, %v5720_v8  ;;  %v5971_v0 = vsub.f32 %v5610_v27, %v5749_v9 }
 0x353   :  { %v2752_v12 = vadd.f32 %v2751_v21, %v2688_v26  ;;  %v5923_v26 = vsub.f32 %v5576_v13, %v5749_v9  ;;  %v2716_v21 = vadd.f32 %v2715_v51, %v2677_v7  ;;  %v2681_v13 = vmul.f32 %v5911_v48, %v5911_v48 }
 0x354   :  { %6545 = vst [vmem:[#allocation10_spill] sm:$0xff] %v5941_v59  ;;  %v5953_v7 = vsub.f32 %v5666_v36, %v5720_v8  ;;  %6547 = vst [vmem:[#allocation12_spill] sm:$0xff] %v5957_v14  ;;  %v2700_v51 = vmul.f32 %v5929_v39, %v5929_v39  ;;  %v2702_v36 = vmul.f32 %v5941_v59, %v5941_v59 }
 0x355   :  { %v2753_v15 = vadd.f32 %v2752_v12, %v2690_v52  ;;  %v5935_v52 = vsub.f32 %v5586_v57, %v5749_v9  ;;  %v2717_v12 = vadd.f32 %v2716_v21, %v2679_v17  ;;  %v2683_v57 = vmul.f32 %v5923_v26, %v5923_v26 }
 0x356   :  { %6546 = vst [vmem:[#allocation11_spill] sm:$0xff] %v5953_v7 }
 0x357   :  { %v2754_v31 = vadd.f32 %v2753_v15, %v2692_v18  ;;  %v5947_v18 = vsub.f32 %v5594_v5, %v5749_v9  ;;  %v2718_v15 = vadd.f32 %v2717_v12, %v2681_v13  ;;  %v5963_v5 = vsub.f32 %v5604_v16, %v5749_v9  ;;  %v6548_v12 = vld [vmem:[#allocation32_spill] sm:$0xff] }
 0x358   :  { %v2704_v16 = vmul.f32 %v5953_v7, %v5953_v7 }
 0x359   :  { %v2755_v24 = vadd.f32 %v2754_v31, %v2694_v43  ;;  %v2685_v31 = vmul.f32 %v5935_v52, %v5935_v52  ;;  %v2719_v17 = vadd.f32 %v2718_v15, %v2683_v57  ;;  %v2687_v8 = vmul.f32 %v5947_v18, %v5947_v18  ;;  %v6549_v15 = vld [vmem:[#allocation33_spill] sm:$0xff] }
 0x35b   :  { %v2756_v53 = vadd.f32 %v2755_v24, %v2696_v3  ;;  %v2720_v3 = vadd.f32 %v2719_v17, %v2685_v31  ;;  %v2706_v24 = vmul.f32 %v5957_v14, %v5957_v14 }
 0x35d   :  { %v2757_v43 = vadd.f32 %v2756_v53, %v2698_v46  ;;  %v5981_v46 = vsub.f32 %v6548_v12, %v5749_v9  ;;  %v2689_v53 = vmul.f32 %v5963_v5, %v5963_v5  ;;  %v2721_v27 = vadd.f32 %v2720_v3, %v2687_v8 }
 0x35e   :  { %v2761_v17 = vsel %vm2422_vm0, %v2706_v24, 0.0  ;;  %v6552_v24 = vld [vmem:[#allocation36_spill] sm:$0xff] }
 0x35f   :  { %v2758_v21 = vadd.f32 %v2757_v43, %v2700_v51  ;;  %v5987_v51 = vsub.f32 %v6549_v15, %v5749_v9  ;;  %v2691_v43 = vmul.f32 %v5971_v0, %v5971_v0  ;;  %v2722_v31 = vadd.f32 %v2721_v27, %v2689_v53 }
 0x360   :  { %v2693_v14 = vmul.f32 %v5981_v46, %v5981_v46 }
 0x361   :  { %v2759_v13 = vadd.f32 %v2758_v21, %v2702_v36  ;;  %v6550_v21 = vld [vmem:[#allocation34_spill] sm:$0xff]  ;;  %v2723_v8 = vadd.f32 %v2722_v31, %v2691_v43  ;;  %v2695_v15 = vmul.f32 %v5987_v51, %v5987_v51  ;;  %v6012_v43 = vsub.f32 %v5672_v40, %v5749_v9 }
 0x362   :  { %v5994_v12 = vsub.f32 %v6550_v21, %v5749_v9 }
 0x363   :  { %v2760_v57 = vadd.f32 %v2759_v13, %v2704_v16  ;;  %v6551_v16 = vld [vmem:[#allocation35_spill] sm:$0xff]  ;;  %v2724_v53 = vadd.f32 %v2723_v8, %v2693_v14 }
 0x364   :  { %v6000_v13 = vsub.f32 %v6551_v16, %v5749_v9  ;;  %v6553_v16 = vld [vmem:[#allocation37_spill] sm:$0xff] }
 0x365   :  { %v2762_v36 = vadd.f32 %v2761_v17, %v2760_v57  ;;  %v6006_v57 = vsub.f32 %v6552_v24, %v5749_v9  ;;  %v2697_v17 = vmul.f32 %v5994_v12, %v5994_v12  ;;  %v2725_v21 = vadd.f32 %v2724_v53, %v2695_v15 }
 0x366   :  { %v6016_v7 = vsub.f32 %v6553_v16, %v5749_v9  ;;  %v2699_v14 = vmul.f32 %v6000_v13, %v6000_v13  ;;  %v2705_v15 = vmul.f32 %v6012_v43, %v6012_v43 }
 0x367   :  { %v2763_v3 = vrot.slane %v2762_v36, 4 }
 0x368   :  { %v2703_v40 = vmul.f32 %v6016_v7, %v6016_v7  ;;  %v2730_v16 = vsel %vm2422_vm0, %v2705_v15, 0.0 }
 0x369   :  { %v2764_v27 = vadd.f32 %v2763_v3, %v2762_v36  ;;  %v2726_v36 = vadd.f32 %v2725_v21, %v2697_v17  ;;  %v2701_v3 = vmul.f32 %v6006_v57, %v6006_v57 }
 0x36b   :  { %v2765_v31 = vrot.slane %v2764_v27, 2  ;;  %v2727_v24 = vadd.f32 %v2726_v36, %v2699_v14 }
 0x36d   :  { %v2766_v8 = vadd.f32 %v2765_v31, %v2764_v27  ;;  %v2728_v59 = vadd.f32 %v2727_v24, %v2701_v3 }
 0x36f   :  { %v2767_v53 = vrot.slane %v2766_v8, 1  ;;  %v2729_v9 = vadd.f32 %v2728_v59, %v2703_v40  ;;  %v2912_v59 = vsub.s32 1, %v5714_v63 }
 0x371   :  { %v2768_v39 = vadd.f32 %v2767_v53, %v2766_v8  ;;  %v2731_v42 = vadd.f32 %v2730_v16, %v2729_v9 }
 0x373   :  { %2833 = vmatprep.mubr.f32.mxu1 %v2768_v39  ;;  %v2732_v17 = vrot.slane %v2731_v42, 4  ;;  %v2904_v39 = vld [vmem:[%s6414_s3] sm:$0x3] }
 0x374   :  { %v2909_v3 = vrot.slane %v2904_v39, %v5717_v22 }
 0x375   :  { %v2733_v27 = vadd.f32 %v2732_v17, %v2731_v42  ;;  %v2966_v42 = vld [vmem:[%s6415_s4] sm:$0x3] }
 0x377   :  { %v2734_v21 = vrot.slane %v2733_v27, 2 }
 0x379   :  { %v2735_v31 = vadd.f32 %v2734_v21, %v2733_v27 }
 0x37b   :  { %v2736_v49 = vrot.slane %v2735_v31, 1 }
 0x37d   :  { %v2737_v14 = vadd.f32 %v2736_v49, %v2735_v31 }
 0x37f   :  { %2834 = vmatmul.mubr.f32.vlgmr.msra.gmra.mrb[54].mxu1 %v2737_v14 }
 0x452   :  { %v2835_v36 = vpop.f32.mrb[54].mxu1 }
 0x453   :  { %v2840_v35 = vmul.f32 0.0012755102, %v2835_v36  ;;  %v2837_v33 = vpop.f32.mrb[55].mxu1 }
 0x454   :  { %v2841_v25 = vmul.f32 0.0012755102, %v2837_v33 }
 0x455   :  { %v2842_v20 = vadd.f32 1e-05, %v2840_v35  ;;  %v6036_v35 = vrot.slane %v2904_v39, %v2912_v59 }
 0x456   :  { %v2843_v38 = vadd.f32 1e-05, %v2841_v25 }
 0x457   :  { %4286 = vrsqrt.f32 %v2842_v20  ;;  %v6041_v20 = vrot.slane %v2966_v42, %v2912_v59 }
 0x458   :  { %4288 = vrsqrt.f32 %v2843_v38  ;;  %v6039_v38 = vrot.slane %v2966_v42, %v5717_v22 }
 0x459   :  { %6554 = vst [vmem:[#allocation13_spill] sm:$0xff] %v6041_v20 }
 0x461   :  { %v4287_v49 = vpop.eup %4286 }
 0x462   :  { %v4289_v8 = vpop.eup %4288  ;;  %v2849_v33 = vrot.slane %v4287_v49, %v5717_v22 }
 0x463   :  { %v6044_v25 = vrot.slane %v4289_v8, %v5717_v22 }
 0x464   :  { %v2854_v63 = vmul.f32 %v2849_v33, %v5765_v44  ;;  %v2856_v24 = vmul.f32 %v2849_v33, %v5775_v47  ;;  %v2858_v15 = vmul.f32 %v2849_v33, %v5789_v37  ;;  %v2860_v53 = vmul.f32 %v2849_v33, %v5805_v1 }
 0x465   :  { %v2862_v40 = vmul.f32 %v2849_v33, %v5815_v6  ;;  %v2864_v9 = vmul.f32 %v2849_v33, %v5827_v29  ;;  %v2866_v16 = vmul.f32 %v2849_v33, %v5839_v60  ;;  %v2868_v17 = vmul.f32 %v2849_v33, %v5851_v54 }
 0x466   :  { %v2870_v27 = vmul.f32 %v2849_v33, %v5863_v61  ;;  %v2872_v22 = vmul.f32 %v2849_v33, %v5875_v4  ;;  %v2874_v44 = vmul.f32 %v2849_v33, %v5887_v45  ;;  %v2876_v47 = vmul.f32 %v2849_v33, %v5899_v32 }
 0x467   :  { %v2878_v37 = vmul.f32 %v2849_v33, %v5911_v48  ;;  %v2880_v1 = vmul.f32 %v2849_v33, %v5923_v26  ;;  %v2882_v6 = vmul.f32 %v2849_v33, %v5935_v52  ;;  %v2884_v29 = vmul.f32 %v2849_v33, %v5947_v18 }
 0x468   :  { %v2886_v60 = vmul.f32 %v2849_v33, %v5963_v5  ;;  %v2888_v54 = vmul.f32 %v2849_v33, %v5971_v0  ;;  %v2890_v61 = vmul.f32 %v2849_v33, %v5981_v46  ;;  %v2892_v4 = vmul.f32 %v2849_v33, %v5987_v51 }
 0x469   :  { %v2894_v45 = vmul.f32 %v2849_v33, %v5994_v12  ;;  %v2896_v32 = vmul.f32 %v2849_v33, %v6000_v13  ;;  %v2898_v48 = vmul.f32 %v2849_v33, %v6006_v57  ;;  %v2900_v26 = vmul.f32 %v2849_v33, %v6016_v7 }
 0x46a   :  { %v2902_v52 = vmul.f32 %v2849_v33, %v6012_v43  ;;  %v2916_v21 = vmul.f32 %v2909_v3, %v2854_v63  ;;  %v2918_v18 = vmul.f32 %v2909_v3, %v2856_v24  ;;  %v2920_v31 = vmul.f32 %v2909_v3, %v2858_v15 }
 0x46b   :  { %v2922_v5 = vmul.f32 %v2909_v3, %v2860_v53  ;;  %v2924_v14 = vmul.f32 %v2909_v3, %v2862_v40  ;;  %v2926_v0 = vmul.f32 %v2909_v3, %v2864_v9  ;;  %v2928_v36 = vmul.f32 %v2909_v3, %v2866_v16 }
 0x46c   :  { %v2930_v46 = vmul.f32 %v2909_v3, %v2868_v17  ;;  %v2932_v39 = vmul.f32 %v2909_v3, %v2870_v27  ;;  %v2934_v51 = vmul.f32 %v2909_v3, %v2872_v22  ;;  %v2936_v59 = vmul.f32 %v2909_v3, %v2874_v44 }
 0x46d   :  { %v2938_v12 = vmul.f32 %v2909_v3, %v2876_v47  ;;  %v2940_v42 = vmul.f32 %v2909_v3, %v2878_v37  ;;  %v2942_v13 = vmul.f32 %v2909_v3, %v2880_v1  ;;  %v2944_v49 = vmul.f32 %v2909_v3, %v2882_v6 }
 0x46e   :  { %v2946_v57 = vmul.f32 %v2909_v3, %v2884_v29  ;;  %v2948_v8 = vmul.f32 %v2909_v3, %v2886_v60  ;;  %v2950_v7 = vmul.f32 %v2909_v3, %v2888_v54  ;;  %v2952_v20 = vmul.f32 %v2909_v3, %v2890_v61 }
 0x46f   :  { %v2954_v43 = vmul.f32 %v2909_v3, %v2892_v4  ;;  %v2956_v33 = vmul.f32 %v2909_v3, %v2894_v45  ;;  %v2958_v63 = vmul.f32 %v2909_v3, %v2896_v32  ;;  %v2960_v24 = vmul.f32 %v2909_v3, %v2898_v48 }
 0x470   :  { %v2962_v15 = vmul.f32 %v2909_v3, %v2900_v26  ;;  %v2964_v53 = vmul.f32 %v2909_v3, %v2902_v52  ;;  %v6072_v40 = vadd.f32 %v6039_v38, %v2916_v21  ;;  %v6075_v9 = vadd.f32 %v6039_v38, %v2918_v18 }
 0x471   :  { %v6078_v16 = vadd.f32 %v6039_v38, %v2920_v31  ;;  %v6081_v17 = vadd.f32 %v6039_v38, %v2922_v5  ;;  %v6084_v27 = vadd.f32 %v6039_v38, %v2924_v14  ;;  %v6087_v22 = vadd.f32 %v6039_v38, %v2926_v0 }
 0x472   :  { %v6090_v3 = vadd.f32 %v6039_v38, %v2928_v36  ;;  %v6093_v44 = vadd.f32 %v6039_v38, %v2930_v46  ;;  %v6096_v47 = vadd.f32 %v6039_v38, %v2932_v39  ;;  %v6099_v37 = vadd.f32 %v6039_v38, %v2934_v51  ;;  %v6569_v51 = vld [vmem:[#allocation10_spill] sm:$0xff]  ;;  %v6570_v39 = vld [vmem:[#allocation11_spill] sm:$0xff]  ;;  %v6571_v46 = vld [vmem:[#allocation12_spill] sm:$0xff] }
 0x473   :  { %v6102_v1 = vadd.f32 %v6039_v38, %v2936_v59  ;;  %v6105_v6 = vadd.f32 %v6039_v38, %v2938_v12  ;;  %v6108_v29 = vadd.f32 %v6039_v38, %v2940_v42  ;;  %v6111_v60 = vadd.f32 %v6039_v38, %v2942_v13  ;;  %v6564_v13 = vld [vmem:[#allocation5_spill] sm:$0xff]  ;;  %v6565_v42 = vld [vmem:[#allocation6_spill] sm:$0xff]  ;;  %v6566_v12 = vld [vmem:[#allocation7_spill] sm:$0xff] }
 0x474   :  { %v6114_v54 = vadd.f32 %v6039_v38, %v2944_v49  ;;  %v6117_v61 = vadd.f32 %v6039_v38, %v2946_v57  ;;  %v6120_v4 = vadd.f32 %v6039_v38, %v2948_v8  ;;  %v6123_v45 = vadd.f32 %v6039_v38, %v2950_v7  ;;  %v6563_v7 = vld [vmem:[#allocation4_spill] sm:$0xff]  ;;  %v6568_v59 = vld [vmem:[#allocation9_spill] sm:$0xff] }
 0x475   :  { %v6126_v32 = vadd.f32 %v6039_v38, %v2952_v20  ;;  %v6129_v48 = vadd.f32 %v6039_v38, %v2954_v43  ;;  %v6132_v26 = vadd.f32 %v6039_v38, %v2956_v33  ;;  %v6135_v52 = vadd.f32 %v6039_v38, %v2958_v63  ;;  %v6562_v63 = vld [vmem:[#allocation3_spill] sm:$0xff] }
 0x476   :  { %v6138_v21 = vadd.f32 %v6039_v38, %v2960_v24  ;;  %v6141_v18 = vadd.f32 %v6039_v38, %v2962_v15  ;;  %v6144_v31 = vadd.f32 %v6039_v38, %v2964_v53  ;;  %v2855_v8 = vmul.f32 %v6044_v25, %v5724_v30  ;;  %v6561_v53 = vld [vmem:[#allocation2_spill] sm:$0xff]  ;;  %v6567_v38 = vld [vmem:[#allocation8_spill] sm:$0xff] }
 0x477   :  { %6555 = vst [vmem:[#allocation14_spill] sm:$0xff] %v6129_v48  ;;  %6556 = vst [vmem:[#allocation15_spill] sm:$0xff] %v6132_v26  ;;  %v2857_v43 = vmul.f32 %v6044_v25, %v5728_v11  ;;  %v2859_v33 = vmul.f32 %v6044_v25, %v5732_v58  ;;  %v2861_v24 = vmul.f32 %v6044_v25, %v5740_v2 }
 0x478   :  { %6557 = vst [vmem:[#allocation16_spill] sm:$0xff] %v6135_v52  ;;  %6558 = vst [vmem:[#allocation17_spill] sm:$0xff] %v6138_v21  ;;  %v2863_v15 = vmul.f32 %v6044_v25, %v5744_v41  ;;  %v2865_v49 = vmul.f32 %v6044_v25, %v5753_v10  ;;  %v2867_v57 = vmul.f32 %v6044_v25, %v5759_v62 }
 0x479   :  { %6559 = vst [vmem:[#allocation18_spill] sm:$0xff] %v6141_v18  ;;  %6560 = vst [vmem:[#allocation19_spill] sm:$0xff] %v6144_v31  ;;  %v2869_v30 = vmul.f32 %v6044_v25, %v5769_v34  ;;  %v2871_v11 = vmul.f32 %v6044_v25, %v5779_v19  ;;  %v2873_v58 = vmul.f32 %v6044_v25, %v5785_v50 }
 0x47a   :  { %v2875_v2 = vmul.f32 %v6044_v25, %v5799_v56  ;;  %v2877_v41 = vmul.f32 %v6044_v25, %v5809_v28  ;;  %v2879_v10 = vmul.f32 %v6044_v25, %v5821_v23  ;;  %v2881_v62 = vmul.f32 %v6044_v25, %v5833_v55 }
 0x47b   :  { %v2883_v34 = vmul.f32 %v6044_v25, %v6561_v53  ;;  %v2885_v19 = vmul.f32 %v6044_v25, %v6562_v63  ;;  %v2887_v50 = vmul.f32 %v6044_v25, %v6563_v7  ;;  %v2889_v56 = vmul.f32 %v6044_v25, %v6564_v13 }
 0x47c   :  { %v2891_v28 = vmul.f32 %v6044_v25, %v6565_v42  ;;  %v2893_v23 = vmul.f32 %v6044_v25, %v6566_v12  ;;  %v2895_v55 = vmul.f32 %v6044_v25, %v6567_v38  ;;  %v2897_v53 = vmul.f32 %v6044_v25, %v6568_v59 }
 0x47d   :  { %v2899_v63 = vmul.f32 %v6044_v25, %v6569_v51  ;;  %v2901_v7 = vmul.f32 %v6044_v25, %v6570_v39  ;;  %v2903_v13 = vmul.f32 %v6044_v25, %v6571_v46  ;;  %v2917_v42 = vmul.f32 %v6036_v35, %v2855_v8 }
 0x47e   :  { %v2919_v36 = vmul.f32 %v6036_v35, %v2857_v43  ;;  %v2921_v12 = vmul.f32 %v6036_v35, %v2859_v33  ;;  %v2923_v38 = vmul.f32 %v6036_v35, %v2861_v24  ;;  %v2925_v0 = vmul.f32 %v6036_v35, %v2863_v15 }
 0x47f   :  { %v2927_v59 = vmul.f32 %v6036_v35, %v2865_v49  ;;  %v2929_v51 = vmul.f32 %v6036_v35, %v2867_v57  ;;  %v2931_v14 = vmul.f32 %v6036_v35, %v2869_v30  ;;  %v2933_v39 = vmul.f32 %v6036_v35, %v2871_v11 }
 0x480   :  { %v2935_v25 = vmul.f32 %v6036_v35, %v2873_v58  ;;  %v2937_v46 = vmul.f32 %v6036_v35, %v2875_v2  ;;  %v2939_v8 = vmul.f32 %v6036_v35, %v2877_v41  ;;  %v2941_v43 = vmul.f32 %v6036_v35, %v2879_v10 }
 0x481   :  { %v2943_v33 = vmul.f32 %v6036_v35, %v2881_v62  ;;  %v2945_v24 = vmul.f32 %v6036_v35, %v2883_v34  ;;  %v2947_v49 = vmul.f32 %v6036_v35, %v2885_v19  ;;  %v2949_v57 = vmul.f32 %v6036_v35, %v2887_v50  ;;  %v6572_v34 = vld [vmem:[#allocation13_spill] sm:$0xff] }
 0x482   :  { %v2951_v15 = vmul.f32 %v6036_v35, %v2889_v56  ;;  %v2953_v30 = vmul.f32 %v6036_v35, %v2891_v28  ;;  %v2955_v11 = vmul.f32 %v6036_v35, %v2893_v23  ;;  %v2957_v58 = vmul.f32 %v6036_v35, %v2895_v55 }
 0x483   :  { %v2959_v2 = vmul.f32 %v6036_v35, %v2897_v53  ;;  %v2961_v41 = vmul.f32 %v6036_v35, %v2899_v63  ;;  %v2963_v10 = vmul.f32 %v6036_v35, %v2901_v7  ;;  %v2965_v62 = vmul.f32 %v6036_v35, %v2903_v13 }
 0x484   :  { %v2979_v19 = vadd.f32 %v6572_v34, %v2917_v42  ;;  %v2981_v50 = vadd.f32 %v6572_v34, %v2919_v36  ;;  %v2983_v56 = vadd.f32 %v6572_v34, %v2921_v12  ;;  %v2985_v28 = vadd.f32 %v6572_v34, %v2923_v38 }
 0x485   :  { %v2987_v23 = vadd.f32 %v6572_v34, %v2925_v0  ;;  %v2989_v55 = vadd.f32 %v6572_v34, %v2927_v59  ;;  %v2991_v53 = vadd.f32 %v6572_v34, %v2929_v51  ;;  %v2993_v63 = vadd.f32 %v6572_v34, %v2931_v14 }
 0x486   :  { %v2995_v7 = vadd.f32 %v6572_v34, %v2933_v39  ;;  %v2997_v35 = vadd.f32 %v6572_v34, %v2935_v25  ;;  %v2999_v13 = vadd.f32 %v6572_v34, %v2937_v46  ;;  %v3001_v36 = vadd.f32 %v6572_v34, %v2939_v8 }
 0x487   :  { %v3003_v42 = vadd.f32 %v6572_v34, %v2941_v43  ;;  %v3005_v12 = vadd.f32 %v6572_v34, %v2943_v33  ;;  %v3007_v0 = vadd.f32 %v6572_v34, %v2945_v24  ;;  %v3009_v38 = vadd.f32 %v6572_v34, %v2947_v49 }
 0x488   :  { %v3011_v59 = vadd.f32 %v6572_v34, %v2949_v57  ;;  %v3013_v14 = vadd.f32 %v6572_v34, %v2951_v15  ;;  %v3015_v51 = vadd.f32 %v6572_v34, %v2953_v30  ;;  %v3017_v39 = vadd.f32 %v6572_v34, %v2955_v11 }
 0x489   :  { %v6267_v25 = vadd.f32 %v6572_v34, %v2957_v58  ;;  %v6270_v46 = vadd.f32 %v6572_v34, %v2959_v2  ;;  %v6273_v8 = vadd.f32 %v6572_v34, %v2961_v41  ;;  %v6276_v43 = vadd.f32 %v6572_v34, %v2963_v10 }
 0x48a   :  { %v6279_v33 = vadd.f32 %v6572_v34, %v2965_v62  ;;  %v3029_v24 = vmax.f32 %v2979_v19, 0.0  ;;  %v3031_v49 = vmax.f32 %v2981_v50, 0.0  ;;  %v3033_v57 = vmax.f32 %v2983_v56, 0.0 }
 0x48b   :  { %v3035_v15 = vmax.f32 %v2985_v28, 0.0  ;;  %v3037_v30 = vmax.f32 %v2987_v23, 0.0  ;;  %v3039_v11 = vmax.f32 %v2989_v55, 0.0  ;;  %v3041_v58 = vmax.f32 %v2991_v53, 0.0 }
 0x48c   :  { %v3043_v5 = vmax.f32 %v2993_v63, 0.0  ;;  %v3045_v20 = vmax.f32 %v2995_v7, 0.0  ;;  %v3047_v2 = vmax.f32 %v2997_v35, 0.0  ;;  %v3049_v31 = vmax.f32 %v2999_v13, 0.0 }
 0x48d   :  { %v3051_v18 = vmax.f32 %v3001_v36, 0.0  ;;  %v3053_v41 = vmax.f32 %v3003_v42, 0.0  ;;  %v3055_v21 = vmax.f32 %v3005_v12, 0.0  ;;  %v3057_v52 = vmax.f32 %v3007_v0, 0.0 }
 0x48e   :  { %v3059_v10 = vmax.f32 %v3009_v38, 0.0  ;;  %v3061_v26 = vmax.f32 %v3011_v59, 0.0  ;;  %v3063_v48 = vmax.f32 %v3013_v14, 0.0  ;;  %v3065_v62 = vmax.f32 %v3015_v51, 0.0 }
 0x48f   :  { %v3067_v34 = vmax.f32 %v3017_v39, 0.0  ;;  %v3069_v19 = vmax.f32 %v6267_v25, 0.0  ;;  %v3071_v50 = vmax.f32 %v6270_v46, 0.0  ;;  %v3073_v56 = vmax.f32 %v6273_v8, 0.0 }
 0x490   :  { %v3075_v28 = vmax.f32 %v6276_v43, 0.0  ;;  %v3077_v23 = vmax.f32 %v6279_v33, 0.0  ;;  %v6573_v55 = vmax.f32 %v6072_v40, 0.0  ;;  %v6574_v63 = vmax.f32 %v6075_v9, 0.0 }
 0x491   :  { %v6575_v35 = vmax.f32 %v6078_v16, 0.0  ;;  %v6576_v36 = vmax.f32 %v6081_v17, 0.0  ;;  %v6577_v12 = vmax.f32 %v6084_v27, 0.0  ;;  %v6578_v38 = vmax.f32 %v6087_v22, 0.0 }
 0x492   :  { %v3545_v53 = vpack.c.bf16 %v3029_v24, %v6573_v55  ;;  %v3546_v7 = vpack.c.bf16 %v3031_v49, %v6574_v63  ;;  %v6579_v14 = vmax.f32 %v6090_v3, 0.0  ;;  %v6580_v40 = vmax.f32 %v6093_v44, 0.0  ;;  %v6598_v24 = vld [vmem:[#allocation17_spill] sm:$0xff] }
 0x493   :  { %v3547_v13 = vpack.c.bf16 %v3033_v57, %v6575_v35  ;;  %v3548_v42 = vpack.c.bf16 %v3035_v15, %v6576_v36  ;;  %v3549_v0 = vpack.c.bf16 %v3037_v30, %v6577_v12  ;;  %v3550_v59 = vpack.c.bf16 %v3039_v11, %v6578_v38  ;;  %v6600_v15 = vld [vmem:[#allocation18_spill] sm:$0xff] }
 0x494   :  { %v3551_v51 = vpack.c.bf16 %v3041_v58, %v6579_v14  ;;  %v3552_v39 = vpack.c.bf16 %v3043_v5, %v6580_v40  ;;  %v6581_v9 = vmax.f32 %v6096_v47, 0.0  ;;  %v6582_v16 = vmax.f32 %v6099_v37, 0.0  ;;  %3230 = vst [vmem:[%s6416_s5] sm:$0xff] %v3545_v53  ;;  %3231 = vst [vmem:[%s6416_s5 + $0x8] sm:$0xff] %v3546_v7  ;;  %v6602_v58 = vld [vmem:[#allocation19_spill] sm:$0xff] }
 0x495   :  { %v6583_v17 = vmax.f32 %v6102_v1, 0.0  ;;  %v6584_v27 = vmax.f32 %v6105_v6, 0.0  ;;  %3232 = vst [vmem:[%s6416_s5 + $0x10] sm:$0xff] %v3547_v13  ;;  %3233 = vst [vmem:[%s6416_s5 + $0x18] sm:$0xff] %v3548_v42  ;;  %v6585_v22 = vmax.f32 %v6108_v29, 0.0  ;;  %v6586_v44 = vmax.f32 %v6111_v60, 0.0 }
 0x496   :  { %v3553_v25 = vpack.c.bf16 %v3045_v20, %v6581_v9  ;;  %v3554_v46 = vpack.c.bf16 %v3047_v2, %v6582_v16  ;;  %v6587_v37 = vmax.f32 %v6114_v54, 0.0  ;;  %v6588_v6 = vmax.f32 %v6117_v61, 0.0  ;;  %3234 = vst [vmem:[%s6416_s5 + $0x20] sm:$0xff] %v3549_v0  ;;  %3235 = vst [vmem:[%s6416_s5 + $0x28] sm:$0xff] %v3550_v59 }
 0x497   :  { %v3555_v8 = vpack.c.bf16 %v3049_v31, %v6583_v17  ;;  %v3556_v43 = vpack.c.bf16 %v3051_v18, %v6584_v27  ;;  %v3557_v3 = vpack.c.bf16 %v3053_v41, %v6585_v22  ;;  %v3558_v47 = vpack.c.bf16 %v3055_v21, %v6586_v44  ;;  %3236 = vst [vmem:[%s6416_s5 + $0x30] sm:$0xff] %v3551_v51  ;;  %v6592_v31 = vld [vmem:[#allocation14_spill] sm:$0xff] }
 0x498   :  { %v3559_v1 = vpack.c.bf16 %v3057_v52, %v6587_v37  ;;  %v3560_v18 = vpack.c.bf16 %v3059_v10, %v6588_v6  ;;  %3237 = vst [vmem:[%s6416_s5 + $0x38] sm:$0xff] %v3552_v39  ;;  %v6589_v29 = vmax.f32 %v6120_v4, 0.0  ;;  %v6590_v54 = vmax.f32 %v6123_v45, 0.0  ;;  %3238 = vst [vmem:[%s6416_s5 + $0x40] sm:$0xff] %v3553_v25  ;;  %v6594_v4 = vld [vmem:[#allocation15_spill] sm:$0xff] }
 0x499   :  { %v6591_v52 = vmax.f32 %v6126_v32, 0.0  ;;  %v6593_v20 = vmax.f32 %v6592_v31, 0.0  ;;  %3239 = vst [vmem:[%s6416_s5 + $0x48] sm:$0xff] %v3554_v46  ;;  %3240 = vst [vmem:[%s6416_s5 + $0x50] sm:$0xff] %v3555_v8  ;;  %v6595_v45 = vmax.f32 %v6594_v4, 0.0  ;;  %v6599_v49 = vmax.f32 %v6598_v24, 0.0 }
 0x49a   :  { %v3561_v60 = vpack.c.bf16 %v3061_v26, %v6589_v29  ;;  %v3562_v61 = vpack.c.bf16 %v3063_v48, %v6590_v54  ;;  %3241 = vst [vmem:[%s6416_s5 + $0x58] sm:$0xff] %v3556_v43  ;;  %v6596_v48 = vld [vmem:[#allocation16_spill] sm:$0xff]  ;;  %v6601_v30 = vmax.f32 %v6600_v15, 0.0  ;;  %3242 = vst [vmem:[%s6416_s5 + $0x60] sm:$0xff] %v3557_v3  ;;  %v6603_v2 = vmax.f32 %v6602_v58, 0.0 }
 0x49b   :  { %v3563_v21 = vpack.c.bf16 %v3065_v62, %v6591_v52  ;;  %v3564_v5 = vpack.c.bf16 %v3067_v34, %v6593_v20  ;;  %v3565_v32 = vpack.c.bf16 %v3069_v19, %v6595_v45  ;;  %v6597_v26 = vmax.f32 %v6596_v48, 0.0  ;;  %3243 = vst [vmem:[%s6416_s5 + $0x68] sm:$0xff] %v3558_v47  ;;  %3244 = vst [vmem:[%s6416_s5 + $0x70] sm:$0xff] %v3559_v1 }
 0x49c   :  { %v3567_v57 = vpack.c.bf16 %v3073_v56, %v6599_v49  ;;  %v3568_v11 = vpack.c.bf16 %v3075_v28, %v6601_v30  ;;  %3245 = vst [vmem:[%s6416_s5 + $0x78] sm:$0xff] %v3560_v18  ;;  %v3569_v41 = vpack.c.bf16 %v3077_v23, %v6603_v2  ;;  %3246 = vst [vmem:[%s6416_s5 + $0x80] sm:$0xff] %v3561_v60 }
 0x49d   :  { %v3566_v33 = vpack.c.bf16 %v3071_v50, %v6597_v26  ;;  %3247 = vst [vmem:[%s6416_s5 + $0x88] sm:$0xff] %v3562_v61  ;;  %3248 = vst [vmem:[%s6416_s5 + $0x90] sm:$0xff] %v3563_v21 }
 0x49e   :  { %3249 = vst [vmem:[%s6416_s5 + $0x98] sm:$0xff] %v3564_v5  ;;  %3250 = vst [vmem:[%s6416_s5 + $0xa0] sm:$0xff] %v3565_v32 }
 0x49f   :  { %3251 = vst [vmem:[%s6416_s5 + $0xa8] sm:$0xff] %v3566_v33  ;;  %3252 = vst [vmem:[%s6416_s5 + $0xb0] sm:$0xff] %v3567_v57 }
 0x4a0   :  { %3253 = vst [vmem:[%s6416_s5 + $0xb8] sm:$0xff] %v3568_v11  ;;  %3254 = vst [vmem:[%s6416_s5 + $0xc0] sm:$0x33] %v3569_v41 }

// kernel: generator_forward.7
= control target key start
LH: loop header
LB: loop body
LE: loop exit
PB: predicated region body
PF: predicated region fallthrough
CT: control target
= control target key end

     0   :  { %v5828_v0 = vmov 0   ;;  %v5829_v39 = vmov 0.0   ;;  %vm5830_vm0 = vmmov 0   ;;  %vm1829_vm1 = vcmask 523264   ;;  %s7514_s1 = inlined_call_operand.vmem [shape: bf16[576,128], index: 1, kind: input, shape index: {}]   ;;  %s7515_s0 = inlined_call_operand.vmem [shape: bf16[784,576], index: 0, kind: input, shape index: {}]   ;;  %s7516_s2 = inlined_call_operand.vmem [shape: f32[1,128], index: 2, kind: input, shape index: {}]   ;;  %s7517_s3 = inlined_call_operand.vmem [shape: f32[784,128], index: 3, kind: output, shape index: {}]  }
   0x1   :  { %1977 = vmatprep.subr.bf16.mxu1 %v5828_v0  ;;  %2402 = vmatprep.subr.bf16.mxu0 %v5828_v0  ;;  %v5055_v1 = vld [vmem:[%s7514_s1] sm:$0xff]   ;;  %v5057_v3 = vld [vmem:[%s7514_s1 + $0x8] sm:$0xff]   ;;  %v5059_v5 = vld [vmem:[%s7514_s1 + $0x10] sm:$0xff]  }
   0x2   :  { %v5859_v2 = vld [vmem:[%s7514_s1 + $0x80] sm:$0xff]   ;;  %1978 = vmatpush1.bf16.msra.mxu1 %v5055_v1  ;;  %v5869_v4 = vld [vmem:[%s7514_s1 + $0x88] sm:$0xff]   ;;  %v5880_v6 = vld [vmem:[%s7514_s1 + $0x90] sm:$0xff]  }
   0x3   :  { %2403 = vmatpush1.bf16.msra.mxu0 %v5859_v2  ;;  %1979 = vmatprep.subr.bf16.mxu1 %v5828_v0  ;;  %v5061_v7 = vld [vmem:[%s7514_s1 + $0x18] sm:$0xff]   ;;  %v5063_v9 = vld [vmem:[%s7514_s1 + $0x20] sm:$0xff]   ;;  %v5065_v11 = vld [vmem:[%s7514_s1 + $0x28] sm:$0xff]  }
   0x4   :  { %2404 = vmatprep.subr.bf16.mxu0 %v5828_v0  ;;  %v5891_v8 = vld [vmem:[%s7514_s1 + $0x98] sm:$0xff]   ;;  %v5902_v10 = vld [vmem:[%s7514_s1 + $0xa0] sm:$0xff]   ;;  %v5913_v12 = vld [vmem:[%s7514_s1 + $0xa8] sm:$0xff]  }
   0x5   :  { %v5067_v13 = vld [vmem:[%s7514_s1 + $0x30] sm:$0xff]   ;;  %v5069_v15 = vld [vmem:[%s7514_s1 + $0x38] sm:$0xff]   ;;  %v5071_v17 = vld [vmem:[%s7514_s1 + $0x40] sm:$0xff]  }
   0x6   :  { %1980 = vmatpush1.bf16.msra.mxu1 %v5057_v3  ;;  %v5924_v14 = vld [vmem:[%s7514_s1 + $0xb0] sm:$0xff]   ;;  %v5935_v16 = vld [vmem:[%s7514_s1 + $0xb8] sm:$0xff]   ;;  %v5946_v18 = vld [vmem:[%s7514_s1 + $0xc0] sm:$0xff]  }
   0x7   :  { %2405 = vmatpush1.bf16.msra.mxu0 %v5869_v4  ;;  %1981 = vmatprep.subr.bf16.mxu1 %v5828_v0  ;;  %v5089_v19 = vld [vmem:[%s7515_s0 + $0x4] ss:$20 sps:$4 sm:$0xff]   ;;  %v5073_v20 = vld [vmem:[%s7514_s1 + $0x48] sm:$0xff]   ;;  %v5075_v23 = vld [vmem:[%s7514_s1 + $0x50] sm:$0xff]  }
   0x8   :  { %2406 = vmatprep.subr.bf16.mxu0 %v5828_v0  ;;  %v5092_v21 = vld [vmem:[%s7515_s0 + $0xc] ss:$20 sps:$4 sm:$0xff]   ;;  %2009 = vmatprep.mubr.bf16.mxu1 %v5089_v19  ;;  %v5974_v24 = vld [vmem:[%s7514_s1 + $0xd0] sm:$0xff]   ;;  %v5077_v25 = vld [vmem:[%s7514_s1 + $0x58] sm:$0xff]  }
   0x9   :  { %v5963_v22 = vld [vmem:[%s7514_s1 + $0xc8] sm:$0xff]   ;;  %2434 = vmatprep.mubr.bf16.mxu0 %v5092_v21  ;;  %v5985_v26 = vld [vmem:[%s7514_s1 + $0xd8] sm:$0xff]   ;;  %v5079_v27 = vld [vmem:[%s7514_s1 + $0x60] sm:$0xff]  }
   0xa   :  { %1982 = vmatpush1.bf16.msra.mxu1 %v5059_v5  ;;  %v5996_v28 = vld [vmem:[%s7514_s1 + $0xe0] sm:$0xff]   ;;  %v5081_v29 = vld [vmem:[%s7514_s1 + $0x68] sm:$0xff]   ;;  %v5083_v31 = vld [vmem:[%s7514_s1 + $0x70] sm:$0xff]  }
   0xb   :  { %2407 = vmatpush1.bf16.msra.mxu0 %v5880_v6  ;;  %1983 = vmatprep.subr.bf16.mxu1 %v5828_v0  ;;  %v6007_v30 = vld [vmem:[%s7514_s1 + $0xe8] sm:$0xff]   ;;  %v6018_v32 = vld [vmem:[%s7514_s1 + $0xf0] sm:$0xff]   ;;  %v5085_v33 = vld [vmem:[%s7514_s1 + $0x78] sm:$0xff]  }
   0xc   :  { %2408 = vmatprep.subr.bf16.mxu0 %v5828_v0  ;;  %v6029_v34 = vld [vmem:[%s7514_s1 + $0xf8] sm:$0xff]   ;;  %v5087_v35 = vld [vmem:[%s7515_s0] ss:$20 sps:$4 sm:$0xff]   ;;  %v5130_v41 = vld [vmem:[%s7514_s1 + $0x108] sm:$0xff]  }
   0xd   :  { %v5090_v36 = vld [vmem:[%s7515_s0 + $0x8] ss:$20 sps:$4 sm:$0xff]   ;;  %v5094_v37 = vld [vmem:[%s7515_s0 + $0x2c] ss:$20 sps:$4 sm:$0xff]   ;;  %v5099_v43 = vld [vmem:[%s7515_s0 + $0x30] ss:$20 sps:$4 sm:$0xff]  }
   0xe   :  { %1984 = vmatpush1.bf16.msra.mxu1 %v5061_v7  ;;  %v5093_v38 = vld [vmem:[%s7514_s1 + $0x100] sm:$0xff]   ;;  %v5096_v40 = vld [vmem:[%s7515_s0 + $0x34] ss:$20 sps:$4 sm:$0xff]   ;;  %v5102_v45 = vld [vmem:[%s7515_s0 + $0x5c] ss:$20 sps:$4 sm:$0xff]  }
   0xf   :  { %2409 = vmatpush1.bf16.msra.mxu0 %v5891_v8  ;;  %1985 = vmatprep.subr.bf16.mxu1 %v5828_v0  ;;  %v5098_v42 = vld [vmem:[%s7515_s0 + $0x28] ss:$20 sps:$4 sm:$0xff]   ;;  %v5167_v46 = vld [vmem:[%s7514_s1 + $0x110] sm:$0xff]   ;;  %v5105_v48 = vld [vmem:[%s7515_s0 + $0x58] ss:$20 sps:$4 sm:$0xff]  }
  0x10   :  { %2410 = vmatprep.subr.bf16.mxu0 %v5828_v0  ;;  %v5100_v44 = vld [vmem:[%s7515_s0 + $0x54] ss:$20 sps:$4 sm:$0xff]   ;;  %v5104_v47 = vld [vmem:[%s7515_s0 + $0x50] ss:$20 sps:$4 sm:$0xff]   ;;  %v5110_v51 = vld [vmem:[%s7515_s0 + $0x78] ss:$20 sps:$4 sm:$0xff]  }
  0x11   :  { %v5106_v49 = vld [vmem:[%s7515_s0 + $0x7c] ss:$20 sps:$4 sm:$0xff]   ;;  %v5108_v50 = vld [vmem:[%s7515_s0 + $0x84] ss:$20 sps:$4 sm:$0xff]   ;;  %v5111_v52 = vld [vmem:[%s7515_s0 + $0x80] ss:$20 sps:$4 sm:$0xff]  }
  0x12   :  { %1986 = vmatpush1.bf16.msra.mxu1 %v5063_v9  ;;  %v5112_v53 = vld [vmem:[%s7515_s0 + $0xa4] ss:$20 sps:$4 sm:$0xff]   ;;  %v5114_v54 = vld [vmem:[%s7515_s0 + $0xac] ss:$20 sps:$4 sm:$0xff]   ;;  %v5117_v57 = vld [vmem:[%s7515_s0 + $0xa8] ss:$20 sps:$4 sm:$0xff]  }
  0x13   :  { %2411 = vmatpush1.bf16.msra.mxu0 %v5902_v10  ;;  %1987 = vmatprep.subr.bf16.mxu1 %v5828_v0  ;;  %v5208_v55 = vld [vmem:[%s7514_s1 + $0x118] sm:$0xff]   ;;  %v5116_v56 = vld [vmem:[%s7515_s0 + $0xa0] ss:$20 sps:$4 sm:$0xff]   ;;  %v5123_v61 = vld [vmem:[%s7515_s0 + $0xd0] ss:$20 sps:$4 sm:$0xff]  }
  0x14   :  { %2412 = vmatprep.subr.bf16.mxu0 %v5828_v0  ;;  %v5118_v58 = vld [vmem:[%s7515_s0 + $0xcc] ss:$20 sps:$4 sm:$0xff]   ;;  %v5120_v59 = vld [vmem:[%s7515_s0 + $0xd4] ss:$20 sps:$4 sm:$0xff]   ;;  %v5126_v63 = vld [vmem:[%s7515_s0 + $0xfc] ss:$20 sps:$4 sm:$0xff]  }
  0x15   :  { %v5122_v60 = vld [vmem:[%s7515_s0 + $0xc8] ss:$20 sps:$4 sm:$0xff]   ;;  %v5128_v1 = vld [vmem:[%s7515_s0 + $0xf0] ss:$20 sps:$4 sm:$0xff]   ;;  %v5135_v5 = vld [vmem:[%s7515_s0 + $0x118] ss:$20 sps:$4 sm:$0xff]  }
  0x16   :  { %1988 = vmatpush1.bf16.msra.mxu1 %v5065_v11  ;;  %v5124_v62 = vld [vmem:[%s7515_s0 + $0xf4] ss:$20 sps:$4 sm:$0xff]   ;;  %v5131_v3 = vld [vmem:[%s7515_s0 + $0x11c] ss:$20 sps:$4 sm:$0xff]   ;;  %v5137_v7 = vld [vmem:[%s7515_s0 + $0x144] ss:$20 sps:$4 sm:$0xff]  }
  0x17   :  { %2413 = vmatpush1.bf16.msra.mxu0 %v5913_v12  ;;  %1989 = vmatprep.subr.bf16.mxu1 %v5828_v0  ;;  %v5141_v9 = vld [vmem:[%s7515_s0 + $0x140] ss:$20 sps:$4 sm:$0xff]   ;;  %v5157_v19 = vld [vmem:[%s7515_s0 + $0x1c4] ss:$20 sps:$4 sm:$0xff]  }
  0x18   :  { %2414 = vmatprep.subr.bf16.mxu0 %v5828_v0  ;;  %v5143_v11 = vld [vmem:[%s7515_s0 + $0x16c] ss:$20 sps:$4 sm:$0xff]  }
  0x19   :  { %v5160_v21 = vld [vmem:[%s7515_s0 + $0x1c0] ss:$20 sps:$4 sm:$0xff]  }
  0x1a   :  { %1990 = vmatpush1.bf16.msra.mxu1 %v5067_v13  ;;  %v5147_v13 = vld [vmem:[%s7515_s0 + $0x168] ss:$20 sps:$4 sm:$0xff]  }
  0x1b   :  { %2415 = vmatpush1.bf16.msra.mxu0 %v5924_v14  ;;  %1991 = vmatprep.subr.bf16.mxu1 %v5828_v0 }
  0x1c   :  { %2416 = vmatprep.subr.bf16.mxu0 %v5828_v0 }
  0x1e   :  { %1992 = vmatpush1.bf16.msra.mxu1 %v5069_v15  ;;  %v5149_v15 = vld [vmem:[%s7515_s0 + $0x194] ss:$20 sps:$4 sm:$0xff]  }
  0x1f   :  { %2417 = vmatpush1.bf16.msra.mxu0 %v5935_v16  ;;  %1993 = vmatprep.subr.bf16.mxu1 %v5828_v0 }
  0x20   :  { %2418 = vmatprep.subr.bf16.mxu0 %v5828_v0 }
  0x22   :  { %1994 = vmatpush1.bf16.msra.mxu1 %v5071_v17  ;;  %v5154_v17 = vld [vmem:[%s7515_s0 + $0x198] ss:$20 sps:$4 sm:$0xff]  }
  0x23   :  { %2419 = vmatpush1.bf16.msra.mxu0 %v5946_v18  ;;  %1995 = vmatprep.subr.bf16.mxu1 %v5828_v0 }
  0x24   :  { %2420 = vmatprep.subr.bf16.mxu0 %v5828_v0 }
  0x26   :  { %1996 = vmatpush1.bf16.msra.mxu1 %v5073_v20  ;;  %v5159_v20 = vld [vmem:[%s7515_s0 + $0x1b8] ss:$20 sps:$4 sm:$0xff]  }
  0x27   :  { %2421 = vmatpush1.bf16.msra.mxu0 %v5963_v22  ;;  %1997 = vmatprep.subr.bf16.mxu1 %v5828_v0 }
  0x28   :  { %2422 = vmatprep.subr.bf16.mxu0 %v5828_v0 }
  0x2a   :  { %1998 = vmatpush1.bf16.msra.mxu1 %v5075_v23  ;;  %v5163_v23 = vld [vmem:[%s7515_s0 + $0x1ec] ss:$20 sps:$4 sm:$0xff]  }
  0x2b   :  { %2423 = vmatpush1.bf16.msra.mxu0 %v5974_v24  ;;  %1999 = vmatprep.subr.bf16.mxu1 %v5828_v0 }
  0x2c   :  { %2424 = vmatprep.subr.bf16.mxu0 %v5828_v0 }
  0x2e   :  { %2000 = vmatpush1.bf16.msra.mxu1 %v5077_v25  ;;  %v5166_v25 = vld [vmem:[%s7515_s0 + $0x1e8] ss:$20 sps:$4 sm:$0xff]  }
  0x2f   :  { %2425 = vmatpush1.bf16.msra.mxu0 %v5985_v26  ;;  %2001 = vmatprep.subr.bf16.mxu1 %v5828_v0 }
  0x30   :  { %2426 = vmatprep.subr.bf16.mxu0 %v5828_v0 }
  0x32   :  { %2002 = vmatpush1.bf16.msra.mxu1 %v5079_v27  ;;  %v5170_v27 = vld [vmem:[%s7515_s0 + $0x214] ss:$20 sps:$4 sm:$0xff]  }
  0x33   :  { %2427 = vmatpush1.bf16.msra.mxu0 %v5996_v28  ;;  %2003 = vmatprep.subr.bf16.mxu1 %v5828_v0 }
  0x34   :  { %2428 = vmatprep.subr.bf16.mxu0 %v5828_v0 }
  0x36   :  { %2004 = vmatpush1.bf16.msra.mxu1 %v5081_v29  ;;  %v5173_v29 = vld [vmem:[%s7515_s0 + $0x210] ss:$20 sps:$4 sm:$0xff]  }
  0x37   :  { %2429 = vmatpush1.bf16.msra.mxu0 %v6007_v30  ;;  %2005 = vmatprep.subr.bf16.mxu1 %v5828_v0 }
  0x38   :  { %2430 = vmatprep.subr.bf16.mxu0 %v5828_v0 }
  0x3a   :  { %2006 = vmatpush1.bf16.msra.mxu1 %v5083_v31  ;;  %v5176_v31 = vld [vmem:[%s7515_s0 + $0x23c] ss:$20 sps:$4 sm:$0xff]  }
  0x3b   :  { %2431 = vmatpush1.bf16.msra.mxu0 %v6018_v32  ;;  %2007 = vmatprep.subr.bf16.mxu1 %v5828_v0 }
  0x3c   :  { %2432 = vmatprep.subr.bf16.mxu0 %v5828_v0 }
  0x3e   :  { %2008 = vmatpush1.bf16.msra.mxu1 %v5085_v33  ;;  %v5179_v33 = vld [vmem:[%s7515_s0 + $0x238] ss:$20 sps:$4 sm:$0xff]  }
  0x3f   :  { %2433 = vmatpush1.bf16.msra.mxu0 %v6029_v34  ;;  %4628 = vmatprep.subr.bf16.mxu1 %v5828_v0 }
  0x40   :  { %4424 = vmatprep.subr.bf16.mxu0 %v5829_v39 }
  0x41   :  { %2010 = vmatmul.mubr.bf16.vlgmr.msra.gmra.mrb[0].mxu1 %v5087_v35  ;;  %v5182_v35 = vld [vmem:[%s7515_s0 + $0x264] ss:$20 sps:$4 sm:$0xff]  }
  0x42   :  { %2435 = vmatmul.mubr.bf16.vlgmr.msra.gmra.mrb[0].mxu0 %v5090_v36  ;;  %2017 = vmatprep.mubr.bf16.mxu1 %v5094_v37  ;;  %v5184_v36 = vld [vmem:[%s7515_s0 + $0x258] ss:$20 sps:$4 sm:$0xff]   ;;  %v5185_v37 = vld [vmem:[%s7515_s0 + $0x260] ss:$20 sps:$4 sm:$0xff]  }
  0x43   :  { %4425 = vmatpush3.bf16.msra.mxu0 %v5093_v38  ;;  %4644 = vmatpush1.bf16.msra.mxu1 %v5859_v2  ;;  %v5129_v2 = vld [vmem:[%s7515_s0 + $0xf8] ss:$20 sps:$4 sm:$0xff]  }
  0x44   :  { %2442 = vmatprep.mubr.bf16.mxu0 %v5096_v40  ;;  %4629 = vmatprep.subr.bf16.mxu1 %v5828_v0  ;;  %v5186_v38 = vld [vmem:[%s7515_s0 + $0x284] ss:$20 sps:$4 sm:$0xff]   ;;  %v5188_v40 = vld [vmem:[%s7515_s0 + $0x28c] ss:$20 sps:$4 sm:$0xff]  }
  0x45   :  { %4426 = vmatprep.subr.bf16.mxu0 %v5829_v39 }
  0x47   :  { %4645 = vmatpush1.bf16.msra.mxu1 %v5869_v4  ;;  %4427 = vmatpush3.bf16.msra.mxu0 %v5130_v41  ;;  %v5133_v4 = vld [vmem:[%s7515_s0 + $0x124] ss:$20 sps:$4 sm:$0xff]   ;;  %v5190_v41 = vld [vmem:[%s7515_s0 + $0x280] ss:$20 sps:$4 sm:$0xff]  }
  0x48   :  { %4630 = vmatprep.subr.bf16.mxu1 %v5828_v0  ;;  %4428 = vmatprep.subr.bf16.mxu0 %v5829_v39 }
  0x49   :  { %2018 = vmatmul.mubr.bf16.gmra.mrb[4].mxu1 %v5098_v42  ;;  %v5191_v42 = vld [vmem:[%s7515_s0 + $0x288] ss:$20 sps:$4 sm:$0xff]  }
  0x4a   :  { %2443 = vmatmul.mubr.bf16.gmra.mrb[4].mxu0 %v5099_v43  ;;  %2025 = vmatprep.mubr.bf16.mxu1 %v5100_v44  ;;  %v5192_v43 = vld [vmem:[%s7515_s0 + $0x2ac] ss:$20 sps:$4 sm:$0xff]   ;;  %v5194_v44 = vld [vmem:[%s7515_s0 + $0x2b4] ss:$20 sps:$4 sm:$0xff]  }
  0x4b   :  { %2450 = vmatprep.mubr.bf16.mxu0 %v5102_v45  ;;  %4646 = vmatpush1.bf16.msra.mxu1 %v5880_v6  ;;  %v5136_v6 = vld [vmem:[%s7515_s0 + $0x120] ss:$20 sps:$4 sm:$0xff]   ;;  %v5196_v45 = vld [vmem:[%s7515_s0 + $0x2a8] ss:$20 sps:$4 sm:$0xff]  }
  0x4c   :  { %4631 = vmatprep.subr.bf16.mxu1 %v5828_v0  ;;  %4429 = vmatpush3.bf16.msra.mxu0 %v5167_v46  ;;  %v5197_v46 = vld [vmem:[%s7515_s0 + $0x2b0] ss:$20 sps:$4 sm:$0xff]  }
  0x4d   :  { %4430 = vmatprep.subr.bf16.mxu0 %v5829_v39 }
  0x4f   :  { %4647 = vmatpush1.bf16.msra.mxu1 %v5891_v8  ;;  %v5139_v8 = vld [vmem:[%s7515_s0 + $0x14c] ss:$20 sps:$4 sm:$0xff]  }
  0x50   :  { %4632 = vmatprep.subr.bf16.mxu1 %v5828_v0  ;;  %4431 = vmatpush3.bf16.msra.mxu0 %v5208_v55  ;;  %v5211_v55 = vld [vmem:[%s7515_s0 + $0x324] ss:$20 sps:$4 sm:$0xff]  }
  0x51   :  { %2026 = vmatmul.mubr.bf16.gmra.mrb[8].mxu1 %v5104_v47  ;;  %v5198_v47 = vld [vmem:[%s7515_s0 + $0x2d4] ss:$20 sps:$4 sm:$0xff]  }
  0x52   :  { %2451 = vmatmul.mubr.bf16.gmra.mrb[8].mxu0 %v5105_v48  ;;  %2033 = vmatprep.mubr.bf16.mxu1 %v5106_v49  ;;  %v5200_v48 = vld [vmem:[%s7515_s0 + $0x2dc] ss:$20 sps:$4 sm:$0xff]  }
  0x53   :  { %2458 = vmatprep.mubr.bf16.mxu0 %v5108_v50  ;;  %4648 = vmatpush1.bf16.msra.mxu1 %v5902_v10  ;;  %v5142_v10 = vld [vmem:[%s7515_s0 + $0x148] ss:$20 sps:$4 sm:$0xff]   ;;  %v5202_v49 = vld [vmem:[%s7515_s0 + $0x2d0] ss:$20 sps:$4 sm:$0xff]   ;;  %v5203_v50 = vld [vmem:[%s7515_s0 + $0x2d8] ss:$20 sps:$4 sm:$0xff]  }
  0x54   :  { %4633 = vmatprep.subr.bf16.mxu1 %v5828_v0 }
  0x57   :  { %4649 = vmatpush1.bf16.msra.mxu1 %v5913_v12  ;;  %v5145_v12 = vld [vmem:[%s7515_s0 + $0x174] ss:$20 sps:$4 sm:$0xff]  }
  0x58   :  { %4634 = vmatprep.subr.bf16.mxu1 %v5828_v0 }
  0x59   :  { %2034 = vmatmul.mubr.bf16.gmra.mrb[12].mxu1 %v5110_v51  ;;  %v5204_v51 = vld [vmem:[%s7515_s0 + $0x2fc] ss:$20 sps:$4 sm:$0xff]  }
  0x5a   :  { %2459 = vmatmul.mubr.bf16.gmra.mrb[12].mxu0 %v5111_v52  ;;  %2041 = vmatprep.mubr.bf16.mxu1 %v5112_v53  ;;  %v5206_v52 = vld [vmem:[%s7515_s0 + $0x304] ss:$20 sps:$4 sm:$0xff]  }
  0x5b   :  { %2466 = vmatprep.mubr.bf16.mxu0 %v5114_v54  ;;  %4650 = vmatpush1.bf16.msra.mxu1 %v5924_v14  ;;  %v5148_v14 = vld [vmem:[%s7515_s0 + $0x170] ss:$20 sps:$4 sm:$0xff]   ;;  %v5209_v53 = vld [vmem:[%s7515_s0 + $0x2f8] ss:$20 sps:$4 sm:$0xff]   ;;  %v5210_v54 = vld [vmem:[%s7515_s0 + $0x300] ss:$20 sps:$4 sm:$0xff]  }
  0x5c   :  { %4635 = vmatprep.subr.bf16.mxu1 %v5828_v0 }
  0x5f   :  { %4651 = vmatpush1.bf16.msra.mxu1 %v5935_v16  ;;  %v5153_v16 = vld [vmem:[%s7515_s0 + $0x190] ss:$20 sps:$4 sm:$0xff]  }
  0x60   :  { %4636 = vmatprep.subr.bf16.mxu1 %v5828_v0 }
  0x61   :  { %2042 = vmatmul.mubr.bf16.gmra.mrb[16].mxu1 %v5116_v56  ;;  %v5213_v56 = vld [vmem:[%s7515_s0 + $0x32c] ss:$20 sps:$4 sm:$0xff]  }
  0x62   :  { %2467 = vmatmul.mubr.bf16.gmra.mrb[16].mxu0 %v5117_v57  ;;  %2049 = vmatprep.mubr.bf16.mxu1 %v5118_v58  ;;  %v5215_v57 = vld [vmem:[%s7515_s0 + $0x320] ss:$20 sps:$4 sm:$0xff]   ;;  %v5216_v58 = vld [vmem:[%s7515_s0 + $0x328] ss:$20 sps:$4 sm:$0xff]  }
  0x63   :  { %2474 = vmatprep.mubr.bf16.mxu0 %v5120_v59  ;;  %4652 = vmatpush1.bf16.msra.mxu1 %v5946_v18  ;;  %v5155_v18 = vld [vmem:[%s7515_s0 + $0x1bc] ss:$20 sps:$4 sm:$0xff]   ;;  %v5217_v59 = vld [vmem:[%s7515_s0 + $0x34c] ss:$20 sps:$4 sm:$0xff]  }
  0x64   :  { %4637 = vmatprep.subr.bf16.mxu1 %v5828_v0 }
  0x67   :  { %4653 = vmatpush1.bf16.msra.mxu1 %v5963_v22  ;;  %v5161_v22 = vld [vmem:[%s7515_s0 + $0x1e4] ss:$20 sps:$4 sm:$0xff]  }
  0x68   :  { %4638 = vmatprep.subr.bf16.mxu1 %v5828_v0 }
  0x69   :  { %2050 = vmatmul.mubr.bf16.gmra.mrb[20].mxu1 %v5122_v60  ;;  %v5219_v60 = vld [vmem:[%s7515_s0 + $0x354] ss:$20 sps:$4 sm:$0xff]  }
  0x6a   :  { %2475 = vmatmul.mubr.bf16.gmra.mrb[20].mxu0 %v5123_v61  ;;  %2057 = vmatprep.mubr.bf16.mxu1 %v5124_v62  ;;  %v5221_v61 = vld [vmem:[%s7515_s0 + $0x348] ss:$20 sps:$4 sm:$0xff]   ;;  %v5222_v62 = vld [vmem:[%s7515_s0 + $0x350] ss:$20 sps:$4 sm:$0xff]  }
  0x6b   :  { %2482 = vmatprep.mubr.bf16.mxu0 %v5126_v63  ;;  %4654 = vmatpush1.bf16.msra.mxu1 %v5974_v24  ;;  %v5165_v24 = vld [vmem:[%s7515_s0 + $0x1e0] ss:$20 sps:$4 sm:$0xff]  }
  0x6c   :  { %4639 = vmatprep.subr.bf16.mxu1 %v5828_v0  ;;  %v5223_v63 = vld [vmem:[%s7515_s0 + $0x374] ss:$20 sps:$4 sm:$0xff]  }
  0x6f   :  { %4655 = vmatpush1.bf16.msra.mxu1 %v5985_v26  ;;  %v5168_v26 = vld [vmem:[%s7515_s0 + $0x20c] ss:$20 sps:$4 sm:$0xff]  }
  0x70   :  { %4640 = vmatprep.subr.bf16.mxu1 %v5828_v0 }
  0x71   :  { %2058 = vmatmul.mubr.bf16.gmra.mrb[24].mxu1 %v5128_v1  ;;  %v5225_v1 = vld [vmem:[%s7515_s0 + $0x37c] ss:$20 sps:$4 sm:$0xff]  }
  0x72   :  { %2483 = vmatmul.mubr.bf16.gmra.mrb[24].mxu0 %v5129_v2  ;;  %2065 = vmatprep.mubr.bf16.mxu1 %v5131_v3  ;;  %v5227_v2 = vld [vmem:[%s7515_s0 + $0x370] ss:$20 sps:$4 sm:$0xff]   ;;  %v5228_v3 = vld [vmem:[%s7515_s0 + $0x378] ss:$20 sps:$4 sm:$0xff]  }
  0x73   :  { %2490 = vmatprep.mubr.bf16.mxu0 %v5133_v4  ;;  %4656 = vmatpush1.bf16.msra.mxu1 %v5996_v28  ;;  %v5172_v28 = vld [vmem:[%s7515_s0 + $0x208] ss:$20 sps:$4 sm:$0xff]  }
  0x74   :  { %4641 = vmatprep.subr.bf16.mxu1 %v5828_v0  ;;  %v5229_v4 = vld [vmem:[%s7515_s0 + $0x39c] ss:$20 sps:$4 sm:$0xff]  }
  0x77   :  { %4657 = vmatpush1.bf16.msra.mxu1 %v6007_v30  ;;  %v5174_v30 = vld [vmem:[%s7515_s0 + $0x234] ss:$20 sps:$4 sm:$0xff]  }
  0x78   :  { %4642 = vmatprep.subr.bf16.mxu1 %v5828_v0 }
  0x79   :  { %2066 = vmatmul.mubr.bf16.gmra.mrb[28].mxu1 %v5135_v5  ;;  %v5231_v5 = vld [vmem:[%s7515_s0 + $0x3a4] ss:$20 sps:$4 sm:$0xff]  }
  0x7a   :  { %2491 = vmatmul.mubr.bf16.gmra.mrb[28].mxu0 %v5136_v6  ;;  %2073 = vmatprep.mubr.bf16.mxu1 %v5137_v7  ;;  %v5233_v6 = vld [vmem:[%s7515_s0 + $0x398] ss:$20 sps:$4 sm:$0xff]   ;;  %v5234_v7 = vld [vmem:[%s7515_s0 + $0x3a0] ss:$20 sps:$4 sm:$0xff]  }
  0x7b   :  { %2498 = vmatprep.mubr.bf16.mxu0 %v5139_v8  ;;  %4658 = vmatpush1.bf16.msra.mxu1 %v6018_v32  ;;  %v5178_v32 = vld [vmem:[%s7515_s0 + $0x230] ss:$20 sps:$4 sm:$0xff]  }
  0x7c   :  { %4643 = vmatprep.subr.bf16.mxu1 %v5828_v0  ;;  %v5151_v0 = vld [vmem:[%s7515_s0 + $0x19c] ss:$20 sps:$4 sm:$0xff]   ;;  %v5235_v8 = vld [vmem:[%s7515_s0 + $0x3c4] ss:$20 sps:$4 sm:$0xff]  }
  0x7f   :  { %4659 = vmatpush1.bf16.msra.mxu1 %v6029_v34  ;;  %v5180_v34 = vld [vmem:[%s7515_s0 + $0x25c] ss:$20 sps:$4 sm:$0xff]  }
  0x81   :  { %2074 = vmatmul.mubr.bf16.gmra.mrb[32].mxu1 %v5141_v9  ;;  %v5237_v9 = vld [vmem:[%s7515_s0 + $0x3cc] ss:$20 sps:$4 sm:$0xff]  }
  0x82   :  { %2499 = vmatmul.mubr.bf16.gmra.mrb[32].mxu0 %v5142_v10  ;;  %2081 = vmatprep.mubr.bf16.mxu1 %v5143_v11  ;;  %v5239_v10 = vld [vmem:[%s7515_s0 + $0x3c0] ss:$20 sps:$4 sm:$0xff]   ;;  %v5240_v11 = vld [vmem:[%s7515_s0 + $0x3c8] ss:$20 sps:$4 sm:$0xff]  }
  0x83   :  { %2506 = vmatprep.mubr.bf16.mxu0 %v5145_v12  ;;  %v5241_v12 = vld [vmem:[%s7515_s0 + $0x3ec] ss:$20 sps:$4 sm:$0xff]  }
  0x89   :  { %2082 = vmatmul.mubr.bf16.gmra.mrb[36].mxu1 %v5147_v13  ;;  %v5243_v13 = vld [vmem:[%s7515_s0 + $0x3e8] ss:$20 sps:$4 sm:$0xff]  }
  0x8a   :  { %2507 = vmatmul.mubr.bf16.gmra.mrb[36].mxu0 %v5148_v14  ;;  %2089 = vmatprep.mubr.bf16.mxu1 %v5149_v15  ;;  %v5244_v14 = vld [vmem:[%s7515_s0 + $0x10] ss:$20 sps:$4 sm:$0xff]   ;;  %v5245_v15 = vld [vmem:[%s7515_s0 + $0x414] ss:$20 sps:$4 sm:$0xff]  }
  0x8b   :  { %2514 = vmatprep.mubr.bf16.mxu0 %v5151_v0  ;;  %v5247_v0 = vld [vmem:[%s7515_s0 + $0x410] ss:$20 sps:$4 sm:$0xff]  }
  0x91   :  { %2090 = vmatmul.mubr.bf16.gmra.mrb[40].mxu1 %v5153_v16  ;;  %v5248_v16 = vld [vmem:[%s7515_s0 + $0x38] ss:$20 sps:$4 sm:$0xff]  }
  0x92   :  { %2515 = vmatmul.mubr.bf16.gmra.mrb[40].mxu0 %v5154_v17  ;;  %2097 = vmatprep.mubr.bf16.mxu1 %v5155_v18  ;;  %v5249_v17 = vld [vmem:[%s7515_s0 + $0x43c] ss:$20 sps:$4 sm:$0xff]  }
  0x93   :  { %2522 = vmatprep.mubr.bf16.mxu0 %v5157_v19 }
  0x99   :  { %2098 = vmatmul.mubr.bf16.gmra.mrb[44].mxu1 %v5159_v20  ;;  %v5251_v20 = vld [vmem:[%s7515_s0 + $0x438] ss:$20 sps:$4 sm:$0xff]  }
  0x9a   :  { %2523 = vmatmul.mubr.bf16.gmra.mrb[44].mxu0 %v5160_v21  ;;  %2105 = vmatprep.mubr.bf16.mxu1 %v5161_v22  ;;  %v5252_v21 = vld [vmem:[%s7515_s0 + $0x60] ss:$20 sps:$4 sm:$0xff]  }
  0x9b   :  { %2530 = vmatprep.mubr.bf16.mxu0 %v5163_v23  ;;  %v5253_v23 = vld [vmem:[%s7515_s0 + $0x464] ss:$20 sps:$4 sm:$0xff]  }
  0xa1   :  { %2106 = vmatmul.mubr.bf16.gmra.mrb[48].mxu1 %v5165_v24 }
  0xa2   :  { %2531 = vmatmul.mubr.bf16.gmra.mrb[48].mxu0 %v5166_v25  ;;  %2113 = vmatprep.mubr.bf16.mxu1 %v5168_v26 }
  0xa3   :  { %2538 = vmatprep.mubr.bf16.mxu0 %v5170_v27  ;;  %v5255_v27 = vld [vmem:[%s7515_s0 + $0x460] ss:$20 sps:$4 sm:$0xff]  }
  0xa9   :  { %2114 = vmatmul.mubr.bf16.gmra.mrb[52].mxu1 %v5172_v28  ;;  %v5256_v28 = vld [vmem:[%s7515_s0 + $0x88] ss:$20 sps:$4 sm:$0xff]  }
  0xaa   :  { %2539 = vmatmul.mubr.bf16.gmra.mrb[52].mxu0 %v5173_v29  ;;  %2121 = vmatprep.mubr.bf16.mxu1 %v5174_v30  ;;  %v5257_v30 = vld [vmem:[%s7515_s0 + $0x48c] ss:$20 sps:$4 sm:$0xff]  }
  0xab   :  { %2546 = vmatprep.mubr.bf16.mxu0 %v5176_v31 }
  0xb1   :  { %2122 = vmatmul.mubr.bf16.gmra.mrb[56].mxu1 %v5178_v32 }
  0xb2   :  { %2547 = vmatmul.mubr.bf16.gmra.mrb[56].mxu0 %v5179_v33  ;;  %2129 = vmatprep.mubr.bf16.mxu1 %v5180_v34  ;;  %v5259_v34 = vld [vmem:[%s7515_s0 + $0x488] ss:$20 sps:$4 sm:$0xff]  }
  0xb3   :  { %2554 = vmatprep.mubr.bf16.mxu0 %v5182_v35  ;;  %v5260_v35 = vld [vmem:[%s7515_s0 + $0xb0] ss:$20 sps:$4 sm:$0xff]  }
  0xb9   :  { %2130 = vmatmul.mubr.bf16.gmra.mrb[60].mxu1 %v5184_v36 }
  0xba   :  { %2555 = vmatmul.mubr.bf16.gmra.mrb[60].mxu0 %v5185_v37  ;;  %2137 = vmatprep.mubr.bf16.mxu1 %v5186_v38  ;;  %v5261_v37 = vld [vmem:[%s7515_s0 + $0x4b4] ss:$20 sps:$4 sm:$0xff]  }
  0xbb   :  { %2562 = vmatprep.mubr.bf16.mxu0 %v5188_v40 }
  0xc1   :  { %2138 = vmatmul.mubr.bf16.gmra.mrb[64].mxu1 %v5190_v41 }
  0xc2   :  { %2563 = vmatmul.mubr.bf16.gmra.mrb[64].mxu0 %v5191_v42  ;;  %2145 = vmatprep.mubr.bf16.mxu1 %v5192_v43  ;;  %v5263_v42 = vld [vmem:[%s7515_s0 + $0x4b0] ss:$20 sps:$4 sm:$0xff]   ;;  %v5264_v43 = vld [vmem:[%s7515_s0 + $0xd8] ss:$20 sps:$4 sm:$0xff]  }
  0xc3   :  { %2570 = vmatprep.mubr.bf16.mxu0 %v5194_v44 }
  0xc9   :  { %2146 = vmatmul.mubr.bf16.gmra.mrb[68].mxu1 %v5196_v45  ;;  %v5265_v45 = vld [vmem:[%s7515_s0 + $0x4dc] ss:$20 sps:$4 sm:$0xff]  }
  0xca   :  { %2571 = vmatmul.mubr.bf16.gmra.mrb[68].mxu0 %v5197_v46  ;;  %2153 = vmatprep.mubr.bf16.mxu1 %v5198_v47 }
  0xcb   :  { %2578 = vmatprep.mubr.bf16.mxu0 %v5200_v48 }
  0xd1   :  { %2154 = vmatmul.mubr.bf16.gmra.mrb[72].mxu1 %v5202_v49  ;;  %v5267_v49 = vld [vmem:[%s7515_s0 + $0x4d8] ss:$20 sps:$4 sm:$0xff]  }
  0xd2   :  { %2579 = vmatmul.mubr.bf16.gmra.mrb[72].mxu0 %v5203_v50  ;;  %2161 = vmatprep.mubr.bf16.mxu1 %v5204_v51  ;;  %v5268_v50 = vld [vmem:[%s7515_s0 + $0x100] ss:$20 sps:$4 sm:$0xff]  }
  0xd3   :  { %2586 = vmatprep.mubr.bf16.mxu0 %v5206_v52  ;;  %v5269_v52 = vld [vmem:[%s7515_s0 + $0x504] ss:$20 sps:$4 sm:$0xff]  }
  0xd9   :  { %2162 = vmatmul.mubr.bf16.gmra.mrb[76].mxu1 %v5209_v53 }
  0xda   :  { %2587 = vmatmul.mubr.bf16.gmra.mrb[76].mxu0 %v5210_v54  ;;  %2169 = vmatprep.mubr.bf16.mxu1 %v5211_v55 }
  0xdb   :  { %2594 = vmatprep.mubr.bf16.mxu0 %v5213_v56  ;;  %v5271_v56 = vld [vmem:[%s7515_s0 + $0x500] ss:$20 sps:$4 sm:$0xff]  }
  0xe1   :  { %2170 = vmatmul.mubr.bf16.gmra.mrb[80].mxu1 %v5215_v57  ;;  %v5272_v57 = vld [vmem:[%s7515_s0 + $0x128] ss:$20 sps:$4 sm:$0xff]  }
  0xe2   :  { %2595 = vmatmul.mubr.bf16.gmra.mrb[80].mxu0 %v5216_v58  ;;  %2177 = vmatprep.mubr.bf16.mxu1 %v5217_v59  ;;  %v5273_v59 = vld [vmem:[%s7515_s0 + $0x52c] ss:$20 sps:$4 sm:$0xff]  }
  0xe3   :  { %2602 = vmatprep.mubr.bf16.mxu0 %v5219_v60 }
  0xe9   :  { %2178 = vmatmul.mubr.bf16.gmra.mrb[84].mxu1 %v5221_v61 }
  0xea   :  { %2603 = vmatmul.mubr.bf16.gmra.mrb[84].mxu0 %v5222_v62  ;;  %2185 = vmatprep.mubr.bf16.mxu1 %v5223_v63  ;;  %v5275_v63 = vld [vmem:[%s7515_s0 + $0x528] ss:$20 sps:$4 sm:$0xff]  }
  0xeb   :  { %2610 = vmatprep.mubr.bf16.mxu0 %v5225_v1  ;;  %v5276_v1 = vld [vmem:[%s7515_s0 + $0x150] ss:$20 sps:$4 sm:$0xff]  }
  0xf1   :  { %2186 = vmatmul.mubr.bf16.gmra.mrb[88].mxu1 %v5227_v2 }
  0xf2   :  { %2611 = vmatmul.mubr.bf16.gmra.mrb[88].mxu0 %v5228_v3  ;;  %2193 = vmatprep.mubr.bf16.mxu1 %v5229_v4  ;;  %v5277_v3 = vld [vmem:[%s7515_s0 + $0x554] ss:$20 sps:$4 sm:$0xff]  }
  0xf3   :  { %2618 = vmatprep.mubr.bf16.mxu0 %v5231_v5 }
  0xf9   :  { %2194 = vmatmul.mubr.bf16.gmra.mrb[92].mxu1 %v5233_v6 }
  0xfa   :  { %2619 = vmatmul.mubr.bf16.gmra.mrb[92].mxu0 %v5234_v7  ;;  %2201 = vmatprep.mubr.bf16.mxu1 %v5235_v8  ;;  %v5279_v7 = vld [vmem:[%s7515_s0 + $0x550] ss:$20 sps:$4 sm:$0xff]   ;;  %v5280_v8 = vld [vmem:[%s7515_s0 + $0x178] ss:$20 sps:$4 sm:$0xff]  }
  0xfb   :  { %2626 = vmatprep.mubr.bf16.mxu0 %v5237_v9 }
 0x101   :  { %2202 = vmatmul.mubr.bf16.gmra.mrb[96].mxu1 %v5239_v10  ;;  %v5281_v10 = vld [vmem:[%s7515_s0 + $0x57c] ss:$20 sps:$4 sm:$0xff]  }
 0x102   :  { %2627 = vmatmul.mubr.bf16.gmra.mrb[96].mxu0 %v5240_v11  ;;  %2209 = vmatprep.mubr.bf16.mxu1 %v5241_v12 }
 0x103   :  { %4432 = vmatprep.mubr.msk.bf16.mxu0 %vm5830_vm0, %v5829_v39 }
 0x109   :  { %2210 = vmatmul.mubr.bf16.gmra.mrb[100].mxu1 %v5243_v13 }
 0x10a   :  { %4433 = vmatmul.mubr.msk.bf16.vlgmr.msra.gmra.mrb[0].mxu0 %vm1829_vm1, %v5244_v14  ;;  %2217 = vmatprep.mubr.bf16.mxu1 %v5245_v15  ;;  %v5283_v14 = vld [vmem:[%s7515_s0 + $0x578] ss:$20 sps:$4 sm:$0xff]   ;;  %v5284_v15 = vld [vmem:[%s7515_s0 + $0x1a0] ss:$20 sps:$4 sm:$0xff]  }
 0x10b   :  { %4436 = vmatprep.mubr.msk.bf16.mxu0 %vm5830_vm0, %v5829_v39 }
 0x111   :  { %2218 = vmatmul.mubr.bf16.gmra.mrb[104].mxu1 %v5247_v0 }
 0x112   :  { %4437 = vmatmul.mubr.msk.bf16.gmra.mrb[4].mxu0 %vm1829_vm1, %v5248_v16  ;;  %2225 = vmatprep.mubr.bf16.mxu1 %v5249_v17  ;;  %v5285_v16 = vld [vmem:[%s7515_s0 + $0x5a4] ss:$20 sps:$4 sm:$0xff]  }
 0x113   :  { %4440 = vmatprep.mubr.msk.bf16.mxu0 %vm5830_vm0, %v5829_v39 }
 0x114   :  { %v6404_v18 = vpop.f32.mrb[0].mxu1 }
 0x115   :  { %v2013_v19 = vpop.f32.mrb[1].mxu1 }
 0x116   :  { %v6412_v22 = vpop.f32.mrb[2].mxu1 }
 0x117   :  { %v2016_v24 = vpop.f32.mrb[3].mxu1 }
 0x119   :  { %2226 = vmatmul.mubr.bf16.gmra.mrb[108].mxu1 %v5251_v20 }
 0x11a   :  { %4441 = vmatmul.mubr.msk.bf16.gmra.mrb[8].mxu0 %vm1829_vm1, %v5252_v21  ;;  %2233 = vmatprep.mubr.bf16.mxu1 %v5253_v23  ;;  %v5287_v21 = vld [vmem:[%s7515_s0 + $0x5a0] ss:$20 sps:$4 sm:$0xff]   ;;  %v5288_v23 = vld [vmem:[%s7515_s0 + $0x1c8] ss:$20 sps:$4 sm:$0xff]  }
 0x11b   :  { %4444 = vmatprep.mubr.msk.bf16.mxu0 %vm5830_vm0, %v5829_v39 }
 0x11c   :  { %v6420_v25 = vpop.f32.mrb[4].mxu1 }
 0x11d   :  { %v2021_v26 = vpop.f32.mrb[5].mxu1 }
 0x11e   :  { %v6428_v29 = vpop.f32.mrb[6].mxu1  ;;  %v5289_v26 = vld [vmem:[%s7515_s0 + $0x5cc] ss:$20 sps:$4 sm:$0xff]  }
 0x11f   :  { %v2024_v31 = vpop.f32.mrb[7].mxu1 }
 0x120   :  { %v5291_v31 = vld [vmem:[%s7515_s0 + $0x5c8] ss:$20 sps:$4 sm:$0xff]  }
 0x121   :  { %2234 = vmatmul.mubr.bf16.gmra.mrb[112].mxu1 %v5255_v27 }
 0x122   :  { %4445 = vmatmul.mubr.msk.bf16.gmra.mrb[12].mxu0 %vm1829_vm1, %v5256_v28  ;;  %2241 = vmatprep.mubr.bf16.mxu1 %v5257_v30 }
 0x123   :  { %4448 = vmatprep.mubr.msk.bf16.mxu0 %vm5830_vm0, %v5829_v39 }
 0x124   :  { %v6436_v32 = vpop.f32.mrb[8].mxu1 }
 0x125   :  { %v2029_v33 = vpop.f32.mrb[9].mxu1 }
 0x126   :  { %v6444_v36 = vpop.f32.mrb[10].mxu1  ;;  %v5292_v33 = vld [vmem:[%s7515_s0 + $0x1f0] ss:$20 sps:$4 sm:$0xff]  }
 0x127   :  { %v2032_v38 = vpop.f32.mrb[11].mxu1 }
 0x129   :  { %2242 = vmatmul.mubr.bf16.gmra.mrb[116].mxu1 %v5259_v34 }
 0x12a   :  { %4449 = vmatmul.mubr.msk.bf16.gmra.mrb[16].mxu0 %vm1829_vm1, %v5260_v35  ;;  %2249 = vmatprep.mubr.bf16.mxu1 %v5261_v37  ;;  %v5293_v35 = vld [vmem:[%s7515_s0 + $0x5f4] ss:$20 sps:$4 sm:$0xff]  }
 0x12b   :  { %4452 = vmatprep.mubr.msk.bf16.mxu0 %vm5830_vm0, %v5829_v39 }
 0x12c   :  { %v6452_v40 = vpop.f32.mrb[12].mxu1 }
 0x12d   :  { %v2037_v41 = vpop.f32.mrb[13].mxu1 }
 0x12e   :  { %v6460_v44 = vpop.f32.mrb[14].mxu1 }
 0x12f   :  { %v2040_v46 = vpop.f32.mrb[15].mxu1 }
 0x130   :  { %v5297_v46 = vld [vmem:[%s7515_s0 + $0x61c] ss:$20 sps:$4 sm:$0xff]  }
 0x131   :  { %2250 = vmatmul.mubr.bf16.gmra.mrb[120].mxu1 %v5263_v42  ;;  %v5295_v42 = vld [vmem:[%s7515_s0 + $0x5f0] ss:$20 sps:$4 sm:$0xff]  }
 0x132   :  { %4453 = vmatmul.mubr.msk.bf16.gmra.mrb[20].mxu0 %vm1829_vm1, %v5264_v43  ;;  %2257 = vmatprep.mubr.bf16.mxu1 %v5265_v45  ;;  %v5296_v43 = vld [vmem:[%s7515_s0 + $0x218] ss:$20 sps:$4 sm:$0xff]  }
 0x133   :  { %4456 = vmatprep.mubr.msk.bf16.mxu0 %vm5830_vm0, %v5829_v39 }
 0x134   :  { %v6468_v47 = vpop.f32.mrb[16].mxu1 }
 0x135   :  { %v2045_v48 = vpop.f32.mrb[17].mxu1 }
 0x136   :  { %v6476_v51 = vpop.f32.mrb[18].mxu1 }
 0x137   :  { %v2048_v53 = vpop.f32.mrb[19].mxu1 }
 0x138   :  { %v5300_v53 = vld [vmem:[%s7515_s0 + $0x240] ss:$20 sps:$4 sm:$0xff]  }
 0x139   :  { %2258 = vmatmul.mubr.bf16.gmra.mrb[124].mxu1 %v5267_v49 }
 0x13a   :  { %4457 = vmatmul.mubr.msk.bf16.gmra.mrb[24].mxu0 %vm1829_vm1, %v5268_v50  ;;  %2265 = vmatprep.mubr.bf16.mxu1 %v5269_v52  ;;  %v5299_v52 = vld [vmem:[%s7515_s0 + $0x618] ss:$20 sps:$4 sm:$0xff]  }
 0x13b   :  { %4460 = vmatprep.mubr.msk.bf16.mxu0 %vm5830_vm0, %v5829_v39 }
 0x13c   :  { %v6484_v54 = vpop.f32.mrb[20].mxu1 }
 0x13d   :  { %v2053_v55 = vpop.f32.mrb[21].mxu1 }
 0x13e   :  { %v6492_v58 = vpop.f32.mrb[22].mxu1 }
 0x13f   :  { %v2056_v60 = vpop.f32.mrb[23].mxu1 }
 0x141   :  { %2266 = vmatmul.mubr.bf16.gmra.mrb[128].mxu1 %v5271_v56  ;;  %v5301_v56 = vld [vmem:[%s7515_s0 + $0x644] ss:$20 sps:$4 sm:$0xff]  }
 0x142   :  { %4461 = vmatmul.mubr.msk.bf16.gmra.mrb[28].mxu0 %vm1829_vm1, %v5272_v57  ;;  %2273 = vmatprep.mubr.bf16.mxu1 %v5273_v59 }
 0x143   :  { %4464 = vmatprep.mubr.msk.bf16.mxu0 %vm5830_vm0, %v5829_v39 }
 0x144   :  { %v6500_v61 = vpop.f32.mrb[24].mxu1 }
 0x145   :  { %v2061_v62 = vpop.f32.mrb[25].mxu1 }
 0x146   :  { %v6508_v2 = vpop.f32.mrb[26].mxu1  ;;  %v5303_v62 = vld [vmem:[%s7515_s0 + $0x640] ss:$20 sps:$4 sm:$0xff]  }
 0x147   :  { %v2064_v4 = vpop.f32.mrb[27].mxu1 }
 0x149   :  { %2274 = vmatmul.mubr.bf16.gmra.mrb[132].mxu1 %v5275_v63  ;;  %v5304_v63 = vld [vmem:[%s7515_s0 + $0x268] ss:$20 sps:$4 sm:$0xff]  }
 0x14a   :  { %4465 = vmatmul.mubr.msk.bf16.gmra.mrb[32].mxu0 %vm1829_vm1, %v5276_v1  ;;  %2281 = vmatprep.mubr.bf16.mxu1 %v5277_v3  ;;  %v5305_v3 = vld [vmem:[%s7515_s0 + $0x66c] ss:$20 sps:$4 sm:$0xff]  }
 0x14b   :  { %4468 = vmatprep.mubr.msk.bf16.mxu0 %vm5830_vm0, %v5829_v39 }
 0x14c   :  { %v6516_v5 = vpop.f32.mrb[28].mxu1 }
 0x14d   :  { %v2069_v6 = vpop.f32.mrb[29].mxu1 }
 0x14e   :  { %v6524_v9 = vpop.f32.mrb[30].mxu1 }
 0x14f   :  { %v2072_v11 = vpop.f32.mrb[31].mxu1 }
 0x151   :  { %2282 = vmatmul.mubr.bf16.gmra.mrb[136].mxu1 %v5279_v7 }
 0x152   :  { %4469 = vmatmul.mubr.msk.bf16.gmra.mrb[36].mxu0 %vm1829_vm1, %v5280_v8  ;;  %2289 = vmatprep.mubr.bf16.mxu1 %v5281_v10  ;;  %v5307_v8 = vld [vmem:[%s7515_s0 + $0x668] ss:$20 sps:$4 sm:$0xff]   ;;  %v5308_v10 = vld [vmem:[%s7515_s0 + $0x290] ss:$20 sps:$4 sm:$0xff]  }
 0x153   :  { %4472 = vmatprep.mubr.msk.bf16.mxu0 %vm5830_vm0, %v5829_v39 }
 0x154   :  { %v6532_v12 = vpop.f32.mrb[32].mxu1 }
 0x155   :  { %v2077_v13 = vpop.f32.mrb[33].mxu1 }
 0x156   :  { %v6540_v0 = vpop.f32.mrb[34].mxu1  ;;  %v5309_v13 = vld [vmem:[%s7515_s0 + $0x694] ss:$20 sps:$4 sm:$0xff]  }
 0x157   :  { %v2080_v17 = vpop.f32.mrb[35].mxu1 }
 0x158   :  { %v5311_v17 = vld [vmem:[%s7515_s0 + $0x690] ss:$20 sps:$4 sm:$0xff]  }
 0x159   :  { %2290 = vmatmul.mubr.bf16.gmra.mrb[140].mxu1 %v5283_v14 }
 0x15a   :  { %4473 = vmatmul.mubr.msk.bf16.gmra.mrb[40].mxu0 %vm1829_vm1, %v5284_v15  ;;  %2297 = vmatprep.mubr.bf16.mxu1 %v5285_v16 }
 0x15b   :  { %4476 = vmatprep.mubr.msk.bf16.mxu0 %vm5830_vm0, %v5829_v39 }
 0x15c   :  { %v6548_v19 = vpop.f32.mrb[36].mxu1 }
 0x15d   :  { %v2085_v20 = vpop.f32.mrb[37].mxu1 }
 0x15e   :  { %v6556_v24 = vpop.f32.mrb[38].mxu1  ;;  %v5312_v20 = vld [vmem:[%s7515_s0 + $0x2b8] ss:$20 sps:$4 sm:$0xff]  }
 0x15f   :  { %v2088_v27 = vpop.f32.mrb[39].mxu1 }
 0x161   :  { %2298 = vmatmul.mubr.bf16.gmra.mrb[144].mxu1 %v5287_v21 }
 0x162   :  { %4477 = vmatmul.mubr.msk.bf16.gmra.mrb[44].mxu0 %vm1829_vm1, %v5288_v23  ;;  %2305 = vmatprep.mubr.bf16.mxu1 %v5289_v26  ;;  %v5313_v23 = vld [vmem:[%s7515_s0 + $0x6bc] ss:$20 sps:$4 sm:$0xff]  }
 0x163   :  { %4480 = vmatprep.mubr.msk.bf16.mxu0 %vm5830_vm0, %v5829_v39 }
 0x164   :  { %v6564_v28 = vpop.f32.mrb[40].mxu1 }
 0x165   :  { %v2093_v30 = vpop.f32.mrb[41].mxu1 }
 0x166   :  { %v6572_v34 = vpop.f32.mrb[42].mxu1 }
 0x167   :  { %v2096_v37 = vpop.f32.mrb[43].mxu1 }
 0x168   :  { %v5317_v37 = vld [vmem:[%s7515_s0 + $0x6e4] ss:$20 sps:$4 sm:$0xff]  }
 0x169   :  { %2306 = vmatmul.mubr.bf16.gmra.mrb[148].mxu1 %v5291_v31  ;;  %v5315_v31 = vld [vmem:[%s7515_s0 + $0x6b8] ss:$20 sps:$4 sm:$0xff]  }
 0x16a   :  { %4481 = vmatmul.mubr.msk.bf16.gmra.mrb[48].mxu0 %vm1829_vm1, %v5292_v33  ;;  %2313 = vmatprep.mubr.bf16.mxu1 %v5293_v35  ;;  %v5316_v33 = vld [vmem:[%s7515_s0 + $0x2e0] ss:$20 sps:$4 sm:$0xff]  }
 0x16b   :  { %4484 = vmatprep.mubr.msk.bf16.mxu0 %vm5830_vm0, %v5829_v39 }
 0x16c   :  { %v6580_v38 = vpop.f32.mrb[44].mxu1 }
 0x16d   :  { %v2101_v41 = vpop.f32.mrb[45].mxu1 }
 0x16e   :  { %v6588_v45 = vpop.f32.mrb[46].mxu1 }
 0x16f   :  { %v2104_v48 = vpop.f32.mrb[47].mxu1 }
 0x170   :  { %v5320_v48 = vld [vmem:[%s7515_s0 + $0x308] ss:$20 sps:$4 sm:$0xff]  }
 0x171   :  { %2314 = vmatmul.mubr.bf16.gmra.mrb[152].mxu1 %v5295_v42 }
 0x172   :  { %4485 = vmatmul.mubr.msk.bf16.gmra.mrb[52].mxu0 %vm1829_vm1, %v5296_v43  ;;  %2321 = vmatprep.mubr.bf16.mxu1 %v5297_v46  ;;  %v5319_v46 = vld [vmem:[%s7515_s0 + $0x6e0] ss:$20 sps:$4 sm:$0xff]  }
 0x173   :  { %4488 = vmatprep.mubr.msk.bf16.mxu0 %vm5830_vm0, %v5829_v39 }
 0x174   :  { %v6596_v49 = vpop.f32.mrb[48].mxu1 }
 0x175   :  { %v2109_v50 = vpop.f32.mrb[49].mxu1 }
 0x176   :  { %v6604_v55 = vpop.f32.mrb[50].mxu1 }
 0x177   :  { %v2112_v57 = vpop.f32.mrb[51].mxu1 }
 0x179   :  { %2322 = vmatmul.mubr.bf16.gmra.mrb[156].mxu1 %v5299_v52  ;;  %v5321_v52 = vld [vmem:[%s7515_s0 + $0x70c] ss:$20 sps:$4 sm:$0xff]  }
 0x17a   :  { %4489 = vmatmul.mubr.msk.bf16.gmra.mrb[56].mxu0 %vm1829_vm1, %v5300_v53  ;;  %2329 = vmatprep.mubr.bf16.mxu1 %v5301_v56 }
 0x17b   :  { %4492 = vmatprep.mubr.msk.bf16.mxu0 %vm5830_vm0, %v5829_v39 }
 0x17c   :  { %v6612_v59 = vpop.f32.mrb[52].mxu1 }
 0x17d   :  { %v2117_v60 = vpop.f32.mrb[53].mxu1 }
 0x17e   :  { %v6620_v1 = vpop.f32.mrb[54].mxu1  ;;  %v5323_v60 = vld [vmem:[%s7515_s0 + $0x708] ss:$20 sps:$4 sm:$0xff]  }
 0x17f   :  { %v2120_v4 = vpop.f32.mrb[55].mxu1 }
 0x181   :  { %2330 = vmatmul.mubr.bf16.gmra.mrb[160].mxu1 %v5303_v62  ;;  %v5324_v62 = vld [vmem:[%s7515_s0 + $0x330] ss:$20 sps:$4 sm:$0xff]  }
 0x182   :  { %4493 = vmatmul.mubr.msk.bf16.gmra.mrb[60].mxu0 %vm1829_vm1, %v5304_v63  ;;  %2337 = vmatprep.mubr.bf16.mxu1 %v5305_v3  ;;  %v5325_v3 = vld [vmem:[%s7515_s0 + $0x734] ss:$20 sps:$4 sm:$0xff]  }
 0x183   :  { %4496 = vmatprep.mubr.msk.bf16.mxu0 %vm5830_vm0, %v5829_v39 }
 0x184   :  { %v6628_v6 = vpop.f32.mrb[56].mxu1 }
 0x185   :  { %v2125_v7 = vpop.f32.mrb[57].mxu1 }
 0x186   :  { %v6636_v11 = vpop.f32.mrb[58].mxu1 }
 0x187   :  { %v2128_v14 = vpop.f32.mrb[59].mxu1 }
 0x189   :  { %2338 = vmatmul.mubr.bf16.gmra.mrb[164].mxu1 %v5307_v8 }
 0x18a   :  { %4497 = vmatmul.mubr.msk.bf16.gmra.mrb[64].mxu0 %vm1829_vm1, %v5308_v10  ;;  %2345 = vmatprep.mubr.bf16.mxu1 %v5309_v13  ;;  %v5327_v10 = vld [vmem:[%s7515_s0 + $0x730] ss:$20 sps:$4 sm:$0xff]   ;;  %v5328_v13 = vld [vmem:[%s7515_s0 + $0x358] ss:$20 sps:$4 sm:$0xff]  }
 0x18b   :  { %4500 = vmatprep.mubr.msk.bf16.mxu0 %vm5830_vm0, %v5829_v39 }
 0x18c   :  { %v6644_v15 = vpop.f32.mrb[60].mxu1 }
 0x18d   :  { %v2133_v16 = vpop.f32.mrb[61].mxu1 }
 0x18e   :  { %v6652_v21 = vpop.f32.mrb[62].mxu1  ;;  %v5329_v16 = vld [vmem:[%s7515_s0 + $0x75c] ss:$20 sps:$4 sm:$0xff]  }
 0x18f   :  { %v2136_v26 = vpop.f32.mrb[63].mxu1 }
 0x190   :  { %v5331_v26 = vld [vmem:[%s7515_s0 + $0x758] ss:$20 sps:$4 sm:$0xff]  }
 0x191   :  { %2346 = vmatmul.mubr.bf16.gmra.mrb[168].mxu1 %v5311_v17 }
 0x192   :  { %4501 = vmatmul.mubr.msk.bf16.gmra.mrb[68].mxu0 %vm1829_vm1, %v5312_v20  ;;  %2353 = vmatprep.mubr.bf16.mxu1 %v5313_v23 }
 0x193   :  { %4504 = vmatprep.mubr.msk.bf16.mxu0 %vm5830_vm0, %v5829_v39 }
 0x194   :  { %v6660_v27 = vpop.f32.mrb[64].mxu1 }
 0x195   :  { %v2141_v30 = vpop.f32.mrb[65].mxu1 }
 0x196   :  { %v6668_v35 = vpop.f32.mrb[66].mxu1  ;;  %v5332_v30 = vld [vmem:[%s7515_s0 + $0x380] ss:$20 sps:$4 sm:$0xff]  }
 0x197   :  { %v2144_v41 = vpop.f32.mrb[67].mxu1 }
 0x199   :  { %2354 = vmatmul.mubr.bf16.gmra.mrb[172].mxu1 %v5315_v31 }
 0x19a   :  { %4505 = vmatmul.mubr.msk.bf16.gmra.mrb[72].mxu0 %vm1829_vm1, %v5316_v33  ;;  %2361 = vmatprep.mubr.bf16.mxu1 %v5317_v37  ;;  %v5333_v33 = vld [vmem:[%s7515_s0 + $0x784] ss:$20 sps:$4 sm:$0xff]  }
 0x19b   :  { %4508 = vmatprep.mubr.msk.bf16.mxu0 %vm5830_vm0, %v5829_v39 }
 0x19c   :  { %v6676_v42 = vpop.f32.mrb[68].mxu1 }
 0x19d   :  { %v2149_v43 = vpop.f32.mrb[69].mxu1 }
 0x19e   :  { %v6684_v50 = vpop.f32.mrb[70].mxu1 }
 0x19f   :  { %v2152_v53 = vpop.f32.mrb[71].mxu1 }
 0x1a0   :  { %v5339_v53 = vld [vmem:[%s7515_s0 + $0x3f4] ss:$20 sps:$4 sm:$0xff]  }
 0x1a1   :  { %2362 = vmatmul.mubr.bf16.gmra.mrb[176].mxu1 %v5319_v46  ;;  %v5335_v46 = vld [vmem:[%s7515_s0 + $0x780] ss:$20 sps:$4 sm:$0xff]  }
 0x1a2   :  { %4509 = vmatmul.mubr.msk.bf16.gmra.mrb[76].mxu0 %vm1829_vm1, %v5320_v48  ;;  %2369 = vmatprep.mubr.bf16.mxu1 %v5321_v52  ;;  %v5336_v48 = vld [vmem:[%s7515_s0 + $0x3a8] ss:$20 sps:$4 sm:$0xff]  }
 0x1a3   :  { %4512 = vmatprep.mubr.msk.bf16.mxu0 %vm5830_vm0, %v5829_v39 }
 0x1a4   :  { %v6692_v56 = vpop.f32.mrb[72].mxu1 }
 0x1a5   :  { %v2157_v57 = vpop.f32.mrb[73].mxu1 }
 0x1a6   :  { %v6700_v63 = vpop.f32.mrb[74].mxu1 }
 0x1a7   :  { %v2160_v4 = vpop.f32.mrb[75].mxu1 }
 0x1a8   :  { %v5340_v4 = vld [vmem:[%s7515_s0 + $0x3d0] ss:$20 sps:$4 sm:$0xff]  }
 0x1a9   :  { %2370 = vmatmul.mubr.bf16.gmra.mrb[180].mxu1 %v5323_v60 }
 0x1aa   :  { %4513 = vmatmul.mubr.msk.bf16.gmra.mrb[80].mxu0 %vm1829_vm1, %v5324_v62  ;;  %2377 = vmatprep.mubr.bf16.mxu1 %v5325_v3  ;;  %v5337_v62 = vld [vmem:[%s7515_s0 + $0x3f0] ss:$20 sps:$4 sm:$0xff]  }
 0x1ab   :  { %4516 = vmatprep.mubr.msk.bf16.mxu0 %vm5830_vm0, %v5829_v39 }
 0x1ac   :  { %v6708_v7 = vpop.f32.mrb[76].mxu1 }
 0x1ad   :  { %v2165_v8 = vpop.f32.mrb[77].mxu1 }
 0x1ae   :  { %v6716_v14 = vpop.f32.mrb[78].mxu1 }
 0x1af   :  { %v2168_v17 = vpop.f32.mrb[79].mxu1 }
 0x1b1   :  { %2378 = vmatmul.mubr.bf16.gmra.mrb[184].mxu1 %v5327_v10  ;;  %v5341_v10 = vld [vmem:[%s7515_s0 + $0x41c] ss:$20 sps:$4 sm:$0xff]  }
 0x1b2   :  { %4517 = vmatmul.mubr.msk.bf16.gmra.mrb[84].mxu0 %vm1829_vm1, %v5328_v13  ;;  %2385 = vmatprep.mubr.bf16.mxu1 %v5329_v16 }
 0x1b3   :  { %4520 = vmatprep.mubr.msk.bf16.mxu0 %vm5830_vm0, %v5829_v39 }
 0x1b4   :  { %v6724_v20 = vpop.f32.mrb[80].mxu1 }
 0x1b5   :  { %v2173_v23 = vpop.f32.mrb[81].mxu1 }
 0x1b6   :  { %v6732_v31 = vpop.f32.mrb[82].mxu1  ;;  %v5343_v23 = vld [vmem:[%s7515_s0 + $0x418] ss:$20 sps:$4 sm:$0xff]  }
 0x1b7   :  { %v2176_v37 = vpop.f32.mrb[83].mxu1 }
 0x1b9   :  { %2386 = vmatmul.mubr.bf16.gmra.mrb[188].mxu1 %v5331_v26  ;;  %v5344_v26 = vld [vmem:[%s7515_s0 + $0x3f8] ss:$20 sps:$4 sm:$0xff]  }
 0x1ba   :  { %4521 = vmatmul.mubr.msk.bf16.gmra.mrb[88].mxu0 %vm1829_vm1, %v5332_v30  ;;  %2393 = vmatprep.mubr.bf16.mxu1 %v5333_v33  ;;  %v5345_v33 = vld [vmem:[%s7515_s0 + $0x444] ss:$20 sps:$4 sm:$0xff]  }
 0x1bb   :  { %4524 = vmatprep.mubr.msk.bf16.mxu0 %vm5830_vm0, %v5829_v39 }
 0x1bc   :  { %v6740_v41 = vpop.f32.mrb[84].mxu1 }
 0x1bd   :  { %v2181_v43 = vpop.f32.mrb[85].mxu1 }
 0x1be   :  { %v6748_v52 = vpop.f32.mrb[86].mxu1 }
 0x1bf   :  { %v2184_v57 = vpop.f32.mrb[87].mxu1 }
 0x1c1   :  { %2394 = vmatmul.mubr.bf16.gmra.mrb[192].mxu1 %v5335_v46 }
 0x1c2   :  { %4525 = vmatmul.mubr.msk.bf16.gmra.mrb[92].mxu0 %vm1829_vm1, %v5336_v48  ;;  %2634 = vmatprep.mubr.bf16.mxu1 %v5339_v53  ;;  %v5347_v48 = vld [vmem:[%s7515_s0 + $0x440] ss:$20 sps:$4 sm:$0xff]  }
 0x1c3   :  { %4528 = vmatprep.mubr.msk.bf16.mxu0 %vm5830_vm0, %v5829_v39  ;;  %v5348_v53 = vld [vmem:[%s7515_s0 + $0x420] ss:$20 sps:$4 sm:$0xff]  }
 0x1c4   :  { %v6756_v60 = vpop.f32.mrb[88].mxu1 }
 0x1c5   :  { %v2189_v3 = vpop.f32.mrb[89].mxu1 }
 0x1c6   :  { %v6764_v8 = vpop.f32.mrb[90].mxu1 }
 0x1c7   :  { %v2192_v13 = vpop.f32.mrb[91].mxu1 }
 0x1c9   :  { %2635 = vmatmul.mubr.bf16.vlgmr.msra.gmra.mrb[100].mxu1 %v5337_v62  ;;  %v5349_v62 = vld [vmem:[%s7515_s0 + $0x46c] ss:$20 sps:$4 sm:$0xff]  }
 0x1ca   :  { %4529 = vmatmul.mubr.msk.bf16.gmra.mrb[96].mxu0 %vm1829_vm1, %v5340_v4  ;;  %2642 = vmatprep.mubr.bf16.mxu1 %v5341_v10  ;;  %v6804_v4 = vld [vmem:[%s7516_s2] ss:$0 sm:$0xff] }
 0x1cb   :  { %4532 = vmatprep.mubr.msk.bf16.mxu0 %vm5830_vm0, %v5829_v39  ;;  %v2012_v10 = vadd.f32 %v6804_v4, %v6404_v18 }
 0x1cc   :  { %v6772_v16 = vpop.f32.mrb[92].mxu1 }
 0x1cd   :  { %v2197_v17 = vpop.f32.mrb[93].mxu1 }
 0x1ce   :  { %v6780_v30 = vpop.f32.mrb[94].mxu1  ;;  %v5351_v17 = vld [vmem:[%s7515_s0 + $0x468] ss:$20 sps:$4 sm:$0xff]  }
 0x1cf   :  { %v2200_v37 = vpop.f32.mrb[95].mxu1 }
 0x1d0   :  { %v5352_v37 = vld [vmem:[%s7515_s0 + $0x448] ss:$20 sps:$4 sm:$0xff]  }
 0x1d1   :  { %2643 = vmatmul.mubr.bf16.gmra.mrb[104].mxu1 %v5343_v23  ;;  %v2015_v23 = vadd.f32 %v6804_v4, %v6412_v22  ;;  %v2020_v22 = vadd.f32 %v6804_v4, %v6420_v25 }
 0x1d2   :  { %4533 = vmatmul.mubr.msk.bf16.gmra.mrb[100].mxu0 %vm1829_vm1, %v5344_v26  ;;  %2650 = vmatprep.mubr.bf16.mxu1 %v5345_v33 }
 0x1d3   :  { %4536 = vmatprep.mubr.msk.bf16.mxu0 %vm5830_vm0, %v5829_v39 }
 0x1d4   :  { %v6788_v43 = vpop.f32.mrb[96].mxu1 }
 0x1d5   :  { %v2205_v46 = vpop.f32.mrb[97].mxu1 }
 0x1d6   :  { %v6796_v57 = vpop.f32.mrb[98].mxu1  ;;  %v5353_v46 = vld [vmem:[%s7515_s0 + $0x494] ss:$20 sps:$4 sm:$0xff]  }
 0x1d7   :  { %v2208_v3 = vpop.f32.mrb[99].mxu1 }
 0x1d9   :  { %2651 = vmatmul.mubr.bf16.gmra.mrb[108].mxu1 %v5347_v48 }
 0x1da   :  { %4537 = vmatmul.mubr.msk.bf16.gmra.mrb[104].mxu0 %vm1829_vm1, %v5348_v53  ;;  %2658 = vmatprep.mubr.bf16.mxu1 %v5349_v62 }
 0x1db   :  { %4540 = vmatprep.mubr.msk.bf16.mxu0 %vm5830_vm0, %v5829_v39 }
 0x1dd   :  { %v2861_v13 = vpop.f32.mrb[0].mxu0 }
 0x1de   :  { %v4661_v26 = vadd.f32 %v2861_v13, %v2012_v10  ;;  %v4434_v33 = vpop.f32.mrb[1].mxu0  ;;  %v5355_v13 = vld [vmem:[%s7515_s0 + $0x490] ss:$20 sps:$4 sm:$0xff]  }
 0x1df   :  { %v2864_v48 = vpop.f32.mrb[2].mxu0  ;;  %v5356_v33 = vld [vmem:[%s7515_s0 + $0x470] ss:$20 sps:$4 sm:$0xff]  }
 0x1e0   :  { %v4273_v18 = vmul.f32 -1.442695, %v4661_v26  ;;  %v4663_v53 = vadd.f32 %v2864_v48, %v2015_v23  ;;  %v4435_v62 = vpop.f32.mrb[3].mxu0 }
 0x1e1   :  { %2659 = vmatmul.mubr.bf16.gmra.mrb[112].mxu1 %v5351_v17  ;;  %v2023_v17 = vadd.f32 %v6804_v4, %v6428_v29  ;;  %v2028_v62 = vadd.f32 %v6804_v4, %v6436_v32  ;;  %v5361_v32 = vld [vmem:[%s7515_s0 + $0x4e4] ss:$20 sps:$4 sm:$0xff]  }
 0x1e2   :  { %5434 = vpow2.f32 %v4273_v18  ;;  %v4274_v3 = vmul.f32 -1.442695, %v4663_v53  ;;  %4541 = vmatmul.mubr.msk.bf16.gmra.mrb[108].mxu0 %vm1829_vm1, %v5352_v37  ;;  %2666 = vmatprep.mubr.bf16.mxu1 %v5353_v46  ;;  %v5357_v37 = vld [vmem:[%s7515_s0 + $0x4bc] ss:$20 sps:$4 sm:$0xff]  }
 0x1e3   :  { %4544 = vmatprep.mubr.msk.bf16.mxu0 %vm5830_vm0, %v5829_v39 }
 0x1e4   :  { %5436 = vpow2.f32 %v4274_v3 }
 0x1e5   :  { %v2869_v10 = vpop.f32.mrb[4].mxu0 }
 0x1e6   :  { %v4665_v23 = vadd.f32 %v2869_v10, %v2020_v22  ;;  %v4438_v26 = vpop.f32.mrb[5].mxu0  ;;  %v5359_v10 = vld [vmem:[%s7515_s0 + $0x4b8] ss:$20 sps:$4 sm:$0xff]  }
 0x1e7   :  { %v2872_v25 = vpop.f32.mrb[6].mxu0 }
 0x1e8   :  { %v4275_v46 = vmul.f32 -1.442695, %v4665_v23  ;;  %v4667_v48 = vadd.f32 %v2872_v25, %v2023_v17  ;;  %v4439_v18 = vpop.f32.mrb[7].mxu0  ;;  %v2031_v17 = vadd.f32 %v6804_v4, %v6444_v36 }
 0x1e9   :  { %2667 = vmatmul.mubr.bf16.gmra.mrb[116].mxu1 %v5355_v13 }
 0x1ea   :  { %5438 = vpow2.f32 %v4275_v46  ;;  %v4276_v53 = vmul.f32 -1.442695, %v4667_v48  ;;  %4545 = vmatmul.mubr.msk.bf16.gmra.mrb[112].mxu0 %vm1829_vm1, %v5356_v33  ;;  %2674 = vmatprep.mubr.bf16.mxu1 %v5357_v37  ;;  %v5360_v33 = vld [vmem:[%s7515_s0 + $0x498] ss:$20 sps:$4 sm:$0xff]  }
 0x1eb   :  { %4548 = vmatprep.mubr.msk.bf16.mxu0 %vm5830_vm0, %v5829_v39 }
 0x1ec   :  { %v5435_v29 = vpop.eup %5434  ;;  %5440 = vpow2.f32 %v4276_v53 }
 0x1ed   :  { %v3546_v3 = vadd.f32 1.0, %v5435_v29  ;;  %v2877_v22 = vpop.f32.mrb[8].mxu0  ;;  %v2036_v29 = vadd.f32 %v6804_v4, %v6452_v40  ;;  %v5365_v40 = vld [vmem:[%s7515_s0 + $0x50c] ss:$20 sps:$4 sm:$0xff]  }
 0x1ee   :  { %v5437_v13 = vpop.eup %5436  ;;  %v4669_v23 = vadd.f32 %v2877_v22, %v2028_v62  ;;  %v4442_v26 = vpop.f32.mrb[9].mxu0  ;;  %v5363_v22 = vld [vmem:[%s7515_s0 + $0x4e0] ss:$20 sps:$4 sm:$0xff]  }
 0x1ef   :  { %5442 = vrcp.f32 %v3546_v3  ;;  %v3547_v37 = vadd.f32 1.0, %v5437_v13  ;;  %v2880_v25 = vpop.f32.mrb[10].mxu0  ;;  %v2039_v13 = vadd.f32 %v6804_v4, %v6460_v44  ;;  %v5364_v26 = vld [vmem:[%s7515_s0 + $0x4c0] ss:$20 sps:$4 sm:$0xff]  }
 0x1f0   :  { %v4277_v46 = vmul.f32 -1.442695, %v4669_v23  ;;  %v4671_v48 = vadd.f32 %v2880_v25, %v2031_v17  ;;  %v4443_v18 = vpop.f32.mrb[11].mxu0 }
 0x1f1   :  { %5444 = vrcp.f32 %v3547_v37  ;;  %2675 = vmatmul.mubr.bf16.gmra.mrb[120].mxu1 %v5359_v10 }
 0x1f2   :  { %5446 = vpow2.f32 %v4277_v46  ;;  %v4278_v36 = vmul.f32 -1.442695, %v4671_v48  ;;  %4549 = vmatmul.mubr.msk.bf16.gmra.mrb[116].mxu0 %vm1829_vm1, %v5360_v33  ;;  %2682 = vmatprep.mubr.bf16.mxu1 %v5361_v32 }
 0x1f3   :  { %4552 = vmatprep.mubr.msk.bf16.mxu0 %vm5830_vm0, %v5829_v39 }
 0x1f4   :  { %v5439_v53 = vpop.eup %5438  ;;  %5448 = vpow2.f32 %v4278_v36 }
 0x1f5   :  { %v3548_v62 = vadd.f32 1.0, %v5439_v53  ;;  %v2885_v3 = vpop.f32.mrb[12].mxu0  ;;  %v2044_v53 = vadd.f32 %v6804_v4, %v6468_v47  ;;  %v5368_v47 = vld [vmem:[%s7515_s0 + $0x4e8] ss:$20 sps:$4 sm:$0xff]  }
 0x1f6   :  { %v5441_v10 = vpop.eup %5440  ;;  %v4673_v17 = vadd.f32 %v2885_v3, %v2036_v29  ;;  %v4446_v23 = vpop.f32.mrb[13].mxu0  ;;  %v5367_v3 = vld [vmem:[%s7515_s0 + $0x508] ss:$20 sps:$4 sm:$0xff]  }
 0x1f7   :  { %5450 = vrcp.f32 %v3548_v62  ;;  %v3549_v33 = vadd.f32 1.0, %v5441_v10  ;;  %v2888_v32 = vpop.f32.mrb[14].mxu0  ;;  %v2047_v10 = vadd.f32 %v6804_v4, %v6476_v51  ;;  %v5369_v23 = vld [vmem:[%s7515_s0 + $0x534] ss:$20 sps:$4 sm:$0xff]  }
 0x1f8   :  { %v4279_v37 = vmul.f32 -1.442695, %v4673_v17  ;;  %v4675_v25 = vadd.f32 %v2888_v32, %v2039_v13  ;;  %v4447_v46 = vpop.f32.mrb[15].mxu0 }
 0x1f9   :  { %v5443_v48 = vpop.eup %5442  ;;  %5452 = vrcp.f32 %v3549_v33  ;;  %2683 = vmatmul.mubr.bf16.gmra.mrb[124].mxu1 %v5363_v22 }
 0x1fa   :  { %3840 = vst [vmem:[%s7517_s3] sm:$0xff] %v5443_v48  ;;  %5454 = vpow2.f32 %v4279_v37  ;;  %v4280_v44 = vmul.f32 -1.442695, %v4675_v25  ;;  %4553 = vmatmul.mubr.msk.bf16.gmra.mrb[120].mxu0 %vm1829_vm1, %v5364_v26  ;;  %2690 = vmatprep.mubr.bf16.mxu1 %v5365_v40 }
 0x1fb   :  { %v5445_v18 = vpop.eup %5444  ;;  %4556 = vmatprep.mubr.msk.bf16.mxu0 %vm5830_vm0, %v5829_v39 }
 0x1fc   :  { %v5447_v36 = vpop.eup %5446  ;;  %3841 = vst [vmem:[%s7517_s3 + $0x8] sm:$0xff] %v5445_v18  ;;  %5456 = vpow2.f32 %v4280_v44  ;;  %v2052_v44 = vadd.f32 %v6804_v4, %v6484_v54  ;;  %v5372_v54 = vld [vmem:[%s7515_s0 + $0x510] ss:$20 sps:$4 sm:$0xff]  }
 0x1fd   :  { %v3550_v29 = vadd.f32 1.0, %v5447_v36  ;;  %v2893_v62 = vpop.f32.mrb[16].mxu0 }
 0x1fe   :  { %v5449_v22 = vpop.eup %5448  ;;  %v4677_v13 = vadd.f32 %v2893_v62, %v2044_v53  ;;  %v4450_v17 = vpop.f32.mrb[17].mxu0  ;;  %v5371_v53 = vld [vmem:[%s7515_s0 + $0x530] ss:$20 sps:$4 sm:$0xff]   ;;  %v2055_v62 = vadd.f32 %v6804_v4, %v6492_v58 }
 0x1ff   :  { %5458 = vrcp.f32 %v3550_v29  ;;  %v3551_v26 = vadd.f32 1.0, %v5449_v22  ;;  %v2896_v40 = vpop.f32.mrb[18].mxu0 }
 0x200   :  { %v4281_v33 = vmul.f32 -1.442695, %v4677_v13  ;;  %v4679_v32 = vadd.f32 %v2896_v40, %v2047_v10  ;;  %v4451_v37 = vpop.f32.mrb[19].mxu0  ;;  %v5373_v10 = vld [vmem:[%s7515_s0 + $0x55c] ss:$20 sps:$4 sm:$0xff]  }
 0x201   :  { %v5451_v25 = vpop.eup %5450  ;;  %5460 = vrcp.f32 %v3551_v26  ;;  %2691 = vmatmul.mubr.bf16.gmra.mrb[128].mxu1 %v5367_v3  ;;  %v2060_v37 = vadd.f32 %v6804_v4, %v6500_v61  ;;  %v5376_v61 = vld [vmem:[%s7515_s0 + $0x538] ss:$20 sps:$4 sm:$0xff]  }
 0x202   :  { %3842 = vst [vmem:[%s7517_s3 + $0x10] sm:$0xff] %v5451_v25  ;;  %5462 = vpow2.f32 %v4281_v33  ;;  %v4282_v51 = vmul.f32 -1.442695, %v4679_v32  ;;  %4557 = vmatmul.mubr.msk.bf16.gmra.mrb[124].mxu0 %vm1829_vm1, %v5368_v47  ;;  %2698 = vmatprep.mubr.bf16.mxu1 %v5369_v23 }
 0x203   :  { %v5453_v46 = vpop.eup %5452  ;;  %4560 = vmatprep.mubr.msk.bf16.mxu0 %vm5830_vm0, %v5829_v39 }
 0x204   :  { %v5455_v48 = vpop.eup %5454  ;;  %3843 = vst [vmem:[%s7517_s3 + $0x18] sm:$0xff] %v5453_v46  ;;  %5464 = vpow2.f32 %v4282_v51  ;;  %v5375_v46 = vld [vmem:[%s7515_s0 + $0x558] ss:$20 sps:$4 sm:$0xff]  }
 0x205   :  { %v3552_v18 = vadd.f32 1.0, %v5455_v48  ;;  %v2901_v36 = vpop.f32.mrb[20].mxu0 }
 0x206   :  { %v5457_v29 = vpop.eup %5456  ;;  %v4681_v3 = vadd.f32 %v2901_v36, %v2052_v44  ;;  %v4454_v22 = vpop.f32.mrb[21].mxu0  ;;  %v2063_v44 = vadd.f32 %v6804_v4, %v6508_v2 }
 0x207   :  { %5466 = vrcp.f32 %v3552_v18  ;;  %v3553_v13 = vadd.f32 1.0, %v5457_v29  ;;  %v2904_v17 = vpop.f32.mrb[22].mxu0 }
 0x208   :  { %v4283_v47 = vmul.f32 -1.442695, %v4681_v3  ;;  %v4683_v23 = vadd.f32 %v2904_v17, %v2055_v62  ;;  %v4455_v26 = vpop.f32.mrb[23].mxu0 }
 0x209   :  { %v5459_v40 = vpop.eup %5458  ;;  %5468 = vrcp.f32 %v3553_v13  ;;  %2699 = vmatmul.mubr.bf16.gmra.mrb[132].mxu1 %v5371_v53  ;;  %v5377_v53 = vld [vmem:[%s7515_s0 + $0x584] ss:$20 sps:$4 sm:$0xff]  }
 0x20a   :  { %3844 = vst [vmem:[%s7517_s3 + $0x20] sm:$0xff] %v5459_v40  ;;  %5470 = vpow2.f32 %v4283_v47  ;;  %v4284_v58 = vmul.f32 -1.442695, %v4683_v23  ;;  %4561 = vmatmul.mubr.msk.bf16.gmra.mrb[128].mxu0 %vm1829_vm1, %v5372_v54  ;;  %2706 = vmatprep.mubr.bf16.mxu1 %v5373_v10  ;;  %v2068_v47 = vadd.f32 %v6804_v4, %v6516_v5  ;;  %v5379_v40 = vld [vmem:[%s7515_s0 + $0x580] ss:$20 sps:$4 sm:$0xff]  }
 0x20b   :  { %v5461_v33 = vpop.eup %5460  ;;  %4564 = vmatprep.mubr.msk.bf16.mxu0 %vm5830_vm0, %v5829_v39  ;;  %v5380_v5 = vld [vmem:[%s7515_s0 + $0x560] ss:$20 sps:$4 sm:$0xff]  }
 0x20c   :  { %v5463_v32 = vpop.eup %5462  ;;  %3845 = vst [vmem:[%s7517_s3 + $0x28] sm:$0xff] %v5461_v33  ;;  %5472 = vpow2.f32 %v4284_v58  ;;  %v2071_v33 = vadd.f32 %v6804_v4, %v6524_v9 }
 0x20d   :  { %v3554_v25 = vadd.f32 1.0, %v5463_v32  ;;  %v2909_v51 = vpop.f32.mrb[24].mxu0 }
 0x20e   :  { %v5465_v48 = vpop.eup %5464  ;;  %v4685_v18 = vadd.f32 %v2909_v51, %v2060_v37  ;;  %v4458_v36 = vpop.f32.mrb[25].mxu0 }
 0x20f   :  { %5474 = vrcp.f32 %v3554_v25  ;;  %v3555_v29 = vadd.f32 1.0, %v5465_v48  ;;  %v2912_v62 = vpop.f32.mrb[26].mxu0  ;;  %v5381_v25 = vld [vmem:[%s7515_s0 + $0x5ac] ss:$20 sps:$4 sm:$0xff]  }
 0x210   :  { %v4285_v3 = vmul.f32 -1.442695, %v4685_v18  ;;  %v4687_v22 = vadd.f32 %v2912_v62, %v2063_v44  ;;  %v4459_v54 = vpop.f32.mrb[27].mxu0 }
 0x211   :  { %v5467_v10 = vpop.eup %5466  ;;  %5476 = vrcp.f32 %v3555_v29  ;;  %2707 = vmatmul.mubr.bf16.gmra.mrb[136].mxu1 %v5375_v46  ;;  %v2076_v29 = vadd.f32 %v6804_v4, %v6532_v12  ;;  %v5384_v12 = vld [vmem:[%s7515_s0 + $0x588] ss:$20 sps:$4 sm:$0xff]  }
 0x212   :  { %3846 = vst [vmem:[%s7517_s3 + $0x30] sm:$0xff] %v5467_v10  ;;  %5478 = vpow2.f32 %v4285_v3  ;;  %v4286_v2 = vmul.f32 -1.442695, %v4687_v22  ;;  %4565 = vmatmul.mubr.msk.bf16.gmra.mrb[132].mxu0 %vm1829_vm1, %v5376_v61  ;;  %2714 = vmatprep.mubr.bf16.mxu1 %v5377_v53  ;;  %v5383_v22 = vld [vmem:[%s7515_s0 + $0x5a8] ss:$20 sps:$4 sm:$0xff]   ;;  %v2079_v10 = vadd.f32 %v6804_v4, %v6540_v0 }
 0x213   :  { %v5469_v13 = vpop.eup %5468  ;;  %4568 = vmatprep.mubr.msk.bf16.mxu0 %vm5830_vm0, %v5829_v39 }
 0x214   :  { %v5471_v17 = vpop.eup %5470  ;;  %3847 = vst [vmem:[%s7517_s3 + $0x38] sm:$0xff] %v5469_v13  ;;  %5480 = vpow2.f32 %v4286_v2 }
 0x215   :  { %v3556_v23 = vadd.f32 1.0, %v5471_v17  ;;  %v2917_v26 = vpop.f32.mrb[28].mxu0  ;;  %v5385_v17 = vld [vmem:[%s7515_s0 + $0x5d4] ss:$20 sps:$4 sm:$0xff]  }
 0x216   :  { %v5473_v58 = vpop.eup %5472  ;;  %v4689_v32 = vadd.f32 %v2917_v26, %v2068_v47  ;;  %v4462_v37 = vpop.f32.mrb[29].mxu0 }
 0x217   :  { %5482 = vrcp.f32 %v3556_v23  ;;  %v3557_v51 = vadd.f32 1.0, %v5473_v58  ;;  %v2920_v46 = vpop.f32.mrb[30].mxu0 }
 0x218   :  { %v4287_v48 = vmul.f32 -1.442695, %v4689_v32  ;;  %v4691_v44 = vadd.f32 %v2920_v46, %v2071_v33  ;;  %v4463_v18 = vpop.f32.mrb[31].mxu0  ;;  %v5387_v46 = vld [vmem:[%s7515_s0 + $0x5d0] ss:$20 sps:$4 sm:$0xff]  }
 0x219   :  { %v5475_v36 = vpop.eup %5474  ;;  %5484 = vrcp.f32 %v3557_v51  ;;  %2715 = vmatmul.mubr.bf16.gmra.mrb[140].mxu1 %v5379_v40 }
 0x21a   :  { %3848 = vst [vmem:[%s7517_s3 + $0x40] sm:$0xff] %v5475_v36  ;;  %5486 = vpow2.f32 %v4287_v48  ;;  %v4288_v9 = vmul.f32 -1.442695, %v4691_v44  ;;  %4569 = vmatmul.mubr.msk.bf16.gmra.mrb[136].mxu0 %vm1829_vm1, %v5380_v5  ;;  %2722 = vmatprep.mubr.bf16.mxu1 %v5381_v25  ;;  %v2084_v5 = vadd.f32 %v6804_v4, %v6548_v19  ;;  %v2087_v44 = vadd.f32 %v6804_v4, %v6556_v24  ;;  %v5388_v19 = vld [vmem:[%s7515_s0 + $0x5b0] ss:$20 sps:$4 sm:$0xff]  }
 0x21b   :  { %v5477_v61 = vpop.eup %5476  ;;  %4572 = vmatprep.mubr.msk.bf16.mxu0 %vm5830_vm0, %v5829_v39 }
 0x21c   :  { %v5479_v53 = vpop.eup %5478  ;;  %3849 = vst [vmem:[%s7517_s3 + $0x48] sm:$0xff] %v5477_v61  ;;  %5488 = vpow2.f32 %v4288_v9  ;;  %v5389_v9 = vld [vmem:[%s7515_s0 + $0x5fc] ss:$20 sps:$4 sm:$0xff]  }
 0x21d   :  { %v3558_v62 = vadd.f32 1.0, %v5479_v53  ;;  %v2925_v3 = vpop.f32.mrb[32].mxu0 }
 0x21e   :  { %v5481_v54 = vpop.eup %5480  ;;  %v4693_v2 = vadd.f32 %v2925_v3, %v2076_v29  ;;  %v4466_v13 = vpop.f32.mrb[33].mxu0 }
 0x21f   :  { %5490 = vrcp.f32 %v3558_v62  ;;  %v3559_v47 = vadd.f32 1.0, %v5481_v54  ;;  %v2928_v23 = vpop.f32.mrb[34].mxu0 }
 0x220   :  { %v4289_v26 = vmul.f32 -1.442695, %v4693_v2  ;;  %v4695_v40 = vadd.f32 %v2928_v23, %v2079_v10  ;;  %v4467_v58 = vpop.f32.mrb[35].mxu0  ;;  %v2092_v2 = vadd.f32 %v6804_v4, %v6564_v28  ;;  %v2095_v23 = vadd.f32 %v6804_v4, %v6572_v34  ;;  %v5392_v28 = vld [vmem:[%s7515_s0 + $0x5d8] ss:$20 sps:$4 sm:$0xff]  }
 0x221   :  { %v5483_v33 = vpop.eup %5482  ;;  %5492 = vrcp.f32 %v3559_v47  ;;  %2723 = vmatmul.mubr.bf16.gmra.mrb[144].mxu1 %v5383_v22  ;;  %v5393_v58 = vld [vmem:[%s7515_s0 + $0x624] ss:$20 sps:$4 sm:$0xff]  }
 0x222   :  { %3850 = vst [vmem:[%s7517_s3 + $0x50] sm:$0xff] %v5483_v33  ;;  %5494 = vpow2.f32 %v4289_v26  ;;  %v4290_v0 = vmul.f32 -1.442695, %v4695_v40  ;;  %4573 = vmatmul.mubr.msk.bf16.gmra.mrb[140].mxu0 %vm1829_vm1, %v5384_v12  ;;  %2730 = vmatprep.mubr.bf16.mxu1 %v5385_v17  ;;  %v5391_v17 = vld [vmem:[%s7515_s0 + $0x5f8] ss:$20 sps:$4 sm:$0xff]  }
 0x223   :  { %v5485_v32 = vpop.eup %5484  ;;  %4576 = vmatprep.mubr.msk.bf16.mxu0 %vm5830_vm0, %v5829_v39 }
 0x224   :  { %v5487_v37 = vpop.eup %5486  ;;  %3851 = vst [vmem:[%s7517_s3 + $0x58] sm:$0xff] %v5485_v32  ;;  %5496 = vpow2.f32 %v4290_v0 }
 0x225   :  { %v3560_v25 = vadd.f32 1.0, %v5487_v37  ;;  %v2933_v51 = vpop.f32.mrb[36].mxu0 }
 0x226   :  { %v5489_v48 = vpop.eup %5488  ;;  %v4697_v18 = vadd.f32 %v2933_v51, %v2084_v5  ;;  %v4470_v36 = vpop.f32.mrb[37].mxu0 }
 0x227   :  { %5498 = vrcp.f32 %v3560_v25  ;;  %v3561_v61 = vadd.f32 1.0, %v5489_v48  ;;  %v2936_v53 = vpop.f32.mrb[38].mxu0  ;;  %v2100_v48 = vadd.f32 %v6804_v4, %v6580_v38  ;;  %v5395_v36 = vld [vmem:[%s7515_s0 + $0x620] ss:$20 sps:$4 sm:$0xff]  }
 0x228   :  { %v4291_v29 = vmul.f32 -1.442695, %v4697_v18  ;;  %v4699_v62 = vadd.f32 %v2936_v53, %v2087_v44  ;;  %v4471_v3 = vpop.f32.mrb[39].mxu0  ;;  %v5396_v38 = vld [vmem:[%s7515_s0 + $0x600] ss:$20 sps:$4 sm:$0xff]  }
 0x229   :  { %v5491_v22 = vpop.eup %5490  ;;  %5500 = vrcp.f32 %v3561_v61  ;;  %2731 = vmatmul.mubr.bf16.gmra.mrb[148].mxu1 %v5387_v46 }
 0x22a   :  { %3852 = vst [vmem:[%s7517_s3 + $0x60] sm:$0xff] %v5491_v22  ;;  %5502 = vpow2.f32 %v4291_v29  ;;  %v4292_v24 = vmul.f32 -1.442695, %v4699_v62  ;;  %4577 = vmatmul.mubr.msk.bf16.gmra.mrb[144].mxu0 %vm1829_vm1, %v5388_v19  ;;  %2738 = vmatprep.mubr.bf16.mxu1 %v5389_v9  ;;  %v2103_v9 = vadd.f32 %v6804_v4, %v6588_v45  ;;  %v5397_v29 = vld [vmem:[%s7515_s0 + $0x64c] ss:$20 sps:$4 sm:$0xff]  }
 0x22b   :  { %v5493_v54 = vpop.eup %5492  ;;  %4580 = vmatprep.mubr.msk.bf16.mxu0 %vm5830_vm0, %v5829_v39 }
 0x22c   :  { %v5495_v10 = vpop.eup %5494  ;;  %3853 = vst [vmem:[%s7517_s3 + $0x68] sm:$0xff] %v5493_v54  ;;  %5504 = vpow2.f32 %v4292_v24 }
 0x22d   :  { %v3562_v13 = vadd.f32 1.0, %v5495_v10  ;;  %v2941_v12 = vpop.f32.mrb[40].mxu0 }
 0x22e   :  { %v5497_v47 = vpop.eup %5496  ;;  %v4701_v26 = vadd.f32 %v2941_v12, %v2092_v2  ;;  %v4474_v40 = vpop.f32.mrb[41].mxu0  ;;  %v2108_v12 = vadd.f32 %v6804_v4, %v6596_v49  ;;  %v5400_v49 = vld [vmem:[%s7515_s0 + $0x628] ss:$20 sps:$4 sm:$0xff]  }
 0x22f   :  { %5506 = vrcp.f32 %v3562_v13  ;;  %v3563_v33 = vadd.f32 1.0, %v5497_v47  ;;  %v2944_v0 = vpop.f32.mrb[42].mxu0  ;;  %v2111_v40 = vadd.f32 %v6804_v4, %v6604_v55 }
 0x230   :  { %v4293_v32 = vmul.f32 -1.442695, %v4701_v26  ;;  %v4703_v37 = vadd.f32 %v2944_v0, %v2095_v23  ;;  %v4475_v5 = vpop.f32.mrb[43].mxu0  ;;  %v5399_v23 = vld [vmem:[%s7515_s0 + $0x648] ss:$20 sps:$4 sm:$0xff]  }
 0x231   :  { %v5499_v25 = vpop.eup %5498  ;;  %5508 = vrcp.f32 %v3563_v33  ;;  %2739 = vmatmul.mubr.bf16.gmra.mrb[152].mxu1 %v5391_v17  ;;  %v5401_v33 = vld [vmem:[%s7515_s0 + $0x674] ss:$20 sps:$4 sm:$0xff]  }
 0x232   :  { %3854 = vst [vmem:[%s7517_s3 + $0x70] sm:$0xff] %v5499_v25  ;;  %5510 = vpow2.f32 %v4293_v32  ;;  %v4294_v34 = vmul.f32 -1.442695, %v4703_v37  ;;  %4581 = vmatmul.mubr.msk.bf16.gmra.mrb[148].mxu0 %vm1829_vm1, %v5392_v28  ;;  %2746 = vmatprep.mubr.bf16.mxu1 %v5393_v58 }
 0x233   :  { %v5501_v51 = vpop.eup %5500  ;;  %4584 = vmatprep.mubr.msk.bf16.mxu0 %vm5830_vm0, %v5829_v39 }
 0x234   :  { %v5503_v46 = vpop.eup %5502  ;;  %3855 = vst [vmem:[%s7517_s3 + $0x78] sm:$0xff] %v5501_v51  ;;  %5512 = vpow2.f32 %v4294_v34 }
 0x235   :  { %v3564_v44 = vadd.f32 1.0, %v5503_v46  ;;  %v2949_v18 = vpop.f32.mrb[44].mxu0 }
 0x236   :  { %v5505_v19 = vpop.eup %5504  ;;  %v4705_v61 = vadd.f32 %v2949_v18, %v2100_v48  ;;  %v4478_v53 = vpop.f32.mrb[45].mxu0  ;;  %v2116_v48 = vadd.f32 %v6804_v4, %v6612_v59  ;;  %v5404_v59 = vld [vmem:[%s7515_s0 + $0x650] ss:$20 sps:$4 sm:$0xff]  }
 0x237   :  { %5514 = vrcp.f32 %v3564_v44  ;;  %v3565_v62 = vadd.f32 1.0, %v5505_v19  ;;  %v2952_v3 = vpop.f32.mrb[46].mxu0 }
 0x238   :  { %v4295_v22 = vmul.f32 -1.442695, %v4705_v61  ;;  %v4707_v24 = vadd.f32 %v2952_v3, %v2103_v9  ;;  %v4479_v54 = vpop.f32.mrb[47].mxu0  ;;  %v2119_v9 = vadd.f32 %v6804_v4, %v6620_v1 }
 0x239   :  { %v5507_v10 = vpop.eup %5506  ;;  %5516 = vrcp.f32 %v3565_v62  ;;  %2747 = vmatmul.mubr.bf16.gmra.mrb[156].mxu1 %v5395_v36  ;;  %v5403_v36 = vld [vmem:[%s7515_s0 + $0x670] ss:$20 sps:$4 sm:$0xff]  }
 0x23a   :  { %3856 = vst [vmem:[%s7517_s3 + $0x80] sm:$0xff] %v5507_v10  ;;  %5518 = vpow2.f32 %v4295_v22  ;;  %v4296_v45 = vmul.f32 -1.442695, %v4707_v24  ;;  %4585 = vmatmul.mubr.msk.bf16.gmra.mrb[152].mxu0 %vm1829_vm1, %v5396_v38  ;;  %2754 = vmatprep.mubr.bf16.mxu1 %v5397_v29  ;;  %v5405_v38 = vld [vmem:[%s7515_s0 + $0x69c] ss:$20 sps:$4 sm:$0xff]  }
 0x23b   :  { %v5509_v2 = vpop.eup %5508  ;;  %4588 = vmatprep.mubr.msk.bf16.mxu0 %vm5830_vm0, %v5829_v39 }
 0x23c   :  { %v5511_v13 = vpop.eup %5510  ;;  %3857 = vst [vmem:[%s7517_s3 + $0x88] sm:$0xff] %v5509_v2  ;;  %5520 = vpow2.f32 %v4296_v45  ;;  %v2124_v2 = vadd.f32 %v6804_v4, %v6628_v6  ;;  %v5408_v6 = vld [vmem:[%s7515_s0 + $0x678] ss:$20 sps:$4 sm:$0xff]  }
 0x23d   :  { %v3566_v17 = vadd.f32 1.0, %v5511_v13  ;;  %v2957_v47 = vpop.f32.mrb[48].mxu0 }
 0x23e   :  { %v5513_v26 = vpop.eup %5512  ;;  %v4709_v28 = vadd.f32 %v2957_v47, %v2108_v12  ;;  %v4482_v58 = vpop.f32.mrb[49].mxu0 }
 0x23f   :  { %5522 = vrcp.f32 %v3566_v17  ;;  %v3567_v0 = vadd.f32 1.0, %v5513_v26  ;;  %v2960_v32 = vpop.f32.mrb[50].mxu0  ;;  %v5407_v17 = vld [vmem:[%s7515_s0 + $0x698] ss:$20 sps:$4 sm:$0xff]  }
 0x240   :  { %v4297_v37 = vmul.f32 -1.442695, %v4709_v28  ;;  %v4711_v5 = vadd.f32 %v2960_v32, %v2111_v40  ;;  %v4483_v25 = vpop.f32.mrb[51].mxu0  ;;  %v5409_v28 = vld [vmem:[%s7515_s0 + $0x6c4] ss:$20 sps:$4 sm:$0xff]  }
 0x241   :  { %v5515_v34 = vpop.eup %5514  ;;  %5524 = vrcp.f32 %v3567_v0  ;;  %2755 = vmatmul.mubr.bf16.gmra.mrb[160].mxu1 %v5399_v23  ;;  %v2127_v23 = vadd.f32 %v6804_v4, %v6636_v11 }
 0x242   :  { %3858 = vst [vmem:[%s7517_s3 + $0x90] sm:$0xff] %v5515_v34  ;;  %5526 = vpow2.f32 %v4297_v37  ;;  %v4298_v55 = vmul.f32 -1.442695, %v4711_v5  ;;  %4589 = vmatmul.mubr.msk.bf16.gmra.mrb[156].mxu0 %vm1829_vm1, %v5400_v49  ;;  %2762 = vmatprep.mubr.bf16.mxu1 %v5401_v33  ;;  %v2132_v34 = vadd.f32 %v6804_v4, %v6644_v15  ;;  %v5412_v15 = vld [vmem:[%s7515_s0 + $0x6a0] ss:$20 sps:$4 sm:$0xff]  }
 0x243   :  { %v5517_v51 = vpop.eup %5516  ;;  %4592 = vmatprep.mubr.msk.bf16.mxu0 %vm5830_vm0, %v5829_v39 }
 0x244   :  { %v5519_v46 = vpop.eup %5518  ;;  %3859 = vst [vmem:[%s7517_s3 + $0x98] sm:$0xff] %v5517_v51  ;;  %5528 = vpow2.f32 %v4298_v55 }
 0x245   :  { %v3568_v44 = vadd.f32 1.0, %v5519_v46  ;;  %v2965_v18 = vpop.f32.mrb[52].mxu0  ;;  %v5411_v46 = vld [vmem:[%s7515_s0 + $0x6c0] ss:$20 sps:$4 sm:$0xff]  }
 0x246   :  { %v5521_v19 = vpop.eup %5520  ;;  %v4713_v61 = vadd.f32 %v2965_v18, %v2116_v48  ;;  %v4486_v53 = vpop.f32.mrb[53].mxu0 }
 0x247   :  { %5530 = vrcp.f32 %v3568_v44  ;;  %v3569_v29 = vadd.f32 1.0, %v5521_v19  ;;  %v2968_v62 = vpop.f32.mrb[54].mxu0  ;;  %v2135_v44 = vadd.f32 %v6804_v4, %v6652_v21  ;;  %v5413_v19 = vld [vmem:[%s7515_s0 + $0x6ec] ss:$20 sps:$4 sm:$0xff]  }
 0x248   :  { %v4299_v3 = vmul.f32 -1.442695, %v4713_v61  ;;  %v4715_v22 = vadd.f32 %v2968_v62, %v2119_v9  ;;  %v4487_v24 = vpop.f32.mrb[55].mxu0 }
 0x249   :  { %v5523_v54 = vpop.eup %5522  ;;  %5532 = vrcp.f32 %v3569_v29  ;;  %2763 = vmatmul.mubr.bf16.gmra.mrb[164].mxu1 %v5403_v36 }
 0x24a   :  { %3860 = vst [vmem:[%s7517_s3 + $0xa0] sm:$0xff] %v5523_v54  ;;  %5534 = vpow2.f32 %v4299_v3  ;;  %v4300_v1 = vmul.f32 -1.442695, %v4715_v22  ;;  %4593 = vmatmul.mubr.msk.bf16.gmra.mrb[160].mxu0 %vm1829_vm1, %v5404_v59  ;;  %2770 = vmatprep.mubr.bf16.mxu1 %v5405_v38  ;;  %v2140_v22 = vadd.f32 %v6804_v4, %v6660_v27  ;;  %v5416_v27 = vld [vmem:[%s7515_s0 + $0x6c8] ss:$20 sps:$4 sm:$0xff]  }
 0x24b   :  { %v5525_v10 = vpop.eup %5524  ;;  %4596 = vmatprep.mubr.msk.bf16.mxu0 %vm5830_vm0, %v5829_v39 }
 0x24c   :  { %v5527_v45 = vpop.eup %5526  ;;  %3861 = vst [vmem:[%s7517_s3 + $0xa8] sm:$0xff] %v5525_v10  ;;  %5536 = vpow2.f32 %v4300_v1  ;;  %v5415_v1 = vld [vmem:[%s7515_s0 + $0x6e8] ss:$20 sps:$4 sm:$0xff]  }
 0x24d   :  { %v3570_v13 = vadd.f32 1.0, %v5527_v45  ;;  %v2973_v12 = vpop.f32.mrb[56].mxu0  ;;  %v2143_v45 = vadd.f32 %v6804_v4, %v6668_v35 }
 0x24e   :  { %v5529_v47 = vpop.eup %5528  ;;  %v4717_v26 = vadd.f32 %v2973_v12, %v2124_v2  ;;  %v4490_v40 = vpop.f32.mrb[57].mxu0  ;;  %v5417_v12 = vld [vmem:[%s7515_s0 + $0x714] ss:$20 sps:$4 sm:$0xff]  }
 0x24f   :  { %5538 = vrcp.f32 %v3570_v13  ;;  %v3571_v58 = vadd.f32 1.0, %v5529_v47  ;;  %v2976_v49 = vpop.f32.mrb[58].mxu0 }
 0x250   :  { %v4301_v33 = vmul.f32 -1.442695, %v4717_v26  ;;  %v4719_v0 = vadd.f32 %v2976_v49, %v2127_v23  ;;  %v4491_v32 = vpop.f32.mrb[59].mxu0  ;;  %v2148_v49 = vadd.f32 %v6804_v4, %v6676_v42  ;;  %v5420_v42 = vld [vmem:[%s7515_s0 + $0x6f0] ss:$20 sps:$4 sm:$0xff]  }
 0x251   :  { %v5531_v37 = vpop.eup %5530  ;;  %5540 = vrcp.f32 %v3571_v58  ;;  %2771 = vmatmul.mubr.bf16.gmra.mrb[168].mxu1 %v5407_v17  ;;  %v5419_v32 = vld [vmem:[%s7515_s0 + $0x710] ss:$20 sps:$4 sm:$0xff]  }
 0x252   :  { %3862 = vst [vmem:[%s7517_s3 + $0xb0] sm:$0xff] %v5531_v37  ;;  %5542 = vpow2.f32 %v4301_v33  ;;  %v4302_v11 = vmul.f32 -1.442695, %v4719_v0  ;;  %4597 = vmatmul.mubr.msk.bf16.gmra.mrb[164].mxu0 %vm1829_vm1, %v5408_v6  ;;  %2778 = vmatprep.mubr.bf16.mxu1 %v5409_v28 }
 0x253   :  { %v5533_v5 = vpop.eup %5532  ;;  %4600 = vmatprep.mubr.msk.bf16.mxu0 %vm5830_vm0, %v5829_v39 }
 0x254   :  { %v5535_v25 = vpop.eup %5534  ;;  %3863 = vst [vmem:[%s7517_s3 + $0xb8] sm:$0xff] %v5533_v5  ;;  %5544 = vpow2.f32 %v4302_v11  ;;  %v2151_v11 = vadd.f32 %v6804_v4, %v6684_v50 }
 0x255   :  { %v3572_v55 = vadd.f32 1.0, %v5535_v25  ;;  %v2981_v51 = vpop.f32.mrb[60].mxu0 }
 0x256   :  { %v5537_v48 = vpop.eup %5536  ;;  %v4721_v18 = vadd.f32 %v2981_v51, %v2132_v34  ;;  %v4494_v36 = vpop.f32.mrb[61].mxu0  ;;  %v5421_v34 = vld [vmem:[%s7515_s0 + $0x73c] ss:$20 sps:$4 sm:$0xff]  }
 0x257   :  { %5546 = vrcp.f32 %v3572_v55  ;;  %v3573_v9 = vadd.f32 1.0, %v5537_v48  ;;  %v2984_v61 = vpop.f32.mrb[62].mxu0 }
 0x258   :  { %v4303_v53 = vmul.f32 -1.442695, %v4721_v18  ;;  %v4723_v59 = vadd.f32 %v2984_v61, %v2135_v44  ;;  %v4495_v38 = vpop.f32.mrb[63].mxu0 }
 0x259   :  { %v5539_v29 = vpop.eup %5538  ;;  %5548 = vrcp.f32 %v3573_v9  ;;  %2779 = vmatmul.mubr.bf16.gmra.mrb[172].mxu1 %v5411_v46  ;;  %v2159_v38 = vadd.f32 %v6804_v4, %v6700_v63 }
 0x25a   :  { %3864 = vst [vmem:[%s7517_s3 + $0xc0] sm:$0xff] %v5539_v29  ;;  %5550 = vpow2.f32 %v4303_v53  ;;  %v4304_v21 = vmul.f32 -1.442695, %v4723_v59  ;;  %4601 = vmatmul.mubr.msk.bf16.gmra.mrb[168].mxu0 %vm1829_vm1, %v5412_v15  ;;  %2786 = vmatprep.mubr.bf16.mxu1 %v5413_v19  ;;  %v2156_v19 = vadd.f32 %v6804_v4, %v6692_v56  ;;  %v5423_v53 = vld [vmem:[%s7515_s0 + $0x738] ss:$20 sps:$4 sm:$0xff]  }
 0x25b   :  { %v5541_v62 = vpop.eup %5540  ;;  %4604 = vmatprep.mubr.msk.bf16.mxu0 %vm5830_vm0, %v5829_v39  ;;  %v5424_v56 = vld [vmem:[%s7515_s0 + $0x718] ss:$20 sps:$4 sm:$0xff]  }
 0x25c   :  { %v5543_v3 = vpop.eup %5542  ;;  %3865 = vst [vmem:[%s7517_s3 + $0xc8] sm:$0xff] %v5541_v62  ;;  %5552 = vpow2.f32 %v4304_v21  ;;  %v5425_v62 = vld [vmem:[%s7515_s0 + $0x764] ss:$20 sps:$4 sm:$0xff]  }
 0x25d   :  { %v3574_v24 = vadd.f32 1.0, %v5543_v3  ;;  %v2989_v54 = vpop.f32.mrb[64].mxu0 }
 0x25e   :  { %v5545_v10 = vpop.eup %5544  ;;  %v4725_v2 = vadd.f32 %v2989_v54, %v2140_v22  ;;  %v4498_v13 = vpop.f32.mrb[65].mxu0 }
 0x25f   :  { %5554 = vrcp.f32 %v3574_v24  ;;  %v3575_v17 = vadd.f32 1.0, %v5545_v10  ;;  %v2992_v47 = vpop.f32.mrb[66].mxu0 }
 0x260   :  { %v4305_v23 = vmul.f32 -1.442695, %v4725_v2  ;;  %v4727_v26 = vadd.f32 %v2992_v47, %v2143_v45  ;;  %v4499_v40 = vpop.f32.mrb[67].mxu0  ;;  %v7209_v2 = vld [vmem:[%s7516_s2] ss:$0 sm:$0xff] }
 0x261   :  { %v5547_v6 = vpop.eup %5546  ;;  %5556 = vrcp.f32 %v3575_v17  ;;  %2787 = vmatmul.mubr.bf16.gmra.mrb[176].mxu1 %v5415_v1  ;;  %v2164_v13 = vadd.f32 %v7209_v2, %v6708_v7  ;;  %v5427_v17 = vld [vmem:[%s7515_s0 + $0x760] ss:$20 sps:$4 sm:$0xff]  }
 0x262   :  { %3866 = vst [vmem:[%s7517_s3 + $0xd0] sm:$0xff] %v5547_v6  ;;  %5558 = vpow2.f32 %v4305_v23  ;;  %v4306_v35 = vmul.f32 -1.442695, %v4727_v26  ;;  %4605 = vmatmul.mubr.msk.bf16.gmra.mrb[172].mxu0 %vm1829_vm1, %v5416_v27  ;;  %2794 = vmatprep.mubr.bf16.mxu1 %v5417_v12  ;;  %v2167_v23 = vadd.f32 %v7209_v2, %v6716_v14  ;;  %v5428_v7 = vld [vmem:[%s7515_s0 + $0x740] ss:$20 sps:$4 sm:$0xff]  }
 0x263   :  { %v5549_v28 = vpop.eup %5548  ;;  %4608 = vmatprep.mubr.msk.bf16.mxu0 %vm5830_vm0, %v5829_v39  ;;  %v5429_v6 = vld [vmem:[%s7515_s0 + $0x78c] ss:$20 sps:$4 sm:$0xff]  }
 0x264   :  { %v5551_v58 = vpop.eup %5550  ;;  %3867 = vst [vmem:[%s7517_s3 + $0xd8] sm:$0xff] %v5549_v28  ;;  %5560 = vpow2.f32 %v4306_v35 }
 0x265   :  { %v3576_v33 = vadd.f32 1.0, %v5551_v58  ;;  %v2997_v0 = vpop.f32.mrb[68].mxu0 }
 0x266   :  { %v5553_v37 = vpop.eup %5552  ;;  %v4729_v5 = vadd.f32 %v2997_v0, %v2148_v49  ;;  %v4502_v25 = vpop.f32.mrb[69].mxu0 }
 0x267   :  { %5562 = vrcp.f32 %v3576_v33  ;;  %v3577_v55 = vadd.f32 1.0, %v5553_v37  ;;  %v3000_v51 = vpop.f32.mrb[70].mxu0 }
 0x268   :  { %v4307_v46 = vmul.f32 -1.442695, %v4729_v5  ;;  %v4731_v48 = vadd.f32 %v3000_v51, %v2151_v11  ;;  %v4503_v44 = vpop.f32.mrb[71].mxu0  ;;  %v2172_v11 = vadd.f32 %v7209_v2, %v6724_v20  ;;  %v5432_v20 = vld [vmem:[%s7515_s0 + $0x768] ss:$20 sps:$4 sm:$0xff]  }
 0x269   :  { %v5555_v18 = vpop.eup %5554  ;;  %5564 = vrcp.f32 %v3577_v55  ;;  %2795 = vmatmul.mubr.bf16.gmra.mrb[180].mxu1 %v5419_v32  ;;  %v2175_v55 = vadd.f32 %v7209_v2, %v6732_v31 }
 0x26a   :  { %3868 = vst [vmem:[%s7517_s3 + $0xe0] sm:$0xff] %v5555_v18  ;;  %5566 = vpow2.f32 %v4307_v46  ;;  %v4308_v50 = vmul.f32 -1.442695, %v4731_v48  ;;  %4609 = vmatmul.mubr.msk.bf16.gmra.mrb[176].mxu0 %vm1829_vm1, %v5420_v42  ;;  %2802 = vmatprep.mubr.bf16.mxu1 %v5421_v34  ;;  %v5431_v42 = vld [vmem:[%s7515_s0 + $0x788] ss:$20 sps:$4 sm:$0xff]  }
 0x26b   :  { %v5557_v36 = vpop.eup %5556  ;;  %4612 = vmatprep.mubr.msk.bf16.mxu0 %vm5830_vm0, %v5829_v39 }
 0x26c   :  { %v5559_v15 = vpop.eup %5558  ;;  %3869 = vst [vmem:[%s7517_s3 + $0xe8] sm:$0xff] %v5557_v36  ;;  %5568 = vpow2.f32 %v4308_v50 }
 0x26d   :  { %v3578_v9 = vadd.f32 1.0, %v5559_v15  ;;  %v3005_v61 = vpop.f32.mrb[72].mxu0 }
 0x26e   :  { %v5561_v59 = vpop.eup %5560  ;;  %v4733_v29 = vadd.f32 %v3005_v61, %v2156_v19  ;;  %v4506_v21 = vpop.f32.mrb[73].mxu0  ;;  %v2180_v61 = vadd.f32 %v7209_v2, %v6740_v41 }
 0x26f   :  { %5570 = vrcp.f32 %v3578_v9  ;;  %v3579_v3 = vadd.f32 1.0, %v5561_v59  ;;  %v3008_v22 = vpop.f32.mrb[74].mxu0 }
 0x270   :  { %v4309_v24 = vmul.f32 -1.442695, %v4733_v29  ;;  %v4735_v54 = vadd.f32 %v3008_v22, %v2159_v38  ;;  %v4507_v1 = vpop.f32.mrb[75].mxu0  ;;  %v2183_v29 = vadd.f32 %v7209_v2, %v6748_v52 }
 0x271   :  { %v5563_v10 = vpop.eup %5562  ;;  %5572 = vrcp.f32 %v3579_v3  ;;  %2803 = vmatmul.mubr.bf16.gmra.mrb[184].mxu1 %v5423_v53 }
 0x272   :  { %3870 = vst [vmem:[%s7517_s3 + $0xf0] sm:$0xff] %v5563_v10  ;;  %5574 = vpow2.f32 %v4309_v24  ;;  %v4310_v63 = vmul.f32 -1.442695, %v4735_v54  ;;  %4613 = vmatmul.mubr.msk.bf16.gmra.mrb[180].mxu0 %vm1829_vm1, %v5424_v56  ;;  %2810 = vmatprep.mubr.bf16.mxu1 %v5425_v62 }
 0x273   :  { %v5565_v4 = vpop.eup %5564  ;;  %4616 = vmatprep.mubr.msk.bf16.mxu0 %vm5830_vm0, %v5829_v39 }
 0x274   :  { %v5567_v45 = vpop.eup %5566  ;;  %3871 = vst [vmem:[%s7517_s3 + $0xf8] sm:$0xff] %v5565_v4  ;;  %5576 = vpow2.f32 %v4310_v63  ;;  %v2188_v63 = vadd.f32 %v7209_v2, %v6756_v60 }
 0x275   :  { %v3580_v27 = vadd.f32 1.0, %v5567_v45  ;;  %v3013_v12 = vpop.f32.mrb[76].mxu0 }
 0x276   :  { %v5569_v47 = vpop.eup %5568  ;;  %v4737_v26 = vadd.f32 %v3013_v12, %v2164_v13  ;;  %v4510_v40 = vpop.f32.mrb[77].mxu0 }
 0x277   :  { %5578 = vrcp.f32 %v3580_v27  ;;  %v3581_v35 = vadd.f32 1.0, %v5569_v47  ;;  %v3016_v28 = vpop.f32.mrb[78].mxu0  ;;  %v2191_v27 = vadd.f32 %v7209_v2, %v6764_v8  ;;  %v2196_v8 = vadd.f32 %v7209_v2, %v6772_v16 }
 0x278   :  { %v4311_v58 = vmul.f32 -1.442695, %v4737_v26  ;;  %v4739_v49 = vadd.f32 %v3016_v28, %v2167_v23  ;;  %v4511_v33 = vpop.f32.mrb[79].mxu0 }
 0x279   :  { %v5571_v0 = vpop.eup %5570  ;;  %5580 = vrcp.f32 %v3581_v35  ;;  %2811 = vmatmul.mubr.bf16.gmra.mrb[188].mxu1 %v5427_v17 }
 0x27a   :  { %3872 = vst [vmem:[%s7517_s3 + $0x100] sm:$0xff] %v5571_v0  ;;  %5582 = vpow2.f32 %v4311_v58  ;;  %v4312_v14 = vmul.f32 -1.442695, %v4739_v49  ;;  %4617 = vmatmul.mubr.msk.bf16.gmra.mrb[184].mxu0 %vm1829_vm1, %v5428_v7  ;;  %2818 = vmatprep.mubr.bf16.mxu1 %v5429_v6  ;;  %v2199_v0 = vadd.f32 %v7209_v2, %v6780_v30  ;;  %v2204_v30 = vadd.f32 %v7209_v2, %v6788_v43 }
 0x27b   :  { %v5573_v32 = vpop.eup %5572  ;;  %4620 = vmatprep.mubr.msk.bf16.mxu0 %vm5830_vm0, %v5829_v39 }
 0x27c   :  { %v5575_v37 = vpop.eup %5574  ;;  %3873 = vst [vmem:[%s7517_s3 + $0x108] sm:$0xff] %v5573_v32  ;;  %5584 = vpow2.f32 %v4312_v14 }
 0x27d   :  { %v3582_v5 = vadd.f32 1.0, %v5575_v37  ;;  %v3021_v25 = vpop.f32.mrb[80].mxu0 }
 0x27e   :  { %v5577_v34 = vpop.eup %5576  ;;  %v4741_v51 = vadd.f32 %v3021_v25, %v2172_v11  ;;  %v4514_v46 = vpop.f32.mrb[81].mxu0 }
 0x27f   :  { %5586 = vrcp.f32 %v3582_v5  ;;  %v3583_v48 = vadd.f32 1.0, %v5577_v34  ;;  %v3024_v44 = vpop.f32.mrb[82].mxu0 }
 0x280   :  { %v4313_v18 = vmul.f32 -1.442695, %v4741_v51  ;;  %v4743_v50 = vadd.f32 %v3024_v44, %v2175_v55  ;;  %v4515_v36 = vpop.f32.mrb[83].mxu0 }
 0x281   :  { %v5579_v15 = vpop.eup %5578  ;;  %5588 = vrcp.f32 %v3583_v48  ;;  %2819 = vmatmul.mubr.bf16.gmra.mrb[192].mxu1 %v5431_v42 }
 0x282   :  { %3874 = vst [vmem:[%s7517_s3 + $0x110] sm:$0xff] %v5579_v15  ;;  %5590 = vpow2.f32 %v4313_v18  ;;  %v4314_v31 = vmul.f32 -1.442695, %v4743_v50  ;;  %4621 = vmatmul.mubr.msk.bf16.gmra.mrb[188].mxu0 %vm1829_vm1, %v5432_v20  ;;  %v2207_v50 = vadd.f32 %v7209_v2, %v6796_v57 }
 0x283   :  { %v5581_v19 = vpop.eup %5580  ;;  %4624 = vmatprep.mubr.msk.bf16.mxu0 %vm5830_vm0, %v5829_v39  ;;  %v5433_v39 = vld [vmem:[%s7515_s0 + $0x790] ss:$20 sps:$4 sm:$0xff]  }
 0x284   :  { %v5583_v9 = vpop.eup %5582  ;;  %3875 = vst [vmem:[%s7517_s3 + $0x118] sm:$0xff] %v5581_v19  ;;  %5592 = vpow2.f32 %v4314_v31 }
 0x285   :  { %v3584_v53 = vadd.f32 1.0, %v5583_v9  ;;  %v3029_v59 = vpop.f32.mrb[84].mxu0 }
 0x286   :  { %v5585_v38 = vpop.eup %5584  ;;  %v4745_v21 = vadd.f32 %v3029_v59, %v2180_v61  ;;  %v4518_v56 = vpop.f32.mrb[85].mxu0 }
 0x287   :  { %5594 = vrcp.f32 %v3584_v53  ;;  %v3585_v62 = vadd.f32 1.0, %v5585_v38  ;;  %v3032_v41 = vpop.f32.mrb[86].mxu0 }
 0x288   :  { %v4315_v3 = vmul.f32 -1.442695, %v4745_v21  ;;  %v4747_v22 = vadd.f32 %v3032_v41, %v2183_v29  ;;  %v4519_v24 = vpop.f32.mrb[87].mxu0 }
 0x289   :  { %v5587_v54 = vpop.eup %5586  ;;  %5596 = vrcp.f32 %v3585_v62 }
 0x28a   :  { %3876 = vst [vmem:[%s7517_s3 + $0x120] sm:$0xff] %v5587_v54  ;;  %5598 = vpow2.f32 %v4315_v3  ;;  %v4316_v52 = vmul.f32 -1.442695, %v4747_v22  ;;  %4625 = vmatmul.mubr.msk.bf16.gmra.mrb[192].mxu0 %vm1829_vm1, %v5433_v39 }
 0x28b   :  { %v5589_v1 = vpop.eup %5588 }
 0x28c   :  { %v5591_v10 = vpop.eup %5590  ;;  %3877 = vst [vmem:[%s7517_s3 + $0x128] sm:$0xff] %v5589_v1  ;;  %5600 = vpow2.f32 %v4316_v52 }
 0x28d   :  { %v3586_v4 = vadd.f32 1.0, %v5591_v10  ;;  %v3037_v45 = vpop.f32.mrb[88].mxu0 }
 0x28e   :  { %v5593_v13 = vpop.eup %5592  ;;  %v4749_v12 = vadd.f32 %v3037_v45, %v2188_v63  ;;  %v4522_v17 = vpop.f32.mrb[89].mxu0 }
 0x28f   :  { %5602 = vrcp.f32 %v3586_v4  ;;  %v3587_v47 = vadd.f32 1.0, %v5593_v13  ;;  %v3040_v23 = vpop.f32.mrb[90].mxu0 }
 0x290   :  { %v4317_v26 = vmul.f32 -1.442695, %v4749_v12  ;;  %v4751_v40 = vadd.f32 %v3040_v23, %v2191_v27  ;;  %v4523_v7 = vpop.f32.mrb[91].mxu0 }
 0x291   :  { %v5595_v60 = vpop.eup %5594  ;;  %5604 = vrcp.f32 %v3587_v47 }
 0x292   :  { %3878 = vst [vmem:[%s7517_s3 + $0x130] sm:$0xff] %v5595_v60  ;;  %5606 = vpow2.f32 %v4317_v26  ;;  %v4318_v6 = vmul.f32 -1.442695, %v4751_v40 }
 0x293   :  { %v5597_v35 = vpop.eup %5596 }
 0x294   :  { %v5599_v28 = vpop.eup %5598  ;;  %3879 = vst [vmem:[%s7517_s3 + $0x138] sm:$0xff] %v5597_v35  ;;  %5608 = vpow2.f32 %v4318_v6 }
 0x295   :  { %v3588_v58 = vadd.f32 1.0, %v5599_v28  ;;  %v3045_v49 = vpop.f32.mrb[92].mxu0 }
 0x296   :  { %v5601_v33 = vpop.eup %5600  ;;  %v4753_v14 = vadd.f32 %v3045_v49, %v2196_v8  ;;  %v4526_v32 = vpop.f32.mrb[93].mxu0 }
 0x297   :  { %5610 = vrcp.f32 %v3588_v58  ;;  %v3589_v37 = vadd.f32 1.0, %v5601_v33  ;;  %v3048_v11 = vpop.f32.mrb[94].mxu0 }
 0x298   :  { %v4319_v5 = vmul.f32 -1.442695, %v4753_v14  ;;  %v4755_v25 = vadd.f32 %v3048_v11, %v2199_v0  ;;  %v4527_v42 = vpop.f32.mrb[95].mxu0 }
 0x299   :  { %v5603_v16 = vpop.eup %5602  ;;  %5612 = vrcp.f32 %v3589_v37 }
 0x29a   :  { %3880 = vst [vmem:[%s7517_s3 + $0x140] sm:$0xff] %v5603_v16  ;;  %5614 = vpow2.f32 %v4319_v5  ;;  %v4320_v34 = vmul.f32 -1.442695, %v4755_v25 }
 0x29b   :  { %v5605_v55 = vpop.eup %5604 }
 0x29c   :  { %v5607_v51 = vpop.eup %5606  ;;  %3881 = vst [vmem:[%s7517_s3 + $0x148] sm:$0xff] %v5605_v55  ;;  %5616 = vpow2.f32 %v4320_v34  ;;  %v2636_v46 = vpop.f32.mrb[100].mxu1 }
 0x29d   :  { %v3590_v20 = vadd.f32 1.0, %v5607_v51  ;;  %v3053_v48 = vpop.f32.mrb[96].mxu0  ;;  %v2638_v44 = vpop.f32.mrb[101].mxu1  ;;  %v4760_v56 = vadd.f32 %v7209_v2, %v2636_v46 }
 0x29e   :  { %v5609_v18 = vpop.eup %5608  ;;  %v4757_v36 = vadd.f32 %v3053_v48, %v2204_v30  ;;  %v4530_v15 = vpop.f32.mrb[97].mxu0 }
 0x29f   :  { %v2639_v31 = vpop.f32.mrb[102].mxu1  ;;  %5618 = vrcp.f32 %v3590_v20  ;;  %v3591_v19 = vadd.f32 1.0, %v5609_v18  ;;  %v3056_v9 = vpop.f32.mrb[98].mxu0 }
 0x2a0   :  { %v2641_v43 = vpop.f32.mrb[103].mxu1  ;;  %v4321_v61 = vmul.f32 -1.442695, %v4757_v36  ;;  %v4759_v53 = vadd.f32 %v3056_v9, %v2207_v50  ;;  %v4531_v59 = vpop.f32.mrb[99].mxu0  ;;  %v4762_v24 = vadd.f32 %v7209_v2, %v2639_v31 }
 0x2a1   :  { %v5611_v38 = vpop.eup %5610  ;;  %5620 = vrcp.f32 %v3591_v19 }
 0x2a2   :  { %3882 = vst [vmem:[%s7517_s3 + $0x150] sm:$0xff] %v5611_v38  ;;  %5622 = vpow2.f32 %v4321_v61  ;;  %v4322_v29 = vmul.f32 -1.442695, %v4759_v53 }
 0x2a3   :  { %v5613_v21 = vpop.eup %5612 }
 0x2a4   :  { %v5615_v57 = vpop.eup %5614  ;;  %3883 = vst [vmem:[%s7517_s3 + $0x158] sm:$0xff] %v5613_v21  ;;  %5624 = vpow2.f32 %v4322_v29  ;;  %v2644_v39 = vpop.f32.mrb[104].mxu1 }
 0x2a5   :  { %v3592_v62 = vadd.f32 1.0, %v5615_v57  ;;  %v3061_v41 = vpop.f32.mrb[100].mxu0  ;;  %v2646_v3 = vpop.f32.mrb[105].mxu1  ;;  %v4764_v26 = vadd.f32 %v7209_v2, %v2644_v39 }
 0x2a6   :  { %v5617_v22 = vpop.eup %5616  ;;  %v4761_v54 = vadd.f32 %v4760_v56, %v3061_v41  ;;  %v4534_v52 = vpop.f32.mrb[101].mxu0 }
 0x2a7   :  { %v2647_v1 = vpop.f32.mrb[106].mxu1  ;;  %5626 = vrcp.f32 %v3592_v62  ;;  %v3593_v10 = vadd.f32 1.0, %v5617_v22  ;;  %v3064_v63 = vpop.f32.mrb[102].mxu0 }
 0x2a8   :  { %v2649_v4 = vpop.f32.mrb[107].mxu1  ;;  %v4323_v45 = vmul.f32 -1.442695, %v4761_v54  ;;  %v4763_v13 = vadd.f32 %v4762_v24, %v3064_v63  ;;  %v4535_v27 = vpop.f32.mrb[103].mxu0  ;;  %v4766_v28 = vadd.f32 %v7209_v2, %v2647_v1 }
 0x2a9   :  { %v5619_v12 = vpop.eup %5618  ;;  %5628 = vrcp.f32 %v3593_v10 }
 0x2aa   :  { %3884 = vst [vmem:[%s7517_s3 + $0x160] sm:$0xff] %v5619_v12  ;;  %5630 = vpow2.f32 %v4323_v45  ;;  %v4324_v17 = vmul.f32 -1.442695, %v4763_v13 }
 0x2ab   :  { %v5621_v47 = vpop.eup %5620 }
 0x2ac   :  { %v5623_v23 = vpop.eup %5622  ;;  %3885 = vst [vmem:[%s7517_s3 + $0x168] sm:$0xff] %v5621_v47  ;;  %5632 = vpow2.f32 %v4324_v17  ;;  %v2652_v40 = vpop.f32.mrb[108].mxu1 }
 0x2ad   :  { %v3594_v7 = vadd.f32 1.0, %v5623_v23  ;;  %v3069_v60 = vpop.f32.mrb[104].mxu0  ;;  %v2654_v6 = vpop.f32.mrb[109].mxu1  ;;  %v4768_v34 = vadd.f32 %v7209_v2, %v2652_v40 }
 0x2ae   :  { %v5625_v35 = vpop.eup %5624  ;;  %v4765_v8 = vadd.f32 %v4764_v26, %v3069_v60  ;;  %v4538_v58 = vpop.f32.mrb[105].mxu0 }
 0x2af   :  { %v2655_v49 = vpop.f32.mrb[110].mxu1  ;;  %5634 = vrcp.f32 %v3594_v7  ;;  %v3595_v33 = vadd.f32 1.0, %v5625_v35  ;;  %v3072_v0 = vpop.f32.mrb[106].mxu0 }
 0x2b0   :  { %v2657_v14 = vpop.f32.mrb[111].mxu1  ;;  %v4325_v32 = vmul.f32 -1.442695, %v4765_v8  ;;  %v4767_v37 = vadd.f32 %v4766_v28, %v3072_v0  ;;  %v4539_v11 = vpop.f32.mrb[107].mxu0  ;;  %v4770_v48 = vadd.f32 %v7209_v2, %v2655_v49 }
 0x2b1   :  { %v5627_v5 = vpop.eup %5626  ;;  %5636 = vrcp.f32 %v3595_v33 }
 0x2b2   :  { %3886 = vst [vmem:[%s7517_s3 + $0x170] sm:$0xff] %v5627_v5  ;;  %5638 = vpow2.f32 %v4325_v32  ;;  %v4326_v25 = vmul.f32 -1.442695, %v4767_v37 }
 0x2b3   :  { %v5629_v42 = vpop.eup %5628 }
 0x2b4   :  { %v5631_v16 = vpop.eup %5630  ;;  %3887 = vst [vmem:[%s7517_s3 + $0x178] sm:$0xff] %v5629_v42  ;;  %5640 = vpow2.f32 %v4326_v25  ;;  %v2660_v55 = vpop.f32.mrb[112].mxu1 }
 0x2b5   :  { %v3596_v51 = vadd.f32 1.0, %v5631_v16  ;;  %v3077_v30 = vpop.f32.mrb[108].mxu0  ;;  %v2662_v46 = vpop.f32.mrb[113].mxu1  ;;  %v4772_v29 = vadd.f32 %v7209_v2, %v2660_v55 }
 0x2b6   :  { %v5633_v20 = vpop.eup %5632  ;;  %v4769_v44 = vadd.f32 %v4768_v34, %v3077_v30  ;;  %v4542_v18 = vpop.f32.mrb[109].mxu0 }
 0x2b7   :  { %v2663_v50 = vpop.f32.mrb[114].mxu1  ;;  %5642 = vrcp.f32 %v3596_v51  ;;  %v3597_v36 = vadd.f32 1.0, %v5633_v20  ;;  %v3080_v15 = vpop.f32.mrb[110].mxu0 }
 0x2b8   :  { %v2665_v31 = vpop.f32.mrb[115].mxu1  ;;  %v4327_v19 = vmul.f32 -1.442695, %v4769_v44  ;;  %v4771_v9 = vadd.f32 %v4770_v48, %v3080_v15  ;;  %v4543_v43 = vpop.f32.mrb[111].mxu0  ;;  %v4774_v41 = vadd.f32 %v7209_v2, %v2663_v50 }
 0x2b9   :  { %v5635_v61 = vpop.eup %5634  ;;  %5644 = vrcp.f32 %v3597_v36 }
 0x2ba   :  { %3888 = vst [vmem:[%s7517_s3 + $0x180] sm:$0xff] %v5635_v61  ;;  %5646 = vpow2.f32 %v4327_v19  ;;  %v4328_v53 = vmul.f32 -1.442695, %v4771_v9 }
 0x2bb   :  { %v5637_v59 = vpop.eup %5636 }
 0x2bc   :  { %v5639_v38 = vpop.eup %5638  ;;  %3889 = vst [vmem:[%s7517_s3 + $0x188] sm:$0xff] %v5637_v59  ;;  %5648 = vpow2.f32 %v4328_v53  ;;  %v2668_v21 = vpop.f32.mrb[116].mxu1 }
 0x2bd   :  { %v3598_v57 = vadd.f32 1.0, %v5639_v38  ;;  %v3085_v56 = vpop.f32.mrb[112].mxu0  ;;  %v2670_v39 = vpop.f32.mrb[117].mxu1  ;;  %v4776_v17 = vadd.f32 %v7209_v2, %v2668_v21 }
 0x2be   :  { %v5641_v62 = vpop.eup %5640  ;;  %v4773_v3 = vadd.f32 %v4772_v29, %v3085_v56  ;;  %v4546_v22 = vpop.f32.mrb[113].mxu0 }
 0x2bf   :  { %v2671_v24 = vpop.f32.mrb[118].mxu1  ;;  %5650 = vrcp.f32 %v3598_v57  ;;  %v3599_v54 = vadd.f32 1.0, %v5641_v62  ;;  %v3088_v52 = vpop.f32.mrb[114].mxu0 }
 0x2c0   :  { %v2673_v1 = vpop.f32.mrb[119].mxu1  ;;  %v4329_v10 = vmul.f32 -1.442695, %v4773_v3  ;;  %v4775_v63 = vadd.f32 %v4774_v41, %v3088_v52  ;;  %v4547_v4 = vpop.f32.mrb[115].mxu0  ;;  %v4778_v60 = vadd.f32 %v7209_v2, %v2671_v24 }
 0x2c1   :  { %v5643_v45 = vpop.eup %5642  ;;  %5652 = vrcp.f32 %v3599_v54 }
 0x2c2   :  { %3890 = vst [vmem:[%s7517_s3 + $0x190] sm:$0xff] %v5643_v45  ;;  %5654 = vpow2.f32 %v4329_v10  ;;  %v4330_v13 = vmul.f32 -1.442695, %v4775_v63 }
 0x2c3   :  { %v5645_v27 = vpop.eup %5644 }
 0x2c4   :  { %v5647_v12 = vpop.eup %5646  ;;  %3891 = vst [vmem:[%s7517_s3 + $0x198] sm:$0xff] %v5645_v27  ;;  %5656 = vpow2.f32 %v4330_v13  ;;  %v2676_v47 = vpop.f32.mrb[120].mxu1 }
 0x2c5   :  { %v3600_v23 = vadd.f32 1.0, %v5647_v12  ;;  %v3093_v26 = vpop.f32.mrb[116].mxu0  ;;  %v2678_v40 = vpop.f32.mrb[121].mxu1  ;;  %v4780_v25 = vadd.f32 %v7209_v2, %v2676_v47 }
 0x2c6   :  { %v5649_v7 = vpop.eup %5648  ;;  %v4777_v6 = vadd.f32 %v4776_v17, %v3093_v26  ;;  %v4550_v35 = vpop.f32.mrb[117].mxu0 }
 0x2c7   :  { %v2679_v28 = vpop.f32.mrb[122].mxu1  ;;  %5658 = vrcp.f32 %v3600_v23  ;;  %v3601_v8 = vadd.f32 1.0, %v5649_v7  ;;  %v3096_v58 = vpop.f32.mrb[118].mxu0 }
 0x2c8   :  { %v2681_v49 = vpop.f32.mrb[123].mxu1  ;;  %v4331_v33 = vmul.f32 -1.442695, %v4777_v6  ;;  %v4779_v0 = vadd.f32 %v4778_v60, %v3096_v58  ;;  %v4551_v14 = vpop.f32.mrb[119].mxu0  ;;  %v4782_v30 = vadd.f32 %v7209_v2, %v2679_v28 }
 0x2c9   :  { %v5651_v32 = vpop.eup %5650  ;;  %5660 = vrcp.f32 %v3601_v8 }
 0x2ca   :  { %3892 = vst [vmem:[%s7517_s3 + $0x1a0] sm:$0xff] %v5651_v32  ;;  %5662 = vpow2.f32 %v4331_v33  ;;  %v4332_v37 = vmul.f32 -1.442695, %v4779_v0 }
 0x2cb   :  { %v5653_v11 = vpop.eup %5652 }
 0x2cc   :  { %v5655_v5 = vpop.eup %5654  ;;  %3893 = vst [vmem:[%s7517_s3 + $0x1a8] sm:$0xff] %v5653_v11  ;;  %5664 = vpow2.f32 %v4332_v37  ;;  %v2684_v42 = vpop.f32.mrb[124].mxu1 }
 0x2cd   :  { %v3602_v16 = vadd.f32 1.0, %v5655_v5  ;;  %v3101_v34 = vpop.f32.mrb[120].mxu0  ;;  %v2686_v55 = vpop.f32.mrb[125].mxu1  ;;  %v4784_v53 = vadd.f32 %v7209_v2, %v2684_v42 }
 0x2ce   :  { %v5657_v51 = vpop.eup %5656  ;;  %v4781_v46 = vadd.f32 %v4780_v25, %v3101_v34  ;;  %v4554_v20 = vpop.f32.mrb[121].mxu0 }
 0x2cf   :  { %v2687_v48 = vpop.f32.mrb[126].mxu1  ;;  %5666 = vrcp.f32 %v3602_v16  ;;  %v3603_v44 = vadd.f32 1.0, %v5657_v51  ;;  %v3104_v18 = vpop.f32.mrb[122].mxu0 }
 0x2d0   :  { %v2689_v50 = vpop.f32.mrb[127].mxu1  ;;  %v4333_v36 = vmul.f32 -1.442695, %v4781_v46  ;;  %v4783_v15 = vadd.f32 %v4782_v30, %v3104_v18  ;;  %v4555_v31 = vpop.f32.mrb[123].mxu0  ;;  %v4786_v56 = vadd.f32 %v7209_v2, %v2687_v48 }
 0x2d1   :  { %v5659_v19 = vpop.eup %5658  ;;  %5668 = vrcp.f32 %v3603_v44 }
 0x2d2   :  { %3894 = vst [vmem:[%s7517_s3 + $0x1b0] sm:$0xff] %v5659_v19  ;;  %5670 = vpow2.f32 %v4333_v36  ;;  %v4334_v9 = vmul.f32 -1.442695, %v4783_v15 }
 0x2d3   :  { %v5661_v43 = vpop.eup %5660 }
 0x2d4   :  { %v5663_v61 = vpop.eup %5662  ;;  %3895 = vst [vmem:[%s7517_s3 + $0x1b8] sm:$0xff] %v5661_v43  ;;  %5672 = vpow2.f32 %v4334_v9  ;;  %v2692_v59 = vpop.f32.mrb[128].mxu1 }
 0x2d5   :  { %v3604_v38 = vadd.f32 1.0, %v5663_v61  ;;  %v3109_v29 = vpop.f32.mrb[124].mxu0  ;;  %v2694_v21 = vpop.f32.mrb[129].mxu1  ;;  %v4788_v13 = vadd.f32 %v7209_v2, %v2692_v59 }
 0x2d6   :  { %v5665_v57 = vpop.eup %5664  ;;  %v4785_v39 = vadd.f32 %v4784_v53, %v3109_v29  ;;  %v4558_v62 = vpop.f32.mrb[125].mxu0 }
 0x2d7   :  { %v2695_v41 = vpop.f32.mrb[130].mxu1  ;;  %5674 = vrcp.f32 %v3604_v38  ;;  %v3605_v3 = vadd.f32 1.0, %v5665_v57  ;;  %v3112_v22 = vpop.f32.mrb[126].mxu0 }
 0x2d8   :  { %v2697_v24 = vpop.f32.mrb[131].mxu1  ;;  %v4335_v54 = vmul.f32 -1.442695, %v4785_v39  ;;  %v4787_v52 = vadd.f32 %v4786_v56, %v3112_v22  ;;  %v4559_v1 = vpop.f32.mrb[127].mxu0  ;;  %v4790_v26 = vadd.f32 %v7209_v2, %v2695_v41 }
 0x2d9   :  { %v5667_v10 = vpop.eup %5666  ;;  %5676 = vrcp.f32 %v3605_v3 }
 0x2da   :  { %3896 = vst [vmem:[%s7517_s3 + $0x1c0] sm:$0xff] %v5667_v10  ;;  %5678 = vpow2.f32 %v4335_v54  ;;  %v4336_v63 = vmul.f32 -1.442695, %v4787_v52 }
 0x2db   :  { %v5669_v4 = vpop.eup %5668 }
 0x2dc   :  { %v5671_v45 = vpop.eup %5670  ;;  %3897 = vst [vmem:[%s7517_s3 + $0x1c8] sm:$0xff] %v5669_v4  ;;  %5680 = vpow2.f32 %v4336_v63  ;;  %v2700_v27 = vpop.f32.mrb[132].mxu1 }
 0x2dd   :  { %v3606_v12 = vadd.f32 1.0, %v5671_v45  ;;  %v3117_v17 = vpop.f32.mrb[128].mxu0  ;;  %v2702_v47 = vpop.f32.mrb[133].mxu1  ;;  %v4792_v37 = vadd.f32 %v7209_v2, %v2700_v27 }
 0x2de   :  { %v5673_v23 = vpop.eup %5672  ;;  %v4789_v40 = vadd.f32 %v4788_v13, %v3117_v17  ;;  %v4562_v7 = vpop.f32.mrb[129].mxu0 }
 0x2df   :  { %v2703_v60 = vpop.f32.mrb[134].mxu1  ;;  %5682 = vrcp.f32 %v3606_v12  ;;  %v3607_v6 = vadd.f32 1.0, %v5673_v23  ;;  %v3120_v35 = vpop.f32.mrb[130].mxu0 }
 0x2e0   :  { %v2705_v28 = vpop.f32.mrb[135].mxu1  ;;  %v4337_v8 = vmul.f32 -1.442695, %v4789_v40  ;;  %v4791_v58 = vadd.f32 %v4790_v26, %v3120_v35  ;;  %v4563_v49 = vpop.f32.mrb[131].mxu0  ;;  %v4794_v34 = vadd.f32 %v7209_v2, %v2703_v60 }
 0x2e1   :  { %v5675_v33 = vpop.eup %5674  ;;  %5684 = vrcp.f32 %v3607_v6 }
 0x2e2   :  { %3898 = vst [vmem:[%s7517_s3 + $0x1d0] sm:$0xff] %v5675_v33  ;;  %5686 = vpow2.f32 %v4337_v8  ;;  %v4338_v0 = vmul.f32 -1.442695, %v4791_v58 }
 0x2e3   :  { %v5677_v14 = vpop.eup %5676 }
 0x2e4   :  { %v5679_v32 = vpop.eup %5678  ;;  %3899 = vst [vmem:[%s7517_s3 + $0x1d8] sm:$0xff] %v5677_v14  ;;  %5688 = vpow2.f32 %v4338_v0  ;;  %v2708_v11 = vpop.f32.mrb[136].mxu1 }
 0x2e5   :  { %v3608_v5 = vadd.f32 1.0, %v5679_v32  ;;  %v3125_v25 = vpop.f32.mrb[132].mxu0  ;;  %v2710_v42 = vpop.f32.mrb[137].mxu1  ;;  %v4796_v9 = vadd.f32 %v7209_v2, %v2708_v11 }
 0x2e6   :  { %v5681_v16 = vpop.eup %5680  ;;  %v4793_v55 = vadd.f32 %v4792_v37, %v3125_v25  ;;  %v4566_v51 = vpop.f32.mrb[133].mxu0 }
 0x2e7   :  { %v2711_v30 = vpop.f32.mrb[138].mxu1  ;;  %5690 = vrcp.f32 %v3608_v5  ;;  %v3609_v46 = vadd.f32 1.0, %v5681_v16  ;;  %v3128_v20 = vpop.f32.mrb[134].mxu0 }
 0x2e8   :  { %v2713_v48 = vpop.f32.mrb[139].mxu1  ;;  %v4339_v44 = vmul.f32 -1.442695, %v4793_v55  ;;  %v4795_v18 = vadd.f32 %v4794_v34, %v3128_v20  ;;  %v4567_v50 = vpop.f32.mrb[135].mxu0  ;;  %v4798_v29 = vadd.f32 %v7209_v2, %v2711_v30 }
 0x2e9   :  { %v5683_v36 = vpop.eup %5682  ;;  %5692 = vrcp.f32 %v3609_v46 }
 0x2ea   :  { %3900 = vst [vmem:[%s7517_s3 + $0x1e0] sm:$0xff] %v5683_v36  ;;  %5694 = vpow2.f32 %v4339_v44  ;;  %v4340_v15 = vmul.f32 -1.442695, %v4795_v18 }
 0x2eb   :  { %v5685_v31 = vpop.eup %5684 }
 0x2ec   :  { %v5687_v19 = vpop.eup %5686  ;;  %3901 = vst [vmem:[%s7517_s3 + $0x1e8] sm:$0xff] %v5685_v31  ;;  %5696 = vpow2.f32 %v4340_v15  ;;  %v2716_v43 = vpop.f32.mrb[140].mxu1 }
 0x2ed   :  { %v3610_v61 = vadd.f32 1.0, %v5687_v19  ;;  %v3133_v53 = vpop.f32.mrb[136].mxu0  ;;  %v2718_v59 = vpop.f32.mrb[141].mxu1  ;;  %v4800_v63 = vadd.f32 %v7209_v2, %v2716_v43 }
 0x2ee   :  { %v5689_v38 = vpop.eup %5688  ;;  %v4797_v21 = vadd.f32 %v4796_v9, %v3133_v53  ;;  %v4570_v57 = vpop.f32.mrb[137].mxu0 }
 0x2ef   :  { %v2719_v56 = vpop.f32.mrb[142].mxu1  ;;  %5698 = vrcp.f32 %v3610_v61  ;;  %v3611_v39 = vadd.f32 1.0, %v5689_v38  ;;  %v3136_v62 = vpop.f32.mrb[138].mxu0 }
 0x2f0   :  { %v2721_v41 = vpop.f32.mrb[143].mxu1  ;;  %v4341_v3 = vmul.f32 -1.442695, %v4797_v21  ;;  %v4799_v22 = vadd.f32 %v4798_v29, %v3136_v62  ;;  %v4571_v24 = vpop.f32.mrb[139].mxu0  ;;  %v4802_v17 = vadd.f32 %v7209_v2, %v2719_v56 }
 0x2f1   :  { %v5691_v54 = vpop.eup %5690  ;;  %5700 = vrcp.f32 %v3611_v39 }
 0x2f2   :  { %3902 = vst [vmem:[%s7517_s3 + $0x1f0] sm:$0xff] %v5691_v54  ;;  %5702 = vpow2.f32 %v4341_v3  ;;  %v4342_v52 = vmul.f32 -1.442695, %v4799_v22 }
 0x2f3   :  { %v5693_v1 = vpop.eup %5692 }
 0x2f4   :  { %v5695_v10 = vpop.eup %5694  ;;  %3903 = vst [vmem:[%s7517_s3 + $0x1f8] sm:$0xff] %v5693_v1  ;;  %5704 = vpow2.f32 %v4342_v52  ;;  %v2724_v4 = vpop.f32.mrb[144].mxu1 }
 0x2f5   :  { %v3612_v45 = vadd.f32 1.0, %v5695_v10  ;;  %v3141_v13 = vpop.f32.mrb[140].mxu0  ;;  %v2726_v27 = vpop.f32.mrb[145].mxu1  ;;  %v4804_v0 = vadd.f32 %v7209_v2, %v2724_v4 }
 0x2f6   :  { %v5697_v12 = vpop.eup %5696  ;;  %v4801_v47 = vadd.f32 %v4800_v63, %v3141_v13  ;;  %v4574_v23 = vpop.f32.mrb[141].mxu0 }
 0x2f7   :  { %v2727_v26 = vpop.f32.mrb[146].mxu1  ;;  %5706 = vrcp.f32 %v3612_v45  ;;  %v3613_v40 = vadd.f32 1.0, %v5697_v12  ;;  %v3144_v7 = vpop.f32.mrb[142].mxu0 }
 0x2f8   :  { %v2729_v60 = vpop.f32.mrb[147].mxu1  ;;  %v4343_v6 = vmul.f32 -1.442695, %v4801_v47  ;;  %v4803_v35 = vadd.f32 %v4802_v17, %v3144_v7  ;;  %v4575_v28 = vpop.f32.mrb[143].mxu0  ;;  %v4806_v25 = vadd.f32 %v7209_v2, %v2727_v26 }
 0x2f9   :  { %v5699_v8 = vpop.eup %5698  ;;  %5708 = vrcp.f32 %v3613_v40 }
 0x2fa   :  { %3904 = vst [vmem:[%s7517_s3 + $0x200] sm:$0xff] %v5699_v8  ;;  %5710 = vpow2.f32 %v4343_v6  ;;  %v4344_v58 = vmul.f32 -1.442695, %v4803_v35  ;;  %v7414_v8 = vld [vmem:[%s7516_s2] ss:$0 sm:$0xff] }
 0x2fb   :  { %v5701_v49 = vpop.eup %5700 }
 0x2fc   :  { %v5703_v33 = vpop.eup %5702  ;;  %3905 = vst [vmem:[%s7517_s3 + $0x208] sm:$0xff] %v5701_v49  ;;  %5712 = vpow2.f32 %v4344_v58  ;;  %v2732_v14 = vpop.f32.mrb[148].mxu1 }
 0x2fd   :  { %v3614_v32 = vadd.f32 1.0, %v5703_v33  ;;  %v3149_v37 = vpop.f32.mrb[144].mxu0  ;;  %v2734_v11 = vpop.f32.mrb[149].mxu1  ;;  %v4808_v15 = vadd.f32 %v7209_v2, %v2732_v14 }
 0x2fe   :  { %v5705_v5 = vpop.eup %5704  ;;  %v4805_v42 = vadd.f32 %v4804_v0, %v3149_v37  ;;  %v4578_v16 = vpop.f32.mrb[145].mxu0 }
 0x2ff   :  { %v2735_v34 = vpop.f32.mrb[150].mxu1  ;;  %5714 = vrcp.f32 %v3614_v32  ;;  %v3615_v55 = vadd.f32 1.0, %v5705_v5  ;;  %v3152_v51 = vpop.f32.mrb[146].mxu0 }
 0x300   :  { %v2737_v30 = vpop.f32.mrb[151].mxu1  ;;  %v4345_v46 = vmul.f32 -1.442695, %v4805_v42  ;;  %v4807_v20 = vadd.f32 %v4806_v25, %v3152_v51  ;;  %v4579_v48 = vpop.f32.mrb[147].mxu0  ;;  %v4810_v53 = vadd.f32 %v7209_v2, %v2735_v34 }
 0x301   :  { %v5707_v44 = vpop.eup %5706  ;;  %5716 = vrcp.f32 %v3615_v55 }
 0x302   :  { %3906 = vst [vmem:[%s7517_s3 + $0x210] sm:$0xff] %v5707_v44  ;;  %5718 = vpow2.f32 %v4345_v46  ;;  %v4346_v18 = vmul.f32 -1.442695, %v4807_v20 }
 0x303   :  { %v5709_v50 = vpop.eup %5708 }
 0x304   :  { %v5711_v36 = vpop.eup %5710  ;;  %3907 = vst [vmem:[%s7517_s3 + $0x218] sm:$0xff] %v5709_v50  ;;  %5720 = vpow2.f32 %v4346_v18  ;;  %v2740_v31 = vpop.f32.mrb[152].mxu1 }
 0x305   :  { %v3616_v19 = vadd.f32 1.0, %v5711_v36  ;;  %v3157_v9 = vpop.f32.mrb[148].mxu0  ;;  %v2742_v43 = vpop.f32.mrb[153].mxu1  ;;  %v4812_v52 = vadd.f32 %v7209_v2, %v2740_v31 }
 0x306   :  { %v5713_v61 = vpop.eup %5712  ;;  %v4809_v59 = vadd.f32 %v4808_v15, %v3157_v9  ;;  %v4582_v38 = vpop.f32.mrb[149].mxu0 }
 0x307   :  { %v2743_v29 = vpop.f32.mrb[154].mxu1  ;;  %5722 = vrcp.f32 %v3616_v19  ;;  %v3617_v21 = vadd.f32 1.0, %v5713_v61  ;;  %v3160_v57 = vpop.f32.mrb[150].mxu0 }
 0x308   :  { %v2745_v56 = vpop.f32.mrb[155].mxu1  ;;  %v4347_v39 = vmul.f32 -1.442695, %v4809_v59  ;;  %v4811_v62 = vadd.f32 %v4810_v53, %v3160_v57  ;;  %v4583_v41 = vpop.f32.mrb[151].mxu0  ;;  %v4814_v13 = vadd.f32 %v7209_v2, %v2743_v29 }
 0x309   :  { %v5715_v3 = vpop.eup %5714  ;;  %5724 = vrcp.f32 %v3617_v21 }
 0x30a   :  { %3908 = vst [vmem:[%s7517_s3 + $0x220] sm:$0xff] %v5715_v3  ;;  %5726 = vpow2.f32 %v4347_v39  ;;  %v4348_v22 = vmul.f32 -1.442695, %v4811_v62 }
 0x30b   :  { %v5717_v24 = vpop.eup %5716 }
 0x30c   :  { %v5719_v54 = vpop.eup %5718  ;;  %3909 = vst [vmem:[%s7517_s3 + $0x228] sm:$0xff] %v5717_v24  ;;  %5728 = vpow2.f32 %v4348_v22  ;;  %v2748_v1 = vpop.f32.mrb[156].mxu1 }
 0x30d   :  { %v3618_v10 = vadd.f32 1.0, %v5719_v54  ;;  %v3165_v63 = vpop.f32.mrb[152].mxu0  ;;  %v2750_v4 = vpop.f32.mrb[157].mxu1  ;;  %v4816_v58 = vadd.f32 %v7414_v8, %v2748_v1 }
 0x30e   :  { %v5721_v45 = vpop.eup %5720  ;;  %v4813_v27 = vadd.f32 %v4812_v52, %v3165_v63  ;;  %v4586_v12 = vpop.f32.mrb[153].mxu0 }
 0x30f   :  { %v2751_v17 = vpop.f32.mrb[158].mxu1  ;;  %5730 = vrcp.f32 %v3618_v10  ;;  %v3619_v47 = vadd.f32 1.0, %v5721_v45  ;;  %v3168_v23 = vpop.f32.mrb[154].mxu0 }
 0x310   :  { %v2753_v26 = vpop.f32.mrb[159].mxu1  ;;  %v4349_v40 = vmul.f32 -1.442695, %v4813_v27  ;;  %v4815_v7 = vadd.f32 %v4814_v13, %v3168_v23  ;;  %v4587_v60 = vpop.f32.mrb[155].mxu0  ;;  %v4818_v37 = vadd.f32 %v7414_v8, %v2751_v17 }
 0x311   :  { %v5723_v6 = vpop.eup %5722  ;;  %5732 = vrcp.f32 %v3619_v47 }
 0x312   :  { %3910 = vst [vmem:[%s7517_s3 + $0x230] sm:$0xff] %v5723_v6  ;;  %5734 = vpow2.f32 %v4349_v40  ;;  %v4350_v35 = vmul.f32 -1.442695, %v4815_v7 }
 0x313   :  { %v5725_v28 = vpop.eup %5724 }
 0x314   :  { %v5727_v2 = vpop.eup %5726  ;;  %3911 = vst [vmem:[%s7517_s3 + $0x238] sm:$0xff] %v5725_v28  ;;  %5736 = vpow2.f32 %v4350_v35  ;;  %v2756_v49 = vpop.f32.mrb[160].mxu1 }
 0x315   :  { %v3620_v33 = vadd.f32 1.0, %v5727_v2  ;;  %v3173_v0 = vpop.f32.mrb[156].mxu0  ;;  %v2758_v14 = vpop.f32.mrb[161].mxu1  ;;  %v4820_v18 = vadd.f32 %v7414_v8, %v2756_v49 }
 0x316   :  { %v5729_v32 = vpop.eup %5728  ;;  %v4817_v11 = vadd.f32 %v4816_v58, %v3173_v0  ;;  %v4590_v5 = vpop.f32.mrb[157].mxu0 }
 0x317   :  { %v2759_v25 = vpop.f32.mrb[162].mxu1  ;;  %5738 = vrcp.f32 %v3620_v33  ;;  %v3621_v42 = vadd.f32 1.0, %v5729_v32  ;;  %v3176_v16 = vpop.f32.mrb[158].mxu0 }
 0x318   :  { %v2761_v34 = vpop.f32.mrb[163].mxu1  ;;  %v4351_v55 = vmul.f32 -1.442695, %v4817_v11  ;;  %v4819_v51 = vadd.f32 %v4818_v37, %v3176_v16  ;;  %v4591_v30 = vpop.f32.mrb[159].mxu0  ;;  %v4822_v9 = vadd.f32 %v7414_v8, %v2759_v25 }
 0x319   :  { %v5731_v46 = vpop.eup %5730  ;;  %5740 = vrcp.f32 %v3621_v42 }
 0x31a   :  { %3912 = vst [vmem:[%s7517_s3 + $0x240] sm:$0xff] %v5731_v46  ;;  %5742 = vpow2.f32 %v4351_v55  ;;  %v4352_v20 = vmul.f32 -1.442695, %v4819_v51 }
 0x31b   :  { %v5733_v48 = vpop.eup %5732 }
 0x31c   :  { %v5735_v44 = vpop.eup %5734  ;;  %3913 = vst [vmem:[%s7517_s3 + $0x248] sm:$0xff] %v5733_v48  ;;  %5744 = vpow2.f32 %v4352_v20  ;;  %v2764_v50 = vpop.f32.mrb[164].mxu1 }
 0x31d   :  { %v3622_v36 = vadd.f32 1.0, %v5735_v44  ;;  %v3181_v15 = vpop.f32.mrb[160].mxu0  ;;  %v2766_v31 = vpop.f32.mrb[165].mxu1  ;;  %v4824_v22 = vadd.f32 %v7414_v8, %v2764_v50 }
 0x31e   :  { %v5737_v19 = vpop.eup %5736  ;;  %v4821_v43 = vadd.f32 %v4820_v18, %v3181_v15  ;;  %v4594_v61 = vpop.f32.mrb[161].mxu0 }
 0x31f   :  { %v2767_v53 = vpop.f32.mrb[166].mxu1  ;;  %5746 = vrcp.f32 %v3622_v36  ;;  %v3623_v59 = vadd.f32 1.0, %v5737_v19  ;;  %v3184_v38 = vpop.f32.mrb[162].mxu0 }
 0x320   :  { %v2769_v29 = vpop.f32.mrb[167].mxu1  ;;  %v4353_v21 = vmul.f32 -1.442695, %v4821_v43  ;;  %v4823_v57 = vadd.f32 %v4822_v9, %v3184_v38  ;;  %v4595_v56 = vpop.f32.mrb[163].mxu0  ;;  %v4826_v63 = vadd.f32 %v7414_v8, %v2767_v53 }
 0x321   :  { %v5739_v39 = vpop.eup %5738  ;;  %5748 = vrcp.f32 %v3623_v59 }
 0x322   :  { %3914 = vst [vmem:[%s7517_s3 + $0x250] sm:$0xff] %v5739_v39  ;;  %5750 = vpow2.f32 %v4353_v21  ;;  %v4354_v62 = vmul.f32 -1.442695, %v4823_v57 }
 0x323   :  { %v5741_v41 = vpop.eup %5740 }
 0x324   :  { %v5743_v3 = vpop.eup %5742  ;;  %3915 = vst [vmem:[%s7517_s3 + $0x258] sm:$0xff] %v5741_v41  ;;  %5752 = vpow2.f32 %v4354_v62  ;;  %v2772_v24 = vpop.f32.mrb[168].mxu1 }
 0x325   :  { %v3624_v54 = vadd.f32 1.0, %v5743_v3  ;;  %v3189_v52 = vpop.f32.mrb[164].mxu0  ;;  %v2774_v1 = vpop.f32.mrb[169].mxu1  ;;  %v4828_v35 = vadd.f32 %v7414_v8, %v2772_v24 }
 0x326   :  { %v5745_v10 = vpop.eup %5744  ;;  %v4825_v4 = vadd.f32 %v4824_v22, %v3189_v52  ;;  %v4598_v45 = vpop.f32.mrb[165].mxu0 }
 0x327   :  { %v2775_v13 = vpop.f32.mrb[170].mxu1  ;;  %5754 = vrcp.f32 %v3624_v54  ;;  %v3625_v27 = vadd.f32 1.0, %v5745_v10  ;;  %v3192_v12 = vpop.f32.mrb[166].mxu0 }
 0x328   :  { %v2777_v17 = vpop.f32.mrb[171].mxu1  ;;  %v4355_v47 = vmul.f32 -1.442695, %v4825_v4  ;;  %v4827_v23 = vadd.f32 %v4826_v63, %v3192_v12  ;;  %v4599_v26 = vpop.f32.mrb[167].mxu0  ;;  %v4830_v0 = vadd.f32 %v7414_v8, %v2775_v13 }
 0x329   :  { %v5747_v40 = vpop.eup %5746  ;;  %5756 = vrcp.f32 %v3625_v27 }
 0x32a   :  { %3916 = vst [vmem:[%s7517_s3 + $0x260] sm:$0xff] %v5747_v40  ;;  %5758 = vpow2.f32 %v4355_v47  ;;  %v4356_v7 = vmul.f32 -1.442695, %v4827_v23 }
 0x32b   :  { %v5749_v60 = vpop.eup %5748 }
 0x32c   :  { %v5751_v6 = vpop.eup %5750  ;;  %3917 = vst [vmem:[%s7517_s3 + $0x268] sm:$0xff] %v5749_v60  ;;  %5760 = vpow2.f32 %v4356_v7  ;;  %v2780_v28 = vpop.f32.mrb[172].mxu1 }
 0x32d   :  { %v3626_v2 = vadd.f32 1.0, %v5751_v6  ;;  %v3197_v58 = vpop.f32.mrb[168].mxu0  ;;  %v2782_v49 = vpop.f32.mrb[173].mxu1  ;;  %v4832_v20 = vadd.f32 %v7414_v8, %v2780_v28 }
 0x32e   :  { %v5753_v33 = vpop.eup %5752  ;;  %v4829_v14 = vadd.f32 %v4828_v35, %v3197_v58  ;;  %v4602_v32 = vpop.f32.mrb[169].mxu0 }
 0x32f   :  { %v2783_v37 = vpop.f32.mrb[174].mxu1  ;;  %5762 = vrcp.f32 %v3626_v2  ;;  %v3627_v11 = vadd.f32 1.0, %v5753_v33  ;;  %v3200_v5 = vpop.f32.mrb[170].mxu0 }
 0x330   :  { %v2785_v25 = vpop.f32.mrb[175].mxu1  ;;  %v4357_v42 = vmul.f32 -1.442695, %v4829_v14  ;;  %v4831_v16 = vadd.f32 %v4830_v0, %v3200_v5  ;;  %v4603_v34 = vpop.f32.mrb[171].mxu0  ;;  %v4834_v15 = vadd.f32 %v7414_v8, %v2783_v37 }
 0x331   :  { %v5755_v55 = vpop.eup %5754  ;;  %5764 = vrcp.f32 %v3627_v11 }
 0x332   :  { %3918 = vst [vmem:[%s7517_s3 + $0x270] sm:$0xff] %v5755_v55  ;;  %5766 = vpow2.f32 %v4357_v42  ;;  %v4358_v51 = vmul.f32 -1.442695, %v4831_v16 }
 0x333   :  { %v5757_v30 = vpop.eup %5756 }
 0x334   :  { %v5759_v46 = vpop.eup %5758  ;;  %3919 = vst [vmem:[%s7517_s3 + $0x278] sm:$0xff] %v5757_v30  ;;  %5768 = vpow2.f32 %v4358_v51  ;;  %v2788_v48 = vpop.f32.mrb[176].mxu1 }
 0x335   :  { %v3628_v44 = vadd.f32 1.0, %v5759_v46  ;;  %v3205_v18 = vpop.f32.mrb[172].mxu0  ;;  %v2790_v50 = vpop.f32.mrb[177].mxu1  ;;  %v4836_v62 = vadd.f32 %v7414_v8, %v2788_v48 }
 0x336   :  { %v5761_v36 = vpop.eup %5760  ;;  %v4833_v31 = vadd.f32 %v4832_v20, %v3205_v18  ;;  %v4606_v19 = vpop.f32.mrb[173].mxu0 }
 0x337   :  { %v2791_v9 = vpop.f32.mrb[178].mxu1  ;;  %5770 = vrcp.f32 %v3628_v44  ;;  %v3629_v43 = vadd.f32 1.0, %v5761_v36  ;;  %v3208_v61 = vpop.f32.mrb[174].mxu0 }
 0x338   :  { %v2793_v53 = vpop.f32.mrb[179].mxu1  ;;  %v4359_v59 = vmul.f32 -1.442695, %v4833_v31  ;;  %v4835_v38 = vadd.f32 %v4834_v15, %v3208_v61  ;;  %v4607_v29 = vpop.f32.mrb[175].mxu0  ;;  %v4838_v52 = vadd.f32 %v7414_v8, %v2791_v9 }
 0x339   :  { %v5763_v21 = vpop.eup %5762  ;;  %5772 = vrcp.f32 %v3629_v43 }
 0x33a   :  { %3920 = vst [vmem:[%s7517_s3 + $0x280] sm:$0xff] %v5763_v21  ;;  %5774 = vpow2.f32 %v4359_v59  ;;  %v4360_v57 = vmul.f32 -1.442695, %v4835_v38 }
 0x33b   :  { %v5765_v56 = vpop.eup %5764 }
 0x33c   :  { %v5767_v39 = vpop.eup %5766  ;;  %3921 = vst [vmem:[%s7517_s3 + $0x288] sm:$0xff] %v5765_v56  ;;  %5776 = vpow2.f32 %v4360_v57  ;;  %v2796_v41 = vpop.f32.mrb[180].mxu1 }
 0x33d   :  { %v3630_v3 = vadd.f32 1.0, %v5767_v39  ;;  %v3213_v22 = vpop.f32.mrb[176].mxu0  ;;  %v2798_v24 = vpop.f32.mrb[181].mxu1  ;;  %v4840_v7 = vadd.f32 %v7414_v8, %v2796_v41 }
 0x33e   :  { %v5769_v54 = vpop.eup %5768  ;;  %v4837_v1 = vadd.f32 %v4836_v62, %v3213_v22  ;;  %v4610_v10 = vpop.f32.mrb[177].mxu0 }
 0x33f   :  { %v2799_v63 = vpop.f32.mrb[182].mxu1  ;;  %5778 = vrcp.f32 %v3630_v3  ;;  %v3631_v4 = vadd.f32 1.0, %v5769_v54  ;;  %v3216_v45 = vpop.f32.mrb[178].mxu0 }
 0x340   :  { %v2801_v13 = vpop.f32.mrb[183].mxu1  ;;  %v4361_v27 = vmul.f32 -1.442695, %v4837_v1  ;;  %v4839_v12 = vadd.f32 %v4838_v52, %v3216_v45  ;;  %v4611_v17 = vpop.f32.mrb[179].mxu0  ;;  %v4842_v58 = vadd.f32 %v7414_v8, %v2799_v63 }
 0x341   :  { %v5771_v47 = vpop.eup %5770  ;;  %5780 = vrcp.f32 %v3631_v4 }
 0x342   :  { %3922 = vst [vmem:[%s7517_s3 + $0x290] sm:$0xff] %v5771_v47  ;;  %5782 = vpow2.f32 %v4361_v27  ;;  %v4362_v23 = vmul.f32 -1.442695, %v4839_v12 }
 0x343   :  { %v5773_v26 = vpop.eup %5772 }
 0x344   :  { %v5775_v40 = vpop.eup %5774  ;;  %3923 = vst [vmem:[%s7517_s3 + $0x298] sm:$0xff] %v5773_v26  ;;  %5784 = vpow2.f32 %v4362_v23  ;;  %v2804_v60 = vpop.f32.mrb[184].mxu1 }
 0x345   :  { %v3632_v6 = vadd.f32 1.0, %v5775_v40  ;;  %v3221_v35 = vpop.f32.mrb[180].mxu0  ;;  %v2806_v28 = vpop.f32.mrb[185].mxu1  ;;  %v4844_v51 = vadd.f32 %v7414_v8, %v2804_v60 }
 0x346   :  { %v5777_v2 = vpop.eup %5776  ;;  %v4841_v49 = vadd.f32 %v4840_v7, %v3221_v35  ;;  %v4614_v33 = vpop.f32.mrb[181].mxu0 }
 0x347   :  { %v2807_v0 = vpop.f32.mrb[186].mxu1  ;;  %5786 = vrcp.f32 %v3632_v6  ;;  %v3633_v14 = vadd.f32 1.0, %v5777_v2  ;;  %v3224_v32 = vpop.f32.mrb[182].mxu0 }
 0x348   :  { %v2809_v37 = vpop.f32.mrb[187].mxu1  ;;  %v4363_v11 = vmul.f32 -1.442695, %v4841_v49  ;;  %v4843_v5 = vadd.f32 %v4842_v58, %v3224_v32  ;;  %v4615_v25 = vpop.f32.mrb[183].mxu0  ;;  %v4846_v18 = vadd.f32 %v7414_v8, %v2807_v0 }
 0x349   :  { %v5779_v42 = vpop.eup %5778  ;;  %5788 = vrcp.f32 %v3633_v14 }
 0x34a   :  { %3924 = vst [vmem:[%s7517_s3 + $0x2a0] sm:$0xff] %v5779_v42  ;;  %5790 = vpow2.f32 %v4363_v11  ;;  %v4364_v16 = vmul.f32 -1.442695, %v4843_v5 }
 0x34b   :  { %v5781_v34 = vpop.eup %5780 }
 0x34c   :  { %v5783_v55 = vpop.eup %5782  ;;  %3925 = vst [vmem:[%s7517_s3 + $0x2a8] sm:$0xff] %v5781_v34  ;;  %5792 = vpow2.f32 %v4364_v16  ;;  %v2812_v30 = vpop.f32.mrb[188].mxu1 }
 0x34d   :  { %v3634_v46 = vadd.f32 1.0, %v5783_v55  ;;  %v3229_v20 = vpop.f32.mrb[184].mxu0  ;;  %v2814_v48 = vpop.f32.mrb[189].mxu1  ;;  %v4848_v57 = vadd.f32 %v7414_v8, %v2812_v30 }
 0x34e   :  { %v5785_v44 = vpop.eup %5784  ;;  %v4845_v50 = vadd.f32 %v4844_v51, %v3229_v20  ;;  %v4618_v36 = vpop.f32.mrb[185].mxu0 }
 0x34f   :  { %v2815_v15 = vpop.f32.mrb[190].mxu1  ;;  %5794 = vrcp.f32 %v3634_v46  ;;  %v3635_v31 = vadd.f32 1.0, %v5785_v44  ;;  %v3232_v19 = vpop.f32.mrb[186].mxu0 }
 0x350   :  { %v2817_v9 = vpop.f32.mrb[191].mxu1  ;;  %v4365_v43 = vmul.f32 -1.442695, %v4845_v50  ;;  %v4847_v61 = vadd.f32 %v4846_v18, %v3232_v19  ;;  %v4619_v53 = vpop.f32.mrb[187].mxu0  ;;  %v4850_v22 = vadd.f32 %v7414_v8, %v2815_v15 }
 0x351   :  { %v5787_v59 = vpop.eup %5786  ;;  %5796 = vrcp.f32 %v3635_v31 }
 0x352   :  { %3926 = vst [vmem:[%s7517_s3 + $0x2b0] sm:$0xff] %v5787_v59  ;;  %5798 = vpow2.f32 %v4365_v43  ;;  %v4366_v38 = vmul.f32 -1.442695, %v4847_v61 }
 0x353   :  { %v5789_v29 = vpop.eup %5788 }
 0x354   :  { %v5791_v21 = vpop.eup %5790  ;;  %3927 = vst [vmem:[%s7517_s3 + $0x2b8] sm:$0xff] %v5789_v29  ;;  %5800 = vpow2.f32 %v4366_v38  ;;  %v2820_v56 = vpop.f32.mrb[192].mxu1 }
 0x355   :  { %v3636_v39 = vadd.f32 1.0, %v5791_v21  ;;  %v3237_v62 = vpop.f32.mrb[188].mxu0  ;;  %v2822_v41 = vpop.f32.mrb[193].mxu1  ;;  %v4852_v23 = vadd.f32 %v7414_v8, %v2820_v56 }
 0x356   :  { %v5793_v3 = vpop.eup %5792  ;;  %v4849_v24 = vadd.f32 %v4848_v57, %v3237_v62  ;;  %v4622_v54 = vpop.f32.mrb[189].mxu0 }
 0x357   :  { %v2823_v52 = vpop.f32.mrb[194].mxu1  ;;  %5802 = vrcp.f32 %v3636_v39  ;;  %v3637_v1 = vadd.f32 1.0, %v5793_v3  ;;  %v3240_v10 = vpop.f32.mrb[190].mxu0 }
 0x358   :  { %v2825_v63 = vpop.f32.mrb[195].mxu1  ;;  %v4367_v4 = vmul.f32 -1.442695, %v4849_v24  ;;  %v4851_v45 = vadd.f32 %v4850_v22, %v3240_v10  ;;  %v4623_v13 = vpop.f32.mrb[191].mxu0  ;;  %v4854_v60 = vadd.f32 %v7414_v8, %v2823_v52 }
 0x359   :  { %v5795_v27 = vpop.eup %5794  ;;  %5804 = vrcp.f32 %v3637_v1 }
 0x35a   :  { %3928 = vst [vmem:[%s7517_s3 + $0x2c0] sm:$0xff] %v5795_v27  ;;  %5806 = vpow2.f32 %v4367_v4  ;;  %v4368_v12 = vmul.f32 -1.442695, %v4851_v45 }
 0x35b   :  { %v5797_v17 = vpop.eup %5796 }
 0x35c   :  { %v5799_v47 = vpop.eup %5798  ;;  %3929 = vst [vmem:[%s7517_s3 + $0x2c8] sm:$0xff] %v5797_v17  ;;  %5808 = vpow2.f32 %v4368_v12 }
 0x35d   :  { %v3638_v26 = vadd.f32 1.0, %v5799_v47  ;;  %v3245_v40 = vpop.f32.mrb[192].mxu0 }
 0x35e   :  { %v5801_v7 = vpop.eup %5800  ;;  %v4853_v6 = vadd.f32 %v4852_v23, %v3245_v40  ;;  %v4626_v35 = vpop.f32.mrb[193].mxu0 }
 0x35f   :  { %5810 = vrcp.f32 %v3638_v26  ;;  %v3639_v28 = vadd.f32 1.0, %v5801_v7  ;;  %v3248_v2 = vpop.f32.mrb[194].mxu0 }
 0x360   :  { %v4369_v58 = vmul.f32 -1.442695, %v4853_v6  ;;  %v4855_v49 = vadd.f32 %v4854_v60, %v3248_v2  ;;  %v4627_v33 = vpop.f32.mrb[195].mxu0 }
 0x361   :  { %v5803_v0 = vpop.eup %5802  ;;  %5812 = vrcp.f32 %v3639_v28 }
 0x362   :  { %3930 = vst [vmem:[%s7517_s3 + $0x2d0] sm:$0xff] %v5803_v0  ;;  %5814 = vpow2.f32 %v4369_v58  ;;  %v4370_v14 = vmul.f32 -1.442695, %v4855_v49 }
 0x363   :  { %v5805_v32 = vpop.eup %5804 }
 0x364   :  { %v5807_v37 = vpop.eup %5806  ;;  %3931 = vst [vmem:[%s7517_s3 + $0x2d8] sm:$0xff] %v5805_v32  ;;  %5816 = vpow2.f32 %v4370_v14 }
 0x365   :  { %v3640_v8 = vadd.f32 1.0, %v5807_v37 }
 0x366   :  { %v5809_v11 = vpop.eup %5808 }
 0x367   :  { %5818 = vrcp.f32 %v3640_v8  ;;  %v3641_v5 = vadd.f32 1.0, %v5809_v11 }
 0x369   :  { %v5811_v25 = vpop.eup %5810  ;;  %5820 = vrcp.f32 %v3641_v5 }
 0x36a   :  { %3932 = vst [vmem:[%s7517_s3 + $0x2e0] sm:$0xff] %v5811_v25 }
 0x36b   :  { %v5813_v42 = vpop.eup %5812 }
 0x36c   :  { %v5815_v16 = vpop.eup %5814  ;;  %3933 = vst [vmem:[%s7517_s3 + $0x2e8] sm:$0xff] %v5813_v42 }
 0x36d   :  { %v3642_v34 = vadd.f32 1.0, %v5815_v16 }
 0x36e   :  { %v5817_v55 = vpop.eup %5816 }
 0x36f   :  { %5822 = vrcp.f32 %v3642_v34  ;;  %v3643_v51 = vadd.f32 1.0, %v5817_v55 }
 0x371   :  { %v5819_v30 = vpop.eup %5818  ;;  %5824 = vrcp.f32 %v3643_v51 }
 0x372   :  { %3934 = vst [vmem:[%s7517_s3 + $0x2f0] sm:$0xff] %v5819_v30 }
 0x373   :  { %v5821_v46 = vpop.eup %5820 }
 0x374   :  { %3935 = vst [vmem:[%s7517_s3 + $0x2f8] sm:$0xff] %v5821_v46 }
 0x379   :  { %v5823_v20 = vpop.eup %5822 }
 0x37a   :  { %3936 = vst [vmem:[%s7517_s3 + $0x300] sm:$0xff] %v5823_v20 }
 0x37b   :  { %v5825_v48 = vpop.eup %5824 }
 0x37c   :  { %3937 = vst [vmem:[%s7517_s3 + $0x308] sm:$0xff] %v5825_v48 }

</bundles_post_ra>
